<compile_context>
chip_gen: v7x
topology: tpu7x:2x2x1
jax: 0.10.0
libtpu: 0.0.40
codegen_flags: <defaults>
</compile_context>

<pallas_src>
import numpy as np
import jax
import jax.numpy as jnp
from jax import lax
from jax.experimental import pallas as pl
from jax.experimental.pallas import tpu as pltpu


def _make_rollout_kernel(mass, g, dt, I_np, invI_np, T, unroll):
    mass = float(mass)
    g = float(g)
    dt = float(dt)
    inv_mass = 1.0 / mass

    # Compile-time diagonal-inertia fast path.
    diag = bool(np.allclose(I_np, np.diag(np.diag(I_np))))
    Id = [float(I_np[i, i]) for i in range(3)]
    iId = [float(invI_np[i, i]) for i in range(3)]
    # cross(omega, I@omega) for diagonal I: [o1*o2*(I2-I1), o2*o0*(I0-I2), o0*o1*(I1-I0)]
    d0 = Id[2] - Id[1]
    d1 = Id[0] - Id[2]
    d2 = Id[1] - Id[0]
    # General-I columns baked as compile-time python-float scalars.
    Icol = [[float(I_np[r, c]) for r in range(3)] for c in range(3)]
    iIcol = [[float(invI_np[r, c]) for r in range(3)] for c in range(3)]

    def kernel(x_ref, act_ref, states_ref, carry_ref):
        c = pl.program_id(0)

        # ---- constants: built from iota (no captured arrays), hoisted out of loop
        lane = lax.broadcasted_iota(jnp.int32, (1, 3), 1)
        E0 = (lane == 0).astype(jnp.float32)
        E1 = (lane == 1).astype(jnp.float32)
        E2 = (lane == 2).astype(jnp.float32)

        def col(vals):  # (1,3) row built from python-float scalars
            return vals[0] * E0 + vals[1] * E1 + vals[2] * E2

        grav = (-mass * g) * E2
        if diag:
            iIrow = col(iId)  # elementwise inverse-inertia row
        else:
            Ic0, Ic1, Ic2 = col(Icol[0]), col(Icol[1]), col(Icol[2])
            iIc0, iIc1, iIc2 = col(iIcol[0]), col(iIcol[1]), col(iIcol[2])

        # ---- initialize the cross-chunk state carry from x on the first chunk
        @pl.when(c == 0)
        def _():
            carry_ref[...] = x_ref[...]

        s = carry_ref[...]                      # (1, 18)
        pos = s[:, 0:3]
        v = s[:, 3:6]
        r0 = s[:, 6:9]                          # rows of R
        r1 = s[:, 9:12]
        r2 = s[:, 12:15]
        omega = s[:, 15:18]

        def body(t, carry):
            pos, v, r0, r1, r2, omega = carry
            act = act_ref[pl.ds(t, 1), :]       # (1, 4)
            fz = act[:, 0:1]
            tau = act[:, 1:4]

            # dv = (grav + R @ [0,0,fz]) / mass     (R @ e_z = third column of R)
            Rz = r0[:, 2:3] * E0 + r1[:, 2:3] * E1 + r2[:, 2:3] * E2
            dv = (grav + Rz * fz) * inv_mass

            # domega = invI @ (tau - omega x (I @ omega))
            o0, o1, o2 = omega[:, 0:1], omega[:, 1:2], omega[:, 2:3]
            if diag:
                cr = ((o1 * o2 * d0) * E0
                      + (o2 * o0 * d1) * E1
                      + (o0 * o1 * d2) * E2)
                domega = (tau - cr) * iIrow
            else:
                Iw = o0 * Ic0 + o1 * Ic1 + o2 * Ic2
                w0, w1, w2 = Iw[:, 0:1], Iw[:, 1:2], Iw[:, 2:3]
                cr = ((o1 * w2 - o2 * w1) * E0
                      + (o2 * w0 - o0 * w2) * E1
                      + (o0 * w1 - o1 * w0) * E2)
                tmt = tau - cr
                domega = (tmt[:, 0:1] * iIc0 + tmt[:, 1:2] * iIc1
                          + tmt[:, 2:3] * iIc2)

            # rotation update: exp = cos*I + sin*K + (1-cos) n n^T,  K = skew(n)
            # (theta == 0  =>  sin=0, 1-cos=0  =>  exp = I, matching the reference)
            a0, a1, a2 = o0 * dt, o1 * dt, o2 * dt
            angle = omega * dt
            theta2 = a0 * a0 + a1 * a1 + a2 * a2
            safe2 = jnp.where(theta2 > 0.0, theta2, 1.0)
            inv_t = lax.rsqrt(safe2)
            theta = theta2 * inv_t              # = sqrt(theta2), exactly 0 when theta2==0
            n0, n1, n2 = a0 * inv_t, a1 * inv_t, a2 * inv_t
            nvec = angle * inv_t
            st = jnp.sin(theta)
            cth = jnp.cos(theta)
            ct = 1.0 - cth
            k0 = -n2 * E1 + n1 * E2             # rows of skew(n)
            k1 = n2 * E0 - n0 * E2
            k2 = -n1 * E0 + n0 * E1
            e0 = cth * E0 + st * k0 + (ct * n0) * nvec
            e1 = cth * E1 + st * k1 + (ct * n1) * nvec
            e2 = cth * E2 + st * k2 + (ct * n2) * nvec

            # next_R = R @ exp   (row_i(next_R) = sum_k R[i,k] * row_k(exp))
            nr0 = r0[:, 0:1] * e0 + r0[:, 1:2] * e1 + r0[:, 2:3] * e2
            nr1 = r1[:, 0:1] * e0 + r1[:, 1:2] * e1 + r1[:, 2:3] * e2
            nr2 = r2[:, 0:1] * e0 + r2[:, 1:2] * e1 + r2[:, 2:3] * e2

            npos = pos + v * dt
            nv = v + dv * dt
            nomega = omega + domega * dt

            # direct masked sub-slice stores (off the serial carry chain)
            row = pl.ds(t, 1)
            states_ref[row, 0:3] = npos
            states_ref[row, 3:6] = nv
            states_ref[row, 6:9] = nr0
            states_ref[row, 9:12] = nr1
            states_ref[row, 12:15] = nr2
            states_ref[row, 15:18] = nomega
            return (npos, nv, nr0, nr1, nr2, nomega)

        pos, v, r0, r1, r2, omega = lax.fori_loop(
            0, T, body, (pos, v, r0, r1, r2, omega), unroll=unroll)

        # persist the running state for the next chunk (single concat per chunk)
        carry_ref[...] = jnp.concatenate([pos, v, r0, r1, r2, omega], axis=1)

    return kernel


def path_forward(x, actions, mass, g, I, dt, chunk=2048):
    """Equivalent of path.forward(x): returns (states[steps,18], actions[steps,4])."""
    x = jnp.asarray(x, jnp.float32).reshape(1, 18)
    actions = jnp.asarray(actions, jnp.float32)
    steps = actions.shape[0]
    I_np = np.asarray(I, np.float32)
    invI_np = np.linalg.inv(I_np).astype(np.float32)     # torch.inverse(self.I)

    # chunk size: T steps per grid iteration (amortizes per-grid-step overhead).
    # T capped at 4096 so the lane-padded double-buffered blocks stay inside
    # v5e's 16 MiB default scoped-VMEM limit.
    if steps <= chunk:
        T = steps                          # single chunk: block == full array dims
    else:
        T = max(8, (min(int(chunk), 4096) // 8) * 8)   # multiple of 8 (sublanes)
    num_chunks = -(-steps // T)
    padded = num_chunks * T

    acts = actions
    if padded != steps:
        acts = jnp.pad(actions, ((0, padded - steps), (0, 0)))

    unroll = max(1, min(8, T))
    kernel = _make_rollout_kernel(mass, g, dt, I_np, invI_np, T, unroll)

    states = pl.pallas_call(
        kernel,
        out_shape=jax.ShapeDtypeStruct((padded, 18), jnp.float32),
        grid_spec=pltpu.PrefetchScalarGridSpec(
            num_scalar_prefetch=0,
            grid=(num_chunks,),
            in_specs=[
                pl.BlockSpec((1, 18), lambda c: (0, 0)),   # initial state
                pl.BlockSpec((T, 4), lambda c: (c, 0)),    # actions for this chunk
            ],
            out_specs=pl.BlockSpec((T, 18), lambda c: (c, 0)),
            scratch_shapes=[pltpu.VMEM((1, 18), jnp.float32)],  # cross-chunk carry
        ),
        compiler_params=pltpu.CompilerParams(
            dimension_semantics=("arbitrary",)),           # sequential rollout
    )(x, acts)

    return states[:steps], actions


def _reference_forward(x, actions, mass, g, I, dt):
    """Pure numpy mirror of the torch module (for correctness check)."""
    x = np.asarray(x, np.float32)
    actions = np.asarray(actions, np.float32)
    I = np.asarray(I, np.float32)
    invI = np.linalg.inv(I).astype(np.float32)
    steps = actions.shape[0]
    states = np.zeros((steps, 18), np.float32)
    s = x.copy()
    for it in range(steps):
        a = actions[it]
        fz, tau = a[0], a[1:4]
        pos, v = s[0:3], s[3:6]
        R = s[6:15].reshape(3, 3)
        omega = s[15:18]
        sum_action = np.array([0.0, 0.0, fz], np.float32)
        grav = np.array([0.0, 0.0, -mass * g], np.float32)
        dv = (grav + R @ sum_action) / mass
        domega = invI @ (tau - np.cross(omega, I @ omega))
        angle = omega * dt
        theta = np.linalg.norm(angle)
        if theta == 0:
            exp_i = np.eye(3, dtype=np.float32)
        else:
            n = angle / theta
            K = np.array([[0, -n[2], n[1]],
                          [n[2], 0, -n[0]],
                          [-n[1], n[0], 0]], np.float32)
            exp_i = np.eye(3, dtype=np.float32) + np.sin(theta) * K \
                + (1 - np.cos(theta)) * (K @ K)
        nR = R @ exp_i
        ns = np.concatenate([pos + v * dt, v + dv * dt,
                             nR.reshape(-1), omega + domega * dt]).astype(np.float32)
        states[it] = ns
        s = ns
    return states, actions


def _make_inputs(key, steps, mass, g):
    k1, k2, k3 = jax.random.split(key, 3)
    init_actions = jnp.concatenate(
        [mass * g + 0.5 * jax.random.normal(k1, (steps, 1)),
         0.05 * jax.random.normal(k2, (steps, 3))], axis=1).astype(jnp.float32)
    pos0 = 0.1 * jax.random.normal(k3, (3,))
    v0 = jnp.array([0.1, -0.05, 0.2], jnp.float32)
    R0 = jnp.eye(3, dtype=jnp.float32).reshape(-1)
    w0 = jnp.zeros((3,), jnp.float32)          # exercises the theta == 0 branch
    x = jnp.concatenate([pos0, v0, R0, w0]).astype(jnp.float32)
    return x, init_actions


if __name__ == "__main__":
    mass = 1.2
    g = 9.81
    dt = 0.05
    key = jax.random.PRNGKey(0)
    ka, kb, kc = jax.random.split(key, 3)

    # Test 1: small rollout, single chunk, diagonal I (fast path).
    I_diag = np.diag([0.02, 0.02, 0.04]).astype(np.float32)
    steps = 8
    x, init_actions = _make_inputs(ka, steps, mass, g)
    states, actions = path_forward(x, init_actions, mass, g, I_diag, dt)
    states = jax.block_until_ready(states)
    ref_states, _ = _reference_forward(np.asarray(x), np.asarray(init_actions),
                                       mass, g, I_diag, dt)
    assert states.shape == (steps, 18) and states.dtype == jnp.float32
    assert actions.shape == (steps, 4)
    assert np.allclose(np.asarray(states), ref_states, rtol=2e-3, atol=2e-3), \
        "mismatch vs reference rollout (single chunk, diagonal I)"
    assert np.allclose(np.asarray(actions), np.asarray(init_actions))

    # Test 2: multi-chunk path with padding (steps=20, chunk=8 -> 3 chunks).
    steps2 = 20
    x2, acts2 = _make_inputs(kb, steps2, mass, g)
    states2, actions2 = path_forward(x2, acts2, mass, g, I_diag, dt, chunk=8)
    states2 = jax.block_until_ready(states2)
    ref_states2, _ = _reference_forward(np.asarray(x2), np.asarray(acts2),
                                        mass, g, I_diag, dt)
    assert states2.shape == (steps2, 18)
    assert np.allclose(np.asarray(states2), ref_states2, rtol=2e-3, atol=2e-3), \
        "mismatch vs reference rollout (multi chunk)"

    # Test 3: non-diagonal inertia (general path).
    I_full = np.array([[0.02, 0.002, 0.0],
                       [0.002, 0.025, 0.001],
                       [0.0, 0.001, 0.04]], np.float32)
    steps3 = 12
    x3, acts3 = _make_inputs(kc, steps3, mass, g)
    states3, _ = path_forward(x3, acts3, mass, g, I_full, dt)
    states3 = jax.block_until_ready(states3)
    ref_states3, _ = _reference_forward(np.asarray(x3), np.asarray(acts3),
                                        mass, g, I_full, dt)
    assert np.allclose(np.asarray(states3), ref_states3, rtol=2e-3, atol=2e-3), \
        "mismatch vs reference rollout (general I)"

    print("KERNEL_OK")
</pallas_src>

<mosaic_0001>
module attributes {stable_mosaic.version = 11 : i64} {
  func.func @kernel(%arg0: i32, %arg1: memref<1x18xf32, #tpu.memory_space<vmem>>, %arg2: memref<8x4xf32, #tpu.memory_space<vmem>>, %arg3: memref<8x18xf32, #tpu.memory_space<vmem>>, %arg4: memref<1x18xf32, #tpu.memory_space<vmem>>) attributes {dimension_semantics = [#tpu.dimension_semantics<arbitrary>], iteration_bounds = array<i64: 1>, scalar_prefetch = 0 : i64, scratch_operands = 1 : i64, tpu.core_type = #tpu.core_type<tc>, window_params = [{pipeline_mode = #tpu.pipeline_mode<synchronous>, transform_indices = @transform_0, window_bounds = array<i64: 1, 18>}, {transform_indices = @transform_1, window_bounds = array<i64: 8, 4>}, {transform_indices = @transform_2, window_bounds = array<i64: 8, 18>}]} {
    %0 = tpu.iota {dimensions = array<i32: 1>} : vector<1x3xi32>
    %c0_i32 = arith.constant 0 : i32
    %1 = vector.broadcast %c0_i32 : i32 to vector<1x3xi32>
    %2 = arith.cmpi eq, %0, %1 : vector<1x3xi32>
    %3 = arith.extui %2 : vector<1x3xi1> to vector<1x3xi32>
    %4 = arith.sitofp %3 : vector<1x3xi32> to vector<1x3xf32>
    %c1_i32 = arith.constant 1 : i32
    %5 = vector.broadcast %c1_i32 : i32 to vector<1x3xi32>
    %6 = arith.cmpi eq, %0, %5 : vector<1x3xi32>
    %7 = arith.extui %6 : vector<1x3xi1> to vector<1x3xi32>
    %8 = arith.sitofp %7 : vector<1x3xi32> to vector<1x3xf32>
    %c2_i32 = arith.constant 2 : i32
    %9 = vector.broadcast %c2_i32 : i32 to vector<1x3xi32>
    %10 = arith.cmpi eq, %0, %9 : vector<1x3xi32>
    %11 = arith.extui %10 : vector<1x3xi1> to vector<1x3xi32>
    %12 = arith.sitofp %11 : vector<1x3xi32> to vector<1x3xf32>
    %cst = arith.constant -1.177200e+01 : f32
    %13 = vector.broadcast %cst : f32 to vector<1x3xf32>
    %14 = arith.mulf %13, %12 : vector<1x3xf32>
    %cst_0 = arith.constant 5.000000e+01 : f32
    %15 = vector.broadcast %cst_0 : f32 to vector<1x3xf32>
    %16 = arith.mulf %15, %4 : vector<1x3xf32>
    %cst_1 = arith.constant 5.000000e+01 : f32
    %17 = vector.broadcast %cst_1 : f32 to vector<1x3xf32>
    %18 = arith.mulf %17, %8 : vector<1x3xf32>
    %19 = arith.addf %16, %18 : vector<1x3xf32>
    %cst_2 = arith.constant 2.500000e+01 : f32
    %20 = vector.broadcast %cst_2 : f32 to vector<1x3xf32>
    %21 = arith.mulf %20, %12 : vector<1x3xf32>
    %22 = arith.addf %19, %21 : vector<1x3xf32>
    %c0_i32_3 = arith.constant 0 : i32
    %23 = arith.cmpi eq, %arg0, %c0_i32_3 : i32
    %24 = arith.extui %23 : i1 to i32
    %c0_i32_4 = arith.constant 0 : i32
    %25 = arith.cmpi ne, %24, %c0_i32_4 : i32
    scf.if %25 {
      %c0_190 = arith.constant 0 : index
      %c0_191 = arith.constant 0 : index
      %1395 = vector.load %arg1[%c0_190, %c0_191] : memref<1x18xf32, #tpu.memory_space<vmem>>, vector<1x18xf32>
      %c0_192 = arith.constant 0 : index
      %c0_193 = arith.constant 0 : index
      %1396 = vector.load %arg4[%c0_192, %c0_193] : memref<1x18xf32, #tpu.memory_space<vmem>>, vector<1x18xf32>
      tpu.vector_store %arg4[%c0_192, %c0_193], %1395 {strides = array<i32>} : memref<1x18xf32, #tpu.memory_space<vmem>>, vector<1x18xf32>,
    } else {
    }
    %c0 = arith.constant 0 : index
    %c0_5 = arith.constant 0 : index
    %26 = vector.load %arg4[%c0, %c0_5] : memref<1x18xf32, #tpu.memory_space<vmem>>, vector<1x18xf32>
    %27 = vector.extract_strided_slice %26 {offsets = [0, 0], sizes = [1, 3], strides = [1, 1]} : vector<1x18xf32> to vector<1x3xf32>
    %28 = vector.extract_strided_slice %26 {offsets = [0, 3], sizes = [1, 3], strides = [1, 1]} : vector<1x18xf32> to vector<1x3xf32>
    %29 = vector.extract_strided_slice %26 {offsets = [0, 6], sizes = [1, 3], strides = [1, 1]} : vector<1x18xf32> to vector<1x3xf32>
    %30 = vector.extract_strided_slice %26 {offsets = [0, 9], sizes = [1, 3], strides = [1, 1]} : vector<1x18xf32> to vector<1x3xf32>
    %31 = vector.extract_strided_slice %26 {offsets = [0, 12], sizes = [1, 3], strides = [1, 1]} : vector<1x18xf32> to vector<1x3xf32>
    %32 = vector.extract_strided_slice %26 {offsets = [0, 15], sizes = [1, 3], strides = [1, 1]} : vector<1x18xf32> to vector<1x3xf32>
    %c0_i32_6 = arith.constant 0 : i32
    %33 = arith.index_cast %c0_i32_6 : i32 to index
    %c0_7 = arith.constant 0 : index
    %34 = vector.load %arg2[%33, %c0_7] : memref<8x4xf32, #tpu.memory_space<vmem>>, vector<1x4xf32>
    %35 = vector.extract_strided_slice %34 {offsets = [0, 0], sizes = [1, 1], strides = [1, 1]} : vector<1x4xf32> to vector<1x1xf32>
    %36 = vector.extract_strided_slice %34 {offsets = [0, 1], sizes = [1, 3], strides = [1, 1]} : vector<1x4xf32> to vector<1x3xf32>
    %37 = vector.extract_strided_slice %29 {offsets = [0, 2], sizes = [1, 1], strides = [1, 1]} : vector<1x3xf32> to vector<1x1xf32>
    %38 = vector.broadcast %37 : vector<1x1xf32> to vector<1x3xf32>
    %39 = arith.mulf %38, %4 : vector<1x3xf32>
    %40 = vector.extract_strided_slice %30 {offsets = [0, 2], sizes = [1, 1], strides = [1, 1]} : vector<1x3xf32> to vector<1x1xf32>
    %41 = vector.broadcast %40 : vector<1x1xf32> to vector<1x3xf32>
    %42 = arith.mulf %41, %8 : vector<1x3xf32>
    %43 = arith.addf %39, %42 : vector<1x3xf32>
    %44 = vector.extract_strided_slice %31 {offsets = [0, 2], sizes = [1, 1], strides = [1, 1]} : vector<1x3xf32> to vector<1x1xf32>
    %45 = vector.broadcast %44 : vector<1x1xf32> to vector<1x3xf32>
    %46 = arith.mulf %45, %12 : vector<1x3xf32>
    %47 = arith.addf %43, %46 : vector<1x3xf32>
    %48 = vector.broadcast %35 : vector<1x1xf32> to vector<1x3xf32>
    %49 = arith.mulf %47, %48 : vector<1x3xf32>
    %50 = arith.addf %14, %49 : vector<1x3xf32>
    %cst_8 = arith.constant 0.833333313 : f32
    %51 = vector.broadcast %cst_8 : f32 to vector<1x3xf32>
    %52 = arith.mulf %50, %51 : vector<1x3xf32>
    %53 = vector.extract_strided_slice %32 {offsets = [0, 0], sizes = [1, 1], strides = [1, 1]} : vector<1x3xf32> to vector<1x1xf32>
    %54 = vector.extract_strided_slice %32 {offsets = [0, 1], sizes = [1, 1], strides = [1, 1]} : vector<1x3xf32> to vector<1x1xf32>
    %55 = vector.extract_strided_slice %32 {offsets = [0, 2], sizes = [1, 1], strides = [1, 1]} : vector<1x3xf32> to vector<1x1xf32>
    %56 = arith.mulf %54, %55 : vector<1x1xf32>
    %cst_9 = arith.constant 2.000000e-02 : f32
    %57 = vector.broadcast %cst_9 : f32 to vector<1x1xf32>
    %58 = arith.mulf %56, %57 : vector<1x1xf32>
    %59 = vector.broadcast %58 : vector<1x1xf32> to vector<1x3xf32>
    %60 = arith.mulf %59, %4 : vector<1x3xf32>
    %61 = arith.mulf %55, %53 : vector<1x1xf32>
    %cst_10 = arith.constant -2.000000e-02 : f32
    %62 = vector.broadcast %cst_10 : f32 to vector<1x1xf32>
    %63 = arith.mulf %61, %62 : vector<1x1xf32>
    %64 = vector.broadcast %63 : vector<1x1xf32> to vector<1x3xf32>
    %65 = arith.mulf %64, %8 : vector<1x3xf32>
    %66 = arith.addf %60, %65 : vector<1x3xf32>
    %67 = arith.mulf %53, %54 : vector<1x1xf32>
    %cst_11 = arith.constant 0.000000e+00 : f32
    %68 = vector.broadcast %cst_11 : f32 to vector<1x1xf32>
    %69 = arith.mulf %67, %68 : vector<1x1xf32>
    %70 = vector.broadcast %69 : vector<1x1xf32> to vector<1x3xf32>
    %71 = arith.mulf %70, %12 : vector<1x3xf32>
    %72 = arith.addf %66, %71 : vector<1x3xf32>
    %73 = arith.subf %36, %72 : vector<1x3xf32>
    %74 = arith.mulf %73, %22 : vector<1x3xf32>
    %cst_12 = arith.constant 5.000000e-02 : f32
    %75 = vector.broadcast %cst_12 : f32 to vector<1x1xf32>
    %76 = arith.mulf %53, %75 : vector<1x1xf32>
    %cst_13 = arith.constant 5.000000e-02 : f32
    %77 = vector.broadcast %cst_13 : f32 to vector<1x1xf32>
    %78 = arith.mulf %54, %77 : vector<1x1xf32>
    %cst_14 = arith.constant 5.000000e-02 : f32
    %79 = vector.broadcast %cst_14 : f32 to vector<1x1xf32>
    %80 = arith.mulf %55, %79 : vector<1x1xf32>
    %cst_15 = arith.constant 5.000000e-02 : f32
    %81 = vector.broadcast %cst_15 : f32 to vector<1x3xf32>
    %82 = arith.mulf %32, %81 : vector<1x3xf32>
    %83 = arith.mulf %76, %76 : vector<1x1xf32>
    %84 = arith.mulf %78, %78 : vector<1x1xf32>
    %85 = arith.addf %83, %84 : vector<1x1xf32>
    %86 = arith.mulf %80, %80 : vector<1x1xf32>
    %87 = arith.addf %85, %86 : vector<1x1xf32>
    %cst_16 = arith.constant 0.000000e+00 : f32
    %88 = vector.broadcast %cst_16 : f32 to vector<1x1xf32>
    %89 = arith.cmpf ogt, %87, %88 : vector<1x1xf32>
    %cst_17 = arith.constant 1.000000e+00 : f32
    %90 = vector.broadcast %cst_17 : f32 to vector<1x1xf32>
    %91 = arith.select %89, %87, %90 : vector<1x1xi1>, vector<1x1xf32>
    %92 = math.rsqrt %91 : vector<1x1xf32>
    %93 = arith.mulf %87, %92 : vector<1x1xf32>
    %94 = arith.mulf %76, %92 : vector<1x1xf32>
    %95 = arith.mulf %78, %92 : vector<1x1xf32>
    %96 = arith.mulf %80, %92 : vector<1x1xf32>
    %97 = vector.broadcast %92 : vector<1x1xf32> to vector<1x3xf32>
    %98 = arith.mulf %82, %97 : vector<1x3xf32>
    %99 = math.sin %93 : vector<1x1xf32>
    %100 = math.cos %93 : vector<1x1xf32>
    %cst_18 = arith.constant 1.000000e+00 : f32
    %101 = vector.broadcast %cst_18 : f32 to vector<1x1xf32>
    %102 = arith.subf %101, %100 : vector<1x1xf32>
    %cst_19 = arith.constant 0.000000e+00 : f32
    %103 = vector.broadcast %cst_19 : f32 to vector<1x1xf32>
    %104 = arith.subf %103, %96 : vector<1x1xf32>
    %105 = vector.broadcast %104 : vector<1x1xf32> to vector<1x3xf32>
    %106 = arith.mulf %105, %8 : vector<1x3xf32>
    %107 = vector.broadcast %95 : vector<1x1xf32> to vector<1x3xf32>
    %108 = arith.mulf %107, %12 : vector<1x3xf32>
    %109 = arith.addf %106, %108 : vector<1x3xf32>
    %110 = vector.broadcast %96 : vector<1x1xf32> to vector<1x3xf32>
    %111 = arith.mulf %110, %4 : vector<1x3xf32>
    %112 = vector.broadcast %94 : vector<1x1xf32> to vector<1x3xf32>
    %113 = arith.mulf %112, %12 : vector<1x3xf32>
    %114 = arith.subf %111, %113 : vector<1x3xf32>
    %cst_20 = arith.constant 0.000000e+00 : f32
    %115 = vector.broadcast %cst_20 : f32 to vector<1x1xf32>
    %116 = arith.subf %115, %95 : vector<1x1xf32>
    %117 = vector.broadcast %116 : vector<1x1xf32> to vector<1x3xf32>
    %118 = arith.mulf %117, %4 : vector<1x3xf32>
    %119 = vector.broadcast %94 : vector<1x1xf32> to vector<1x3xf32>
    %120 = arith.mulf %119, %8 : vector<1x3xf32>
    %121 = arith.addf %118, %120 : vector<1x3xf32>
    %122 = vector.broadcast %100 : vector<1x1xf32> to vector<1x3xf32>
    %123 = arith.mulf %122, %4 : vector<1x3xf32>
    %124 = vector.broadcast %99 : vector<1x1xf32> to vector<1x3xf32>
    %125 = arith.mulf %124, %109 : vector<1x3xf32>
    %126 = arith.addf %123, %125 : vector<1x3xf32>
    %127 = arith.mulf %102, %94 : vector<1x1xf32>
    %128 = vector.broadcast %127 : vector<1x1xf32> to vector<1x3xf32>
    %129 = arith.mulf %128, %98 : vector<1x3xf32>
    %130 = arith.addf %126, %129 : vector<1x3xf32>
    %131 = vector.broadcast %100 : vector<1x1xf32> to vector<1x3xf32>
    %132 = arith.mulf %131, %8 : vector<1x3xf32>
    %133 = vector.broadcast %99 : vector<1x1xf32> to vector<1x3xf32>
    %134 = arith.mulf %133, %114 : vector<1x3xf32>
    %135 = arith.addf %132, %134 : vector<1x3xf32>
    %136 = arith.mulf %102, %95 : vector<1x1xf32>
    %137 = vector.broadcast %136 : vector<1x1xf32> to vector<1x3xf32>
    %138 = arith.mulf %137, %98 : vector<1x3xf32>
    %139 = arith.addf %135, %138 : vector<1x3xf32>
    %140 = vector.broadcast %100 : vector<1x1xf32> to vector<1x3xf32>
    %141 = arith.mulf %140, %12 : vector<1x3xf32>
    %142 = vector.broadcast %99 : vector<1x1xf32> to vector<1x3xf32>
    %143 = arith.mulf %142, %121 : vector<1x3xf32>
    %144 = arith.addf %141, %143 : vector<1x3xf32>
    %145 = arith.mulf %102, %96 : vector<1x1xf32>
    %146 = vector.broadcast %145 : vector<1x1xf32> to vector<1x3xf32>
    %147 = arith.mulf %146, %98 : vector<1x3xf32>
    %148 = arith.addf %144, %147 : vector<1x3xf32>
    %149 = vector.extract_strided_slice %29 {offsets = [0, 0], sizes = [1, 1], strides = [1, 1]} : vector<1x3xf32> to vector<1x1xf32>
    %150 = vector.broadcast %149 : vector<1x1xf32> to vector<1x3xf32>
    %151 = arith.mulf %150, %130 : vector<1x3xf32>
    %152 = vector.extract_strided_slice %29 {offsets = [0, 1], sizes = [1, 1], strides = [1, 1]} : vector<1x3xf32> to vector<1x1xf32>
    %153 = vector.broadcast %152 : vector<1x1xf32> to vector<1x3xf32>
    %154 = arith.mulf %153, %139 : vector<1x3xf32>
    %155 = arith.addf %151, %154 : vector<1x3xf32>
    %156 = vector.extract_strided_slice %29 {offsets = [0, 2], sizes = [1, 1], strides = [1, 1]} : vector<1x3xf32> to vector<1x1xf32>
    %157 = vector.broadcast %156 : vector<1x1xf32> to vector<1x3xf32>
    %158 = arith.mulf %157, %148 : vector<1x3xf32>
    %159 = arith.addf %155, %158 : vector<1x3xf32>
    %160 = vector.extract_strided_slice %30 {offsets = [0, 0], sizes = [1, 1], strides = [1, 1]} : vector<1x3xf32> to vector<1x1xf32>
    %161 = vector.broadcast %160 : vector<1x1xf32> to vector<1x3xf32>
    %162 = arith.mulf %161, %130 : vector<1x3xf32>
    %163 = vector.extract_strided_slice %30 {offsets = [0, 1], sizes = [1, 1], strides = [1, 1]} : vector<1x3xf32> to vector<1x1xf32>
    %164 = vector.broadcast %163 : vector<1x1xf32> to vector<1x3xf32>
    %165 = arith.mulf %164, %139 : vector<1x3xf32>
    %166 = arith.addf %162, %165 : vector<1x3xf32>
    %167 = vector.extract_strided_slice %30 {offsets = [0, 2], sizes = [1, 1], strides = [1, 1]} : vector<1x3xf32> to vector<1x1xf32>
    %168 = vector.broadcast %167 : vector<1x1xf32> to vector<1x3xf32>
    %169 = arith.mulf %168, %148 : vector<1x3xf32>
    %170 = arith.addf %166, %169 : vector<1x3xf32>
    %171 = vector.extract_strided_slice %31 {offsets = [0, 0], sizes = [1, 1], strides = [1, 1]} : vector<1x3xf32> to vector<1x1xf32>
    %172 = vector.broadcast %171 : vector<1x1xf32> to vector<1x3xf32>
    %173 = arith.mulf %172, %130 : vector<1x3xf32>
    %174 = vector.extract_strided_slice %31 {offsets = [0, 1], sizes = [1, 1], strides = [1, 1]} : vector<1x3xf32> to vector<1x1xf32>
    %175 = vector.broadcast %174 : vector<1x1xf32> to vector<1x3xf32>
    %176 = arith.mulf %175, %139 : vector<1x3xf32>
    %177 = arith.addf %173, %176 : vector<1x3xf32>
    %178 = vector.extract_strided_slice %31 {offsets = [0, 2], sizes = [1, 1], strides = [1, 1]} : vector<1x3xf32> to vector<1x1xf32>
    %179 = vector.broadcast %178 : vector<1x1xf32> to vector<1x3xf32>
    %180 = arith.mulf %179, %148 : vector<1x3xf32>
    %181 = arith.addf %177, %180 : vector<1x3xf32>
    %cst_21 = arith.constant 5.000000e-02 : f32
    %182 = vector.broadcast %cst_21 : f32 to vector<1x3xf32>
    %183 = arith.mulf %28, %182 : vector<1x3xf32>
    %184 = arith.addf %27, %183 : vector<1x3xf32>
    %cst_22 = arith.constant 5.000000e-02 : f32
    %185 = vector.broadcast %cst_22 : f32 to vector<1x3xf32>
    %186 = arith.mulf %52, %185 : vector<1x3xf32>
    %187 = arith.addf %28, %186 : vector<1x3xf32>
    %cst_23 = arith.constant 5.000000e-02 : f32
    %188 = vector.broadcast %cst_23 : f32 to vector<1x3xf32>
    %189 = arith.mulf %74, %188 : vector<1x3xf32>
    %190 = arith.addf %32, %189 : vector<1x3xf32>
    %191 = arith.index_cast %c0_i32_6 : i32 to index
    %c0_24 = arith.constant 0 : index
    %192 = vector.load %arg3[%191, %c0_24] : memref<8x18xf32, #tpu.memory_space<vmem>>, vector<1x3xf32>
    tpu.vector_store %arg3[%191, %c0_24], %184 {strides = array<i32>} : memref<8x18xf32, #tpu.memory_space<vmem>>, vector<1x3xf32>,
    %193 = arith.index_cast %c0_i32_6 : i32 to index
    %c3 = arith.constant 3 : index
    %194 = vector.load %arg3[%193, %c3] : memref<8x18xf32, #tpu.memory_space<vmem>>, vector<1x3xf32>
    tpu.vector_store %arg3[%193, %c3], %187 {strides = array<i32>} : memref<8x18xf32, #tpu.memory_space<vmem>>, vector<1x3xf32>,
    %195 = arith.index_cast %c0_i32_6 : i32 to index
    %c6 = arith.constant 6 : index
    %196 = vector.load %arg3[%195, %c6] : memref<8x18xf32, #tpu.memory_space<vmem>>, vector<1x3xf32>
    tpu.vector_store %arg3[%195, %c6], %159 {strides = array<i32>} : memref<8x18xf32, #tpu.memory_space<vmem>>, vector<1x3xf32>,
    %197 = arith.index_cast %c0_i32_6 : i32 to index
    %c9 = arith.constant 9 : index
    %198 = vector.load %arg3[%197, %c9] : memref<8x18xf32, #tpu.memory_space<vmem>>, vector<1x3xf32>
    tpu.vector_store %arg3[%197, %c9], %170 {strides = array<i32>} : memref<8x18xf32, #tpu.memory_space<vmem>>, vector<1x3xf32>,
    %199 = arith.index_cast %c0_i32_6 : i32 to index
    %c12 = arith.constant 12 : index
    %200 = vector.load %arg3[%199, %c12] : memref<8x18xf32, #tpu.memory_space<vmem>>, vector<1x3xf32>
    tpu.vector_store %arg3[%199, %c12], %181 {strides = array<i32>} : memref<8x18xf32, #tpu.memory_space<vmem>>, vector<1x3xf32>,
    %201 = arith.index_cast %c0_i32_6 : i32 to index
    %c15 = arith.constant 15 : index
    %202 = vector.load %arg3[%201, %c15] : memref<8x18xf32, #tpu.memory_space<vmem>>, vector<1x3xf32>
    tpu.vector_store %arg3[%201, %c15], %190 {strides = array<i32>} : memref<8x18xf32, #tpu.memory_space<vmem>>, vector<1x3xf32>,
    %c1_i32_25 = arith.constant 1 : i32
    %203 = arith.index_cast %c1_i32_25 : i32 to index
    %c0_26 = arith.constant 0 : index
    %204 = vector.load %arg2[%203, %c0_26] : memref<8x4xf32, #tpu.memory_space<vmem>>, vector<1x4xf32>
    %205 = vector.extract_strided_slice %204 {offsets = [0, 0], sizes = [1, 1], strides = [1, 1]} : vector<1x4xf32> to vector<1x1xf32>
    %206 = vector.extract_strided_slice %204 {offsets = [0, 1], sizes = [1, 3], strides = [1, 1]} : vector<1x4xf32> to vector<1x3xf32>
    %207 = vector.extract_strided_slice %159 {offsets = [0, 2], sizes = [1, 1], strides = [1, 1]} : vector<1x3xf32> to vector<1x1xf32>
    %208 = vector.broadcast %207 : vector<1x1xf32> to vector<1x3xf32>
    %209 = arith.mulf %208, %4 : vector<1x3xf32>
    %210 = vector.extract_strided_slice %170 {offsets = [0, 2], sizes = [1, 1], strides = [1, 1]} : vector<1x3xf32> to vector<1x1xf32>
    %211 = vector.broadcast %210 : vector<1x1xf32> to vector<1x3xf32>
    %212 = arith.mulf %211, %8 : vector<1x3xf32>
    %213 = arith.addf %209, %212 : vector<1x3xf32>
    %214 = vector.extract_strided_slice %181 {offsets = [0, 2], sizes = [1, 1], strides = [1, 1]} : vector<1x3xf32> to vector<1x1xf32>
    %215 = vector.broadcast %214 : vector<1x1xf32> to vector<1x3xf32>
    %216 = arith.mulf %215, %12 : vector<1x3xf32>
    %217 = arith.addf %213, %216 : vector<1x3xf32>
    %218 = vector.broadcast %205 : vector<1x1xf32> to vector<1x3xf32>
    %219 = arith.mulf %217, %218 : vector<1x3xf32>
    %220 = arith.addf %14, %219 : vector<1x3xf32>
    %cst_27 = arith.constant 0.833333313 : f32
    %221 = vector.broadcast %cst_27 : f32 to vector<1x3xf32>
    %222 = arith.mulf %220, %221 : vector<1x3xf32>
    %223 = vector.extract_strided_slice %190 {offsets = [0, 0], sizes = [1, 1], strides = [1, 1]} : vector<1x3xf32> to vector<1x1xf32>
    %224 = vector.extract_strided_slice %190 {offsets = [0, 1], sizes = [1, 1], strides = [1, 1]} : vector<1x3xf32> to vector<1x1xf32>
    %225 = vector.extract_strided_slice %190 {offsets = [0, 2], sizes = [1, 1], strides = [1, 1]} : vector<1x3xf32> to vector<1x1xf32>
    %226 = arith.mulf %224, %225 : vector<1x1xf32>
    %cst_28 = arith.constant 2.000000e-02 : f32
    %227 = vector.broadcast %cst_28 : f32 to vector<1x1xf32>
    %228 = arith.mulf %226, %227 : vector<1x1xf32>
    %229 = vector.broadcast %228 : vector<1x1xf32> to vector<1x3xf32>
    %230 = arith.mulf %229, %4 : vector<1x3xf32>
    %231 = arith.mulf %225, %223 : vector<1x1xf32>
    %cst_29 = arith.constant -2.000000e-02 : f32
    %232 = vector.broadcast %cst_29 : f32 to vector<1x1xf32>
    %233 = arith.mulf %231, %232 : vector<1x1xf32>
    %234 = vector.broadcast %233 : vector<1x1xf32> to vector<1x3xf32>
    %235 = arith.mulf %234, %8 : vector<1x3xf32>
    %236 = arith.addf %230, %235 : vector<1x3xf32>
    %237 = arith.mulf %223, %224 : vector<1x1xf32>
    %cst_30 = arith.constant 0.000000e+00 : f32
    %238 = vector.broadcast %cst_30 : f32 to vector<1x1xf32>
    %239 = arith.mulf %237, %238 : vector<1x1xf32>
    %240 = vector.broadcast %239 : vector<1x1xf32> to vector<1x3xf32>
    %241 = arith.mulf %240, %12 : vector<1x3xf32>
    %242 = arith.addf %236, %241 : vector<1x3xf32>
    %243 = arith.subf %206, %242 : vector<1x3xf32>
    %244 = arith.mulf %243, %22 : vector<1x3xf32>
    %cst_31 = arith.constant 5.000000e-02 : f32
    %245 = vector.broadcast %cst_31 : f32 to vector<1x1xf32>
    %246 = arith.mulf %223, %245 : vector<1x1xf32>
    %cst_32 = arith.constant 5.000000e-02 : f32
    %247 = vector.broadcast %cst_32 : f32 to vector<1x1xf32>
    %248 = arith.mulf %224, %247 : vector<1x1xf32>
    %cst_33 = arith.constant 5.000000e-02 : f32
    %249 = vector.broadcast %cst_33 : f32 to vector<1x1xf32>
    %250 = arith.mulf %225, %249 : vector<1x1xf32>
    %cst_34 = arith.constant 5.000000e-02 : f32
    %251 = vector.broadcast %cst_34 : f32 to vector<1x3xf32>
    %252 = arith.mulf %190, %251 : vector<1x3xf32>
    %253 = arith.mulf %246, %246 : vector<1x1xf32>
    %254 = arith.mulf %248, %248 : vector<1x1xf32>
    %255 = arith.addf %253, %254 : vector<1x1xf32>
    %256 = arith.mulf %250, %250 : vector<1x1xf32>
    %257 = arith.addf %255, %256 : vector<1x1xf32>
    %cst_35 = arith.constant 0.000000e+00 : f32
    %258 = vector.broadcast %cst_35 : f32 to vector<1x1xf32>
    %259 = arith.cmpf ogt, %257, %258 : vector<1x1xf32>
    %cst_36 = arith.constant 1.000000e+00 : f32
    %260 = vector.broadcast %cst_36 : f32 to vector<1x1xf32>
    %261 = arith.select %259, %257, %260 : vector<1x1xi1>, vector<1x1xf32>
    %262 = math.rsqrt %261 : vector<1x1xf32>
    %263 = arith.mulf %257, %262 : vector<1x1xf32>
    %264 = arith.mulf %246, %262 : vector<1x1xf32>
    %265 = arith.mulf %248, %262 : vector<1x1xf32>
    %266 = arith.mulf %250, %262 : vector<1x1xf32>
    %267 = vector.broadcast %262 : vector<1x1xf32> to vector<1x3xf32>
    %268 = arith.mulf %252, %267 : vector<1x3xf32>
    %269 = math.sin %263 : vector<1x1xf32>
    %270 = math.cos %263 : vector<1x1xf32>
    %cst_37 = arith.constant 1.000000e+00 : f32
    %271 = vector.broadcast %cst_37 : f32 to vector<1x1xf32>
    %272 = arith.subf %271, %270 : vector<1x1xf32>
    %cst_38 = arith.constant 0.000000e+00 : f32
    %273 = vector.broadcast %cst_38 : f32 to vector<1x1xf32>
    %274 = arith.subf %273, %266 : vector<1x1xf32>
    %275 = vector.broadcast %274 : vector<1x1xf32> to vector<1x3xf32>
    %276 = arith.mulf %275, %8 : vector<1x3xf32>
    %277 = vector.broadcast %265 : vector<1x1xf32> to vector<1x3xf32>
    %278 = arith.mulf %277, %12 : vector<1x3xf32>
    %279 = arith.addf %276, %278 : vector<1x3xf32>
    %280 = vector.broadcast %266 : vector<1x1xf32> to vector<1x3xf32>
    %281 = arith.mulf %280, %4 : vector<1x3xf32>
    %282 = vector.broadcast %264 : vector<1x1xf32> to vector<1x3xf32>
    %283 = arith.mulf %282, %12 : vector<1x3xf32>
    %284 = arith.subf %281, %283 : vector<1x3xf32>
    %cst_39 = arith.constant 0.000000e+00 : f32
    %285 = vector.broadcast %cst_39 : f32 to vector<1x1xf32>
    %286 = arith.subf %285, %265 : vector<1x1xf32>
    %287 = vector.broadcast %286 : vector<1x1xf32> to vector<1x3xf32>
    %288 = arith.mulf %287, %4 : vector<1x3xf32>
    %289 = vector.broadcast %264 : vector<1x1xf32> to vector<1x3xf32>
    %290 = arith.mulf %289, %8 : vector<1x3xf32>
    %291 = arith.addf %288, %290 : vector<1x3xf32>
    %292 = vector.broadcast %270 : vector<1x1xf32> to vector<1x3xf32>
    %293 = arith.mulf %292, %4 : vector<1x3xf32>
    %294 = vector.broadcast %269 : vector<1x1xf32> to vector<1x3xf32>
    %295 = arith.mulf %294, %279 : vector<1x3xf32>
    %296 = arith.addf %293, %295 : vector<1x3xf32>
    %297 = arith.mulf %272, %264 : vector<1x1xf32>
    %298 = vector.broadcast %297 : vector<1x1xf32> to vector<1x3xf32>
    %299 = arith.mulf %298, %268 : vector<1x3xf32>
    %300 = arith.addf %296, %299 : vector<1x3xf32>
    %301 = vector.broadcast %270 : vector<1x1xf32> to vector<1x3xf32>
    %302 = arith.mulf %301, %8 : vector<1x3xf32>
    %303 = vector.broadcast %269 : vector<1x1xf32> to vector<1x3xf32>
    %304 = arith.mulf %303, %284 : vector<1x3xf32>
    %305 = arith.addf %302, %304 : vector<1x3xf32>
    %306 = arith.mulf %272, %265 : vector<1x1xf32>
    %307 = vector.broadcast %306 : vector<1x1xf32> to vector<1x3xf32>
    %308 = arith.mulf %307, %268 : vector<1x3xf32>
    %309 = arith.addf %305, %308 : vector<1x3xf32>
    %310 = vector.broadcast %270 : vector<1x1xf32> to vector<1x3xf32>
    %311 = arith.mulf %310, %12 : vector<1x3xf32>
    %312 = vector.broadcast %269 : vector<1x1xf32> to vector<1x3xf32>
    %313 = arith.mulf %312, %291 : vector<1x3xf32>
    %314 = arith.addf %311, %313 : vector<1x3xf32>
    %315 = arith.mulf %272, %266 : vector<1x1xf32>
    %316 = vector.broadcast %315 : vector<1x1xf32> to vector<1x3xf32>
    %317 = arith.mulf %316, %268 : vector<1x3xf32>
    %318 = arith.addf %314, %317 : vector<1x3xf32>
    %319 = vector.extract_strided_slice %159 {offsets = [0, 0], sizes = [1, 1], strides = [1, 1]} : vector<1x3xf32> to vector<1x1xf32>
    %320 = vector.broadcast %319 : vector<1x1xf32> to vector<1x3xf32>
    %321 = arith.mulf %320, %300 : vector<1x3xf32>
    %322 = vector.extract_strided_slice %159 {offsets = [0, 1], sizes = [1, 1], strides = [1, 1]} : vector<1x3xf32> to vector<1x1xf32>
    %323 = vector.broadcast %322 : vector<1x1xf32> to vector<1x3xf32>
    %324 = arith.mulf %323, %309 : vector<1x3xf32>
    %325 = arith.addf %321, %324 : vector<1x3xf32>
    %326 = vector.extract_strided_slice %159 {offsets = [0, 2], sizes = [1, 1], strides = [1, 1]} : vector<1x3xf32> to vector<1x1xf32>
    %327 = vector.broadcast %326 : vector<1x1xf32> to vector<1x3xf32>
    %328 = arith.mulf %327, %318 : vector<1x3xf32>
    %329 = arith.addf %325, %328 : vector<1x3xf32>
    %330 = vector.extract_strided_slice %170 {offsets = [0, 0], sizes = [1, 1], strides = [1, 1]} : vector<1x3xf32> to vector<1x1xf32>
    %331 = vector.broadcast %330 : vector<1x1xf32> to vector<1x3xf32>
    %332 = arith.mulf %331, %300 : vector<1x3xf32>
    %333 = vector.extract_strided_slice %170 {offsets = [0, 1], sizes = [1, 1], strides = [1, 1]} : vector<1x3xf32> to vector<1x1xf32>
    %334 = vector.broadcast %333 : vector<1x1xf32> to vector<1x3xf32>
    %335 = arith.mulf %334, %309 : vector<1x3xf32>
    %336 = arith.addf %332, %335 : vector<1x3xf32>
    %337 = vector.extract_strided_slice %170 {offsets = [0, 2], sizes = [1, 1], strides = [1, 1]} : vector<1x3xf32> to vector<1x1xf32>
    %338 = vector.broadcast %337 : vector<1x1xf32> to vector<1x3xf32>
    %339 = arith.mulf %338, %318 : vector<1x3xf32>
    %340 = arith.addf %336, %339 : vector<1x3xf32>
    %341 = vector.extract_strided_slice %181 {offsets = [0, 0], sizes = [1, 1], strides = [1, 1]} : vector<1x3xf32> to vector<1x1xf32>
    %342 = vector.broadcast %341 : vector<1x1xf32> to vector<1x3xf32>
    %343 = arith.mulf %342, %300 : vector<1x3xf32>
    %344 = vector.extract_strided_slice %181 {offsets = [0, 1], sizes = [1, 1], strides = [1, 1]} : vector<1x3xf32> to vector<1x1xf32>
    %345 = vector.broadcast %344 : vector<1x1xf32> to vector<1x3xf32>
    %346 = arith.mulf %345, %309 : vector<1x3xf32>
    %347 = arith.addf %343, %346 : vector<1x3xf32>
    %348 = vector.extract_strided_slice %181 {offsets = [0, 2], sizes = [1, 1], strides = [1, 1]} : vector<1x3xf32> to vector<1x1xf32>
    %349 = vector.broadcast %348 : vector<1x1xf32> to vector<1x3xf32>
    %350 = arith.mulf %349, %318 : vector<1x3xf32>
    %351 = arith.addf %347, %350 : vector<1x3xf32>
    %cst_40 = arith.constant 5.000000e-02 : f32
    %352 = vector.broadcast %cst_40 : f32 to vector<1x3xf32>
    %353 = arith.mulf %187, %352 : vector<1x3xf32>
    %354 = arith.addf %184, %353 : vector<1x3xf32>
    %cst_41 = arith.constant 5.000000e-02 : f32
    %355 = vector.broadcast %cst_41 : f32 to vector<1x3xf32>
    %356 = arith.mulf %222, %355 : vector<1x3xf32>
    %357 = arith.addf %187, %356 : vector<1x3xf32>
    %cst_42 = arith.constant 5.000000e-02 : f32
    %358 = vector.broadcast %cst_42 : f32 to vector<1x3xf32>
    %359 = arith.mulf %244, %358 : vector<1x3xf32>
    %360 = arith.addf %190, %359 : vector<1x3xf32>
    %361 = arith.index_cast %c1_i32_25 : i32 to index
    %c0_43 = arith.constant 0 : index
    %362 = vector.load %arg3[%361, %c0_43] : memref<8x18xf32, #tpu.memory_space<vmem>>, vector<1x3xf32>
    tpu.vector_store %arg3[%361, %c0_43], %354 {strides = array<i32>} : memref<8x18xf32, #tpu.memory_space<vmem>>, vector<1x3xf32>,
    %363 = arith.index_cast %c1_i32_25 : i32 to index
    %c3_44 = arith.constant 3 : index
    %364 = vector.load %arg3[%363, %c3_44] : memref<8x18xf32, #tpu.memory_space<vmem>>, vector<1x3xf32>
    tpu.vector_store %arg3[%363, %c3_44], %357 {strides = array<i32>} : memref<8x18xf32, #tpu.memory_space<vmem>>, vector<1x3xf32>,
    %365 = arith.index_cast %c1_i32_25 : i32 to index
    %c6_45 = arith.constant 6 : index
    %366 = vector.load %arg3[%365, %c6_45] : memref<8x18xf32, #tpu.memory_space<vmem>>, vector<1x3xf32>
    tpu.vector_store %arg3[%365, %c6_45], %329 {strides = array<i32>} : memref<8x18xf32, #tpu.memory_space<vmem>>, vector<1x3xf32>,
    %367 = arith.index_cast %c1_i32_25 : i32 to index
    %c9_46 = arith.constant 9 : index
    %368 = vector.load %arg3[%367, %c9_46] : memref<8x18xf32, #tpu.memory_space<vmem>>, vector<1x3xf32>
    tpu.vector_store %arg3[%367, %c9_46], %340 {strides = array<i32>} : memref<8x18xf32, #tpu.memory_space<vmem>>, vector<1x3xf32>,
    %369 = arith.index_cast %c1_i32_25 : i32 to index
    %c12_47 = arith.constant 12 : index
    %370 = vector.load %arg3[%369, %c12_47] : memref<8x18xf32, #tpu.memory_space<vmem>>, vector<1x3xf32>
    tpu.vector_store %arg3[%369, %c12_47], %351 {strides = array<i32>} : memref<8x18xf32, #tpu.memory_space<vmem>>, vector<1x3xf32>,
    %371 = arith.index_cast %c1_i32_25 : i32 to index
    %c15_48 = arith.constant 15 : index
    %372 = vector.load %arg3[%371, %c15_48] : memref<8x18xf32, #tpu.memory_space<vmem>>, vector<1x3xf32>
    tpu.vector_store %arg3[%371, %c15_48], %360 {strides = array<i32>} : memref<8x18xf32, #tpu.memory_space<vmem>>, vector<1x3xf32>,
    %c2_i32_49 = arith.constant 2 : i32
    %373 = arith.index_cast %c2_i32_49 : i32 to index
    %c0_50 = arith.constant 0 : index
    %374 = vector.load %arg2[%373, %c0_50] : memref<8x4xf32, #tpu.memory_space<vmem>>, vector<1x4xf32>
    %375 = vector.extract_strided_slice %374 {offsets = [0, 0], sizes = [1, 1], strides = [1, 1]} : vector<1x4xf32> to vector<1x1xf32>
    %376 = vector.extract_strided_slice %374 {offsets = [0, 1], sizes = [1, 3], strides = [1, 1]} : vector<1x4xf32> to vector<1x3xf32>
    %377 = vector.extract_strided_slice %329 {offsets = [0, 2], sizes = [1, 1], strides = [1, 1]} : vector<1x3xf32> to vector<1x1xf32>
    %378 = vector.broadcast %377 : vector<1x1xf32> to vector<1x3xf32>
    %379 = arith.mulf %378, %4 : vector<1x3xf32>
    %380 = vector.extract_strided_slice %340 {offsets = [0, 2], sizes = [1, 1], strides = [1, 1]} : vector<1x3xf32> to vector<1x1xf32>
    %381 = vector.broadcast %380 : vector<1x1xf32> to vector<1x3xf32>
    %382 = arith.mulf %381, %8 : vector<1x3xf32>
    %383 = arith.addf %379, %382 : vector<1x3xf32>
    %384 = vector.extract_strided_slice %351 {offsets = [0, 2], sizes = [1, 1], strides = [1, 1]} : vector<1x3xf32> to vector<1x1xf32>
    %385 = vector.broadcast %384 : vector<1x1xf32> to vector<1x3xf32>
    %386 = arith.mulf %385, %12 : vector<1x3xf32>
    %387 = arith.addf %383, %386 : vector<1x3xf32>
    %388 = vector.broadcast %375 : vector<1x1xf32> to vector<1x3xf32>
    %389 = arith.mulf %387, %388 : vector<1x3xf32>
    %390 = arith.addf %14, %389 : vector<1x3xf32>
    %cst_51 = arith.constant 0.833333313 : f32
    %391 = vector.broadcast %cst_51 : f32 to vector<1x3xf32>
    %392 = arith.mulf %390, %391 : vector<1x3xf32>
    %393 = vector.extract_strided_slice %360 {offsets = [0, 0], sizes = [1, 1], strides = [1, 1]} : vector<1x3xf32> to vector<1x1xf32>
    %394 = vector.extract_strided_slice %360 {offsets = [0, 1], sizes = [1, 1], strides = [1, 1]} : vector<1x3xf32> to vector<1x1xf32>
    %395 = vector.extract_strided_slice %360 {offsets = [0, 2], sizes = [1, 1], strides = [1, 1]} : vector<1x3xf32> to vector<1x1xf32>
    %396 = arith.mulf %394, %395 : vector<1x1xf32>
    %cst_52 = arith.constant 2.000000e-02 : f32
    %397 = vector.broadcast %cst_52 : f32 to vector<1x1xf32>
    %398 = arith.mulf %396, %397 : vector<1x1xf32>
    %399 = vector.broadcast %398 : vector<1x1xf32> to vector<1x3xf32>
    %400 = arith.mulf %399, %4 : vector<1x3xf32>
    %401 = arith.mulf %395, %393 : vector<1x1xf32>
    %cst_53 = arith.constant -2.000000e-02 : f32
    %402 = vector.broadcast %cst_53 : f32 to vector<1x1xf32>
    %403 = arith.mulf %401, %402 : vector<1x1xf32>
    %404 = vector.broadcast %403 : vector<1x1xf32> to vector<1x3xf32>
    %405 = arith.mulf %404, %8 : vector<1x3xf32>
    %406 = arith.addf %400, %405 : vector<1x3xf32>
    %407 = arith.mulf %393, %394 : vector<1x1xf32>
    %cst_54 = arith.constant 0.000000e+00 : f32
    %408 = vector.broadcast %cst_54 : f32 to vector<1x1xf32>
    %409 = arith.mulf %407, %408 : vector<1x1xf32>
    %410 = vector.broadcast %409 : vector<1x1xf32> to vector<1x3xf32>
    %411 = arith.mulf %410, %12 : vector<1x3xf32>
    %412 = arith.addf %406, %411 : vector<1x3xf32>
    %413 = arith.subf %376, %412 : vector<1x3xf32>
    %414 = arith.mulf %413, %22 : vector<1x3xf32>
    %cst_55 = arith.constant 5.000000e-02 : f32
    %415 = vector.broadcast %cst_55 : f32 to vector<1x1xf32>
    %416 = arith.mulf %393, %415 : vector<1x1xf32>
    %cst_56 = arith.constant 5.000000e-02 : f32
    %417 = vector.broadcast %cst_56 : f32 to vector<1x1xf32>
    %418 = arith.mulf %394, %417 : vector<1x1xf32>
    %cst_57 = arith.constant 5.000000e-02 : f32
    %419 = vector.broadcast %cst_57 : f32 to vector<1x1xf32>
    %420 = arith.mulf %395, %419 : vector<1x1xf32>
    %cst_58 = arith.constant 5.000000e-02 : f32
    %421 = vector.broadcast %cst_58 : f32 to vector<1x3xf32>
    %422 = arith.mulf %360, %421 : vector<1x3xf32>
    %423 = arith.mulf %416, %416 : vector<1x1xf32>
    %424 = arith.mulf %418, %418 : vector<1x1xf32>
    %425 = arith.addf %423, %424 : vector<1x1xf32>
    %426 = arith.mulf %420, %420 : vector<1x1xf32>
    %427 = arith.addf %425, %426 : vector<1x1xf32>
    %cst_59 = arith.constant 0.000000e+00 : f32
    %428 = vector.broadcast %cst_59 : f32 to vector<1x1xf32>
    %429 = arith.cmpf ogt, %427, %428 : vector<1x1xf32>
    %cst_60 = arith.constant 1.000000e+00 : f32
    %430 = vector.broadcast %cst_60 : f32 to vector<1x1xf32>
    %431 = arith.select %429, %427, %430 : vector<1x1xi1>, vector<1x1xf32>
    %432 = math.rsqrt %431 : vector<1x1xf32>
    %433 = arith.mulf %427, %432 : vector<1x1xf32>
    %434 = arith.mulf %416, %432 : vector<1x1xf32>
    %435 = arith.mulf %418, %432 : vector<1x1xf32>
    %436 = arith.mulf %420, %432 : vector<1x1xf32>
    %437 = vector.broadcast %432 : vector<1x1xf32> to vector<1x3xf32>
    %438 = arith.mulf %422, %437 : vector<1x3xf32>
    %439 = math.sin %433 : vector<1x1xf32>
    %440 = math.cos %433 : vector<1x1xf32>
    %cst_61 = arith.constant 1.000000e+00 : f32
    %441 = vector.broadcast %cst_61 : f32 to vector<1x1xf32>
    %442 = arith.subf %441, %440 : vector<1x1xf32>
    %cst_62 = arith.constant 0.000000e+00 : f32
    %443 = vector.broadcast %cst_62 : f32 to vector<1x1xf32>
    %444 = arith.subf %443, %436 : vector<1x1xf32>
    %445 = vector.broadcast %444 : vector<1x1xf32> to vector<1x3xf32>
    %446 = arith.mulf %445, %8 : vector<1x3xf32>
    %447 = vector.broadcast %435 : vector<1x1xf32> to vector<1x3xf32>
    %448 = arith.mulf %447, %12 : vector<1x3xf32>
    %449 = arith.addf %446, %448 : vector<1x3xf32>
    %450 = vector.broadcast %436 : vector<1x1xf32> to vector<1x3xf32>
    %451 = arith.mulf %450, %4 : vector<1x3xf32>
    %452 = vector.broadcast %434 : vector<1x1xf32> to vector<1x3xf32>
    %453 = arith.mulf %452, %12 : vector<1x3xf32>
    %454 = arith.subf %451, %453 : vector<1x3xf32>
    %cst_63 = arith.constant 0.000000e+00 : f32
    %455 = vector.broadcast %cst_63 : f32 to vector<1x1xf32>
    %456 = arith.subf %455, %435 : vector<1x1xf32>
    %457 = vector.broadcast %456 : vector<1x1xf32> to vector<1x3xf32>
    %458 = arith.mulf %457, %4 : vector<1x3xf32>
    %459 = vector.broadcast %434 : vector<1x1xf32> to vector<1x3xf32>
    %460 = arith.mulf %459, %8 : vector<1x3xf32>
    %461 = arith.addf %458, %460 : vector<1x3xf32>
    %462 = vector.broadcast %440 : vector<1x1xf32> to vector<1x3xf32>
    %463 = arith.mulf %462, %4 : vector<1x3xf32>
    %464 = vector.broadcast %439 : vector<1x1xf32> to vector<1x3xf32>
    %465 = arith.mulf %464, %449 : vector<1x3xf32>
    %466 = arith.addf %463, %465 : vector<1x3xf32>
    %467 = arith.mulf %442, %434 : vector<1x1xf32>
    %468 = vector.broadcast %467 : vector<1x1xf32> to vector<1x3xf32>
    %469 = arith.mulf %468, %438 : vector<1x3xf32>
    %470 = arith.addf %466, %469 : vector<1x3xf32>
    %471 = vector.broadcast %440 : vector<1x1xf32> to vector<1x3xf32>
    %472 = arith.mulf %471, %8 : vector<1x3xf32>
    %473 = vector.broadcast %439 : vector<1x1xf32> to vector<1x3xf32>
    %474 = arith.mulf %473, %454 : vector<1x3xf32>
    %475 = arith.addf %472, %474 : vector<1x3xf32>
    %476 = arith.mulf %442, %435 : vector<1x1xf32>
    %477 = vector.broadcast %476 : vector<1x1xf32> to vector<1x3xf32>
    %478 = arith.mulf %477, %438 : vector<1x3xf32>
    %479 = arith.addf %475, %478 : vector<1x3xf32>
    %480 = vector.broadcast %440 : vector<1x1xf32> to vector<1x3xf32>
    %481 = arith.mulf %480, %12 : vector<1x3xf32>
    %482 = vector.broadcast %439 : vector<1x1xf32> to vector<1x3xf32>
    %483 = arith.mulf %482, %461 : vector<1x3xf32>
    %484 = arith.addf %481, %483 : vector<1x3xf32>
    %485 = arith.mulf %442, %436 : vector<1x1xf32>
    %486 = vector.broadcast %485 : vector<1x1xf32> to vector<1x3xf32>
    %487 = arith.mulf %486, %438 : vector<1x3xf32>
    %488 = arith.addf %484, %487 : vector<1x3xf32>
    %489 = vector.extract_strided_slice %329 {offsets = [0, 0], sizes = [1, 1], strides = [1, 1]} : vector<1x3xf32> to vector<1x1xf32>
    %490 = vector.broadcast %489 : vector<1x1xf32> to vector<1x3xf32>
    %491 = arith.mulf %490, %470 : vector<1x3xf32>
    %492 = vector.extract_strided_slice %329 {offsets = [0, 1], sizes = [1, 1], strides = [1, 1]} : vector<1x3xf32> to vector<1x1xf32>
    %493 = vector.broadcast %492 : vector<1x1xf32> to vector<1x3xf32>
    %494 = arith.mulf %493, %479 : vector<1x3xf32>
    %495 = arith.addf %491, %494 : vector<1x3xf32>
    %496 = vector.extract_strided_slice %329 {offsets = [0, 2], sizes = [1, 1], strides = [1, 1]} : vector<1x3xf32> to vector<1x1xf32>
    %497 = vector.broadcast %496 : vector<1x1xf32> to vector<1x3xf32>
    %498 = arith.mulf %497, %488 : vector<1x3xf32>
    %499 = arith.addf %495, %498 : vector<1x3xf32>
    %500 = vector.extract_strided_slice %340 {offsets = [0, 0], sizes = [1, 1], strides = [1, 1]} : vector<1x3xf32> to vector<1x1xf32>
    %501 = vector.broadcast %500 : vector<1x1xf32> to vector<1x3xf32>
    %502 = arith.mulf %501, %470 : vector<1x3xf32>
    %503 = vector.extract_strided_slice %340 {offsets = [0, 1], sizes = [1, 1], strides = [1, 1]} : vector<1x3xf32> to vector<1x1xf32>
    %504 = vector.broadcast %503 : vector<1x1xf32> to vector<1x3xf32>
    %505 = arith.mulf %504, %479 : vector<1x3xf32>
    %506 = arith.addf %502, %505 : vector<1x3xf32>
    %507 = vector.extract_strided_slice %340 {offsets = [0, 2], sizes = [1, 1], strides = [1, 1]} : vector<1x3xf32> to vector<1x1xf32>
    %508 = vector.broadcast %507 : vector<1x1xf32> to vector<1x3xf32>
    %509 = arith.mulf %508, %488 : vector<1x3xf32>
    %510 = arith.addf %506, %509 : vector<1x3xf32>
    %511 = vector.extract_strided_slice %351 {offsets = [0, 0], sizes = [1, 1], strides = [1, 1]} : vector<1x3xf32> to vector<1x1xf32>
    %512 = vector.broadcast %511 : vector<1x1xf32> to vector<1x3xf32>
    %513 = arith.mulf %512, %470 : vector<1x3xf32>
    %514 = vector.extract_strided_slice %351 {offsets = [0, 1], sizes = [1, 1], strides = [1, 1]} : vector<1x3xf32> to vector<1x1xf32>
    %515 = vector.broadcast %514 : vector<1x1xf32> to vector<1x3xf32>
    %516 = arith.mulf %515, %479 : vector<1x3xf32>
    %517 = arith.addf %513, %516 : vector<1x3xf32>
    %518 = vector.extract_strided_slice %351 {offsets = [0, 2], sizes = [1, 1], strides = [1, 1]} : vector<1x3xf32> to vector<1x1xf32>
    %519 = vector.broadcast %518 : vector<1x1xf32> to vector<1x3xf32>
    %520 = arith.mulf %519, %488 : vector<1x3xf32>
    %521 = arith.addf %517, %520 : vector<1x3xf32>
    %cst_64 = arith.constant 5.000000e-02 : f32
    %522 = vector.broadcast %cst_64 : f32 to vector<1x3xf32>
    %523 = arith.mulf %357, %522 : vector<1x3xf32>
    %524 = arith.addf %354, %523 : vector<1x3xf32>
    %cst_65 = arith.constant 5.000000e-02 : f32
    %525 = vector.broadcast %cst_65 : f32 to vector<1x3xf32>
    %526 = arith.mulf %392, %525 : vector<1x3xf32>
    %527 = arith.addf %357, %526 : vector<1x3xf32>
    %cst_66 = arith.constant 5.000000e-02 : f32
    %528 = vector.broadcast %cst_66 : f32 to vector<1x3xf32>
    %529 = arith.mulf %414, %528 : vector<1x3xf32>
    %530 = arith.addf %360, %529 : vector<1x3xf32>
    %531 = arith.index_cast %c2_i32_49 : i32 to index
    %c0_67 = arith.constant 0 : index
    %532 = vector.load %arg3[%531, %c0_67] : memref<8x18xf32, #tpu.memory_space<vmem>>, vector<1x3xf32>
    tpu.vector_store %arg3[%531, %c0_67], %524 {strides = array<i32>} : memref<8x18xf32, #tpu.memory_space<vmem>>, vector<1x3xf32>,
    %533 = arith.index_cast %c2_i32_49 : i32 to index
    %c3_68 = arith.constant 3 : index
    %534 = vector.load %arg3[%533, %c3_68] : memref<8x18xf32, #tpu.memory_space<vmem>>, vector<1x3xf32>
    tpu.vector_store %arg3[%533, %c3_68], %527 {strides = array<i32>} : memref<8x18xf32, #tpu.memory_space<vmem>>, vector<1x3xf32>,
    %535 = arith.index_cast %c2_i32_49 : i32 to index
    %c6_69 = arith.constant 6 : index
    %536 = vector.load %arg3[%535, %c6_69] : memref<8x18xf32, #tpu.memory_space<vmem>>, vector<1x3xf32>
    tpu.vector_store %arg3[%535, %c6_69], %499 {strides = array<i32>} : memref<8x18xf32, #tpu.memory_space<vmem>>, vector<1x3xf32>,
    %537 = arith.index_cast %c2_i32_49 : i32 to index
    %c9_70 = arith.constant 9 : index
    %538 = vector.load %arg3[%537, %c9_70] : memref<8x18xf32, #tpu.memory_space<vmem>>, vector<1x3xf32>
    tpu.vector_store %arg3[%537, %c9_70], %510 {strides = array<i32>} : memref<8x18xf32, #tpu.memory_space<vmem>>, vector<1x3xf32>,
    %539 = arith.index_cast %c2_i32_49 : i32 to index
    %c12_71 = arith.constant 12 : index
    %540 = vector.load %arg3[%539, %c12_71] : memref<8x18xf32, #tpu.memory_space<vmem>>, vector<1x3xf32>
    tpu.vector_store %arg3[%539, %c12_71], %521 {strides = array<i32>} : memref<8x18xf32, #tpu.memory_space<vmem>>, vector<1x3xf32>,
    %541 = arith.index_cast %c2_i32_49 : i32 to index
    %c15_72 = arith.constant 15 : index
    %542 = vector.load %arg3[%541, %c15_72] : memref<8x18xf32, #tpu.memory_space<vmem>>, vector<1x3xf32>
    tpu.vector_store %arg3[%541, %c15_72], %530 {strides = array<i32>} : memref<8x18xf32, #tpu.memory_space<vmem>>, vector<1x3xf32>,
    %c3_i32 = arith.constant 3 : i32
    %543 = arith.index_cast %c3_i32 : i32 to index
    %c0_73 = arith.constant 0 : index
    %544 = vector.load %arg2[%543, %c0_73] : memref<8x4xf32, #tpu.memory_space<vmem>>, vector<1x4xf32>
    %545 = vector.extract_strided_slice %544 {offsets = [0, 0], sizes = [1, 1], strides = [1, 1]} : vector<1x4xf32> to vector<1x1xf32>
    %546 = vector.extract_strided_slice %544 {offsets = [0, 1], sizes = [1, 3], strides = [1, 1]} : vector<1x4xf32> to vector<1x3xf32>
    %547 = vector.extract_strided_slice %499 {offsets = [0, 2], sizes = [1, 1], strides = [1, 1]} : vector<1x3xf32> to vector<1x1xf32>
    %548 = vector.broadcast %547 : vector<1x1xf32> to vector<1x3xf32>
    %549 = arith.mulf %548, %4 : vector<1x3xf32>
    %550 = vector.extract_strided_slice %510 {offsets = [0, 2], sizes = [1, 1], strides = [1, 1]} : vector<1x3xf32> to vector<1x1xf32>
    %551 = vector.broadcast %550 : vector<1x1xf32> to vector<1x3xf32>
    %552 = arith.mulf %551, %8 : vector<1x3xf32>
    %553 = arith.addf %549, %552 : vector<1x3xf32>
    %554 = vector.extract_strided_slice %521 {offsets = [0, 2], sizes = [1, 1], strides = [1, 1]} : vector<1x3xf32> to vector<1x1xf32>
    %555 = vector.broadcast %554 : vector<1x1xf32> to vector<1x3xf32>
    %556 = arith.mulf %555, %12 : vector<1x3xf32>
    %557 = arith.addf %553, %556 : vector<1x3xf32>
    %558 = vector.broadcast %545 : vector<1x1xf32> to vector<1x3xf32>
    %559 = arith.mulf %557, %558 : vector<1x3xf32>
    %560 = arith.addf %14, %559 : vector<1x3xf32>
    %cst_74 = arith.constant 0.833333313 : f32
    %561 = vector.broadcast %cst_74 : f32 to vector<1x3xf32>
    %562 = arith.mulf %560, %561 : vector<1x3xf32>
    %563 = vector.extract_strided_slice %530 {offsets = [0, 0], sizes = [1, 1], strides = [1, 1]} : vector<1x3xf32> to vector<1x1xf32>
    %564 = vector.extract_strided_slice %530 {offsets = [0, 1], sizes = [1, 1], strides = [1, 1]} : vector<1x3xf32> to vector<1x1xf32>
    %565 = vector.extract_strided_slice %530 {offsets = [0, 2], sizes = [1, 1], strides = [1, 1]} : vector<1x3xf32> to vector<1x1xf32>
    %566 = arith.mulf %564, %565 : vector<1x1xf32>
    %cst_75 = arith.constant 2.000000e-02 : f32
    %567 = vector.broadcast %cst_75 : f32 to vector<1x1xf32>
    %568 = arith.mulf %566, %567 : vector<1x1xf32>
    %569 = vector.broadcast %568 : vector<1x1xf32> to vector<1x3xf32>
    %570 = arith.mulf %569, %4 : vector<1x3xf32>
    %571 = arith.mulf %565, %563 : vector<1x1xf32>
    %cst_76 = arith.constant -2.000000e-02 : f32
    %572 = vector.broadcast %cst_76 : f32 to vector<1x1xf32>
    %573 = arith.mulf %571, %572 : vector<1x1xf32>
    %574 = vector.broadcast %573 : vector<1x1xf32> to vector<1x3xf32>
    %575 = arith.mulf %574, %8 : vector<1x3xf32>
    %576 = arith.addf %570, %575 : vector<1x3xf32>
    %577 = arith.mulf %563, %564 : vector<1x1xf32>
    %cst_77 = arith.constant 0.000000e+00 : f32
    %578 = vector.broadcast %cst_77 : f32 to vector<1x1xf32>
    %579 = arith.mulf %577, %578 : vector<1x1xf32>
    %580 = vector.broadcast %579 : vector<1x1xf32> to vector<1x3xf32>
    %581 = arith.mulf %580, %12 : vector<1x3xf32>
    %582 = arith.addf %576, %581 : vector<1x3xf32>
    %583 = arith.subf %546, %582 : vector<1x3xf32>
    %584 = arith.mulf %583, %22 : vector<1x3xf32>
    %cst_78 = arith.constant 5.000000e-02 : f32
    %585 = vector.broadcast %cst_78 : f32 to vector<1x1xf32>
    %586 = arith.mulf %563, %585 : vector<1x1xf32>
    %cst_79 = arith.constant 5.000000e-02 : f32
    %587 = vector.broadcast %cst_79 : f32 to vector<1x1xf32>
    %588 = arith.mulf %564, %587 : vector<1x1xf32>
    %cst_80 = arith.constant 5.000000e-02 : f32
    %589 = vector.broadcast %cst_80 : f32 to vector<1x1xf32>
    %590 = arith.mulf %565, %589 : vector<1x1xf32>
    %cst_81 = arith.constant 5.000000e-02 : f32
    %591 = vector.broadcast %cst_81 : f32 to vector<1x3xf32>
    %592 = arith.mulf %530, %591 : vector<1x3xf32>
    %593 = arith.mulf %586, %586 : vector<1x1xf32>
    %594 = arith.mulf %588, %588 : vector<1x1xf32>
    %595 = arith.addf %593, %594 : vector<1x1xf32>
    %596 = arith.mulf %590, %590 : vector<1x1xf32>
    %597 = arith.addf %595, %596 : vector<1x1xf32>
    %cst_82 = arith.constant 0.000000e+00 : f32
    %598 = vector.broadcast %cst_82 : f32 to vector<1x1xf32>
    %599 = arith.cmpf ogt, %597, %598 : vector<1x1xf32>
    %cst_83 = arith.constant 1.000000e+00 : f32
    %600 = vector.broadcast %cst_83 : f32 to vector<1x1xf32>
    %601 = arith.select %599, %597, %600 : vector<1x1xi1>, vector<1x1xf32>
    %602 = math.rsqrt %601 : vector<1x1xf32>
    %603 = arith.mulf %597, %602 : vector<1x1xf32>
    %604 = arith.mulf %586, %602 : vector<1x1xf32>
    %605 = arith.mulf %588, %602 : vector<1x1xf32>
    %606 = arith.mulf %590, %602 : vector<1x1xf32>
    %607 = vector.broadcast %602 : vector<1x1xf32> to vector<1x3xf32>
    %608 = arith.mulf %592, %607 : vector<1x3xf32>
    %609 = math.sin %603 : vector<1x1xf32>
    %610 = math.cos %603 : vector<1x1xf32>
    %cst_84 = arith.constant 1.000000e+00 : f32
    %611 = vector.broadcast %cst_84 : f32 to vector<1x1xf32>
    %612 = arith.subf %611, %610 : vector<1x1xf32>
    %cst_85 = arith.constant 0.000000e+00 : f32
    %613 = vector.broadcast %cst_85 : f32 to vector<1x1xf32>
    %614 = arith.subf %613, %606 : vector<1x1xf32>
    %615 = vector.broadcast %614 : vector<1x1xf32> to vector<1x3xf32>
    %616 = arith.mulf %615, %8 : vector<1x3xf32>
    %617 = vector.broadcast %605 : vector<1x1xf32> to vector<1x3xf32>
    %618 = arith.mulf %617, %12 : vector<1x3xf32>
    %619 = arith.addf %616, %618 : vector<1x3xf32>
    %620 = vector.broadcast %606 : vector<1x1xf32> to vector<1x3xf32>
    %621 = arith.mulf %620, %4 : vector<1x3xf32>
    %622 = vector.broadcast %604 : vector<1x1xf32> to vector<1x3xf32>
    %623 = arith.mulf %622, %12 : vector<1x3xf32>
    %624 = arith.subf %621, %623 : vector<1x3xf32>
    %cst_86 = arith.constant 0.000000e+00 : f32
    %625 = vector.broadcast %cst_86 : f32 to vector<1x1xf32>
    %626 = arith.subf %625, %605 : vector<1x1xf32>
    %627 = vector.broadcast %626 : vector<1x1xf32> to vector<1x3xf32>
    %628 = arith.mulf %627, %4 : vector<1x3xf32>
    %629 = vector.broadcast %604 : vector<1x1xf32> to vector<1x3xf32>
    %630 = arith.mulf %629, %8 : vector<1x3xf32>
    %631 = arith.addf %628, %630 : vector<1x3xf32>
    %632 = vector.broadcast %610 : vector<1x1xf32> to vector<1x3xf32>
    %633 = arith.mulf %632, %4 : vector<1x3xf32>
    %634 = vector.broadcast %609 : vector<1x1xf32> to vector<1x3xf32>
    %635 = arith.mulf %634, %619 : vector<1x3xf32>
    %636 = arith.addf %633, %635 : vector<1x3xf32>
    %637 = arith.mulf %612, %604 : vector<1x1xf32>
    %638 = vector.broadcast %637 : vector<1x1xf32> to vector<1x3xf32>
    %639 = arith.mulf %638, %608 : vector<1x3xf32>
    %640 = arith.addf %636, %639 : vector<1x3xf32>
    %641 = vector.broadcast %610 : vector<1x1xf32> to vector<1x3xf32>
    %642 = arith.mulf %641, %8 : vector<1x3xf32>
    %643 = vector.broadcast %609 : vector<1x1xf32> to vector<1x3xf32>
    %644 = arith.mulf %643, %624 : vector<1x3xf32>
    %645 = arith.addf %642, %644 : vector<1x3xf32>
    %646 = arith.mulf %612, %605 : vector<1x1xf32>
    %647 = vector.broadcast %646 : vector<1x1xf32> to vector<1x3xf32>
    %648 = arith.mulf %647, %608 : vector<1x3xf32>
    %649 = arith.addf %645, %648 : vector<1x3xf32>
    %650 = vector.broadcast %610 : vector<1x1xf32> to vector<1x3xf32>
    %651 = arith.mulf %650, %12 : vector<1x3xf32>
    %652 = vector.broadcast %609 : vector<1x1xf32> to vector<1x3xf32>
    %653 = arith.mulf %652, %631 : vector<1x3xf32>
    %654 = arith.addf %651, %653 : vector<1x3xf32>
    %655 = arith.mulf %612, %606 : vector<1x1xf32>
    %656 = vector.broadcast %655 : vector<1x1xf32> to vector<1x3xf32>
    %657 = arith.mulf %656, %608 : vector<1x3xf32>
    %658 = arith.addf %654, %657 : vector<1x3xf32>
    %659 = vector.extract_strided_slice %499 {offsets = [0, 0], sizes = [1, 1], strides = [1, 1]} : vector<1x3xf32> to vector<1x1xf32>
    %660 = vector.broadcast %659 : vector<1x1xf32> to vector<1x3xf32>
    %661 = arith.mulf %660, %640 : vector<1x3xf32>
    %662 = vector.extract_strided_slice %499 {offsets = [0, 1], sizes = [1, 1], strides = [1, 1]} : vector<1x3xf32> to vector<1x1xf32>
    %663 = vector.broadcast %662 : vector<1x1xf32> to vector<1x3xf32>
    %664 = arith.mulf %663, %649 : vector<1x3xf32>
    %665 = arith.addf %661, %664 : vector<1x3xf32>
    %666 = vector.extract_strided_slice %499 {offsets = [0, 2], sizes = [1, 1], strides = [1, 1]} : vector<1x3xf32> to vector<1x1xf32>
    %667 = vector.broadcast %666 : vector<1x1xf32> to vector<1x3xf32>
    %668 = arith.mulf %667, %658 : vector<1x3xf32>
    %669 = arith.addf %665, %668 : vector<1x3xf32>
    %670 = vector.extract_strided_slice %510 {offsets = [0, 0], sizes = [1, 1], strides = [1, 1]} : vector<1x3xf32> to vector<1x1xf32>
    %671 = vector.broadcast %670 : vector<1x1xf32> to vector<1x3xf32>
    %672 = arith.mulf %671, %640 : vector<1x3xf32>
    %673 = vector.extract_strided_slice %510 {offsets = [0, 1], sizes = [1, 1], strides = [1, 1]} : vector<1x3xf32> to vector<1x1xf32>
    %674 = vector.broadcast %673 : vector<1x1xf32> to vector<1x3xf32>
    %675 = arith.mulf %674, %649 : vector<1x3xf32>
    %676 = arith.addf %672, %675 : vector<1x3xf32>
    %677 = vector.extract_strided_slice %510 {offsets = [0, 2], sizes = [1, 1], strides = [1, 1]} : vector<1x3xf32> to vector<1x1xf32>
    %678 = vector.broadcast %677 : vector<1x1xf32> to vector<1x3xf32>
    %679 = arith.mulf %678, %658 : vector<1x3xf32>
    %680 = arith.addf %676, %679 : vector<1x3xf32>
    %681 = vector.extract_strided_slice %521 {offsets = [0, 0], sizes = [1, 1], strides = [1, 1]} : vector<1x3xf32> to vector<1x1xf32>
    %682 = vector.broadcast %681 : vector<1x1xf32> to vector<1x3xf32>
    %683 = arith.mulf %682, %640 : vector<1x3xf32>
    %684 = vector.extract_strided_slice %521 {offsets = [0, 1], sizes = [1, 1], strides = [1, 1]} : vector<1x3xf32> to vector<1x1xf32>
    %685 = vector.broadcast %684 : vector<1x1xf32> to vector<1x3xf32>
    %686 = arith.mulf %685, %649 : vector<1x3xf32>
    %687 = arith.addf %683, %686 : vector<1x3xf32>
    %688 = vector.extract_strided_slice %521 {offsets = [0, 2], sizes = [1, 1], strides = [1, 1]} : vector<1x3xf32> to vector<1x1xf32>
    %689 = vector.broadcast %688 : vector<1x1xf32> to vector<1x3xf32>
    %690 = arith.mulf %689, %658 : vector<1x3xf32>
    %691 = arith.addf %687, %690 : vector<1x3xf32>
    %cst_87 = arith.constant 5.000000e-02 : f32
    %692 = vector.broadcast %cst_87 : f32 to vector<1x3xf32>
    %693 = arith.mulf %527, %692 : vector<1x3xf32>
    %694 = arith.addf %524, %693 : vector<1x3xf32>
    %cst_88 = arith.constant 5.000000e-02 : f32
    %695 = vector.broadcast %cst_88 : f32 to vector<1x3xf32>
    %696 = arith.mulf %562, %695 : vector<1x3xf32>
    %697 = arith.addf %527, %696 : vector<1x3xf32>
    %cst_89 = arith.constant 5.000000e-02 : f32
    %698 = vector.broadcast %cst_89 : f32 to vector<1x3xf32>
    %699 = arith.mulf %584, %698 : vector<1x3xf32>
    %700 = arith.addf %530, %699 : vector<1x3xf32>
    %701 = arith.index_cast %c3_i32 : i32 to index
    %c0_90 = arith.constant 0 : index
    %702 = vector.load %arg3[%701, %c0_90] : memref<8x18xf32, #tpu.memory_space<vmem>>, vector<1x3xf32>
    tpu.vector_store %arg3[%701, %c0_90], %694 {strides = array<i32>} : memref<8x18xf32, #tpu.memory_space<vmem>>, vector<1x3xf32>,
    %703 = arith.index_cast %c3_i32 : i32 to index
    %c3_91 = arith.constant 3 : index
    %704 = vector.load %arg3[%703, %c3_91] : memref<8x18xf32, #tpu.memory_space<vmem>>, vector<1x3xf32>
    tpu.vector_store %arg3[%703, %c3_91], %697 {strides = array<i32>} : memref<8x18xf32, #tpu.memory_space<vmem>>, vector<1x3xf32>,
    %705 = arith.index_cast %c3_i32 : i32 to index
    %c6_92 = arith.constant 6 : index
    %706 = vector.load %arg3[%705, %c6_92] : memref<8x18xf32, #tpu.memory_space<vmem>>, vector<1x3xf32>
    tpu.vector_store %arg3[%705, %c6_92], %669 {strides = array<i32>} : memref<8x18xf32, #tpu.memory_space<vmem>>, vector<1x3xf32>,
    %707 = arith.index_cast %c3_i32 : i32 to index
    %c9_93 = arith.constant 9 : index
    %708 = vector.load %arg3[%707, %c9_93] : memref<8x18xf32, #tpu.memory_space<vmem>>, vector<1x3xf32>
    tpu.vector_store %arg3[%707, %c9_93], %680 {strides = array<i32>} : memref<8x18xf32, #tpu.memory_space<vmem>>, vector<1x3xf32>,
    %709 = arith.index_cast %c3_i32 : i32 to index
    %c12_94 = arith.constant 12 : index
    %710 = vector.load %arg3[%709, %c12_94] : memref<8x18xf32, #tpu.memory_space<vmem>>, vector<1x3xf32>
    tpu.vector_store %arg3[%709, %c12_94], %691 {strides = array<i32>} : memref<8x18xf32, #tpu.memory_space<vmem>>, vector<1x3xf32>,
    %711 = arith.index_cast %c3_i32 : i32 to index
    %c15_95 = arith.constant 15 : index
    %712 = vector.load %arg3[%711, %c15_95] : memref<8x18xf32, #tpu.memory_space<vmem>>, vector<1x3xf32>
    tpu.vector_store %arg3[%711, %c15_95], %700 {strides = array<i32>} : memref<8x18xf32, #tpu.memory_space<vmem>>, vector<1x3xf32>,
    %c4_i32 = arith.constant 4 : i32
    %713 = arith.index_cast %c4_i32 : i32 to index
    %c0_96 = arith.constant 0 : index
    %714 = vector.load %arg2[%713, %c0_96] : memref<8x4xf32, #tpu.memory_space<vmem>>, vector<1x4xf32>
    %715 = vector.extract_strided_slice %714 {offsets = [0, 0], sizes = [1, 1], strides = [1, 1]} : vector<1x4xf32> to vector<1x1xf32>
    %716 = vector.extract_strided_slice %714 {offsets = [0, 1], sizes = [1, 3], strides = [1, 1]} : vector<1x4xf32> to vector<1x3xf32>
    %717 = vector.extract_strided_slice %669 {offsets = [0, 2], sizes = [1, 1], strides = [1, 1]} : vector<1x3xf32> to vector<1x1xf32>
    %718 = vector.broadcast %717 : vector<1x1xf32> to vector<1x3xf32>
    %719 = arith.mulf %718, %4 : vector<1x3xf32>
    %720 = vector.extract_strided_slice %680 {offsets = [0, 2], sizes = [1, 1], strides = [1, 1]} : vector<1x3xf32> to vector<1x1xf32>
    %721 = vector.broadcast %720 : vector<1x1xf32> to vector<1x3xf32>
    %722 = arith.mulf %721, %8 : vector<1x3xf32>
    %723 = arith.addf %719, %722 : vector<1x3xf32>
    %724 = vector.extract_strided_slice %691 {offsets = [0, 2], sizes = [1, 1], strides = [1, 1]} : vector<1x3xf32> to vector<1x1xf32>
    %725 = vector.broadcast %724 : vector<1x1xf32> to vector<1x3xf32>
    %726 = arith.mulf %725, %12 : vector<1x3xf32>
    %727 = arith.addf %723, %726 : vector<1x3xf32>
    %728 = vector.broadcast %715 : vector<1x1xf32> to vector<1x3xf32>
    %729 = arith.mulf %727, %728 : vector<1x3xf32>
    %730 = arith.addf %14, %729 : vector<1x3xf32>
    %cst_97 = arith.constant 0.833333313 : f32
    %731 = vector.broadcast %cst_97 : f32 to vector<1x3xf32>
    %732 = arith.mulf %730, %731 : vector<1x3xf32>
    %733 = vector.extract_strided_slice %700 {offsets = [0, 0], sizes = [1, 1], strides = [1, 1]} : vector<1x3xf32> to vector<1x1xf32>
    %734 = vector.extract_strided_slice %700 {offsets = [0, 1], sizes = [1, 1], strides = [1, 1]} : vector<1x3xf32> to vector<1x1xf32>
    %735 = vector.extract_strided_slice %700 {offsets = [0, 2], sizes = [1, 1], strides = [1, 1]} : vector<1x3xf32> to vector<1x1xf32>
    %736 = arith.mulf %734, %735 : vector<1x1xf32>
    %cst_98 = arith.constant 2.000000e-02 : f32
    %737 = vector.broadcast %cst_98 : f32 to vector<1x1xf32>
    %738 = arith.mulf %736, %737 : vector<1x1xf32>
    %739 = vector.broadcast %738 : vector<1x1xf32> to vector<1x3xf32>
    %740 = arith.mulf %739, %4 : vector<1x3xf32>
    %741 = arith.mulf %735, %733 : vector<1x1xf32>
    %cst_99 = arith.constant -2.000000e-02 : f32
    %742 = vector.broadcast %cst_99 : f32 to vector<1x1xf32>
    %743 = arith.mulf %741, %742 : vector<1x1xf32>
    %744 = vector.broadcast %743 : vector<1x1xf32> to vector<1x3xf32>
    %745 = arith.mulf %744, %8 : vector<1x3xf32>
    %746 = arith.addf %740, %745 : vector<1x3xf32>
    %747 = arith.mulf %733, %734 : vector<1x1xf32>
    %cst_100 = arith.constant 0.000000e+00 : f32
    %748 = vector.broadcast %cst_100 : f32 to vector<1x1xf32>
    %749 = arith.mulf %747, %748 : vector<1x1xf32>
    %750 = vector.broadcast %749 : vector<1x1xf32> to vector<1x3xf32>
    %751 = arith.mulf %750, %12 : vector<1x3xf32>
    %752 = arith.addf %746, %751 : vector<1x3xf32>
    %753 = arith.subf %716, %752 : vector<1x3xf32>
    %754 = arith.mulf %753, %22 : vector<1x3xf32>
    %cst_101 = arith.constant 5.000000e-02 : f32
    %755 = vector.broadcast %cst_101 : f32 to vector<1x1xf32>
    %756 = arith.mulf %733, %755 : vector<1x1xf32>
    %cst_102 = arith.constant 5.000000e-02 : f32
    %757 = vector.broadcast %cst_102 : f32 to vector<1x1xf32>
    %758 = arith.mulf %734, %757 : vector<1x1xf32>
    %cst_103 = arith.constant 5.000000e-02 : f32
    %759 = vector.broadcast %cst_103 : f32 to vector<1x1xf32>
    %760 = arith.mulf %735, %759 : vector<1x1xf32>
    %cst_104 = arith.constant 5.000000e-02 : f32
    %761 = vector.broadcast %cst_104 : f32 to vector<1x3xf32>
    %762 = arith.mulf %700, %761 : vector<1x3xf32>
    %763 = arith.mulf %756, %756 : vector<1x1xf32>
    %764 = arith.mulf %758, %758 : vector<1x1xf32>
    %765 = arith.addf %763, %764 : vector<1x1xf32>
    %766 = arith.mulf %760, %760 : vector<1x1xf32>
    %767 = arith.addf %765, %766 : vector<1x1xf32>
    %cst_105 = arith.constant 0.000000e+00 : f32
    %768 = vector.broadcast %cst_105 : f32 to vector<1x1xf32>
    %769 = arith.cmpf ogt, %767, %768 : vector<1x1xf32>
    %cst_106 = arith.constant 1.000000e+00 : f32
    %770 = vector.broadcast %cst_106 : f32 to vector<1x1xf32>
    %771 = arith.select %769, %767, %770 : vector<1x1xi1>, vector<1x1xf32>
    %772 = math.rsqrt %771 : vector<1x1xf32>
    %773 = arith.mulf %767, %772 : vector<1x1xf32>
    %774 = arith.mulf %756, %772 : vector<1x1xf32>
    %775 = arith.mulf %758, %772 : vector<1x1xf32>
    %776 = arith.mulf %760, %772 : vector<1x1xf32>
    %777 = vector.broadcast %772 : vector<1x1xf32> to vector<1x3xf32>
    %778 = arith.mulf %762, %777 : vector<1x3xf32>
    %779 = math.sin %773 : vector<1x1xf32>
    %780 = math.cos %773 : vector<1x1xf32>
    %cst_107 = arith.constant 1.000000e+00 : f32
    %781 = vector.broadcast %cst_107 : f32 to vector<1x1xf32>
    %782 = arith.subf %781, %780 : vector<1x1xf32>
    %cst_108 = arith.constant 0.000000e+00 : f32
    %783 = vector.broadcast %cst_108 : f32 to vector<1x1xf32>
    %784 = arith.subf %783, %776 : vector<1x1xf32>
    %785 = vector.broadcast %784 : vector<1x1xf32> to vector<1x3xf32>
    %786 = arith.mulf %785, %8 : vector<1x3xf32>
    %787 = vector.broadcast %775 : vector<1x1xf32> to vector<1x3xf32>
    %788 = arith.mulf %787, %12 : vector<1x3xf32>
    %789 = arith.addf %786, %788 : vector<1x3xf32>
    %790 = vector.broadcast %776 : vector<1x1xf32> to vector<1x3xf32>
    %791 = arith.mulf %790, %4 : vector<1x3xf32>
    %792 = vector.broadcast %774 : vector<1x1xf32> to vector<1x3xf32>
    %793 = arith.mulf %792, %12 : vector<1x3xf32>
    %794 = arith.subf %791, %793 : vector<1x3xf32>
    %cst_109 = arith.constant 0.000000e+00 : f32
    %795 = vector.broadcast %cst_109 : f32 to vector<1x1xf32>
    %796 = arith.subf %795, %775 : vector<1x1xf32>
    %797 = vector.broadcast %796 : vector<1x1xf32> to vector<1x3xf32>
    %798 = arith.mulf %797, %4 : vector<1x3xf32>
    %799 = vector.broadcast %774 : vector<1x1xf32> to vector<1x3xf32>
    %800 = arith.mulf %799, %8 : vector<1x3xf32>
    %801 = arith.addf %798, %800 : vector<1x3xf32>
    %802 = vector.broadcast %780 : vector<1x1xf32> to vector<1x3xf32>
    %803 = arith.mulf %802, %4 : vector<1x3xf32>
    %804 = vector.broadcast %779 : vector<1x1xf32> to vector<1x3xf32>
    %805 = arith.mulf %804, %789 : vector<1x3xf32>
    %806 = arith.addf %803, %805 : vector<1x3xf32>
    %807 = arith.mulf %782, %774 : vector<1x1xf32>
    %808 = vector.broadcast %807 : vector<1x1xf32> to vector<1x3xf32>
    %809 = arith.mulf %808, %778 : vector<1x3xf32>
    %810 = arith.addf %806, %809 : vector<1x3xf32>
    %811 = vector.broadcast %780 : vector<1x1xf32> to vector<1x3xf32>
    %812 = arith.mulf %811, %8 : vector<1x3xf32>
    %813 = vector.broadcast %779 : vector<1x1xf32> to vector<1x3xf32>
    %814 = arith.mulf %813, %794 : vector<1x3xf32>
    %815 = arith.addf %812, %814 : vector<1x3xf32>
    %816 = arith.mulf %782, %775 : vector<1x1xf32>
    %817 = vector.broadcast %816 : vector<1x1xf32> to vector<1x3xf32>
    %818 = arith.mulf %817, %778 : vector<1x3xf32>
    %819 = arith.addf %815, %818 : vector<1x3xf32>
    %820 = vector.broadcast %780 : vector<1x1xf32> to vector<1x3xf32>
    %821 = arith.mulf %820, %12 : vector<1x3xf32>
    %822 = vector.broadcast %779 : vector<1x1xf32> to vector<1x3xf32>
    %823 = arith.mulf %822, %801 : vector<1x3xf32>
    %824 = arith.addf %821, %823 : vector<1x3xf32>
    %825 = arith.mulf %782, %776 : vector<1x1xf32>
    %826 = vector.broadcast %825 : vector<1x1xf32> to vector<1x3xf32>
    %827 = arith.mulf %826, %778 : vector<1x3xf32>
    %828 = arith.addf %824, %827 : vector<1x3xf32>
    %829 = vector.extract_strided_slice %669 {offsets = [0, 0], sizes = [1, 1], strides = [1, 1]} : vector<1x3xf32> to vector<1x1xf32>
    %830 = vector.broadcast %829 : vector<1x1xf32> to vector<1x3xf32>
    %831 = arith.mulf %830, %810 : vector<1x3xf32>
    %832 = vector.extract_strided_slice %669 {offsets = [0, 1], sizes = [1, 1], strides = [1, 1]} : vector<1x3xf32> to vector<1x1xf32>
    %833 = vector.broadcast %832 : vector<1x1xf32> to vector<1x3xf32>
    %834 = arith.mulf %833, %819 : vector<1x3xf32>
    %835 = arith.addf %831, %834 : vector<1x3xf32>
    %836 = vector.extract_strided_slice %669 {offsets = [0, 2], sizes = [1, 1], strides = [1, 1]} : vector<1x3xf32> to vector<1x1xf32>
    %837 = vector.broadcast %836 : vector<1x1xf32> to vector<1x3xf32>
    %838 = arith.mulf %837, %828 : vector<1x3xf32>
    %839 = arith.addf %835, %838 : vector<1x3xf32>
    %840 = vector.extract_strided_slice %680 {offsets = [0, 0], sizes = [1, 1], strides = [1, 1]} : vector<1x3xf32> to vector<1x1xf32>
    %841 = vector.broadcast %840 : vector<1x1xf32> to vector<1x3xf32>
    %842 = arith.mulf %841, %810 : vector<1x3xf32>
    %843 = vector.extract_strided_slice %680 {offsets = [0, 1], sizes = [1, 1], strides = [1, 1]} : vector<1x3xf32> to vector<1x1xf32>
    %844 = vector.broadcast %843 : vector<1x1xf32> to vector<1x3xf32>
    %845 = arith.mulf %844, %819 : vector<1x3xf32>
    %846 = arith.addf %842, %845 : vector<1x3xf32>
    %847 = vector.extract_strided_slice %680 {offsets = [0, 2], sizes = [1, 1], strides = [1, 1]} : vector<1x3xf32> to vector<1x1xf32>
    %848 = vector.broadcast %847 : vector<1x1xf32> to vector<1x3xf32>
    %849 = arith.mulf %848, %828 : vector<1x3xf32>
    %850 = arith.addf %846, %849 : vector<1x3xf32>
    %851 = vector.extract_strided_slice %691 {offsets = [0, 0], sizes = [1, 1], strides = [1, 1]} : vector<1x3xf32> to vector<1x1xf32>
    %852 = vector.broadcast %851 : vector<1x1xf32> to vector<1x3xf32>
    %853 = arith.mulf %852, %810 : vector<1x3xf32>
    %854 = vector.extract_strided_slice %691 {offsets = [0, 1], sizes = [1, 1], strides = [1, 1]} : vector<1x3xf32> to vector<1x1xf32>
    %855 = vector.broadcast %854 : vector<1x1xf32> to vector<1x3xf32>
    %856 = arith.mulf %855, %819 : vector<1x3xf32>
    %857 = arith.addf %853, %856 : vector<1x3xf32>
    %858 = vector.extract_strided_slice %691 {offsets = [0, 2], sizes = [1, 1], strides = [1, 1]} : vector<1x3xf32> to vector<1x1xf32>
    %859 = vector.broadcast %858 : vector<1x1xf32> to vector<1x3xf32>
    %860 = arith.mulf %859, %828 : vector<1x3xf32>
    %861 = arith.addf %857, %860 : vector<1x3xf32>
    %cst_110 = arith.constant 5.000000e-02 : f32
    %862 = vector.broadcast %cst_110 : f32 to vector<1x3xf32>
    %863 = arith.mulf %697, %862 : vector<1x3xf32>
    %864 = arith.addf %694, %863 : vector<1x3xf32>
    %cst_111 = arith.constant 5.000000e-02 : f32
    %865 = vector.broadcast %cst_111 : f32 to vector<1x3xf32>
    %866 = arith.mulf %732, %865 : vector<1x3xf32>
    %867 = arith.addf %697, %866 : vector<1x3xf32>
    %cst_112 = arith.constant 5.000000e-02 : f32
    %868 = vector.broadcast %cst_112 : f32 to vector<1x3xf32>
    %869 = arith.mulf %754, %868 : vector<1x3xf32>
    %870 = arith.addf %700, %869 : vector<1x3xf32>
    %871 = arith.index_cast %c4_i32 : i32 to index
    %c0_113 = arith.constant 0 : index
    %872 = vector.load %arg3[%871, %c0_113] : memref<8x18xf32, #tpu.memory_space<vmem>>, vector<1x3xf32>
    tpu.vector_store %arg3[%871, %c0_113], %864 {strides = array<i32>} : memref<8x18xf32, #tpu.memory_space<vmem>>, vector<1x3xf32>,
    %873 = arith.index_cast %c4_i32 : i32 to index
    %c3_114 = arith.constant 3 : index
    %874 = vector.load %arg3[%873, %c3_114] : memref<8x18xf32, #tpu.memory_space<vmem>>, vector<1x3xf32>
    tpu.vector_store %arg3[%873, %c3_114], %867 {strides = array<i32>} : memref<8x18xf32, #tpu.memory_space<vmem>>, vector<1x3xf32>,
    %875 = arith.index_cast %c4_i32 : i32 to index
    %c6_115 = arith.constant 6 : index
    %876 = vector.load %arg3[%875, %c6_115] : memref<8x18xf32, #tpu.memory_space<vmem>>, vector<1x3xf32>
    tpu.vector_store %arg3[%875, %c6_115], %839 {strides = array<i32>} : memref<8x18xf32, #tpu.memory_space<vmem>>, vector<1x3xf32>,
    %877 = arith.index_cast %c4_i32 : i32 to index
    %c9_116 = arith.constant 9 : index
    %878 = vector.load %arg3[%877, %c9_116] : memref<8x18xf32, #tpu.memory_space<vmem>>, vector<1x3xf32>
    tpu.vector_store %arg3[%877, %c9_116], %850 {strides = array<i32>} : memref<8x18xf32, #tpu.memory_space<vmem>>, vector<1x3xf32>,
    %879 = arith.index_cast %c4_i32 : i32 to index
    %c12_117 = arith.constant 12 : index
    %880 = vector.load %arg3[%879, %c12_117] : memref<8x18xf32, #tpu.memory_space<vmem>>, vector<1x3xf32>
    tpu.vector_store %arg3[%879, %c12_117], %861 {strides = array<i32>} : memref<8x18xf32, #tpu.memory_space<vmem>>, vector<1x3xf32>,
    %881 = arith.index_cast %c4_i32 : i32 to index
    %c15_118 = arith.constant 15 : index
    %882 = vector.load %arg3[%881, %c15_118] : memref<8x18xf32, #tpu.memory_space<vmem>>, vector<1x3xf32>
    tpu.vector_store %arg3[%881, %c15_118], %870 {strides = array<i32>} : memref<8x18xf32, #tpu.memory_space<vmem>>, vector<1x3xf32>,
    %c5_i32 = arith.constant 5 : i32
    %883 = arith.index_cast %c5_i32 : i32 to index
    %c0_119 = arith.constant 0 : index
    %884 = vector.load %arg2[%883, %c0_119] : memref<8x4xf32, #tpu.memory_space<vmem>>, vector<1x4xf32>
    %885 = vector.extract_strided_slice %884 {offsets = [0, 0], sizes = [1, 1], strides = [1, 1]} : vector<1x4xf32> to vector<1x1xf32>
    %886 = vector.extract_strided_slice %884 {offsets = [0, 1], sizes = [1, 3], strides = [1, 1]} : vector<1x4xf32> to vector<1x3xf32>
    %887 = vector.extract_strided_slice %839 {offsets = [0, 2], sizes = [1, 1], strides = [1, 1]} : vector<1x3xf32> to vector<1x1xf32>
    %888 = vector.broadcast %887 : vector<1x1xf32> to vector<1x3xf32>
    %889 = arith.mulf %888, %4 : vector<1x3xf32>
    %890 = vector.extract_strided_slice %850 {offsets = [0, 2], sizes = [1, 1], strides = [1, 1]} : vector<1x3xf32> to vector<1x1xf32>
    %891 = vector.broadcast %890 : vector<1x1xf32> to vector<1x3xf32>
    %892 = arith.mulf %891, %8 : vector<1x3xf32>
    %893 = arith.addf %889, %892 : vector<1x3xf32>
    %894 = vector.extract_strided_slice %861 {offsets = [0, 2], sizes = [1, 1], strides = [1, 1]} : vector<1x3xf32> to vector<1x1xf32>
    %895 = vector.broadcast %894 : vector<1x1xf32> to vector<1x3xf32>
    %896 = arith.mulf %895, %12 : vector<1x3xf32>
    %897 = arith.addf %893, %896 : vector<1x3xf32>
    %898 = vector.broadcast %885 : vector<1x1xf32> to vector<1x3xf32>
    %899 = arith.mulf %897, %898 : vector<1x3xf32>
    %900 = arith.addf %14, %899 : vector<1x3xf32>
    %cst_120 = arith.constant 0.833333313 : f32
    %901 = vector.broadcast %cst_120 : f32 to vector<1x3xf32>
    %902 = arith.mulf %900, %901 : vector<1x3xf32>
    %903 = vector.extract_strided_slice %870 {offsets = [0, 0], sizes = [1, 1], strides = [1, 1]} : vector<1x3xf32> to vector<1x1xf32>
    %904 = vector.extract_strided_slice %870 {offsets = [0, 1], sizes = [1, 1], strides = [1, 1]} : vector<1x3xf32> to vector<1x1xf32>
    %905 = vector.extract_strided_slice %870 {offsets = [0, 2], sizes = [1, 1], strides = [1, 1]} : vector<1x3xf32> to vector<1x1xf32>
    %906 = arith.mulf %904, %905 : vector<1x1xf32>
    %cst_121 = arith.constant 2.000000e-02 : f32
    %907 = vector.broadcast %cst_121 : f32 to vector<1x1xf32>
    %908 = arith.mulf %906, %907 : vector<1x1xf32>
    %909 = vector.broadcast %908 : vector<1x1xf32> to vector<1x3xf32>
    %910 = arith.mulf %909, %4 : vector<1x3xf32>
    %911 = arith.mulf %905, %903 : vector<1x1xf32>
    %cst_122 = arith.constant -2.000000e-02 : f32
    %912 = vector.broadcast %cst_122 : f32 to vector<1x1xf32>
    %913 = arith.mulf %911, %912 : vector<1x1xf32>
    %914 = vector.broadcast %913 : vector<1x1xf32> to vector<1x3xf32>
    %915 = arith.mulf %914, %8 : vector<1x3xf32>
    %916 = arith.addf %910, %915 : vector<1x3xf32>
    %917 = arith.mulf %903, %904 : vector<1x1xf32>
    %cst_123 = arith.constant 0.000000e+00 : f32
    %918 = vector.broadcast %cst_123 : f32 to vector<1x1xf32>
    %919 = arith.mulf %917, %918 : vector<1x1xf32>
    %920 = vector.broadcast %919 : vector<1x1xf32> to vector<1x3xf32>
    %921 = arith.mulf %920, %12 : vector<1x3xf32>
    %922 = arith.addf %916, %921 : vector<1x3xf32>
    %923 = arith.subf %886, %922 : vector<1x3xf32>
    %924 = arith.mulf %923, %22 : vector<1x3xf32>
    %cst_124 = arith.constant 5.000000e-02 : f32
    %925 = vector.broadcast %cst_124 : f32 to vector<1x1xf32>
    %926 = arith.mulf %903, %925 : vector<1x1xf32>
    %cst_125 = arith.constant 5.000000e-02 : f32
    %927 = vector.broadcast %cst_125 : f32 to vector<1x1xf32>
    %928 = arith.mulf %904, %927 : vector<1x1xf32>
    %cst_126 = arith.constant 5.000000e-02 : f32
    %929 = vector.broadcast %cst_126 : f32 to vector<1x1xf32>
    %930 = arith.mulf %905, %929 : vector<1x1xf32>
    %cst_127 = arith.constant 5.000000e-02 : f32
    %931 = vector.broadcast %cst_127 : f32 to vector<1x3xf32>
    %932 = arith.mulf %870, %931 : vector<1x3xf32>
    %933 = arith.mulf %926, %926 : vector<1x1xf32>
    %934 = arith.mulf %928, %928 : vector<1x1xf32>
    %935 = arith.addf %933, %934 : vector<1x1xf32>
    %936 = arith.mulf %930, %930 : vector<1x1xf32>
    %937 = arith.addf %935, %936 : vector<1x1xf32>
    %cst_128 = arith.constant 0.000000e+00 : f32
    %938 = vector.broadcast %cst_128 : f32 to vector<1x1xf32>
    %939 = arith.cmpf ogt, %937, %938 : vector<1x1xf32>
    %cst_129 = arith.constant 1.000000e+00 : f32
    %940 = vector.broadcast %cst_129 : f32 to vector<1x1xf32>
    %941 = arith.select %939, %937, %940 : vector<1x1xi1>, vector<1x1xf32>
    %942 = math.rsqrt %941 : vector<1x1xf32>
    %943 = arith.mulf %937, %942 : vector<1x1xf32>
    %944 = arith.mulf %926, %942 : vector<1x1xf32>
    %945 = arith.mulf %928, %942 : vector<1x1xf32>
    %946 = arith.mulf %930, %942 : vector<1x1xf32>
    %947 = vector.broadcast %942 : vector<1x1xf32> to vector<1x3xf32>
    %948 = arith.mulf %932, %947 : vector<1x3xf32>
    %949 = math.sin %943 : vector<1x1xf32>
    %950 = math.cos %943 : vector<1x1xf32>
    %cst_130 = arith.constant 1.000000e+00 : f32
    %951 = vector.broadcast %cst_130 : f32 to vector<1x1xf32>
    %952 = arith.subf %951, %950 : vector<1x1xf32>
    %cst_131 = arith.constant 0.000000e+00 : f32
    %953 = vector.broadcast %cst_131 : f32 to vector<1x1xf32>
    %954 = arith.subf %953, %946 : vector<1x1xf32>
    %955 = vector.broadcast %954 : vector<1x1xf32> to vector<1x3xf32>
    %956 = arith.mulf %955, %8 : vector<1x3xf32>
    %957 = vector.broadcast %945 : vector<1x1xf32> to vector<1x3xf32>
    %958 = arith.mulf %957, %12 : vector<1x3xf32>
    %959 = arith.addf %956, %958 : vector<1x3xf32>
    %960 = vector.broadcast %946 : vector<1x1xf32> to vector<1x3xf32>
    %961 = arith.mulf %960, %4 : vector<1x3xf32>
    %962 = vector.broadcast %944 : vector<1x1xf32> to vector<1x3xf32>
    %963 = arith.mulf %962, %12 : vector<1x3xf32>
    %964 = arith.subf %961, %963 : vector<1x3xf32>
    %cst_132 = arith.constant 0.000000e+00 : f32
    %965 = vector.broadcast %cst_132 : f32 to vector<1x1xf32>
    %966 = arith.subf %965, %945 : vector<1x1xf32>
    %967 = vector.broadcast %966 : vector<1x1xf32> to vector<1x3xf32>
    %968 = arith.mulf %967, %4 : vector<1x3xf32>
    %969 = vector.broadcast %944 : vector<1x1xf32> to vector<1x3xf32>
    %970 = arith.mulf %969, %8 : vector<1x3xf32>
    %971 = arith.addf %968, %970 : vector<1x3xf32>
    %972 = vector.broadcast %950 : vector<1x1xf32> to vector<1x3xf32>
    %973 = arith.mulf %972, %4 : vector<1x3xf32>
    %974 = vector.broadcast %949 : vector<1x1xf32> to vector<1x3xf32>
    %975 = arith.mulf %974, %959 : vector<1x3xf32>
    %976 = arith.addf %973, %975 : vector<1x3xf32>
    %977 = arith.mulf %952, %944 : vector<1x1xf32>
    %978 = vector.broadcast %977 : vector<1x1xf32> to vector<1x3xf32>
    %979 = arith.mulf %978, %948 : vector<1x3xf32>
    %980 = arith.addf %976, %979 : vector<1x3xf32>
    %981 = vector.broadcast %950 : vector<1x1xf32> to vector<1x3xf32>
    %982 = arith.mulf %981, %8 : vector<1x3xf32>
    %983 = vector.broadcast %949 : vector<1x1xf32> to vector<1x3xf32>
    %984 = arith.mulf %983, %964 : vector<1x3xf32>
    %985 = arith.addf %982, %984 : vector<1x3xf32>
    %986 = arith.mulf %952, %945 : vector<1x1xf32>
    %987 = vector.broadcast %986 : vector<1x1xf32> to vector<1x3xf32>
    %988 = arith.mulf %987, %948 : vector<1x3xf32>
    %989 = arith.addf %985, %988 : vector<1x3xf32>
    %990 = vector.broadcast %950 : vector<1x1xf32> to vector<1x3xf32>
    %991 = arith.mulf %990, %12 : vector<1x3xf32>
    %992 = vector.broadcast %949 : vector<1x1xf32> to vector<1x3xf32>
    %993 = arith.mulf %992, %971 : vector<1x3xf32>
    %994 = arith.addf %991, %993 : vector<1x3xf32>
    %995 = arith.mulf %952, %946 : vector<1x1xf32>
    %996 = vector.broadcast %995 : vector<1x1xf32> to vector<1x3xf32>
    %997 = arith.mulf %996, %948 : vector<1x3xf32>
    %998 = arith.addf %994, %997 : vector<1x3xf32>
    %999 = vector.extract_strided_slice %839 {offsets = [0, 0], sizes = [1, 1], strides = [1, 1]} : vector<1x3xf32> to vector<1x1xf32>
    %1000 = vector.broadcast %999 : vector<1x1xf32> to vector<1x3xf32>
    %1001 = arith.mulf %1000, %980 : vector<1x3xf32>
    %1002 = vector.extract_strided_slice %839 {offsets = [0, 1], sizes = [1, 1], strides = [1, 1]} : vector<1x3xf32> to vector<1x1xf32>
    %1003 = vector.broadcast %1002 : vector<1x1xf32> to vector<1x3xf32>
    %1004 = arith.mulf %1003, %989 : vector<1x3xf32>
    %1005 = arith.addf %1001, %1004 : vector<1x3xf32>
    %1006 = vector.extract_strided_slice %839 {offsets = [0, 2], sizes = [1, 1], strides = [1, 1]} : vector<1x3xf32> to vector<1x1xf32>
    %1007 = vector.broadcast %1006 : vector<1x1xf32> to vector<1x3xf32>
    %1008 = arith.mulf %1007, %998 : vector<1x3xf32>
    %1009 = arith.addf %1005, %1008 : vector<1x3xf32>
    %1010 = vector.extract_strided_slice %850 {offsets = [0, 0], sizes = [1, 1], strides = [1, 1]} : vector<1x3xf32> to vector<1x1xf32>
    %1011 = vector.broadcast %1010 : vector<1x1xf32> to vector<1x3xf32>
    %1012 = arith.mulf %1011, %980 : vector<1x3xf32>
    %1013 = vector.extract_strided_slice %850 {offsets = [0, 1], sizes = [1, 1], strides = [1, 1]} : vector<1x3xf32> to vector<1x1xf32>
    %1014 = vector.broadcast %1013 : vector<1x1xf32> to vector<1x3xf32>
    %1015 = arith.mulf %1014, %989 : vector<1x3xf32>
    %1016 = arith.addf %1012, %1015 : vector<1x3xf32>
    %1017 = vector.extract_strided_slice %850 {offsets = [0, 2], sizes = [1, 1], strides = [1, 1]} : vector<1x3xf32> to vector<1x1xf32>
    %1018 = vector.broadcast %1017 : vector<1x1xf32> to vector<1x3xf32>
    %1019 = arith.mulf %1018, %998 : vector<1x3xf32>
    %1020 = arith.addf %1016, %1019 : vector<1x3xf32>
    %1021 = vector.extract_strided_slice %861 {offsets = [0, 0], sizes = [1, 1], strides = [1, 1]} : vector<1x3xf32> to vector<1x1xf32>
    %1022 = vector.broadcast %1021 : vector<1x1xf32> to vector<1x3xf32>
    %1023 = arith.mulf %1022, %980 : vector<1x3xf32>
    %1024 = vector.extract_strided_slice %861 {offsets = [0, 1], sizes = [1, 1], strides = [1, 1]} : vector<1x3xf32> to vector<1x1xf32>
    %1025 = vector.broadcast %1024 : vector<1x1xf32> to vector<1x3xf32>
    %1026 = arith.mulf %1025, %989 : vector<1x3xf32>
    %1027 = arith.addf %1023, %1026 : vector<1x3xf32>
    %1028 = vector.extract_strided_slice %861 {offsets = [0, 2], sizes = [1, 1], strides = [1, 1]} : vector<1x3xf32> to vector<1x1xf32>
    %1029 = vector.broadcast %1028 : vector<1x1xf32> to vector<1x3xf32>
    %1030 = arith.mulf %1029, %998 : vector<1x3xf32>
    %1031 = arith.addf %1027, %1030 : vector<1x3xf32>
    %cst_133 = arith.constant 5.000000e-02 : f32
    %1032 = vector.broadcast %cst_133 : f32 to vector<1x3xf32>
    %1033 = arith.mulf %867, %1032 : vector<1x3xf32>
    %1034 = arith.addf %864, %1033 : vector<1x3xf32>
    %cst_134 = arith.constant 5.000000e-02 : f32
    %1035 = vector.broadcast %cst_134 : f32 to vector<1x3xf32>
    %1036 = arith.mulf %902, %1035 : vector<1x3xf32>
    %1037 = arith.addf %867, %1036 : vector<1x3xf32>
    %cst_135 = arith.constant 5.000000e-02 : f32
    %1038 = vector.broadcast %cst_135 : f32 to vector<1x3xf32>
    %1039 = arith.mulf %924, %1038 : vector<1x3xf32>
    %1040 = arith.addf %870, %1039 : vector<1x3xf32>
    %1041 = arith.index_cast %c5_i32 : i32 to index
    %c0_136 = arith.constant 0 : index
    %1042 = vector.load %arg3[%1041, %c0_136] : memref<8x18xf32, #tpu.memory_space<vmem>>, vector<1x3xf32>
    tpu.vector_store %arg3[%1041, %c0_136], %1034 {strides = array<i32>} : memref<8x18xf32, #tpu.memory_space<vmem>>, vector<1x3xf32>,
    %1043 = arith.index_cast %c5_i32 : i32 to index
    %c3_137 = arith.constant 3 : index
    %1044 = vector.load %arg3[%1043, %c3_137] : memref<8x18xf32, #tpu.memory_space<vmem>>, vector<1x3xf32>
    tpu.vector_store %arg3[%1043, %c3_137], %1037 {strides = array<i32>} : memref<8x18xf32, #tpu.memory_space<vmem>>, vector<1x3xf32>,
    %1045 = arith.index_cast %c5_i32 : i32 to index
    %c6_138 = arith.constant 6 : index
    %1046 = vector.load %arg3[%1045, %c6_138] : memref<8x18xf32, #tpu.memory_space<vmem>>, vector<1x3xf32>
    tpu.vector_store %arg3[%1045, %c6_138], %1009 {strides = array<i32>} : memref<8x18xf32, #tpu.memory_space<vmem>>, vector<1x3xf32>,
    %1047 = arith.index_cast %c5_i32 : i32 to index
    %c9_139 = arith.constant 9 : index
    %1048 = vector.load %arg3[%1047, %c9_139] : memref<8x18xf32, #tpu.memory_space<vmem>>, vector<1x3xf32>
    tpu.vector_store %arg3[%1047, %c9_139], %1020 {strides = array<i32>} : memref<8x18xf32, #tpu.memory_space<vmem>>, vector<1x3xf32>,
    %1049 = arith.index_cast %c5_i32 : i32 to index
    %c12_140 = arith.constant 12 : index
    %1050 = vector.load %arg3[%1049, %c12_140] : memref<8x18xf32, #tpu.memory_space<vmem>>, vector<1x3xf32>
    tpu.vector_store %arg3[%1049, %c12_140], %1031 {strides = array<i32>} : memref<8x18xf32, #tpu.memory_space<vmem>>, vector<1x3xf32>,
    %1051 = arith.index_cast %c5_i32 : i32 to index
    %c15_141 = arith.constant 15 : index
    %1052 = vector.load %arg3[%1051, %c15_141] : memref<8x18xf32, #tpu.memory_space<vmem>>, vector<1x3xf32>
    tpu.vector_store %arg3[%1051, %c15_141], %1040 {strides = array<i32>} : memref<8x18xf32, #tpu.memory_space<vmem>>, vector<1x3xf32>,
    %c6_i32 = arith.constant 6 : i32
    %1053 = arith.index_cast %c6_i32 : i32 to index
    %c0_142 = arith.constant 0 : index
    %1054 = vector.load %arg2[%1053, %c0_142] : memref<8x4xf32, #tpu.memory_space<vmem>>, vector<1x4xf32>
    %1055 = vector.extract_strided_slice %1054 {offsets = [0, 0], sizes = [1, 1], strides = [1, 1]} : vector<1x4xf32> to vector<1x1xf32>
    %1056 = vector.extract_strided_slice %1054 {offsets = [0, 1], sizes = [1, 3], strides = [1, 1]} : vector<1x4xf32> to vector<1x3xf32>
    %1057 = vector.extract_strided_slice %1009 {offsets = [0, 2], sizes = [1, 1], strides = [1, 1]} : vector<1x3xf32> to vector<1x1xf32>
    %1058 = vector.broadcast %1057 : vector<1x1xf32> to vector<1x3xf32>
    %1059 = arith.mulf %1058, %4 : vector<1x3xf32>
    %1060 = vector.extract_strided_slice %1020 {offsets = [0, 2], sizes = [1, 1], strides = [1, 1]} : vector<1x3xf32> to vector<1x1xf32>
    %1061 = vector.broadcast %1060 : vector<1x1xf32> to vector<1x3xf32>
    %1062 = arith.mulf %1061, %8 : vector<1x3xf32>
    %1063 = arith.addf %1059, %1062 : vector<1x3xf32>
    %1064 = vector.extract_strided_slice %1031 {offsets = [0, 2], sizes = [1, 1], strides = [1, 1]} : vector<1x3xf32> to vector<1x1xf32>
    %1065 = vector.broadcast %1064 : vector<1x1xf32> to vector<1x3xf32>
    %1066 = arith.mulf %1065, %12 : vector<1x3xf32>
    %1067 = arith.addf %1063, %1066 : vector<1x3xf32>
    %1068 = vector.broadcast %1055 : vector<1x1xf32> to vector<1x3xf32>
    %1069 = arith.mulf %1067, %1068 : vector<1x3xf32>
    %1070 = arith.addf %14, %1069 : vector<1x3xf32>
    %cst_143 = arith.constant 0.833333313 : f32
    %1071 = vector.broadcast %cst_143 : f32 to vector<1x3xf32>
    %1072 = arith.mulf %1070, %1071 : vector<1x3xf32>
    %1073 = vector.extract_strided_slice %1040 {offsets = [0, 0], sizes = [1, 1], strides = [1, 1]} : vector<1x3xf32> to vector<1x1xf32>
    %1074 = vector.extract_strided_slice %1040 {offsets = [0, 1], sizes = [1, 1], strides = [1, 1]} : vector<1x3xf32> to vector<1x1xf32>
    %1075 = vector.extract_strided_slice %1040 {offsets = [0, 2], sizes = [1, 1], strides = [1, 1]} : vector<1x3xf32> to vector<1x1xf32>
    %1076 = arith.mulf %1074, %1075 : vector<1x1xf32>
    %cst_144 = arith.constant 2.000000e-02 : f32
    %1077 = vector.broadcast %cst_144 : f32 to vector<1x1xf32>
    %1078 = arith.mulf %1076, %1077 : vector<1x1xf32>
    %1079 = vector.broadcast %1078 : vector<1x1xf32> to vector<1x3xf32>
    %1080 = arith.mulf %1079, %4 : vector<1x3xf32>
    %1081 = arith.mulf %1075, %1073 : vector<1x1xf32>
    %cst_145 = arith.constant -2.000000e-02 : f32
    %1082 = vector.broadcast %cst_145 : f32 to vector<1x1xf32>
    %1083 = arith.mulf %1081, %1082 : vector<1x1xf32>
    %1084 = vector.broadcast %1083 : vector<1x1xf32> to vector<1x3xf32>
    %1085 = arith.mulf %1084, %8 : vector<1x3xf32>
    %1086 = arith.addf %1080, %1085 : vector<1x3xf32>
    %1087 = arith.mulf %1073, %1074 : vector<1x1xf32>
    %cst_146 = arith.constant 0.000000e+00 : f32
    %1088 = vector.broadcast %cst_146 : f32 to vector<1x1xf32>
    %1089 = arith.mulf %1087, %1088 : vector<1x1xf32>
    %1090 = vector.broadcast %1089 : vector<1x1xf32> to vector<1x3xf32>
    %1091 = arith.mulf %1090, %12 : vector<1x3xf32>
    %1092 = arith.addf %1086, %1091 : vector<1x3xf32>
    %1093 = arith.subf %1056, %1092 : vector<1x3xf32>
    %1094 = arith.mulf %1093, %22 : vector<1x3xf32>
    %cst_147 = arith.constant 5.000000e-02 : f32
    %1095 = vector.broadcast %cst_147 : f32 to vector<1x1xf32>
    %1096 = arith.mulf %1073, %1095 : vector<1x1xf32>
    %cst_148 = arith.constant 5.000000e-02 : f32
    %1097 = vector.broadcast %cst_148 : f32 to vector<1x1xf32>
    %1098 = arith.mulf %1074, %1097 : vector<1x1xf32>
    %cst_149 = arith.constant 5.000000e-02 : f32
    %1099 = vector.broadcast %cst_149 : f32 to vector<1x1xf32>
    %1100 = arith.mulf %1075, %1099 : vector<1x1xf32>
    %cst_150 = arith.constant 5.000000e-02 : f32
    %1101 = vector.broadcast %cst_150 : f32 to vector<1x3xf32>
    %1102 = arith.mulf %1040, %1101 : vector<1x3xf32>
    %1103 = arith.mulf %1096, %1096 : vector<1x1xf32>
    %1104 = arith.mulf %1098, %1098 : vector<1x1xf32>
    %1105 = arith.addf %1103, %1104 : vector<1x1xf32>
    %1106 = arith.mulf %1100, %1100 : vector<1x1xf32>
    %1107 = arith.addf %1105, %1106 : vector<1x1xf32>
    %cst_151 = arith.constant 0.000000e+00 : f32
    %1108 = vector.broadcast %cst_151 : f32 to vector<1x1xf32>
    %1109 = arith.cmpf ogt, %1107, %1108 : vector<1x1xf32>
    %cst_152 = arith.constant 1.000000e+00 : f32
    %1110 = vector.broadcast %cst_152 : f32 to vector<1x1xf32>
    %1111 = arith.select %1109, %1107, %1110 : vector<1x1xi1>, vector<1x1xf32>
    %1112 = math.rsqrt %1111 : vector<1x1xf32>
    %1113 = arith.mulf %1107, %1112 : vector<1x1xf32>
    %1114 = arith.mulf %1096, %1112 : vector<1x1xf32>
    %1115 = arith.mulf %1098, %1112 : vector<1x1xf32>
    %1116 = arith.mulf %1100, %1112 : vector<1x1xf32>
    %1117 = vector.broadcast %1112 : vector<1x1xf32> to vector<1x3xf32>
    %1118 = arith.mulf %1102, %1117 : vector<1x3xf32>
    %1119 = math.sin %1113 : vector<1x1xf32>
    %1120 = math.cos %1113 : vector<1x1xf32>
    %cst_153 = arith.constant 1.000000e+00 : f32
    %1121 = vector.broadcast %cst_153 : f32 to vector<1x1xf32>
    %1122 = arith.subf %1121, %1120 : vector<1x1xf32>
    %cst_154 = arith.constant 0.000000e+00 : f32
    %1123 = vector.broadcast %cst_154 : f32 to vector<1x1xf32>
    %1124 = arith.subf %1123, %1116 : vector<1x1xf32>
    %1125 = vector.broadcast %1124 : vector<1x1xf32> to vector<1x3xf32>
    %1126 = arith.mulf %1125, %8 : vector<1x3xf32>
    %1127 = vector.broadcast %1115 : vector<1x1xf32> to vector<1x3xf32>
    %1128 = arith.mulf %1127, %12 : vector<1x3xf32>
    %1129 = arith.addf %1126, %1128 : vector<1x3xf32>
    %1130 = vector.broadcast %1116 : vector<1x1xf32> to vector<1x3xf32>
    %1131 = arith.mulf %1130, %4 : vector<1x3xf32>
    %1132 = vector.broadcast %1114 : vector<1x1xf32> to vector<1x3xf32>
    %1133 = arith.mulf %1132, %12 : vector<1x3xf32>
    %1134 = arith.subf %1131, %1133 : vector<1x3xf32>
    %cst_155 = arith.constant 0.000000e+00 : f32
    %1135 = vector.broadcast %cst_155 : f32 to vector<1x1xf32>
    %1136 = arith.subf %1135, %1115 : vector<1x1xf32>
    %1137 = vector.broadcast %1136 : vector<1x1xf32> to vector<1x3xf32>
    %1138 = arith.mulf %1137, %4 : vector<1x3xf32>
    %1139 = vector.broadcast %1114 : vector<1x1xf32> to vector<1x3xf32>
    %1140 = arith.mulf %1139, %8 : vector<1x3xf32>
    %1141 = arith.addf %1138, %1140 : vector<1x3xf32>
    %1142 = vector.broadcast %1120 : vector<1x1xf32> to vector<1x3xf32>
    %1143 = arith.mulf %1142, %4 : vector<1x3xf32>
    %1144 = vector.broadcast %1119 : vector<1x1xf32> to vector<1x3xf32>
    %1145 = arith.mulf %1144, %1129 : vector<1x3xf32>
    %1146 = arith.addf %1143, %1145 : vector<1x3xf32>
    %1147 = arith.mulf %1122, %1114 : vector<1x1xf32>
    %1148 = vector.broadcast %1147 : vector<1x1xf32> to vector<1x3xf32>
    %1149 = arith.mulf %1148, %1118 : vector<1x3xf32>
    %1150 = arith.addf %1146, %1149 : vector<1x3xf32>
    %1151 = vector.broadcast %1120 : vector<1x1xf32> to vector<1x3xf32>
    %1152 = arith.mulf %1151, %8 : vector<1x3xf32>
    %1153 = vector.broadcast %1119 : vector<1x1xf32> to vector<1x3xf32>
    %1154 = arith.mulf %1153, %1134 : vector<1x3xf32>
    %1155 = arith.addf %1152, %1154 : vector<1x3xf32>
    %1156 = arith.mulf %1122, %1115 : vector<1x1xf32>
    %1157 = vector.broadcast %1156 : vector<1x1xf32> to vector<1x3xf32>
    %1158 = arith.mulf %1157, %1118 : vector<1x3xf32>
    %1159 = arith.addf %1155, %1158 : vector<1x3xf32>
    %1160 = vector.broadcast %1120 : vector<1x1xf32> to vector<1x3xf32>
    %1161 = arith.mulf %1160, %12 : vector<1x3xf32>
    %1162 = vector.broadcast %1119 : vector<1x1xf32> to vector<1x3xf32>
    %1163 = arith.mulf %1162, %1141 : vector<1x3xf32>
    %1164 = arith.addf %1161, %1163 : vector<1x3xf32>
    %1165 = arith.mulf %1122, %1116 : vector<1x1xf32>
    %1166 = vector.broadcast %1165 : vector<1x1xf32> to vector<1x3xf32>
    %1167 = arith.mulf %1166, %1118 : vector<1x3xf32>
    %1168 = arith.addf %1164, %1167 : vector<1x3xf32>
    %1169 = vector.extract_strided_slice %1009 {offsets = [0, 0], sizes = [1, 1], strides = [1, 1]} : vector<1x3xf32> to vector<1x1xf32>
    %1170 = vector.broadcast %1169 : vector<1x1xf32> to vector<1x3xf32>
    %1171 = arith.mulf %1170, %1150 : vector<1x3xf32>
    %1172 = vector.extract_strided_slice %1009 {offsets = [0, 1], sizes = [1, 1], strides = [1, 1]} : vector<1x3xf32> to vector<1x1xf32>
    %1173 = vector.broadcast %1172 : vector<1x1xf32> to vector<1x3xf32>
    %1174 = arith.mulf %1173, %1159 : vector<1x3xf32>
    %1175 = arith.addf %1171, %1174 : vector<1x3xf32>
    %1176 = vector.extract_strided_slice %1009 {offsets = [0, 2], sizes = [1, 1], strides = [1, 1]} : vector<1x3xf32> to vector<1x1xf32>
    %1177 = vector.broadcast %1176 : vector<1x1xf32> to vector<1x3xf32>
    %1178 = arith.mulf %1177, %1168 : vector<1x3xf32>
    %1179 = arith.addf %1175, %1178 : vector<1x3xf32>
    %1180 = vector.extract_strided_slice %1020 {offsets = [0, 0], sizes = [1, 1], strides = [1, 1]} : vector<1x3xf32> to vector<1x1xf32>
    %1181 = vector.broadcast %1180 : vector<1x1xf32> to vector<1x3xf32>
    %1182 = arith.mulf %1181, %1150 : vector<1x3xf32>
    %1183 = vector.extract_strided_slice %1020 {offsets = [0, 1], sizes = [1, 1], strides = [1, 1]} : vector<1x3xf32> to vector<1x1xf32>
    %1184 = vector.broadcast %1183 : vector<1x1xf32> to vector<1x3xf32>
    %1185 = arith.mulf %1184, %1159 : vector<1x3xf32>
    %1186 = arith.addf %1182, %1185 : vector<1x3xf32>
    %1187 = vector.extract_strided_slice %1020 {offsets = [0, 2], sizes = [1, 1], strides = [1, 1]} : vector<1x3xf32> to vector<1x1xf32>
    %1188 = vector.broadcast %1187 : vector<1x1xf32> to vector<1x3xf32>
    %1189 = arith.mulf %1188, %1168 : vector<1x3xf32>
    %1190 = arith.addf %1186, %1189 : vector<1x3xf32>
    %1191 = vector.extract_strided_slice %1031 {offsets = [0, 0], sizes = [1, 1], strides = [1, 1]} : vector<1x3xf32> to vector<1x1xf32>
    %1192 = vector.broadcast %1191 : vector<1x1xf32> to vector<1x3xf32>
    %1193 = arith.mulf %1192, %1150 : vector<1x3xf32>
    %1194 = vector.extract_strided_slice %1031 {offsets = [0, 1], sizes = [1, 1], strides = [1, 1]} : vector<1x3xf32> to vector<1x1xf32>
    %1195 = vector.broadcast %1194 : vector<1x1xf32> to vector<1x3xf32>
    %1196 = arith.mulf %1195, %1159 : vector<1x3xf32>
    %1197 = arith.addf %1193, %1196 : vector<1x3xf32>
    %1198 = vector.extract_strided_slice %1031 {offsets = [0, 2], sizes = [1, 1], strides = [1, 1]} : vector<1x3xf32> to vector<1x1xf32>
    %1199 = vector.broadcast %1198 : vector<1x1xf32> to vector<1x3xf32>
    %1200 = arith.mulf %1199, %1168 : vector<1x3xf32>
    %1201 = arith.addf %1197, %1200 : vector<1x3xf32>
    %cst_156 = arith.constant 5.000000e-02 : f32
    %1202 = vector.broadcast %cst_156 : f32 to vector<1x3xf32>
    %1203 = arith.mulf %1037, %1202 : vector<1x3xf32>
    %1204 = arith.addf %1034, %1203 : vector<1x3xf32>
    %cst_157 = arith.constant 5.000000e-02 : f32
    %1205 = vector.broadcast %cst_157 : f32 to vector<1x3xf32>
    %1206 = arith.mulf %1072, %1205 : vector<1x3xf32>
    %1207 = arith.addf %1037, %1206 : vector<1x3xf32>
    %cst_158 = arith.constant 5.000000e-02 : f32
    %1208 = vector.broadcast %cst_158 : f32 to vector<1x3xf32>
    %1209 = arith.mulf %1094, %1208 : vector<1x3xf32>
    %1210 = arith.addf %1040, %1209 : vector<1x3xf32>
    %1211 = arith.index_cast %c6_i32 : i32 to index
    %c0_159 = arith.constant 0 : index
    %1212 = vector.load %arg3[%1211, %c0_159] : memref<8x18xf32, #tpu.memory_space<vmem>>, vector<1x3xf32>
    tpu.vector_store %arg3[%1211, %c0_159], %1204 {strides = array<i32>} : memref<8x18xf32, #tpu.memory_space<vmem>>, vector<1x3xf32>,
    %1213 = arith.index_cast %c6_i32 : i32 to index
    %c3_160 = arith.constant 3 : index
    %1214 = vector.load %arg3[%1213, %c3_160] : memref<8x18xf32, #tpu.memory_space<vmem>>, vector<1x3xf32>
    tpu.vector_store %arg3[%1213, %c3_160], %1207 {strides = array<i32>} : memref<8x18xf32, #tpu.memory_space<vmem>>, vector<1x3xf32>,
    %1215 = arith.index_cast %c6_i32 : i32 to index
    %c6_161 = arith.constant 6 : index
    %1216 = vector.load %arg3[%1215, %c6_161] : memref<8x18xf32, #tpu.memory_space<vmem>>, vector<1x3xf32>
    tpu.vector_store %arg3[%1215, %c6_161], %1179 {strides = array<i32>} : memref<8x18xf32, #tpu.memory_space<vmem>>, vector<1x3xf32>,
    %1217 = arith.index_cast %c6_i32 : i32 to index
    %c9_162 = arith.constant 9 : index
    %1218 = vector.load %arg3[%1217, %c9_162] : memref<8x18xf32, #tpu.memory_space<vmem>>, vector<1x3xf32>
    tpu.vector_store %arg3[%1217, %c9_162], %1190 {strides = array<i32>} : memref<8x18xf32, #tpu.memory_space<vmem>>, vector<1x3xf32>,
    %1219 = arith.index_cast %c6_i32 : i32 to index
    %c12_163 = arith.constant 12 : index
    %1220 = vector.load %arg3[%1219, %c12_163] : memref<8x18xf32, #tpu.memory_space<vmem>>, vector<1x3xf32>
    tpu.vector_store %arg3[%1219, %c12_163], %1201 {strides = array<i32>} : memref<8x18xf32, #tpu.memory_space<vmem>>, vector<1x3xf32>,
    %1221 = arith.index_cast %c6_i32 : i32 to index
    %c15_164 = arith.constant 15 : index
    %1222 = vector.load %arg3[%1221, %c15_164] : memref<8x18xf32, #tpu.memory_space<vmem>>, vector<1x3xf32>
    tpu.vector_store %arg3[%1221, %c15_164], %1210 {strides = array<i32>} : memref<8x18xf32, #tpu.memory_space<vmem>>, vector<1x3xf32>,
    %c7_i32 = arith.constant 7 : i32
    %1223 = arith.index_cast %c7_i32 : i32 to index
    %c0_165 = arith.constant 0 : index
    %1224 = vector.load %arg2[%1223, %c0_165] : memref<8x4xf32, #tpu.memory_space<vmem>>, vector<1x4xf32>
    %1225 = vector.extract_strided_slice %1224 {offsets = [0, 0], sizes = [1, 1], strides = [1, 1]} : vector<1x4xf32> to vector<1x1xf32>
    %1226 = vector.extract_strided_slice %1224 {offsets = [0, 1], sizes = [1, 3], strides = [1, 1]} : vector<1x4xf32> to vector<1x3xf32>
    %1227 = vector.extract_strided_slice %1179 {offsets = [0, 2], sizes = [1, 1], strides = [1, 1]} : vector<1x3xf32> to vector<1x1xf32>
    %1228 = vector.broadcast %1227 : vector<1x1xf32> to vector<1x3xf32>
    %1229 = arith.mulf %1228, %4 : vector<1x3xf32>
    %1230 = vector.extract_strided_slice %1190 {offsets = [0, 2], sizes = [1, 1], strides = [1, 1]} : vector<1x3xf32> to vector<1x1xf32>
    %1231 = vector.broadcast %1230 : vector<1x1xf32> to vector<1x3xf32>
    %1232 = arith.mulf %1231, %8 : vector<1x3xf32>
    %1233 = arith.addf %1229, %1232 : vector<1x3xf32>
    %1234 = vector.extract_strided_slice %1201 {offsets = [0, 2], sizes = [1, 1], strides = [1, 1]} : vector<1x3xf32> to vector<1x1xf32>
    %1235 = vector.broadcast %1234 : vector<1x1xf32> to vector<1x3xf32>
    %1236 = arith.mulf %1235, %12 : vector<1x3xf32>
    %1237 = arith.addf %1233, %1236 : vector<1x3xf32>
    %1238 = vector.broadcast %1225 : vector<1x1xf32> to vector<1x3xf32>
    %1239 = arith.mulf %1237, %1238 : vector<1x3xf32>
    %1240 = arith.addf %14, %1239 : vector<1x3xf32>
    %cst_166 = arith.constant 0.833333313 : f32
    %1241 = vector.broadcast %cst_166 : f32 to vector<1x3xf32>
    %1242 = arith.mulf %1240, %1241 : vector<1x3xf32>
    %1243 = vector.extract_strided_slice %1210 {offsets = [0, 0], sizes = [1, 1], strides = [1, 1]} : vector<1x3xf32> to vector<1x1xf32>
    %1244 = vector.extract_strided_slice %1210 {offsets = [0, 1], sizes = [1, 1], strides = [1, 1]} : vector<1x3xf32> to vector<1x1xf32>
    %1245 = vector.extract_strided_slice %1210 {offsets = [0, 2], sizes = [1, 1], strides = [1, 1]} : vector<1x3xf32> to vector<1x1xf32>
    %1246 = arith.mulf %1244, %1245 : vector<1x1xf32>
    %cst_167 = arith.constant 2.000000e-02 : f32
    %1247 = vector.broadcast %cst_167 : f32 to vector<1x1xf32>
    %1248 = arith.mulf %1246, %1247 : vector<1x1xf32>
    %1249 = vector.broadcast %1248 : vector<1x1xf32> to vector<1x3xf32>
    %1250 = arith.mulf %1249, %4 : vector<1x3xf32>
    %1251 = arith.mulf %1245, %1243 : vector<1x1xf32>
    %cst_168 = arith.constant -2.000000e-02 : f32
    %1252 = vector.broadcast %cst_168 : f32 to vector<1x1xf32>
    %1253 = arith.mulf %1251, %1252 : vector<1x1xf32>
    %1254 = vector.broadcast %1253 : vector<1x1xf32> to vector<1x3xf32>
    %1255 = arith.mulf %1254, %8 : vector<1x3xf32>
    %1256 = arith.addf %1250, %1255 : vector<1x3xf32>
    %1257 = arith.mulf %1243, %1244 : vector<1x1xf32>
    %cst_169 = arith.constant 0.000000e+00 : f32
    %1258 = vector.broadcast %cst_169 : f32 to vector<1x1xf32>
    %1259 = arith.mulf %1257, %1258 : vector<1x1xf32>
    %1260 = vector.broadcast %1259 : vector<1x1xf32> to vector<1x3xf32>
    %1261 = arith.mulf %1260, %12 : vector<1x3xf32>
    %1262 = arith.addf %1256, %1261 : vector<1x3xf32>
    %1263 = arith.subf %1226, %1262 : vector<1x3xf32>
    %1264 = arith.mulf %1263, %22 : vector<1x3xf32>
    %cst_170 = arith.constant 5.000000e-02 : f32
    %1265 = vector.broadcast %cst_170 : f32 to vector<1x1xf32>
    %1266 = arith.mulf %1243, %1265 : vector<1x1xf32>
    %cst_171 = arith.constant 5.000000e-02 : f32
    %1267 = vector.broadcast %cst_171 : f32 to vector<1x1xf32>
    %1268 = arith.mulf %1244, %1267 : vector<1x1xf32>
    %cst_172 = arith.constant 5.000000e-02 : f32
    %1269 = vector.broadcast %cst_172 : f32 to vector<1x1xf32>
    %1270 = arith.mulf %1245, %1269 : vector<1x1xf32>
    %cst_173 = arith.constant 5.000000e-02 : f32
    %1271 = vector.broadcast %cst_173 : f32 to vector<1x3xf32>
    %1272 = arith.mulf %1210, %1271 : vector<1x3xf32>
    %1273 = arith.mulf %1266, %1266 : vector<1x1xf32>
    %1274 = arith.mulf %1268, %1268 : vector<1x1xf32>
    %1275 = arith.addf %1273, %1274 : vector<1x1xf32>
    %1276 = arith.mulf %1270, %1270 : vector<1x1xf32>
    %1277 = arith.addf %1275, %1276 : vector<1x1xf32>
    %cst_174 = arith.constant 0.000000e+00 : f32
    %1278 = vector.broadcast %cst_174 : f32 to vector<1x1xf32>
    %1279 = arith.cmpf ogt, %1277, %1278 : vector<1x1xf32>
    %cst_175 = arith.constant 1.000000e+00 : f32
    %1280 = vector.broadcast %cst_175 : f32 to vector<1x1xf32>
    %1281 = arith.select %1279, %1277, %1280 : vector<1x1xi1>, vector<1x1xf32>
    %1282 = math.rsqrt %1281 : vector<1x1xf32>
    %1283 = arith.mulf %1277, %1282 : vector<1x1xf32>
    %1284 = arith.mulf %1266, %1282 : vector<1x1xf32>
    %1285 = arith.mulf %1268, %1282 : vector<1x1xf32>
    %1286 = arith.mulf %1270, %1282 : vector<1x1xf32>
    %1287 = vector.broadcast %1282 : vector<1x1xf32> to vector<1x3xf32>
    %1288 = arith.mulf %1272, %1287 : vector<1x3xf32>
    %1289 = math.sin %1283 : vector<1x1xf32>
    %1290 = math.cos %1283 : vector<1x1xf32>
    %cst_176 = arith.constant 1.000000e+00 : f32
    %1291 = vector.broadcast %cst_176 : f32 to vector<1x1xf32>
    %1292 = arith.subf %1291, %1290 : vector<1x1xf32>
    %cst_177 = arith.constant 0.000000e+00 : f32
    %1293 = vector.broadcast %cst_177 : f32 to vector<1x1xf32>
    %1294 = arith.subf %1293, %1286 : vector<1x1xf32>
    %1295 = vector.broadcast %1294 : vector<1x1xf32> to vector<1x3xf32>
    %1296 = arith.mulf %1295, %8 : vector<1x3xf32>
    %1297 = vector.broadcast %1285 : vector<1x1xf32> to vector<1x3xf32>
    %1298 = arith.mulf %1297, %12 : vector<1x3xf32>
    %1299 = arith.addf %1296, %1298 : vector<1x3xf32>
    %1300 = vector.broadcast %1286 : vector<1x1xf32> to vector<1x3xf32>
    %1301 = arith.mulf %1300, %4 : vector<1x3xf32>
    %1302 = vector.broadcast %1284 : vector<1x1xf32> to vector<1x3xf32>
    %1303 = arith.mulf %1302, %12 : vector<1x3xf32>
    %1304 = arith.subf %1301, %1303 : vector<1x3xf32>
    %cst_178 = arith.constant 0.000000e+00 : f32
    %1305 = vector.broadcast %cst_178 : f32 to vector<1x1xf32>
    %1306 = arith.subf %1305, %1285 : vector<1x1xf32>
    %1307 = vector.broadcast %1306 : vector<1x1xf32> to vector<1x3xf32>
    %1308 = arith.mulf %1307, %4 : vector<1x3xf32>
    %1309 = vector.broadcast %1284 : vector<1x1xf32> to vector<1x3xf32>
    %1310 = arith.mulf %1309, %8 : vector<1x3xf32>
    %1311 = arith.addf %1308, %1310 : vector<1x3xf32>
    %1312 = vector.broadcast %1290 : vector<1x1xf32> to vector<1x3xf32>
    %1313 = arith.mulf %1312, %4 : vector<1x3xf32>
    %1314 = vector.broadcast %1289 : vector<1x1xf32> to vector<1x3xf32>
    %1315 = arith.mulf %1314, %1299 : vector<1x3xf32>
    %1316 = arith.addf %1313, %1315 : vector<1x3xf32>
    %1317 = arith.mulf %1292, %1284 : vector<1x1xf32>
    %1318 = vector.broadcast %1317 : vector<1x1xf32> to vector<1x3xf32>
    %1319 = arith.mulf %1318, %1288 : vector<1x3xf32>
    %1320 = arith.addf %1316, %1319 : vector<1x3xf32>
    %1321 = vector.broadcast %1290 : vector<1x1xf32> to vector<1x3xf32>
    %1322 = arith.mulf %1321, %8 : vector<1x3xf32>
    %1323 = vector.broadcast %1289 : vector<1x1xf32> to vector<1x3xf32>
    %1324 = arith.mulf %1323, %1304 : vector<1x3xf32>
    %1325 = arith.addf %1322, %1324 : vector<1x3xf32>
    %1326 = arith.mulf %1292, %1285 : vector<1x1xf32>
    %1327 = vector.broadcast %1326 : vector<1x1xf32> to vector<1x3xf32>
    %1328 = arith.mulf %1327, %1288 : vector<1x3xf32>
    %1329 = arith.addf %1325, %1328 : vector<1x3xf32>
    %1330 = vector.broadcast %1290 : vector<1x1xf32> to vector<1x3xf32>
    %1331 = arith.mulf %1330, %12 : vector<1x3xf32>
    %1332 = vector.broadcast %1289 : vector<1x1xf32> to vector<1x3xf32>
    %1333 = arith.mulf %1332, %1311 : vector<1x3xf32>
    %1334 = arith.addf %1331, %1333 : vector<1x3xf32>
    %1335 = arith.mulf %1292, %1286 : vector<1x1xf32>
    %1336 = vector.broadcast %1335 : vector<1x1xf32> to vector<1x3xf32>
    %1337 = arith.mulf %1336, %1288 : vector<1x3xf32>
    %1338 = arith.addf %1334, %1337 : vector<1x3xf32>
    %1339 = vector.extract_strided_slice %1179 {offsets = [0, 0], sizes = [1, 1], strides = [1, 1]} : vector<1x3xf32> to vector<1x1xf32>
    %1340 = vector.broadcast %1339 : vector<1x1xf32> to vector<1x3xf32>
    %1341 = arith.mulf %1340, %1320 : vector<1x3xf32>
    %1342 = vector.extract_strided_slice %1179 {offsets = [0, 1], sizes = [1, 1], strides = [1, 1]} : vector<1x3xf32> to vector<1x1xf32>
    %1343 = vector.broadcast %1342 : vector<1x1xf32> to vector<1x3xf32>
    %1344 = arith.mulf %1343, %1329 : vector<1x3xf32>
    %1345 = arith.addf %1341, %1344 : vector<1x3xf32>
    %1346 = vector.extract_strided_slice %1179 {offsets = [0, 2], sizes = [1, 1], strides = [1, 1]} : vector<1x3xf32> to vector<1x1xf32>
    %1347 = vector.broadcast %1346 : vector<1x1xf32> to vector<1x3xf32>
    %1348 = arith.mulf %1347, %1338 : vector<1x3xf32>
    %1349 = arith.addf %1345, %1348 : vector<1x3xf32>
    %1350 = vector.extract_strided_slice %1190 {offsets = [0, 0], sizes = [1, 1], strides = [1, 1]} : vector<1x3xf32> to vector<1x1xf32>
    %1351 = vector.broadcast %1350 : vector<1x1xf32> to vector<1x3xf32>
    %1352 = arith.mulf %1351, %1320 : vector<1x3xf32>
    %1353 = vector.extract_strided_slice %1190 {offsets = [0, 1], sizes = [1, 1], strides = [1, 1]} : vector<1x3xf32> to vector<1x1xf32>
    %1354 = vector.broadcast %1353 : vector<1x1xf32> to vector<1x3xf32>
    %1355 = arith.mulf %1354, %1329 : vector<1x3xf32>
    %1356 = arith.addf %1352, %1355 : vector<1x3xf32>
    %1357 = vector.extract_strided_slice %1190 {offsets = [0, 2], sizes = [1, 1], strides = [1, 1]} : vector<1x3xf32> to vector<1x1xf32>
    %1358 = vector.broadcast %1357 : vector<1x1xf32> to vector<1x3xf32>
    %1359 = arith.mulf %1358, %1338 : vector<1x3xf32>
    %1360 = arith.addf %1356, %1359 : vector<1x3xf32>
    %1361 = vector.extract_strided_slice %1201 {offsets = [0, 0], sizes = [1, 1], strides = [1, 1]} : vector<1x3xf32> to vector<1x1xf32>
    %1362 = vector.broadcast %1361 : vector<1x1xf32> to vector<1x3xf32>
    %1363 = arith.mulf %1362, %1320 : vector<1x3xf32>
    %1364 = vector.extract_strided_slice %1201 {offsets = [0, 1], sizes = [1, 1], strides = [1, 1]} : vector<1x3xf32> to vector<1x1xf32>
    %1365 = vector.broadcast %1364 : vector<1x1xf32> to vector<1x3xf32>
    %1366 = arith.mulf %1365, %1329 : vector<1x3xf32>
    %1367 = arith.addf %1363, %1366 : vector<1x3xf32>
    %1368 = vector.extract_strided_slice %1201 {offsets = [0, 2], sizes = [1, 1], strides = [1, 1]} : vector<1x3xf32> to vector<1x1xf32>
    %1369 = vector.broadcast %1368 : vector<1x1xf32> to vector<1x3xf32>
    %1370 = arith.mulf %1369, %1338 : vector<1x3xf32>
    %1371 = arith.addf %1367, %1370 : vector<1x3xf32>
    %cst_179 = arith.constant 5.000000e-02 : f32
    %1372 = vector.broadcast %cst_179 : f32 to vector<1x3xf32>
    %1373 = arith.mulf %1207, %1372 : vector<1x3xf32>
    %1374 = arith.addf %1204, %1373 : vector<1x3xf32>
    %cst_180 = arith.constant 5.000000e-02 : f32
    %1375 = vector.broadcast %cst_180 : f32 to vector<1x3xf32>
    %1376 = arith.mulf %1242, %1375 : vector<1x3xf32>
    %1377 = arith.addf %1207, %1376 : vector<1x3xf32>
    %cst_181 = arith.constant 5.000000e-02 : f32
    %1378 = vector.broadcast %cst_181 : f32 to vector<1x3xf32>
    %1379 = arith.mulf %1264, %1378 : vector<1x3xf32>
    %1380 = arith.addf %1210, %1379 : vector<1x3xf32>
    %1381 = arith.index_cast %c7_i32 : i32 to index
    %c0_182 = arith.constant 0 : index
    %1382 = vector.load %arg3[%1381, %c0_182] : memref<8x18xf32, #tpu.memory_space<vmem>>, vector<1x3xf32>
    tpu.vector_store %arg3[%1381, %c0_182], %1374 {strides = array<i32>} : memref<8x18xf32, #tpu.memory_space<vmem>>, vector<1x3xf32>,
    %1383 = arith.index_cast %c7_i32 : i32 to index
    %c3_183 = arith.constant 3 : index
    %1384 = vector.load %arg3[%1383, %c3_183] : memref<8x18xf32, #tpu.memory_space<vmem>>, vector<1x3xf32>
    tpu.vector_store %arg3[%1383, %c3_183], %1377 {strides = array<i32>} : memref<8x18xf32, #tpu.memory_space<vmem>>, vector<1x3xf32>,
    %1385 = arith.index_cast %c7_i32 : i32 to index
    %c6_184 = arith.constant 6 : index
    %1386 = vector.load %arg3[%1385, %c6_184] : memref<8x18xf32, #tpu.memory_space<vmem>>, vector<1x3xf32>
    tpu.vector_store %arg3[%1385, %c6_184], %1349 {strides = array<i32>} : memref<8x18xf32, #tpu.memory_space<vmem>>, vector<1x3xf32>,
    %1387 = arith.index_cast %c7_i32 : i32 to index
    %c9_185 = arith.constant 9 : index
    %1388 = vector.load %arg3[%1387, %c9_185] : memref<8x18xf32, #tpu.memory_space<vmem>>, vector<1x3xf32>
    tpu.vector_store %arg3[%1387, %c9_185], %1360 {strides = array<i32>} : memref<8x18xf32, #tpu.memory_space<vmem>>, vector<1x3xf32>,
    %1389 = arith.index_cast %c7_i32 : i32 to index
    %c12_186 = arith.constant 12 : index
    %1390 = vector.load %arg3[%1389, %c12_186] : memref<8x18xf32, #tpu.memory_space<vmem>>, vector<1x3xf32>
    tpu.vector_store %arg3[%1389, %c12_186], %1371 {strides = array<i32>} : memref<8x18xf32, #tpu.memory_space<vmem>>, vector<1x3xf32>,
    %1391 = arith.index_cast %c7_i32 : i32 to index
    %c15_187 = arith.constant 15 : index
    %1392 = vector.load %arg3[%1391, %c15_187] : memref<8x18xf32, #tpu.memory_space<vmem>>, vector<1x3xf32>
    tpu.vector_store %arg3[%1391, %c15_187], %1380 {strides = array<i32>} : memref<8x18xf32, #tpu.memory_space<vmem>>, vector<1x3xf32>,
    %c8_i32 = arith.constant 8 : i32
    %1393 = tpu.concatenate %1374, %1377, %1349, %1360, %1371, %1380 in 1 : vector<1x3xf32>, vector<1x3xf32>, vector<1x3xf32>, vector<1x3xf32>, vector<1x3xf32>, vector<1x3xf32> -> vector<1x18xf32>
    %c0_188 = arith.constant 0 : index
    %c0_189 = arith.constant 0 : index
    %1394 = vector.load %arg4[%c0_188, %c0_189] : memref<1x18xf32, #tpu.memory_space<vmem>>, vector<1x18xf32>
    tpu.vector_store %arg4[%c0_188, %c0_189], %1393 {strides = array<i32>} : memref<1x18xf32, #tpu.memory_space<vmem>>, vector<1x18xf32>,
    return
  }
  func.func @transform_0(%arg0: i32) -> (i32, i32) {
    %c0_i32 = arith.constant 0 : i32
    %c0_i32_0 = arith.constant 0 : i32
    %c0_i32_1 = arith.constant 0 : i32
    return %c0_i32, %c0_i32_0 : i32, i32
  }
  func.func @transform_1(%arg0: i32) -> (i32, i32) {
    %c0_i32 = arith.constant 0 : i32
    %c0_i32_0 = arith.constant 0 : i32
    return %arg0, %c0_i32 : i32, i32
  }
  func.func @transform_2(%arg0: i32) -> (i32, i32) {
    %c0_i32 = arith.constant 0 : i32
    %c0_i32_0 = arith.constant 0 : i32
    return %arg0, %c0_i32 : i32, i32
  }
}

</mosaic_0001>

<bundles_post_ra>
// kernel: tpu_custom_call.1
= control target key start
LH: loop header
LB: loop body
LE: loop exit
PB: predicated region body
PF: predicated region fallthrough
CT: control target
= control target key end

     0   :  { %vm34_vm0 = vcmask 139264   ;;  %v6888_v1 = vmov 15   ;;  %s6875_s0 = inlined_call_operand.vmem [shape: f32[1,18], index: 0, kind: input, shape index: {}]   ;;  %s6876_s1 = inlined_call_operand.vmem [shape: f32[8,4], index: 1, kind: input, shape index: {}]   ;;  %s6877_s2 = inlined_call_operand.hbm [shape: f32[8,18], index: 2, kind: output, shape index: {}]  }
   0x1   :  { %v33_v0 = vld [vmem:[%s6875_s0] sm:$0x1]  ;;  %4804 = vset.pattern.permute.xlu0 %v6888_v1 }
   0x2   :  { %35 = vst.msk [vmem:[#allocation2] sm:$0x1] %vm34_vm0, %v33_v0 }
   0x3   :  { %7 = vsyncpa [#allocation4], 0  ;;  %v6882_v2 = vmov 16   ;;  %s5020_s11 = smov 127   ;;  %s5021_s12 = smov 2   ;;  %v6884_v11 = vmov 17   ;;  %v12_v12 = vlaneseq }
   0x4   :  { %4802 = vset.pattern.permute.xlu1 %v6882_v2  ;;  %v5023_v19 = vmov 0.0   ;;  %s5024_s0 = smov 1   ;;  %v5025_v36 = vmov 1966171168   ;;  %v5107_v38 = vld [vmem:[%s6876_s1] sm:$0x1] }
   0x5   :  { %v44_v13 = vshrl.u32 %v12_v12, 7  ;;  %v13_v14 = vand.u32 127, %v12_v12  ;;  %v591_v37 = vunpack.c.l.s4 %v5025_v36  ;;  %s5026_s15 = smov 14   ;;  %s5031_s24 = smov 126  }
   0x6   :  { %s5038_s25 = smov 113   ;;  %s5044_s26 = smov 125  }
   0x7   :  { %v5085_v16 = vsub.s32 0, %v44_v13  ;;  %vm14_vm1 = vcmp.eq.s32.totalorder %v13_v14, 0  ;;  %vm17_vm2 = vcmp.eq.s32.totalorder %v13_v14, 1  ;;  %vm20_vm3 = vcmp.eq.s32.totalorder %v13_v14, 2  ;;  %s5046_s27 = smov 3   ;;  %s5048_s28 = smov 6  }
   0x8   :  { %v5088_v20 = vsel %vm14_vm1, 1.0, %v5023_v19  ;;  %v5090_v22 = vsel %vm17_vm2, 1.0, %v5023_v19  ;;  %v5096_v27 = vsel %vm20_vm3, 1.0, %v5023_v19  ;;  %v592_v40 = vunpack.c.0.s8 %v591_v37  ;;  %s5049_s29 = smov 9   ;;  %s5050_s30 = smov 12  }
   0x9   :  { %v5074_v3 = vld [vmem:[#allocation2] sm:$0x1]  ;;  %v24_v25 = vmul.f32 50.0, %v5088_v20  ;;  %v25_v26 = vmul.f32 50.0, %v5090_v22  ;;  %6936 = vst [vmem:[#allocation6_spill] sm:$0xff] %v5096_v27  ;;  %v27_v33 = vmul.f32 25.0, %v5096_v27 }
   0xa   :  { %76 = vrot.lane.b32.xlu0 %v5074_v3, %s5020_s11  ;;  %v5112_v43 = vsub.s32 %v592_v40, %v44_v13  ;;  %v1222_v40 = vld [vmem:[%s6876_s1 + $0x2] sm:$0x1] }
   0xb   :  { %v26_v32 = vadd.f32 %v25_v26, %v24_v25 }
   0xc   :  { %6938 = vst [vmem:[#allocation8_spill] sm:$0xff] %v5112_v43 }
   0xd   :  { %v28_v35 = vadd.f32 %v27_v33, %v26_v32 }
   0xe   :  { %91 = vrot.lane.b32.xlu0 %v5074_v3, %s5021_s12 }
  0x7c   :  { %v77_v4 = vpop.permute.xlu0 %76 }
  0x7d   :  { %v79_v5 = vmul.f32 %v77_v4, %v5074_v3 }
  0x7f   :  { %v107_v6 = vmul.f32 0.0, %v79_v5  ;;  %v80_v7 = vmul.f32 0.02, %v79_v5 }
  0x80   :  { %v92_v8 = vpop.permute.xlu0 %91 }
  0x81   :  { %110 = vperm.xlu0 %4804, %v107_v6   ;;  %83 = vperm.xlu1 %4802, %v80_v7   ;;  %v94_v9 = vmul.f32 %v92_v8, %v5074_v3  ;;  %v652_v7 = vld [vmem:[%s6876_s1 + $0x1] sm:$0x1] }
  0x83   :  { %v95_v10 = vmul.f32 -0.02, %v94_v9 }
  0x85   :  { %4803 = vset.pattern.permute.xlu1 %v6884_v11  ;;  %4806 = vset.pattern.permute.xlu0 %v6884_v11 }
  0x86   :  { %98 = vperm.xlu1 %4803, %v95_v10  }
  0x8a   :  { %4805 = vset.pattern.permute.xlu1 %v6882_v2 }
 0x100   :  { %v84_v15 = vpop.permute.xlu1 %83  ;;  %v111_v17 = vpop.permute.xlu0 %110 }
 0x101   :  { %v89_v18 = vrot.slane %v84_v15, %v5085_v16  ;;  %v116_v23 = vrot.slane %v111_v17, %v5085_v16 }
 0x103   :  { %v90_v28 = vmul.f32 %v5088_v20, %v89_v18  ;;  %v117_v30 = vmul.f32 %v5096_v27, %v116_v23 }
 0x105   :  { %v99_v21 = vpop.permute.xlu1 %98 }
 0x106   :  { %v104_v24 = vrot.slane %v99_v21, %v5085_v16 }
 0x108   :  { %v105_v29 = vmul.f32 %v5090_v22, %v104_v24 }
 0x10a   :  { %v106_v31 = vadd.f32 %v105_v29, %v90_v28 }
 0x10c   :  { %v118_v34 = vadd.f32 %v117_v30, %v106_v31 }
 0x10e   :  { %120 = vrot.lane.b32.xlu1 %v118_v34, %s5024_s0 }
 0x112   :  { %125 = vrot.lane.b32.xlu1 %v28_v35, %s5024_s0 }
 0x180   :  { %v121_v39 = vpop.permute.xlu1 %120 }
 0x181   :  { %v123_v41 = vsub.f32 %v5107_v38, %v121_v39 }
 0x184   :  { %v5110_v42 = vpop.permute.xlu1 %125 }
 0x185   :  { %6937 = vst [vmem:[#allocation7_spill] sm:$0xff] %v5110_v42  ;;  %v128_v44 = vmul.f32 %v5110_v42, %v123_v41 }
 0x187   :  { %v608_v45 = vmul.f32 0.05, %v128_v44 }
 0x189   :  { %v616_v46 = vrot.slane %v608_v45, %v5112_v43 }
 0x18b   :  { %v623_v47 = vrot.slane %v616_v46, %v5112_v43 }
 0x18d   :  { %624 = vrot.lane.b32.xlu0 %v623_v47, %s5026_s15 }
 0x1ff   :  { %v625_v48 = vpop.permute.xlu0 %624 }
 0x200   :  { %v5119_v49 = vadd.f32 %v625_v48, %v5074_v3 }
 0x202   :  { %694 = vrot.lane.b32.xlu0 %v5119_v49, %s5021_s12  ;;  %679 = vrot.lane.b32.xlu1 %v5119_v49, %s5020_s11 }
 0x274   :  { %v695_v50 = vpop.permute.xlu0 %694  ;;  %v680_v51 = vpop.permute.xlu1 %679 }
 0x275   :  { %v697_v52 = vmul.f32 %v695_v50, %v5119_v49  ;;  %v682_v53 = vmul.f32 %v680_v51, %v5119_v49 }
 0x277   :  { %v698_v54 = vmul.f32 -0.02, %v697_v52  ;;  %v683_v55 = vmul.f32 0.02, %v682_v53  ;;  %v710_v56 = vmul.f32 0.0, %v682_v53 }
 0x279   :  { %701 = vperm.xlu0 %4806, %v698_v54   ;;  %686 = vperm.xlu1 %4805, %v683_v55  }
 0x27d   :  { %4807 = vset.pattern.permute.xlu1 %v6888_v1 }
 0x27e   :  { %713 = vperm.xlu1 %4807, %v710_v56  }
 0x282   :  { %4808 = vset.pattern.permute.xlu1 %v6882_v2 }
 0x2f8   :  { %v702_v57 = vpop.permute.xlu0 %701  ;;  %v687_v58 = vpop.permute.xlu1 %686 }
 0x2f9   :  { %v707_v59 = vrot.slane %v702_v57, %v5085_v16  ;;  %v692_v60 = vrot.slane %v687_v58, %v5085_v16 }
 0x2fb   :  { %v708_v61 = vmul.f32 %v5090_v22, %v707_v59  ;;  %v693_v62 = vmul.f32 %v5088_v20, %v692_v60 }
 0x2fd   :  { %v714_v63 = vpop.permute.xlu1 %713  ;;  %v709_v4 = vadd.f32 %v708_v61, %v693_v62 }
 0x2fe   :  { %v719_v0 = vrot.slane %v714_v63, %v5085_v16 }
 0x300   :  { %v720_v5 = vmul.f32 %v5096_v27, %v719_v0 }
 0x302   :  { %v721_v6 = vadd.f32 %v720_v5, %v709_v4 }
 0x304   :  { %723 = vrot.lane.b32.xlu1 %v721_v6, %s5024_s0 }
 0x376   :  { %v724_v8 = vpop.permute.xlu1 %723 }
 0x377   :  { %v726_v9 = vsub.f32 %v652_v7, %v724_v8 }
 0x379   :  { %v727_v10 = vmul.f32 %v726_v9, %v5110_v42  ;;  %v1792_v9 = vld [vmem:[%s6876_s1 + $0x3] sm:$0x1] }
 0x37b   :  { %v1184_v12 = vmul.f32 0.05, %v727_v10 }
 0x37d   :  { %v1192_v13 = vrot.slane %v1184_v12, %v5112_v43 }
 0x37f   :  { %v1199_v14 = vrot.slane %v1192_v13, %v5112_v43 }
 0x381   :  { %1200 = vrot.lane.b32.xlu0 %v1199_v14, %s5026_s15 }
 0x3f3   :  { %v1201_v15 = vpop.permute.xlu0 %1200 }
 0x3f4   :  { %v5144_v17 = vadd.f32 %v1201_v15, %v5119_v49 }
 0x3f6   :  { %1264 = vrot.lane.b32.xlu0 %v5144_v17, %s5021_s12  ;;  %1249 = vrot.lane.b32.xlu1 %v5144_v17, %s5020_s11 }
 0x468   :  { %v1265_v18 = vpop.permute.xlu0 %1264  ;;  %v1250_v19 = vpop.permute.xlu1 %1249 }
 0x469   :  { %v1267_v21 = vmul.f32 %v1265_v18, %v5144_v17  ;;  %v1252_v23 = vmul.f32 %v1250_v19, %v5144_v17 }
 0x46b   :  { %v1268_v24 = vmul.f32 -0.02, %v1267_v21  ;;  %v1253_v25 = vmul.f32 0.02, %v1252_v23  ;;  %v1280_v26 = vmul.f32 0.0, %v1252_v23 }
 0x46d   :  { %1271 = vperm.xlu0 %4806, %v1268_v24   ;;  %1256 = vperm.xlu1 %4808, %v1253_v25  }
 0x471   :  { %4809 = vset.pattern.permute.xlu1 %v6888_v1  ;;  %4810 = vset.pattern.permute.xlu0 %v6882_v2 }
 0x472   :  { %1283 = vperm.xlu1 %4809, %v1280_v26  }
 0x476   :  { %4811 = vset.pattern.permute.xlu1 %v6884_v11 }
 0x4ec   :  { %v1272_v28 = vpop.permute.xlu0 %1271  ;;  %v1257_v29 = vpop.permute.xlu1 %1256 }
 0x4ed   :  { %v1277_v30 = vrot.slane %v1272_v28, %v5085_v16  ;;  %v1262_v31 = vrot.slane %v1257_v29, %v5085_v16 }
 0x4ef   :  { %v1278_v32 = vmul.f32 %v5090_v22, %v1277_v30  ;;  %v1263_v33 = vmul.f32 %v5088_v20, %v1262_v31 }
 0x4f1   :  { %v1284_v34 = vpop.permute.xlu1 %1283  ;;  %v1279_v36 = vadd.f32 %v1278_v32, %v1263_v33 }
 0x4f2   :  { %v1289_v35 = vrot.slane %v1284_v34, %v5085_v16 }
 0x4f4   :  { %v1290_v37 = vmul.f32 %v5096_v27, %v1289_v35 }
 0x4f6   :  { %v1291_v39 = vadd.f32 %v1290_v37, %v1279_v36 }
 0x4f8   :  { %1293 = vrot.lane.b32.xlu0 %v1291_v39, %s5024_s0 }
 0x56a   :  { %v1294_v41 = vpop.permute.xlu0 %1293 }
 0x56b   :  { %v1296_v44 = vsub.f32 %v1222_v40, %v1294_v41 }
 0x56d   :  { %v1297_v45 = vmul.f32 %v1296_v44, %v5110_v42 }
 0x56f   :  { %v1754_v46 = vmul.f32 0.05, %v1297_v45  ;;  %v5027_v45 = vmov 11  }
 0x571   :  { %v1762_v47 = vrot.slane %v1754_v46, %v5112_v43  ;;  %v5028_v46 = vmov 8  }
 0x573   :  { %v1769_v48 = vrot.slane %v1762_v47, %v5112_v43  ;;  %v6896_v47 = vmov 0  }
 0x575   :  { %1770 = vrot.lane.b32.xlu1 %v1769_v48, %s5026_s15  ;;  %v2362_v48 = vld [vmem:[%s6876_s1 + $0x4] sm:$0x1] }
 0x5e7   :  { %v1771_v50 = vpop.permute.xlu1 %1770 }
 0x5e8   :  { %v5170_v51 = vadd.f32 %v1771_v50, %v5144_v17 }
 0x5ea   :  { %6939 = vst [vmem:[#allocation9_spill] sm:$0xff] %v5170_v51  ;;  %1834 = vrot.lane.b32.xlu1 %v5170_v51, %s5021_s12  ;;  %1819 = vrot.lane.b32.xlu0 %v5170_v51, %s5020_s11 }
 0x65c   :  { %v1835_v52 = vpop.permute.xlu1 %1834  ;;  %v1820_v53 = vpop.permute.xlu0 %1819 }
 0x65d   :  { %v1837_v54 = vmul.f32 %v1835_v52, %v5170_v51  ;;  %v1822_v55 = vmul.f32 %v1820_v53, %v5170_v51 }
 0x65f   :  { %v1838_v56 = vmul.f32 -0.02, %v1837_v54  ;;  %v1823_v57 = vmul.f32 0.02, %v1822_v55  ;;  %v1850_v58 = vmul.f32 0.0, %v1822_v55 }
 0x661   :  { %1841 = vperm.xlu1 %4811, %v1838_v56   ;;  %1826 = vperm.xlu0 %4810, %v1823_v57   ;;  %v5030_v57 = vmov 14  }
 0x665   :  { %4812 = vset.pattern.permute.xlu1 %v6888_v1 }
 0x666   :  { %1853 = vperm.xlu1 %4812, %v1850_v58  }
 0x66a   :  { %4813 = vset.pattern.permute.xlu1 %v6884_v11 }
 0x6e0   :  { %v1842_v59 = vpop.permute.xlu1 %1841  ;;  %v1827_v60 = vpop.permute.xlu0 %1826 }
 0x6e1   :  { %v1847_v61 = vrot.slane %v1842_v59, %v5085_v16  ;;  %v1832_v62 = vrot.slane %v1827_v60, %v5085_v16 }
 0x6e3   :  { %v1848_v63 = vmul.f32 %v5090_v22, %v1847_v61  ;;  %v1833_v0 = vmul.f32 %v5088_v20, %v1832_v62 }
 0x6e5   :  { %v1854_v4 = vpop.permute.xlu1 %1853  ;;  %v1849_v6 = vadd.f32 %v1848_v63, %v1833_v0 }
 0x6e6   :  { %v1859_v5 = vrot.slane %v1854_v4, %v5085_v16 }
 0x6e8   :  { %v1860_v7 = vmul.f32 %v5096_v27, %v1859_v5 }
 0x6ea   :  { %v1861_v8 = vadd.f32 %v1860_v7, %v1849_v6 }
 0x6ec   :  { %1863 = vrot.lane.b32.xlu0 %v1861_v8, %s5024_s0 }
 0x75e   :  { %v1864_v10 = vpop.permute.xlu0 %1863 }
 0x75f   :  { %v1866_v12 = vsub.f32 %v1792_v9, %v1864_v10 }
 0x761   :  { %v1867_v13 = vmul.f32 %v1866_v12, %v5110_v42 }
 0x763   :  { %v2324_v14 = vmul.f32 0.05, %v1867_v13 }
 0x765   :  { %v2332_v15 = vrot.slane %v2324_v14, %v5112_v43 }
 0x767   :  { %v2339_v18 = vrot.slane %v2332_v15, %v5112_v43 }
 0x769   :  { %2340 = vrot.lane.b32.xlu1 %v2339_v18, %s5026_s15 }
 0x7db   :  { %v2341_v19 = vpop.permute.xlu1 %2340 }
 0x7dc   :  { %v5195_v21 = vadd.f32 %v2341_v19, %v5170_v51 }
 0x7de   :  { %6940 = vst [vmem:[#allocation10_spill] sm:$0xff] %v5195_v21  ;;  %2404 = vrot.lane.b32.xlu1 %v5195_v21, %s5021_s12  ;;  %2389 = vrot.lane.b32.xlu0 %v5195_v21, %s5020_s11 }
 0x850   :  { %v2405_v23 = vpop.permute.xlu1 %2404  ;;  %v2390_v24 = vpop.permute.xlu0 %2389 }
 0x851   :  { %v2407_v25 = vmul.f32 %v2405_v23, %v5195_v21  ;;  %v2392_v26 = vmul.f32 %v2390_v24, %v5195_v21 }
 0x853   :  { %v2408_v28 = vmul.f32 -0.02, %v2407_v25  ;;  %v2393_v29 = vmul.f32 0.02, %v2392_v26  ;;  %v2420_v30 = vmul.f32 0.0, %v2392_v26 }
 0x854   :  { %v6901_v25 = vmov 683565275  }
 0x855   :  { %2411 = vperm.xlu1 %4813, %v2408_v28   ;;  %2396 = vperm.xlu0 %4810, %v2393_v29   ;;  %v6878_v28 = vmov 2475754826  }
 0x859   :  { %4814 = vset.pattern.permute.xlu0 %v6888_v1  ;;  %4816 = vset.pattern.permute.xlu1 %v5027_v45 }
 0x85a   :  { %2423 = vperm.xlu0 %4814, %v2420_v30  }
 0x85e   :  { %4815 = vset.pattern.permute.xlu0 %v5028_v46 }
 0x85f   :  { %40 = vperm.xlu0 %4815, %v5074_v3  }
 0x863   :  { %4818 = vset.pattern.permute.xlu0 %v6896_v47 }
 0x864   :  { %70 = vperm.xlu0 %4818, %v5107_v38   ;;  %v5224_v38 = vmul.f32 0.05, %v5074_v3 }
 0x866   :  { %v130_v58 = vmul.f32 %v5224_v38, %v5224_v38 }
 0x868   :  { %4819 = vset.pattern.permute.xlu0 %v6888_v1 }
 0x8d4   :  { %v2412_v31 = vpop.permute.xlu1 %2411  ;;  %v2397_v32 = vpop.permute.xlu0 %2396 }
 0x8d5   :  { %v2417_v33 = vrot.slane %v2412_v31, %v5085_v16  ;;  %v2402_v34 = vrot.slane %v2397_v32, %v5085_v16  ;;  %v6880_v31 = vmov 2131351028  }
 0x8d7   :  { %v2418_v35 = vmul.f32 %v5090_v22, %v2417_v33  ;;  %v2403_v36 = vmul.f32 %v5088_v20, %v2402_v34  ;;  %v6886_v34 = vmov 2102212464  }
 0x8d9   :  { %v2424_v37 = vpop.permute.xlu0 %2423  ;;  %v2419_v40 = vadd.f32 %v2418_v35, %v2403_v36 }
 0x8da   :  { %v2429_v39 = vrot.slane %v2424_v37, %v5085_v16  ;;  %v6890_v37 = vmov 920167782  }
 0x8dc   :  { %v2430_v41 = vmul.f32 %v5096_v27, %v2429_v39 }
 0x8de   :  { %v2431_v44 = vadd.f32 %v2430_v41, %v2419_v40  ;;  %v6892_v41 = vmov 1326507024  }
 0x8e0   :  { %2433 = vrot.lane.b32.xlu1 %v2431_v44, %s5024_s0 }
 0x952   :  { %v2434_v50 = vpop.permute.xlu1 %2433 }
 0x953   :  { %v2436_v52 = vsub.f32 %v2362_v48, %v2434_v50 }
 0x955   :  { %v2437_v53 = vmul.f32 %v2436_v52, %v5110_v42 }
 0x957   :  { %v2894_v54 = vmul.f32 0.05, %v2437_v53 }
 0x959   :  { %v2902_v55 = vrot.slane %v2894_v54, %v5112_v43 }
 0x95b   :  { %v2909_v56 = vrot.slane %v2902_v55, %v5112_v43 }
 0x95d   :  { %2910 = vrot.lane.b32.xlu1 %v2909_v56, %s5026_s15 }
 0x961   :  { %49 = vperm.xlu1 %4816, %v5074_v3  }
 0x965   :  { %4817 = vset.pattern.permute.xlu1 %v5030_v57 }
 0x966   :  { %59 = vperm.xlu1 %4817, %v5074_v3  }
 0x96a   :  { %132 = vrot.lane.b32.xlu1 %v130_v58, %s5020_s11 }
 0x96b   :  { %4820 = vset.pattern.permute.xlu1 %v6884_v11 }
 0x96e   :  { %136 = vrot.lane.b32.xlu1 %v130_v58, %s5031_s24 }
 0x9cf   :  { %v2911_v59 = vpop.permute.xlu1 %2910 }
 0x9d0   :  { %v5248_v10 = vadd.f32 %v2911_v59, %v5195_v21 }
 0x9d2   :  { %6941 = vst [vmem:[#allocation11_spill] sm:$0xff] %v5248_v10 }
 0x9e0   :  { %v5232_v60 = vpop.permute.xlu1 %49 }
 0x9e5   :  { %v5234_v61 = vpop.permute.xlu1 %59 }
 0x9e9   :  { %v133_v62 = vpop.permute.xlu1 %132 }
 0x9ea   :  { %v135_v63 = vadd.f32 %v133_v62, %v130_v58 }
 0x9ed   :  { %v137_v0 = vpop.permute.xlu1 %136 }
 0x9ee   :  { %v139_v4 = vadd.f32 %v137_v0, %v135_v63 }
 0x9f0   :  { %vm140_vm4 = vcmp.gt.f32.partialorder %v139_v4, 0.0 }
 0x9f1   :  { %v141_v5 = vsel %vm140_vm4, %v139_v4, 1.0 }
 0x9f2   :  { %4939 = vrsqrt.f32 %v141_v5 }
 0x9fc   :  { %v5236_v6 = vpop.eup %4939 }
 0x9fd   :  { %v5239_v7 = vmul.f32 %v5236_v6, %v139_v4  ;;  %150 = vrot.lane.b32.xlu1 %v5236_v6, %s5021_s12  ;;  %146 = vrot.lane.b32.xlu0 %v5236_v6, %s5024_s0 }
 0x9ff   :  { %v166_v8 = vand.u32 2139095040, %v5239_v7  ;;  %v163_v14 = vand.u32 2147483647, %v5239_v7  ;;  %vm165_vm12 = vcmp.lt.s32.totalorder %v5239_v7, 0 }
 0xa01   :  { %v167_v9 = vshrl.u32 %v166_v8, 23  ;;  %155 = vperm.xlu0 %4819, %v5236_v6   ;;  %v170_v23 = vand.u32 8388607, %v163_v14  ;;  %vm164_vm13 = vcmp.le.f32.partialorder %v163_v14, 0.7853982 }
 0xa03   :  { %v4671_v12 = vadd.s32 4294967169, %v167_v9  ;;  %v171_v45 = vor.u32 8388608, %v170_v23 }
 0xa05   :  { %v173_v13 = vadd.s32 1, %v4671_v12  ;;  %2974 = vrot.lane.b32.xlu0 %v5248_v10, %s5021_s12  ;;  %v211_v0 = vshll.u32 %v171_v45, 8 }
 0xa07   :  { %vm174_vm5 = vcmp.gt.s32.totalorder %v173_v13, 0 }
 0xa08   :  { %v175_v15 = vsel %vm174_vm5, %v173_v13, 0  ;;  %vm255_vm5 = vweird.f32 %v5239_v7 }
 0xa09   :  { %v177_v18 = vand.u32 31, %v175_v15  ;;  %v176_v24 = vshrl.u32 %v175_v15, 5 }
 0xa0b   :  { %v178_v19 = vsub.s32 32, %v177_v18  ;;  %v180_v26 = vshll.u32 %v6901_v25, %v177_v18  ;;  %v183_v29 = vshll.u32 %v6878_v28, %v177_v18  ;;  %v186_v33 = vshll.u32 %v6880_v31, %v177_v18 }
 0xa0c   :  { %v189_v36 = vshll.u32 %v6886_v34, %v177_v18  ;;  %v192_v40 = vshll.u32 %v6890_v37, %v177_v18  ;;  %vm195_vm6 = vcmp.lt.s32.totalorder %v176_v24, 1  ;;  %vm198_vm7 = vcmp.lt.s32.totalorder %v176_v24, 4 }
 0xa0d   :  { %v181_v30 = vshrl.u32 %v6878_v28, %v178_v19  ;;  %v184_v32 = vshrl.u32 %v6880_v31, %v178_v19  ;;  %v187_v35 = vshrl.u32 %v6886_v34, %v178_v19  ;;  %v190_v39 = vshrl.u32 %v6890_v37, %v178_v19 }
 0xa0e   :  { %v193_v44 = vshrl.u32 %v6892_v41, %v178_v19  ;;  %v179_v57 = vshrl.u32 %v6901_v25, %v178_v19  ;;  %vm197_vm8 = vcmp.lt.s32.totalorder %v176_v24, 3  ;;  %vm196_vm9 = vcmp.lt.s32.totalorder %v176_v24, 2 }
 0xa0f   :  { %v182_v46 = vor.u32 %v181_v30, %v180_v26  ;;  %v185_v48 = vor.u32 %v184_v32, %v183_v29  ;;  %v188_v50 = vor.u32 %v187_v35, %v186_v33  ;;  %v191_v52 = vor.u32 %v190_v39, %v189_v36 }
 0xa10   :  { %v194_v53 = vor.u32 %v193_v44, %v192_v40 }
 0xa11   :  { %v200_v54 = vsel %vm198_vm7, %v188_v50, 2102212464  ;;  %v203_v55 = vsel %vm195_vm6, %v182_v46, %v185_v48  ;;  %v207_v56 = vsel %vm195_vm6, %v185_v48, %v188_v50  ;;  %v204_v58 = vsel %vm198_vm7, %v191_v52, 920167782 }
 0xa12   :  { %v208_v59 = vsel %vm198_vm7, %v194_v53, 1326507024  ;;  %v205_v62 = vsel %vm197_vm8, %v188_v50, %v204_v58  ;;  %v199_v4 = vsel %vm195_vm6, %v179_v57, %v182_v46  ;;  %v201_v5 = vsel %vm197_vm8, %v185_v48, %v200_v54 }
 0xa13   :  { %v209_v63 = vsel %vm197_vm8, %v191_v52, %v208_v59  ;;  %v206_v8 = vsel %vm196_vm9, %v203_v55, %v205_v62  ;;  %v202_v23 = vsel %vm196_vm9, %v199_v4, %v201_v5  ;;  %vm628_vm6 = vcmask 16384  }
 0xa14   :  { %v210_v9 = vsel %vm196_vm9, %v207_v56, %v209_v63  ;;  %v5269_v15 = vmul.u32.u64.low %v211_v0, %v206_v8  ;;  %v5270_v18 = vmul.u32.u64.high %v211_v0, %v206_v8, %v5269_v15  ;;  %v218_v26 = vmul.u32 %v211_v0, %v202_v23 }
 0xa15   :  { %v5266_v12 = vmul.u32.u64.low %v211_v0, %v210_v9  ;;  %v5267_v13 = vmul.u32.u64.high %v211_v0, %v210_v9, %v5266_v12  ;;  %vm630_vm7 = vcmask 40984  }
 0xa16   :  { %v221_v19 = vadd.s32 1, %v5270_v18 }
 0xa17   :  { %vm220_vm10 = vc.u32 %v5267_v13, %v5269_v15  ;;  %v219_v46 = vadd.s32 %v5269_v15, %v5267_v13 }
 0xa18   :  { %v222_v24 = vsel %vm220_vm10, %v221_v19, %v5270_v18 }
 0xa19   :  { %v223_v29 = vadd.s32 %v222_v24, %v218_v26 }
 0xa1b   :  { %v224_v30 = vadd.s32 536870912, %v223_v29 }
 0xa1d   :  { %v225_v32 = vshrl.u32 %v224_v30, 30 }
 0xa1f   :  { %v226_v33 = vshll.u32 %v225_v32, 30  ;;  %v249_v63 = vsub.s32 4, %v225_v32 }
 0xa21   :  { %v227_v35 = vsub.s32 %v223_v29, %v226_v33  ;;  %v250_v5 = vsel %vm165_vm12, %v249_v63, %v225_v32 }
 0xa22   :  { %v252_v9 = vsel %vm164_vm13, 0, %v250_v5 }
 0xa23   :  { %v229_v36 = vsub.s32 0, %v227_v35  ;;  %v256_v12 = vadd.s32 3, %v252_v9  ;;  %v360_v13 = vand.u32 3, %v252_v9 }
 0xa25   :  { %v4672_v39 = vmin.u32 %v229_v36, %v227_v35  ;;  %v257_v15 = vand.u32 3, %v256_v12  ;;  %vm365_vm14 = vcmp.eq.s32.totalorder %v360_v13, 2  ;;  %vm362_vm1 = vcmp.eq.s32.totalorder %v360_v13, 0 }
 0xa26   :  { %vm361_vm3 = vcmp.lt.s32.totalorder %v360_v13, 2 }
 0xa27   :  { %v231_v40 = vclz %v4672_v39  ;;  %vm262_vm15 = vcmp.eq.s32.totalorder %v257_v15, 2  ;;  %vm259_vm2 = vcmp.eq.s32.totalorder %v257_v15, 0  ;;  %vm258_vm4 = vcmp.lt.s32.totalorder %v257_v15, 2  ;;  %v5281_v39 = vpop.permute.xlu0 %40 }
 0xa29   :  { %v4673_v44 = vadd.s32 4294967294, %v231_v40 }
 0xa2b   :  { %vm4674_vm11 = vcmp.lt.s32.totalorder %v4673_v44, 0 }
 0xa2c   :  { %v234_v45 = vsel %vm4674_vm11, 0, %v4673_v44 }
 0xa2d   :  { %v235_v48 = vsub.s32 32, %v234_v45  ;;  %v239_v50 = vsub.s32 4294967266, %v234_v45  ;;  %v236_v52 = vshll.u32 %v227_v35, %v234_v45 }
 0xa2f   :  { %v237_v53 = vshrl.u32 %v219_v46, %v235_v48  ;;  %v240_v54 = vadd.s32 127, %v239_v50  ;;  %v5287_v46 = vpop.permute.xlu0 %70  ;;  %v144_v50 = vmul.f32 %v5236_v6, %v5224_v38 }
 0xa31   :  { %v238_v55 = vor.u32 %v237_v53, %v236_v52  ;;  %v241_v56 = vshll.u32 %v240_v54, 23 }
 0xa33   :  { %v242_v57 = vor.u32 4788187, %v241_v56  ;;  %v245_v59 = vcvt.s32.f32 %v238_v55 }
 0xa35   :  { %v243_v58 = vand.u32 2147483647, %v242_v57 }
 0xa37   :  { %v246_v62 = vmul.f32 %v245_v59, %v243_v58 }
 0xa39   :  { %v247_v0 = vxor.u32 2147483648, %v246_v62 }
 0xa3b   :  { %v248_v4 = vsel %vm165_vm12, %v247_v0, %v246_v62 }
 0xa3c   :  { %v251_v8 = vsel %vm164_vm13, %v5239_v7, %v248_v4 }
 0xa3d   :  { %4941 = vcosq.f32 %v251_v8 }
 0xa3e   :  { %4943 = vsinq.f32 %v251_v8 }
 0xa47   :  { %v4942_v18 = vpop.eup %4941 }
 0xa48   :  { %v4944_v23 = vpop.eup %4943  ;;  %v263_v19 = vxor.u32 2147483648, %v4942_v18 }
 0xa49   :  { %v260_v26 = vxor.u32 2147483648, %v4944_v23 }
 0xa4a   :  { %v367_v24 = vsel %vm365_vm14, %v263_v19, %v4944_v23  ;;  %v264_v14 = vsel %vm262_vm15, %v263_v19, %v4944_v23 }
 0xa4b   :  { %v364_v29 = vsel %vm362_vm1, %v4942_v18, %v260_v26  ;;  %v261_v30 = vsel %vm259_vm2, %v4942_v18, %v260_v26 }
 0xa4c   :  { %v368_v32 = vsel %vm361_vm3, %v364_v29, %v367_v24  ;;  %v265_v33 = vsel %vm258_vm4, %v261_v30, %v264_v14 }
 0xa4d   :  { %v369_v35 = vsel %vm255_vm5, nan, %v368_v32  ;;  %v266_v36 = vsel %vm255_vm5, nan, %v265_v33  ;;  %v5039_v32 = vmov 6   ;;  %v5040_v33 = vmov 7  }
 0xa4e   :  { %429 = vperm.xlu0 %4819, %v369_v35   ;;  %v370_v53 = vsub.f32 1.0, %v369_v35 }
 0xa50   :  { %v448_v54 = vmul.f32 %v370_v53, %v144_v50 }
 0xa6f   :  { %v151_v40 = vpop.permute.xlu1 %150  ;;  %v147_v48 = vpop.permute.xlu0 %146 }
 0xa70   :  { %v5284_v44 = vmul.f32 %v151_v40, %v5224_v38  ;;  %v149_v7 = vmul.f32 %v147_v48, %v5224_v38  ;;  %v5042_v48 = vmov 10  }
 0xa72   :  { %v371_v45 = vsub.f32 0.0, %v5284_v44  ;;  %v414_v52 = vsub.f32 0.0, %v149_v7 }
 0xa74   :  { %374 = vperm.xlu1 %4820, %v371_v45  }
 0xa78   :  { %2959 = vrot.lane.b32.xlu1 %v5248_v10, %s5020_s11 }
 0xa79   :  { %4821 = vset.pattern.permute.xlu1 %v6882_v2 }
 0xa7c   :  { %384 = vperm.xlu1 %4821, %v149_v7  }
 0xa80   :  { %4822 = vset.pattern.permute.xlu1 %v6888_v1  ;;  %v156_v59 = vpop.permute.xlu0 %155 }
 0xa81   :  { %405 = vperm.xlu1 %4822, %v144_v50   ;;  %v161_v63 = vrot.slane %v156_v59, %v5085_v16  ;;  %v5331_v50 = vmul.f32 0.05, %v5119_v49 }
 0xa83   :  { %v162_v4 = vmul.f32 %v161_v63, %v5224_v38 }
 0xa84   :  { %v2975_v15 = vpop.permute.xlu0 %2974 }
 0xa85   :  { %4823 = vset.pattern.permute.xlu1 %v6882_v2 }
 0xa86   :  { %417 = vperm.xlu1 %4823, %v414_v52   ;;  %v5337_v52 = vmul.f32 %v5331_v50, %v5331_v50 }
 0xa8a   :  { %4824 = vset.pattern.permute.xlu1 %v6888_v1 }
 0xa8b   :  { %439 = vperm.xlu1 %4824, %v266_v36   ;;  %v5041_v36 = vmov 9  }
 0xa8f   :  { %451 = vperm.xlu1 %4824, %v448_v54   ;;  %v5345_v54 = vrot.slane %v5232_v60, %v5085_v16 }
 0xa91   :  { %v56_v63 = vmul.f32 %v5090_v22, %v5345_v54 }
 0xa93   :  { %471 = vrot.lane.b32.xlu1 %v149_v7, %s5020_s11  ;;  %v5043_v7 = vmov 13  }
 0xacd   :  { %v5316_v18 = vpop.permute.xlu0 %429 }
 0xaf3   :  { %v5299_v55 = vpop.permute.xlu1 %374 }
 0xaf7   :  { %v2960_v56 = vpop.permute.xlu1 %2959 }
 0xaf8   :  { %v2962_v35 = vmul.f32 %v2960_v56, %v5248_v10  ;;  %v5349_v56 = vrot.slane %v5281_v39, %v5085_v16 }
 0xafa   :  { %v2963_v40 = vmul.f32 0.02, %v2962_v35  ;;  %v2990_v45 = vmul.f32 0.0, %v2962_v35  ;;  %v5045_v35 = vmov 12  }
 0xafb   :  { %v5301_v57 = vpop.permute.xlu1 %384 }
 0xb00   :  { %v5303_v6 = vpop.permute.xlu1 %405 }
 0xb05   :  { %v5305_v58 = vpop.permute.xlu1 %417 }
 0xb0a   :  { %v5307_v62 = vpop.permute.xlu1 %439 }
 0xb0e   :  { %v452_v0 = vpop.permute.xlu1 %451 }
 0xb0f   :  { %v457_v5 = vrot.slane %v452_v0, %v5085_v16  ;;  %v47_v0 = vmul.f32 %v5088_v20, %v5349_v56 }
 0xb11   :  { %v458_v8 = vmul.f32 %v457_v5, %v162_v4 }
 0xb12   :  { %v472_v12 = vpop.permute.xlu1 %471 }
 0xb13   :  { %v463_v9 = vrot.slane %v458_v8, %v5085_v16  ;;  %v474_v13 = vmul.f32 %v472_v12, %v370_v53 }
 0xb15   :  { %464 = vrot.lane.b32.xlu0 %v463_v9, %s5038_s25  ;;  %v57_v9 = vadd.f32 %v56_v63, %v47_v0  ;;  %v390_v63 = vrot.slane %v5301_v57, %v5085_v16  ;;  %v411_v0 = vrot.slane %v5303_v6, %v5085_v16  ;;  %v435_v6 = vrot.slane %v5316_v18, %v5085_v16 }
 0xb19   :  { %477 = vperm.xlu0 %4819, %v474_v13  }
 0xb1d   :  { %497 = vrot.lane.b32.xlu0 %v5284_v44, %s5031_s24 }
 0xb1e   :  { %4826 = vset.pattern.permute.xlu0 %v5040_v33 }
 0xb87   :  { %v5318_v23 = vpop.permute.xlu0 %464 }
 0xb98   :  { %v478_v19 = vpop.permute.xlu0 %477 }
 0xb99   :  { %v483_v26 = vrot.slane %v478_v19, %v5085_v16  ;;  %v5369_v19 = vmul.f32 -11.772, %v5096_v27 }
 0xb9b   :  { %v484_v24 = vmul.f32 %v483_v26, %v162_v4  ;;  %6942 = vst [vmem:[#allocation12_spill] sm:$0xff] %v5369_v19 }
 0xb9c   :  { %v498_v29 = vpop.permute.xlu0 %497 }
 0xb9d   :  { %v489_v14 = vrot.slane %v484_v24, %v5085_v16  ;;  %v500_v30 = vmul.f32 %v498_v29, %v370_v53  ;;  %v2977_v24 = vmul.f32 %v2975_v15, %v5248_v10 }
 0xb9f   :  { %490 = vrot.lane.b32.xlu1 %v489_v14, %s5038_s25  ;;  %v2978_v29 = vmul.f32 -0.02, %v2977_v24 }
 0xba3   :  { %503 = vperm.xlu1 %4824, %v500_v30  }
 0xba7   :  { %4825 = vset.pattern.permute.xlu1 %v5039_v32 }
 0xba8   :  { %521 = vperm.xlu1 %4825, %v5074_v3  }
 0xbac   :  { %4828 = vset.pattern.permute.xlu1 %v5041_v36 }
 0xbad   :  { %542 = vperm.xlu1 %4828, %v5074_v3  }
 0xbb1   :  { %4829 = vset.pattern.permute.xlu1 %v6882_v2 }
 0xbb2   :  { %2966 = vperm.xlu1 %4829, %v2963_v40  }
 0xbb6   :  { %4830 = vset.pattern.permute.xlu1 %v6888_v1 }
 0xbb7   :  { %2993 = vperm.xlu1 %4830, %v2990_v45  }
 0xbbb   :  { %4831 = vset.pattern.permute.xlu1 %v5042_v48  ;;  %v6894_v48 = vmov 2  }
 0xbbc   :  { %551 = vperm.xlu1 %4831, %v5074_v3  }
 0xbc0   :  { %4833 = vset.pattern.permute.xlu1 %v5043_v7 }
 0xbc1   :  { %572 = vperm.xlu1 %4833, %v5074_v3  }
 0xbc5   :  { %584 = vrot.lane.b32.xlu1 %v5224_v38, %s5044_s26  ;;  %v5353_v38 = vrot.slane %v5234_v61, %v5085_v16 }
 0xbc6   :  { %4834 = vset.pattern.permute.xlu1 %v6894_v48 }
 0xbc7   :  { %v66_v60 = vmul.f32 %v5096_v27, %v5353_v38 }
 0xbc9   :  { %735 = vrot.lane.b32.xlu1 %v5337_v52, %s5031_s24  ;;  %v67_v61 = vadd.f32 %v66_v60, %v57_v9  ;;  %v425_v9 = vmul.f32 %v5090_v22, %v411_v0 }
 0xbcb   :  { %v73_v26 = vmul.f32 %v5287_v46, %v67_v61 }
 0xc11   :  { %v5341_v53 = vpop.permute.xlu1 %490 }
 0xc22   :  { %v504_v59 = vpop.permute.xlu1 %503 }
 0xc23   :  { %v509_v5 = vrot.slane %v504_v59, %v5085_v16  ;;  %v423_v59 = vrot.slane %v5305_v58, %v5085_v16  ;;  %v445_v58 = vrot.slane %v5307_v62, %v5085_v16  ;;  %v468_v62 = vmul.f32 %v5090_v22, %v435_v6 }
 0xc25   :  { %v510_v8 = vmul.f32 %v509_v5, %v162_v4  ;;  %v74_v4 = vadd.f32 %v73_v26, %v5369_v19  ;;  %v424_v60 = vmul.f32 %v5088_v20, %v423_v59 }
 0xc27   :  { %v5362_v39 = vpop.permute.xlu1 %521  ;;  %v515_v12 = vrot.slane %v510_v8, %v5085_v16  ;;  %v75_v30 = vmul.f32 0.8333333, %v74_v4  ;;  %v391_v8 = vmul.f32 %v5096_v27, %v390_v63  ;;  %v426_v57 = vadd.f32 %v425_v9, %v424_v60 }
 0xc28   :  { %v527_v18 = vrot.slane %v5362_v39, %v5085_v16 }
 0xc29   :  { %516 = vrot.lane.b32.xlu0 %v515_v12, %s5038_s25  ;;  %v588_v33 = vmul.f32 0.05, %v75_v30 }
 0xc2b   :  { %v596_v15 = vrot.slane %v588_v33, %v5112_v43  ;;  %v495_v33 = vmul.f32 %v445_v58, %v426_v57 }
 0xc2c   :  { %v5366_v13 = vpop.permute.xlu1 %542 }
 0xc2d   :  { %530 = vperm.xlu0 %4826, %v5074_v3   ;;  %v548_v63 = vrot.slane %v5366_v13, %v5085_v16 }
 0xc31   :  { %4827 = vset.pattern.permute.xlu0 %v6884_v11  ;;  %v5376_v14 = vpop.permute.xlu1 %2966 }
 0xc32   :  { %395 = vperm.xlu0 %4827, %v5284_v44   ;;  %v603_v44 = vrot.slane %v596_v15, %v5112_v43  ;;  %v436_v15 = vmul.f32 %v5088_v20, %v435_v6 }
 0xc36   :  { %2981 = vperm.xlu0 %4827, %v2978_v29   ;;  %v5379_v32 = vpop.permute.xlu1 %2993 }
 0xc3a   :  { %4832 = vset.pattern.permute.xlu0 %v5045_v35 }
 0xc3b   :  { %563 = vperm.xlu0 %4832, %v5074_v3   ;;  %v552_v46 = vpop.permute.xlu1 %551 }
 0xc3f   :  { %731 = vrot.lane.b32.xlu0 %v5337_v52, %s5020_s11 }
 0xc40   :  { %v573_v36 = vpop.permute.xlu1 %572  ;;  %4837 = vset.pattern.permute.xlu0 %v6884_v11 }
 0xc43   :  { %604 = vrot.lane.b32.xlu0 %v603_v44, %s5046_s27  ;;  %v494_v44 = vmul.f32 %v5096_v27, %v435_v6 }
 0xc44   :  { %v585_v40 = vpop.permute.xlu1 %584 }
 0xc45   :  { %v5389_v45 = vadd.f32 %v585_v40, %v5074_v3  ;;  %v380_v3 = vrot.slane %v5299_v55, %v5085_v16  ;;  %v412_v55 = vmul.f32 %v5096_v27, %v411_v0  ;;  %v557_v0 = vrot.slane %v552_v46, %v5085_v16 }
 0xc46   :  { %v496_v60 = vadd.f32 %v495_v33, %v494_v44 }
 0xc47   :  { %629 = vst.msk [vmem:[#allocation3] sm:$0x1] %vm628_vm6, %v5389_v45  ;;  %v381_v12 = vmul.f32 %v5090_v22, %v380_v3  ;;  %v578_v3 = vrot.slane %v573_v36, %v5085_v16 }
 0xc49   :  { %v392_v24 = vadd.f32 %v391_v8, %v381_v12 }
 0xc4b   :  { %v446_v29 = vmul.f32 %v445_v58, %v392_v24 }
 0xc4d   :  { %v447_v59 = vadd.f32 %v446_v29, %v436_v15  ;;  %v736_v29 = vpop.permute.xlu1 %735 }
 0xc4f   :  { %v467_v12 = vadd.f32 %v5318_v23, %v447_v59 }
 0xc51   :  { %v528_v39 = vmul.f32 %v527_v18, %v467_v12  ;;  %v549_v6 = vmul.f32 %v548_v63, %v467_v12 }
 0xc9b   :  { %v517_v7 = vpop.permute.xlu0 %516 }
 0xc9c   :  { %v519_v57 = vadd.f32 %v517_v7, %v496_v60 }
 0xc9e   :  { %v539_v33 = vmul.f32 %v519_v57, %v5349_v56  ;;  %v560_v23 = vmul.f32 %v519_v57, %v5345_v54 }
 0xcac   :  { %v531_v5 = vpop.permute.xlu0 %530 }
 0xcb1   :  { %v396_v61 = vpop.permute.xlu0 %395 }
 0xcb2   :  { %v401_v26 = vrot.slane %v396_v61, %v5085_v16 }
 0xcb4   :  { %v402_v4 = vmul.f32 %v5088_v20, %v401_v26 }
 0xcb5   :  { %v5413_v30 = vpop.permute.xlu0 %2981 }
 0xcb6   :  { %v413_v35 = vsub.f32 %v402_v4, %v412_v55 }
 0xcb8   :  { %v469_v40 = vmul.f32 %v445_v58, %v413_v35  ;;  %v536_v58 = vrot.slane %v531_v5, %v5085_v16 }
 0xcba   :  { %v470_v8 = vadd.f32 %v469_v40, %v468_v62  ;;  %v564_v9 = vpop.permute.xlu0 %563  ;;  %v4987_v40 = vld [vmem:[#allocation2] sm:$0x1] }
 0xcbb   :  { %v569_v61 = vrot.slane %v564_v9, %v5085_v16 }
 0xcbc   :  { %v493_v26 = vadd.f32 %v5341_v53, %v470_v8 }
 0xcbd   :  { %v570_v24 = vmul.f32 %v569_v61, %v467_v12 }
 0xcbe   :  { %v579_v13 = vmul.f32 %v578_v3, %v493_v26  ;;  %v732_v55 = vpop.permute.xlu0 %731  ;;  %v537_v46 = vmul.f32 %v536_v58, %v493_v26  ;;  %v558_v4 = vmul.f32 %v557_v0, %v493_v26 }
 0xcbf   :  { %v734_v36 = vadd.f32 %v732_v55, %v5337_v52  ;;  %v581_v52 = vmul.f32 %v519_v57, %v5353_v38 }
 0xcc0   :  { %v538_v35 = vadd.f32 %v537_v46, %v528_v39  ;;  %v559_v7 = vadd.f32 %v558_v4, %v549_v6  ;;  %v580_v5 = vadd.f32 %v579_v13, %v570_v24 }
 0xcc1   :  { %v738_v15 = vadd.f32 %v736_v29, %v734_v36 }
 0xcc2   :  { %v605_v62 = vpop.permute.xlu0 %604  ;;  %v5431_v53 = vadd.f32 %v539_v33, %v538_v35  ;;  %v5433_v44 = vadd.f32 %v560_v23, %v559_v7  ;;  %v5444_v54 = vadd.f32 %v581_v52, %v580_v5 }
 0xcc3   :  { %vm739_vm8 = vcmp.gt.f32.partialorder %v738_v15, 0.0  ;;  %v5435_v59 = vadd.f32 %v4987_v40, %v605_v62 }
 0xcc4   :  { %v740_v18 = vsel %vm739_vm8, %v738_v15, 1.0  ;;  %633 = vrot.lane.b32.xlu1 %v5431_v53, %s5048_s28  ;;  %639 = vrot.lane.b32.xlu0 %v5433_v44, %s5049_s29 }
 0xcc5   :  { %4945 = vrsqrt.f32 %v740_v18  ;;  %631 = vst.msk [vmem:[#allocation3] sm:$0x1] %vm630_vm7, %v5435_v59 }
 0xcc8   :  { %645 = vrot.lane.b32.xlu1 %v5444_v54, %s5050_s30 }
 0xccc   :  { %659 = vperm.xlu1 %4834, %v5433_v44  }
 0xccf   :  { %v5449_v56 = vpop.eup %4945 }
 0xcd0   :  { %v5452_v38 = vmul.f32 %v5449_v56, %v738_v15  ;;  %665 = vperm.xlu1 %4834, %v5444_v54  }
 0xcd2   :  { %v765_v63 = vand.u32 2139095040, %v5452_v38  ;;  %v762_v8 = vand.u32 2147483647, %v5452_v38  ;;  %vm764_vm1 = vcmp.lt.s32.totalorder %v5452_v38, 0 }
 0xcd4   :  { %v766_v0 = vshrl.u32 %v765_v63, 23  ;;  %745 = vrot.lane.b32.xlu1 %v5449_v56, %s5024_s0  ;;  %v769_v61 = vand.u32 8388607, %v762_v8  ;;  %vm763_vm2 = vcmp.le.f32.partialorder %v762_v8, 0.7853982 }
 0xcd5   :  { %4835 = vset.pattern.permute.xlu1 %v6884_v11 }
 0xcd6   :  { %v4679_v3 = vadd.s32 4294967169, %v766_v0  ;;  %v770_v33 = vor.u32 8388608, %v769_v61 }
 0xcd8   :  { %v772_v60 = vadd.s32 1, %v4679_v3  ;;  %749 = vrot.lane.b32.xlu1 %v5449_v56, %s5021_s12 }
 0xcda   :  { %vm773_vm9 = vcmp.gt.s32.totalorder %v772_v60, 0 }
 0xcdb   :  { %v774_v9 = vsel %vm773_vm9, %v772_v60, 0 }
 0xcdc   :  { %v776_v12 = vand.u32 31, %v774_v9  ;;  %v775_v58 = vshrl.u32 %v774_v9, 5  ;;  %v810_v9 = vshll.u32 %v770_v33, 8 }
 0xcde   :  { %v777_v57 = vsub.s32 32, %v776_v12  ;;  %v779_v26 = vshll.u32 %v6901_v25, %v776_v12  ;;  %v782_v39 = vshll.u32 %v6878_v28, %v776_v12  ;;  %v785_v13 = vshll.u32 %v6880_v31, %v776_v12 }
 0xcdf   :  { %v788_v46 = vshll.u32 %v6886_v34, %v776_v12  ;;  %v791_v36 = vshll.u32 %v6890_v37, %v776_v12  ;;  %vm794_vm10 = vcmp.lt.s32.totalorder %v775_v58, 1  ;;  %vm797_vm11 = vcmp.lt.s32.totalorder %v775_v58, 4 }
 0xce0   :  { %v780_v6 = vshrl.u32 %v6878_v28, %v777_v57  ;;  %v783_v24 = vshrl.u32 %v6880_v31, %v777_v57  ;;  %v786_v55 = vshrl.u32 %v6886_v34, %v777_v57  ;;  %v789_v4 = vshrl.u32 %v6890_v37, %v777_v57 }
 0xce1   :  { %v792_v29 = vshrl.u32 %v6892_v41, %v777_v57  ;;  %v778_v18 = vshrl.u32 %v6901_v25, %v777_v57  ;;  %vm796_vm12 = vcmp.lt.s32.totalorder %v775_v58, 3  ;;  %vm795_vm13 = vcmp.lt.s32.totalorder %v775_v58, 2 }
 0xce2   :  { %v781_v23 = vor.u32 %v780_v6, %v779_v26  ;;  %v784_v35 = vor.u32 %v783_v24, %v782_v39  ;;  %v787_v7 = vor.u32 %v786_v55, %v785_v13  ;;  %v790_v15 = vor.u32 %v789_v4, %v788_v46 }
 0xce3   :  { %v793_v5 = vor.u32 %v792_v29, %v791_v36 }
 0xce4   :  { %v799_v62 = vsel %vm797_vm11, %v787_v7, 2102212464  ;;  %v802_v40 = vsel %vm794_vm10, %v781_v23, %v784_v35  ;;  %v806_v52 = vsel %vm794_vm10, %v784_v35, %v787_v7  ;;  %v803_v63 = vsel %vm797_vm11, %v790_v15, 920167782 }
 0xce5   :  { %v807_v0 = vsel %vm797_vm11, %v793_v5, 1326507024  ;;  %v804_v3 = vsel %vm796_vm12, %v787_v7, %v803_v63  ;;  %v798_v12 = vsel %vm794_vm10, %v778_v18, %v781_v23  ;;  %v800_v61 = vsel %vm796_vm12, %v784_v35, %v799_v62 }
 0xce6   :  { %v808_v60 = vsel %vm796_vm12, %v790_v15, %v807_v0  ;;  %v805_v26 = vsel %vm795_vm13, %v802_v40, %v804_v3  ;;  %v801_v46 = vsel %vm795_vm13, %v798_v12, %v800_v61  ;;  %vm854_vm11 = vweird.f32 %v5452_v38 }
 0xce7   :  { %v809_v39 = vsel %vm795_vm13, %v806_v52, %v808_v60  ;;  %v5478_v13 = vmul.u32.u64.low %v810_v9, %v805_v26  ;;  %v5479_v55 = vmul.u32.u64.high %v810_v9, %v805_v26, %v5478_v13  ;;  %v817_v4 = vmul.u32 %v810_v9, %v801_v46 }
 0xce8   :  { %v5475_v6 = vmul.u32.u64.low %v810_v9, %v809_v39  ;;  %v5476_v24 = vmul.u32.u64.high %v810_v9, %v809_v39, %v5475_v6  ;;  %vm636_vm12 = vcmask 65584   ;;  %vm642_vm13 = vcmask 90184  }
 0xce9   :  { %v820_v57 = vadd.s32 1, %v5479_v55 }
 0xcea   :  { %vm819_vm14 = vc.u32 %v5476_v24, %v5478_v13  ;;  %v818_v52 = vadd.s32 %v5478_v13, %v5476_v24 }
 0xceb   :  { %v821_v58 = vsel %vm819_vm14, %v820_v57, %v5479_v55  ;;  %vm648_vm14 = vcmask 114784  }
 0xcec   :  { %v822_v36 = vadd.s32 %v821_v58, %v817_v4 }
 0xcee   :  { %v823_v29 = vadd.s32 536870912, %v822_v36 }
 0xcf0   :  { %v824_v33 = vshrl.u32 %v823_v29, 30 }
 0xcf2   :  { %v825_v23 = vshll.u32 %v824_v33, 30  ;;  %v848_v55 = vsub.s32 4, %v824_v33 }
 0xcf4   :  { %v826_v35 = vsub.s32 %v822_v36, %v825_v23  ;;  %v849_v24 = vsel %vm764_vm1, %v848_v55, %v824_v33 }
 0xcf5   :  { %v851_v4 = vsel %vm763_vm2, 0, %v849_v24  ;;  %v2999_v24 = vrot.slane %v5379_v32, %v5085_v16  ;;  %v743_v32 = vmul.f32 %v5449_v56, %v5331_v50 }
 0xcf6   :  { %v828_v7 = vsub.s32 0, %v826_v35  ;;  %v855_v58 = vadd.s32 3, %v851_v4  ;;  %v959_v36 = vand.u32 3, %v851_v4 }
 0xcf8   :  { %v4680_v15 = vmin.u32 %v828_v7, %v826_v35  ;;  %v856_v29 = vand.u32 3, %v855_v58  ;;  %vm964_vm3 = vcmp.eq.s32.totalorder %v959_v36, 2  ;;  %vm961_vm5 = vcmp.eq.s32.totalorder %v959_v36, 0 }
 0xcf9   :  { %vm960_vm9 = vcmp.lt.s32.totalorder %v959_v36, 2 }
 0xcfa   :  { %v830_v5 = vclz %v4680_v15  ;;  %vm861_vm4 = vcmp.eq.s32.totalorder %v856_v29, 2  ;;  %vm858_vm8 = vcmp.eq.s32.totalorder %v856_v29, 0  ;;  %vm857_vm10 = vcmp.lt.s32.totalorder %v856_v29, 2 }
 0xcfb   :  { %v5522_v29 = vmul.f32 0.05, %v5144_v17 }
 0xcfc   :  { %v4681_v62 = vadd.s32 4294967294, %v830_v5 }
 0xcfe   :  { %vm4682_vm15 = vcmp.lt.s32.totalorder %v4681_v62, 0 }
 0xcff   :  { %v833_v40 = vsel %vm4682_vm15, 0, %v4681_v62  ;;  %vm650_vm15 = vcmask 139384  }
 0xd00   :  { %v834_v18 = vsub.s32 32, %v833_v40  ;;  %v838_v63 = vsub.s32 4294967266, %v833_v40  ;;  %v835_v0 = vshll.u32 %v826_v35, %v833_v40 }
 0xd02   :  { %v836_v3 = vshrl.u32 %v818_v52, %v834_v18  ;;  %v839_v60 = vadd.s32 127, %v838_v63 }
 0xd04   :  { %v837_v9 = vor.u32 %v836_v3, %v835_v0  ;;  %v840_v12 = vshll.u32 %v839_v60, 23 }
 0xd06   :  { %v841_v61 = vor.u32 4788187, %v840_v12  ;;  %v844_v39 = vcvt.s32.f32 %v837_v9 }
 0xd08   :  { %v842_v26 = vand.u32 2147483647, %v841_v61  ;;  %v2987_v61 = vrot.slane %v5413_v30, %v5085_v16 }
 0xd0a   :  { %v845_v6 = vmul.f32 %v844_v39, %v842_v26 }
 0xd0c   :  { %v846_v46 = vxor.u32 2147483648, %v845_v6 }
 0xd0e   :  { %v847_v57 = vsel %vm764_vm1, %v846_v46, %v845_v6  ;;  %v2972_v6 = vrot.slane %v5376_v14, %v5085_v16  ;;  %v3000_v14 = vmul.f32 %v5096_v27, %v2999_v24 }
 0xd0f   :  { %v850_v13 = vsel %vm763_vm2, %v5452_v38, %v847_v57 }
 0xd10   :  { %4947 = vcosq.f32 %v850_v13  ;;  %v2973_v57 = vmul.f32 %v5088_v20, %v2972_v6 }
 0xd11   :  { %4949 = vsinq.f32 %v850_v13 }
 0xd1a   :  { %v4948_v23 = vpop.eup %4947 }
 0xd1b   :  { %v4950_v35 = vpop.eup %4949  ;;  %v862_v7 = vxor.u32 2147483648, %v4948_v23 }
 0xd1c   :  { %v859_v15 = vxor.u32 2147483648, %v4950_v35 }
 0xd1d   :  { %v966_v5 = vsel %vm964_vm3, %v862_v7, %v4950_v35  ;;  %v863_v62 = vsel %vm861_vm4, %v862_v7, %v4950_v35 }
 0xd1e   :  { %v963_v8 = vsel %vm961_vm5, %v4948_v23, %v859_v15  ;;  %v860_v33 = vsel %vm858_vm8, %v4948_v23, %v859_v15  ;;  %v1299_v23 = vmul.f32 %v5522_v29, %v5522_v29 }
 0xd1f   :  { %v967_v40 = vsel %vm960_vm9, %v963_v8, %v966_v5  ;;  %v864_v52 = vsel %vm857_vm10, %v860_v33, %v863_v62 }
 0xd20   :  { %v968_v18 = vsel %vm854_vm11, nan, %v967_v40  ;;  %v865_v63 = vsel %vm854_vm11, nan, %v864_v52 }
 0xd21   :  { %v5512_v4 = vsub.f32 1.0, %v968_v18 }
 0xd23   :  { %v1047_v36 = vmul.f32 %v5512_v4, %v743_v32 }
 0xd36   :  { %v634_v0 = vpop.permute.xlu1 %633  ;;  %v640_v3 = vpop.permute.xlu0 %639 }
 0xd37   :  { %637 = vst.msk [vmem:[#allocation3] sm:$0x1] %vm636_vm12, %v634_v0 }
 0xd38   :  { %643 = vst.msk [vmem:[#allocation3] sm:$0x1] %vm642_vm13, %v640_v3 }
 0xd3a   :  { %v646_v60 = vpop.permute.xlu1 %645 }
 0xd3b   :  { %649 = vst.msk [vmem:[#allocation3] sm:$0x1] %vm648_vm14, %v646_v60 }
 0xd3c   :  { %651 = vst.msk [vmem:[#allocation3] sm:$0x1] %vm650_vm15, %v5119_v49  ;;  %v2988_v49 = vmul.f32 %v5090_v22, %v2987_v61 }
 0xd3e   :  { %v2989_v30 = vadd.f32 %v2988_v49, %v2973_v57 }
 0xd40   :  { %v3001_v58 = vadd.f32 %v3000_v14, %v2989_v30 }
 0xd4b   :  { %v5495_v38 = vpop.permute.xlu1 %659 }
 0xd4f   :  { %v5497_v9 = vpop.permute.xlu1 %665 }
 0xd53   :  { %v746_v12 = vpop.permute.xlu1 %745 }
 0xd54   :  { %v748_v55 = vmul.f32 %v746_v12, %v5331_v50 }
 0xd56   :  { %v1013_v13 = vsub.f32 0.0, %v748_v55 }
 0xd57   :  { %v750_v26 = vpop.permute.xlu1 %749 }
 0xd58   :  { %v752_v39 = vmul.f32 %v750_v26, %v5331_v50 }
 0xd5a   :  { %v970_v46 = vsub.f32 0.0, %v752_v39  ;;  %994 = vperm.xlu0 %4837, %v752_v39  }
 0xd5c   :  { %973 = vperm.xlu1 %4835, %v970_v46  }
 0xd5e   :  { %4839 = vset.pattern.permute.xlu0 %v6882_v2 }
 0xd5f   :  { %1016 = vperm.xlu0 %4839, %v1013_v13  }
 0xd60   :  { %4836 = vset.pattern.permute.xlu1 %v6882_v2 }
 0xd61   :  { %983 = vperm.xlu1 %4836, %v748_v55  }
 0xd63   :  { %4840 = vset.pattern.permute.xlu0 %v6888_v1 }
 0xd64   :  { %754 = vperm.xlu0 %4840, %v5449_v56  }
 0xd65   :  { %3003 = vrot.lane.b32.xlu1 %v3001_v58, %s5024_s0 }
 0xd66   :  { %4838 = vset.pattern.permute.xlu1 %v6888_v1 }
 0xd68   :  { %1050 = vperm.xlu0 %4840, %v1047_v36   ;;  %v6898_v36 = vmov 1  }
 0xd69   :  { %1004 = vperm.xlu1 %4838, %v743_v32  }
 0xd6d   :  { %1028 = vperm.xlu1 %4838, %v968_v18  }
 0xd71   :  { %1038 = vperm.xlu1 %4838, %v865_v63  }
 0xd75   :  { %1301 = vrot.lane.b32.xlu1 %v1299_v23, %s5020_s11 }
 0xd79   :  { %1305 = vrot.lane.b32.xlu1 %v1299_v23, %s5031_s24 }
 0xd7d   :  { %1070 = vrot.lane.b32.xlu1 %v748_v55, %s5020_s11 }
 0xdd9   :  { %v5529_v56 = vpop.permute.xlu0 %994 }
 0xddb   :  { %v5531_v35 = vpop.permute.xlu1 %973 }
 0xdde   :  { %v5533_v7 = vpop.permute.xlu0 %1016 }
 0xde0   :  { %v5535_v15 = vpop.permute.xlu1 %983 }
 0xde3   :  { %v755_v5 = vpop.permute.xlu0 %754 }
 0xde4   :  { %v760_v62 = vrot.slane %v755_v5, %v5085_v16  ;;  %v5538_v8 = vpop.permute.xlu1 %3003 }
 0xde6   :  { %v5541_v40 = vmul.f32 %v760_v62, %v5331_v50 }
 0xde7   :  { %v1051_v33 = vpop.permute.xlu0 %1050 }
 0xde8   :  { %v1056_v52 = vrot.slane %v1051_v33, %v5085_v16  ;;  %v5544_v18 = vpop.permute.xlu1 %1004 }
 0xdea   :  { %v1057_v63 = vmul.f32 %v1056_v52, %v5541_v40 }
 0xdec   :  { %v5547_v0 = vpop.permute.xlu1 %1028  ;;  %v1062_v3 = vrot.slane %v1057_v63, %v5085_v16 }
 0xdee   :  { %1063 = vrot.lane.b32.xlu0 %v1062_v3, %s5038_s25 }
 0xdf0   :  { %v5551_v60 = vpop.permute.xlu1 %1038 }
 0xdf4   :  { %v1302_v12 = vpop.permute.xlu1 %1301 }
 0xdf5   :  { %v1304_v61 = vadd.f32 %v1302_v12, %v1299_v23 }
 0xdf8   :  { %v1306_v26 = vpop.permute.xlu1 %1305 }
 0xdf9   :  { %v1308_v6 = vadd.f32 %v1306_v26, %v1304_v61 }
 0xdfb   :  { %vm1309_vm1 = vcmp.gt.f32.partialorder %v1308_v6, 0.0 }
 0xdfc   :  { %v1310_v50 = vsel %vm1309_vm1, %v1308_v6, 1.0  ;;  %v1071_v55 = vpop.permute.xlu1 %1070 }
 0xdfd   :  { %4951 = vrsqrt.f32 %v1310_v50  ;;  %v1073_v46 = vmul.f32 %v1071_v55, %v5512_v4 }
 0xdff   :  { %1076 = vperm.xlu0 %4840, %v1073_v46  }
 0xe03   :  { %1096 = vrot.lane.b32.xlu0 %v752_v39, %s5031_s24 }
 0xe04   :  { %4842 = vset.pattern.permute.xlu0 %v6898_v36 }
 0xe07   :  { %v5555_v49 = vpop.eup %4951 }
 0xe08   :  { %v5558_v57 = vmul.f32 %v5555_v49, %v1308_v6 }
 0xe0a   :  { %v1335_v24 = vand.u32 2139095040, %v5558_v57  ;;  %v1332_v58 = vand.u32 2147483647, %v5558_v57  ;;  %vm1334_vm11 = vcmp.lt.s32.totalorder %v5558_v57, 0 }
 0xe0c   :  { %v1336_v13 = vshrl.u32 %v1335_v24, 23  ;;  %v1339_v39 = vand.u32 8388607, %v1332_v58  ;;  %vm1333_vm1 = vcmp.le.f32.partialorder %v1332_v58, 0.7853982 }
 0xe0e   :  { %v4687_v30 = vadd.s32 4294967169, %v1336_v13  ;;  %v1340_v46 = vor.u32 8388608, %v1339_v39 }
 0xe10   :  { %v1342_v14 = vadd.s32 1, %v4687_v30 }
 0xe12   :  { %vm1343_vm2 = vcmp.gt.s32.totalorder %v1342_v14, 0 }
 0xe13   :  { %v1344_v32 = vsel %vm1343_vm2, %v1342_v14, 0 }
 0xe14   :  { %v1346_v23 = vand.u32 31, %v1344_v32  ;;  %v1345_v62 = vshrl.u32 %v1344_v32, 5 }
 0xe16   :  { %v1347_v5 = vsub.s32 32, %v1346_v23  ;;  %v1349_v33 = vshll.u32 %v6901_v25, %v1346_v23  ;;  %v1352_v52 = vshll.u32 %v6878_v28, %v1346_v23  ;;  %v1355_v12 = vshll.u32 %v6880_v31, %v1346_v23 }
 0xe17   :  { %v1358_v26 = vshll.u32 %v6886_v34, %v1346_v23  ;;  %v1361_v50 = vshll.u32 %v6890_v37, %v1346_v23  ;;  %vm1364_vm3 = vcmp.lt.s32.totalorder %v1345_v62, 1  ;;  %vm1367_vm4 = vcmp.lt.s32.totalorder %v1345_v62, 4 }
 0xe18   :  { %v1350_v63 = vshrl.u32 %v6878_v28, %v1347_v5  ;;  %v1353_v3 = vshrl.u32 %v6880_v31, %v1347_v5  ;;  %v1356_v61 = vshrl.u32 %v6886_v34, %v1347_v5  ;;  %v1359_v6 = vshrl.u32 %v6890_v37, %v1347_v5 }
 0xe19   :  { %v1362_v55 = vshrl.u32 %v6892_v41, %v1347_v5  ;;  %v1348_v11 = vshrl.u32 %v6901_v25, %v1347_v5  ;;  %vm1366_vm5 = vcmp.lt.s32.totalorder %v1345_v62, 3  ;;  %vm1365_vm8 = vcmp.lt.s32.totalorder %v1345_v62, 2 }
 0xe1a   :  { %v1351_v24 = vor.u32 %v1350_v63, %v1349_v33  ;;  %v1354_v13 = vor.u32 %v1353_v3, %v1352_v52  ;;  %v1357_v30 = vor.u32 %v1356_v61, %v1355_v12  ;;  %v1360_v14 = vor.u32 %v1359_v6, %v1358_v26 }
 0xe1b   :  { %v1363_v32 = vor.u32 %v1362_v55, %v1361_v50  ;;  %v1380_v41 = vshll.u32 %v1340_v46, 8 }
 0xe1c   :  { %v1369_v28 = vsel %vm1367_vm4, %v1357_v30, 2102212464  ;;  %v1372_v31 = vsel %vm1364_vm3, %v1351_v24, %v1354_v13  ;;  %v1376_v2 = vsel %vm1364_vm3, %v1354_v13, %v1357_v30  ;;  %v1373_v34 = vsel %vm1367_vm4, %v1360_v14, 920167782 }
 0xe1d   :  { %v1377_v1 = vsel %vm1367_vm4, %v1363_v32, 1326507024  ;;  %v1374_v23 = vsel %vm1366_vm5, %v1357_v30, %v1373_v34  ;;  %v1368_v39 = vsel %vm1364_vm3, %v1348_v11, %v1351_v24  ;;  %v1370_v33 = vsel %vm1366_vm5, %v1354_v13, %v1369_v28 }
 0xe1e   :  { %v1378_v37 = vsel %vm1366_vm5, %v1360_v14, %v1377_v1  ;;  %v1375_v52 = vsel %vm1365_vm8, %v1372_v31, %v1374_v23  ;;  %v1371_v6 = vsel %vm1365_vm8, %v1368_v39, %v1370_v33  ;;  %vm1424_vm5 = vweird.f32 %v5558_v57 }
 0xe1f   :  { %v1379_v63 = vsel %vm1365_vm8, %v1376_v2, %v1378_v37  ;;  %v5579_v61 = vmul.u32.u64.low %v1380_v41, %v1375_v52  ;;  %v5580_v26 = vmul.u32.u64.high %v1380_v41, %v1375_v52, %v5579_v61  ;;  %v1387_v50 = vmul.u32 %v1380_v41, %v1371_v6 }
 0xe20   :  { %v5576_v3 = vmul.u32.u64.low %v1380_v41, %v1379_v63  ;;  %v5577_v12 = vmul.u32.u64.high %v1380_v41, %v1379_v63, %v5576_v3 }
 0xe21   :  { %v1390_v5 = vadd.s32 1, %v5580_v26 }
 0xe22   :  { %vm1389_vm9 = vc.u32 %v5577_v12, %v5579_v61  ;;  %v1388_v13 = vadd.s32 %v5579_v61, %v5577_v12 }
 0xe23   :  { %v1391_v34 = vsel %vm1389_vm9, %v1390_v5, %v5580_v26 }
 0xe24   :  { %v1392_v1 = vadd.s32 %v1391_v34, %v1387_v50 }
 0xe26   :  { %v1393_v62 = vadd.s32 536870912, %v1392_v1 }
 0xe28   :  { %v1394_v11 = vshrl.u32 %v1393_v62, 30 }
 0xe2a   :  { %v1395_v28 = vshll.u32 %v1394_v11, 30  ;;  %v1418_v6 = vsub.s32 4, %v1394_v11 }
 0xe2c   :  { %v1396_v31 = vsub.s32 %v1392_v1, %v1395_v28  ;;  %v1419_v12 = vsel %vm1334_vm11, %v1418_v6, %v1394_v11 }
 0xe2d   :  { %v5590_v34 = vsel %vm1333_vm1, 0, %v1419_v12  ;;  %v1010_v12 = vrot.slane %v5544_v18, %v5085_v16 }
 0xe2e   :  { %v1398_v2 = vsub.s32 0, %v1396_v31  ;;  %v1425_v1 = vadd.s32 3, %v5590_v34 }
 0xe30   :  { %v4688_v37 = vmin.u32 %v1398_v2, %v1396_v31  ;;  %v1426_v62 = vand.u32 3, %v1425_v1  ;;  %v1000_v1 = vrot.slane %v5529_v56, %v5085_v16 }
 0xe32   :  { %v1400_v55 = vclz %v4688_v37  ;;  %vm1431_vm2 = vcmp.eq.s32.totalorder %v1426_v62, 2  ;;  %vm1428_vm3 = vcmp.eq.s32.totalorder %v1426_v62, 0  ;;  %vm1427_vm4 = vcmp.lt.s32.totalorder %v1426_v62, 2 }
 0xe33   :  { %v989_v62 = vrot.slane %v5535_v15, %v5085_v16 }
 0xe34   :  { %v4689_v46 = vadd.s32 4294967294, %v1400_v55 }
 0xe35   :  { %v990_v18 = vmul.f32 %v5096_v27, %v989_v62 }
 0xe36   :  { %vm4690_vm10 = vcmp.lt.s32.totalorder %v4689_v46, 0 }
 0xe37   :  { %v1403_v24 = vsel %vm4690_vm10, 0, %v4689_v46 }
 0xe38   :  { %v1404_v30 = vsub.s32 32, %v1403_v24  ;;  %v1408_v14 = vsub.s32 4294967266, %v1403_v24  ;;  %v1405_v32 = vshll.u32 %v1396_v31, %v1403_v24 }
 0xe3a   :  { %v1406_v23 = vshrl.u32 %v1388_v13, %v1404_v30  ;;  %v1409_v41 = vadd.s32 127, %v1408_v14 }
 0xe3c   :  { %v1407_v39 = vor.u32 %v1406_v23, %v1405_v32  ;;  %v1410_v33 = vshll.u32 %v1409_v41, 23 }
 0xe3e   :  { %v1411_v52 = vor.u32 4788187, %v1410_v33  ;;  %v1414_v3 = vcvt.s32.f32 %v1407_v39  ;;  %v2932_v39 = vld [vmem:[%s6876_s1 + $0x5] sm:$0x1] }
 0xe3f   :  { %v3006_v33 = vsub.f32 %v2932_v39, %v5538_v8 }
 0xe40   :  { %v1412_v63 = vand.u32 2147483647, %v1411_v52 }
 0xe41   :  { %v3007_v52 = vmul.f32 %v3006_v33, %v5110_v42 }
 0xe42   :  { %v1415_v26 = vmul.f32 %v1414_v3, %v1412_v63 }
 0xe43   :  { %v3464_v63 = vmul.f32 0.05, %v3007_v52 }
 0xe44   :  { %v1416_v5 = vxor.u32 2147483648, %v1415_v26 }
 0xe46   :  { %v1417_v50 = vsel %vm1334_vm11, %v1416_v5, %v1415_v26 }
 0xe47   :  { %v1420_v61 = vsel %vm1333_vm1, %v5558_v57, %v1417_v50 }
 0xe48   :  { %4953 = vcosq.f32 %v1420_v61 }
 0xe49   :  { %4955 = vsinq.f32 %v1420_v61 }
 0xe52   :  { %v5593_v28 = vpop.eup %4953 }
 0xe53   :  { %v5595_v31 = vpop.eup %4955  ;;  %v1432_v2 = vxor.u32 2147483648, %v5593_v28 }
 0xe54   :  { %v1429_v37 = vxor.u32 2147483648, %v5595_v31 }
 0xe55   :  { %v1433_v58 = vsel %vm1431_vm2, %v1432_v2, %v5595_v31 }
 0xe56   :  { %v1430_v11 = vsel %vm1428_vm3, %v5593_v28, %v1429_v37 }
 0xe57   :  { %v1434_v55 = vsel %vm1427_vm4, %v1430_v11, %v1433_v58  ;;  %v1001_v11 = vmul.f32 %v5088_v20, %v1000_v1 }
 0xe58   :  { %v5608_v46 = vsel %vm1424_vm5, nan, %v1434_v55  ;;  %v1022_v55 = vrot.slane %v5533_v7, %v5085_v16 }
 0xe60   :  { %v5610_v24 = vpop.permute.xlu0 %1063 }
 0xe7e   :  { %v1077_v13 = vpop.permute.xlu0 %1076 }
 0xe7f   :  { %v1082_v30 = vrot.slane %v1077_v13, %v5085_v16  ;;  %v1044_v13 = vrot.slane %v5551_v60, %v5085_v16 }
 0xe81   :  { %v1083_v14 = vmul.f32 %v1082_v30, %v5541_v40 }
 0xe82   :  { %v1097_v23 = vpop.permute.xlu0 %1096 }
 0xe83   :  { %v1088_v32 = vrot.slane %v1083_v14, %v5085_v16  ;;  %v1099_v41 = vmul.f32 %v1097_v23, %v5512_v4  ;;  %v3472_v4 = vrot.slane %v3464_v63, %v5112_v43  ;;  %v1023_v23 = vmul.f32 %v5088_v20, %v1022_v55 }
 0xe85   :  { %1089 = vrot.lane.b32.xlu1 %v1088_v32, %s5038_s25  ;;  %v3479_v3 = vrot.slane %v3472_v4, %v5112_v43  ;;  %v1024_v32 = vmul.f32 %v5090_v22, %v1010_v12 }
 0xe87   :  { %v1025_v7 = vadd.f32 %v1024_v32, %v1023_v23 }
 0xe89   :  { %1102 = vperm.xlu1 %4838, %v1099_v41  }
 0xe8d   :  { %4841 = vset.pattern.permute.xlu1 %v6896_v47 }
 0xe8e   :  { %1120 = vperm.xlu1 %4841, %v5431_v53  }
 0xe92   :  { %1133 = vperm.xlu1 %4841, %v5433_v44  }
 0xe96   :  { %4844 = vset.pattern.permute.xlu1 %v6898_v36 }
 0xe97   :  { %1138 = vperm.xlu1 %4844, %v5433_v44   ;;  %v4988_v44 = vld [vmem:[%s6876_s1 + $0x1] sm:$0x1] }
 0xe9b   :  { %1151 = vperm.xlu1 %4844, %v5444_v54  }
 0xe9f   :  { %3480 = vrot.lane.b32.xlu1 %v3479_v3, %s5026_s15 }
 0xea0   :  { %4846 = vset.pattern.permute.xlu1 %v6894_v48 }
 0xef7   :  { %v1090_v8 = vpop.permute.xlu1 %1089 }
 0xf08   :  { %v1103_v26 = vpop.permute.xlu1 %1102 }
 0xf09   :  { %v1108_v6 = vrot.slane %v1103_v26, %v5085_v16  ;;  %v1094_v26 = vmul.f32 %v1044_v13, %v1025_v7 }
 0xf0b   :  { %v1109_v5 = vmul.f32 %v1108_v6, %v5541_v40  ;;  %v1158_v40 = vmul.f32 0.05, %v5435_v59 }
 0xf0d   :  { %v1114_v50 = vrot.slane %v1109_v5, %v5085_v16  ;;  %v1121_v61 = vpop.permute.xlu1 %1120 }
 0xf0f   :  { %1115 = vrot.lane.b32.xlu0 %v1114_v50, %s5038_s25 }
 0xf11   :  { %v1134_v56 = vpop.permute.xlu1 %1133 }
 0xf13   :  { %1125 = vperm.xlu0 %4842, %v5431_v53  }
 0xf16   :  { %v1139_v60 = vpop.permute.xlu1 %1138 }
 0xf17   :  { %4843 = vset.pattern.permute.xlu0 %v6896_v47 }
 0xf18   :  { %672 = vperm.xlu0 %4843, %v4988_v44  }
 0xf1a   :  { %v1152_v1 = vpop.permute.xlu1 %1151 }
 0xf1c   :  { %1146 = vperm.xlu0 %4843, %v5444_v54   ;;  %v979_v54 = vrot.slane %v5531_v35, %v5085_v16  ;;  %v1034_v35 = vrot.slane %v5547_v0, %v5085_v16 }
 0xf1e   :  { %v980_v15 = vmul.f32 %v5090_v22, %v979_v54  ;;  %v1067_v52 = vmul.f32 %v5090_v22, %v1034_v35  ;;  %v1035_v4 = vmul.f32 %v5088_v20, %v1034_v35  ;;  %v1093_v50 = vmul.f32 %v5096_v27, %v1034_v35 }
 0xf20   :  { %4845 = vset.pattern.permute.xlu0 %v6894_v48  ;;  %v991_v41 = vadd.f32 %v990_v18, %v980_v15 }
 0xf21   :  { %654 = vperm.xlu0 %4845, %v5431_v53   ;;  %v1011_v53 = vmul.f32 %v5096_v27, %v1010_v12 }
 0xf22   :  { %v1045_v33 = vmul.f32 %v1044_v13, %v991_v41 }
 0xf23   :  { %v1012_v14 = vsub.f32 %v1001_v11, %v1011_v53  ;;  %v662_v11 = vmul.f32 %v5090_v22, %v5495_v38 }
 0xf24   :  { %v1046_v6 = vadd.f32 %v1045_v33, %v1035_v4 }
 0xf25   :  { %1160 = vrot.lane.b32.xlu0 %v1158_v40, %s5044_s26  ;;  %v1068_v39 = vmul.f32 %v1044_v13, %v1012_v14  ;;  %v1095_v40 = vadd.f32 %v1094_v26, %v1093_v50  ;;  %v668_v14 = vmul.f32 %v5096_v27, %v5497_v9  ;;  %v3481_v50 = vpop.permute.xlu1 %3480 }
 0xf26   :  { %v1066_v0 = vadd.f32 %v5610_v24, %v1046_v6  ;;  %v6943_v6 = vmov 15  }
 0xf27   :  { %v1069_v3 = vadd.f32 %v1068_v39, %v1067_v52 }
 0xf28   :  { %v1123_v62 = vmul.f32 %v1121_v61, %v1066_v0  ;;  %v1136_v39 = vmul.f32 %v1134_v56, %v1066_v0 }
 0xf29   :  { %v1092_v5 = vadd.f32 %v1090_v8, %v1069_v3 }
 0xf2b   :  { %v1154_v18 = vmul.f32 %v1152_v1, %v1092_v5  ;;  %v1141_v61 = vmul.f32 %v1139_v60, %v1092_v5 }
 0xf2d   :  { %v1142_v4 = vadd.f32 %v1141_v61, %v1136_v39  ;;  %v6946_v61 = vmov 16   ;;  %v1313_v39 = vmul.f32 %v5555_v49, %v5522_v29 }
 0xf81   :  { %v1116_v58 = vpop.permute.xlu0 %1115 }
 0xf82   :  { %v1118_v54 = vadd.f32 %v1116_v58, %v1095_v40  ;;  %v5717_v40 = vadd.f32 %v3481_v50, %v5248_v10 }
 0xf84   :  { %v1156_v58 = vmul.f32 %v1118_v54, %v5497_v9  ;;  %v1143_v7 = vmul.f32 %v1118_v54, %v5495_v38  ;;  %v5694_v9 = vmul.f32 0.05, %v5170_v51  ;;  %6944 = vst [vmem:[#allocation13_spill] sm:$0xff] %v5717_v40 }
 0xf92   :  { %v1126_v30 = vpop.permute.xlu0 %1125 }
 0xf93   :  { %v1128_v12 = vmul.f32 %v1126_v30, %v1092_v5  ;;  %v1529_v5 = vand.u32 3, %v5590_v34 }
 0xf95   :  { %v1129_v15 = vadd.f32 %v1128_v12, %v1123_v62  ;;  %vm1531_vm8 = vcmp.eq.s32.totalorder %v1529_v5, 0  ;;  %vm1534_vm9 = vcmp.eq.s32.totalorder %v1529_v5, 2  ;;  %vm1530_vm10 = vcmp.lt.s32.totalorder %v1529_v5, 2 }
 0xf97   :  { %v673_v63 = vpop.permute.xlu0 %672 }
 0xf9b   :  { %v1147_v44 = vpop.permute.xlu0 %1146 }
 0xf9c   :  { %v1149_v53 = vmul.f32 %v1147_v44, %v1066_v0  ;;  %v1533_v44 = vsel %vm1531_vm8, %v5593_v28, %v1429_v37  ;;  %v1536_v0 = vsel %vm1534_vm9, %v1432_v2, %v5595_v31  ;;  %v4989_v28 = vld [vmem:[%s6876_s1 + $0x2] sm:$0x1]  ;;  %v6945_v31 = vmov 17  }
 0xf9d   :  { %v1537_v34 = vsel %vm1530_vm10, %v1533_v44, %v1536_v0  ;;  %v6947_v0 = vmov 2475754826  }
 0xf9e   :  { %v1155_v32 = vadd.f32 %v1154_v18, %v1149_v53  ;;  %v1538_v12 = vsel %vm1424_vm5, nan, %v1537_v34 }
 0xfa0   :  { %v655_v55 = vpop.permute.xlu0 %654  ;;  %v5684_v33 = vadd.f32 %v1156_v58, %v1155_v32 }
 0xfa1   :  { %v657_v13 = vmul.f32 %v5088_v20, %v655_v55  ;;  %v1130_v8 = vmul.f32 %v1118_v54, %v655_v55 }
 0xfa3   :  { %v663_v24 = vadd.f32 %v662_v11, %v657_v13  ;;  %v5675_v35 = vadd.f32 %v1130_v8, %v1129_v15 }
 0xfa4   :  { %v1161_v30 = vpop.permute.xlu0 %1160 }
 0xfa5   :  { %v669_v23 = vadd.f32 %v668_v14, %v663_v24  ;;  %v5679_v41 = vadd.f32 %v1161_v30, %v5389_v45  ;;  %1207 = vrot.lane.b32.xlu0 %v5675_v35, %s5048_s28  ;;  %v5691_v45 = vadd.f32 %v1143_v7, %v1142_v4 }
 0xfa7   :  { %v675_v52 = vmul.f32 %v673_v63, %v669_v23  ;;  %1204 = vst.msk [vmem:[#allocation3 + $0x1] sm:$0x1] %vm628_vm6, %v5679_v41  ;;  %v1869_v63 = vmul.f32 %v5694_v9, %v5694_v9 }
 0xfa9   :  { %v676_v60 = vadd.f32 %v675_v52, %v5369_v19  ;;  %1217 = vrot.lane.b32.xlu0 %v5684_v33, %s5050_s30 }
 0xfab   :  { %v677_v56 = vmul.f32 0.8333333, %v676_v60 }
 0xfad   :  { %1229 = vperm.xlu0 %4845, %v5691_v45   ;;  %v1164_v38 = vmul.f32 0.05, %v677_v56 }
 0xfaf   :  { %v1172_v3 = vrot.slane %v1164_v38, %v5112_v43 }
 0xfb1   :  { %1871 = vrot.lane.b32.xlu0 %v1869_v63, %s5020_s11  ;;  %v1179_v26 = vrot.slane %v1172_v3, %v5112_v43 }
 0xfb2   :  { %4848 = vset.pattern.permute.xlu0 %v6943_v6 }
 0xfb3   :  { %1180 = vrot.lane.b32.xlu1 %v1179_v26, %s5046_s27 }
 0xfb5   :  { %1315 = vrot.lane.b32.xlu0 %v5555_v49, %s5024_s0 }
 0xfb7   :  { %1212 = vrot.lane.b32.xlu1 %v5691_v45, %s5049_s29 }
 0xfb9   :  { %1324 = vperm.xlu0 %4848, %v5555_v49  }
 0xfbb   :  { %1224 = vperm.xlu1 %4846, %v5675_v35  }
 0xfbd   :  { %3529 = vrot.lane.b32.xlu0 %v5717_v40, %s5020_s11 }
 0xfbf   :  { %1235 = vperm.xlu1 %4846, %v5684_v33  }
 0xfc1   :  { %1598 = vperm.xlu0 %4848, %v1538_v12  }
 0xfc3   :  { %4847 = vset.pattern.permute.xlu1 %v6896_v47 }
 0xfc4   :  { %1242 = vperm.xlu1 %4847, %v4989_v28  }
 0xfc8   :  { %1875 = vrot.lane.b32.xlu1 %v1869_v63, %s5031_s24 }
 0xfc9   :  { %4849 = vset.pattern.permute.xlu1 %v6945_v31 }
 0xfcc   :  { %1319 = vrot.lane.b32.xlu1 %v5555_v49, %s5021_s12 }
0x1017   :  { %v1208_v2 = vpop.permute.xlu0 %1207 }
0x101b   :  { %v1218_v62 = vpop.permute.xlu0 %1217 }
0x1025   :  { %v1181_v37 = vpop.permute.xlu1 %1180 }
0x1026   :  { %v5734_v57 = vadd.f32 %v1181_v37, %v5435_v59 }
0x1028   :  { %1205 = vst.msk [vmem:[#allocation3 + $0x1] sm:$0x1] %vm630_vm7, %v5734_v57 }
0x1029   :  { %1210 = vst.msk [vmem:[#allocation3 + $0x1] sm:$0x1] %vm636_vm12, %v1208_v2  ;;  %v1213_v1 = vpop.permute.xlu1 %1212  ;;  %v6948_v2 = vmov 2131351028  }
0x102a   :  { %1215 = vst.msk [vmem:[#allocation3 + $0x1] sm:$0x1] %vm642_vm13, %v1213_v1 }
0x102b   :  { %1220 = vst.msk [vmem:[#allocation3 + $0x1] sm:$0x1] %vm648_vm14, %v1218_v62  ;;  %v6949_v62 = vmov 2102212464  }
0x102c   :  { %1221 = vst.msk [vmem:[#allocation3 + $0x1] sm:$0x1] %vm650_vm15, %v5144_v17  ;;  %v5745_v53 = vpop.permute.xlu0 %1229 }
0x1030   :  { %v1872_v11 = vpop.permute.xlu0 %1871 }
0x1031   :  { %v1874_v18 = vadd.f32 %v1872_v11, %v1869_v63  ;;  %v5772_v63 = vsub.f32 1.0, %v1538_v12 }
0x1033   :  { %v1617_v28 = vmul.f32 %v5772_v63, %v1313_v39 }
0x1034   :  { %v1316_v24 = vpop.permute.xlu0 %1315 }
0x1035   :  { %v5756_v30 = vmul.f32 %v1316_v24, %v5522_v29 }
0x1037   :  { %v1583_v4 = vsub.f32 0.0, %v5756_v30 }
0x103a   :  { %v5743_v54 = vpop.permute.xlu1 %1224 }
0x103e   :  { %v5747_v59 = vpop.permute.xlu1 %1235 }
0x1043   :  { %v5749_v55 = vpop.permute.xlu1 %1242 }
0x1047   :  { %v1876_v15 = vpop.permute.xlu1 %1875 }
0x1048   :  { %v1878_v13 = vadd.f32 %v1876_v15, %v1874_v18  ;;  %v6950_v15 = vmov 920167782  }
0x104a   :  { %vm1879_vm11 = vcmp.gt.f32.partialorder %v1878_v13, 0.0 }
0x104b   :  { %v1880_v8 = vsel %vm1879_vm11, %v1878_v13, 1.0  ;;  %v1320_v14 = vpop.permute.xlu1 %1319 }
0x104c   :  { %4957 = vrsqrt.f32 %v1880_v8  ;;  %v5752_v32 = vmul.f32 %v1320_v14, %v5522_v29  ;;  %v6951_v14 = vmov 1326507024  }
0x104e   :  { %v1540_v17 = vsub.f32 0.0, %v5752_v32 }
0x1050   :  { %1543 = vperm.xlu1 %4849, %v1540_v17  }
0x1054   :  { %4850 = vset.pattern.permute.xlu1 %v6946_v61 }
0x1055   :  { %1553 = vperm.xlu1 %4850, %v5756_v30  }
0x1056   :  { %v5760_v58 = vpop.eup %4957 }
0x1057   :  { %v5763_v23 = vmul.f32 %v5760_v58, %v1878_v13 }
0x1059   :  { %v1905_v7 = vand.u32 2139095040, %v5763_v23  ;;  %4851 = vset.pattern.permute.xlu1 %v6943_v6  ;;  %v6900_v38 = vand.u32 2147483647, %v5763_v23  ;;  %vm1904_vm10 = vcmp.lt.s32.totalorder %v5763_v23, 0 }
0x105a   :  { %1574 = vperm.xlu1 %4851, %v1313_v39  }
0x105b   :  { %v1906_v52 = vshrl.u32 %v1905_v7, 23  ;;  %v1909_v26 = vand.u32 8388607, %v6900_v38 }
0x105d   :  { %v4695_v60 = vadd.s32 4294967169, %v1906_v52  ;;  %v1910_v24 = vor.u32 8388608, %v1909_v26 }
0x105e   :  { %4852 = vset.pattern.permute.xlu1 %v6946_v61 }
0x105f   :  { %v1912_v56 = vadd.s32 1, %v4695_v60  ;;  %1586 = vperm.xlu1 %4852, %v1583_v4   ;;  %v1950_v26 = vshll.u32 %v1910_v24, 8 }
0x1061   :  { %vm1913_vm1 = vcmp.gt.s32.totalorder %v1912_v56, 0 }
0x1062   :  { %v1914_v3 = vsel %vm1913_vm1, %v1912_v56, 0 }
0x1063   :  { %v1916_v49 = vand.u32 31, %v1914_v3  ;;  %3544 = vrot.lane.b32.xlu1 %v5717_v40, %s5021_s12  ;;  %v1915_v50 = vshrl.u32 %v1914_v3, 5 }
0x1064   :  { %4853 = vset.pattern.permute.xlu1 %v6943_v6 }
0x1065   :  { %v1917_v5 = vsub.s32 32, %v1916_v49  ;;  %v1919_v44 = vshll.u32 %v6901_v25, %v1916_v49  ;;  %v1922_v34 = vshll.u32 %v6947_v0, %v1916_v49  ;;  %v1925_v1 = vshll.u32 %v6948_v2, %v1916_v49 }
0x1066   :  { %v1928_v18 = vshll.u32 %v6949_v62, %v1916_v49  ;;  %v1931_v8 = vshll.u32 %v6950_v15, %v1916_v49  ;;  %vm1934_vm2 = vcmp.lt.s32.totalorder %v1915_v50, 1  ;;  %vm1937_vm3 = vcmp.lt.s32.totalorder %v1915_v50, 4 }
0x1067   :  { %v1920_v12 = vshrl.u32 %v6947_v0, %v1917_v5  ;;  %v1923_v37 = vshrl.u32 %v6948_v2, %v1917_v5  ;;  %v1926_v11 = vshrl.u32 %v6949_v62, %v1917_v5  ;;  %1608 = vperm.xlu1 %4853, %v5608_v46   ;;  %v1929_v13 = vshrl.u32 %v6950_v15, %v1917_v5 }
0x1068   :  { %v1932_v17 = vshrl.u32 %v6951_v14, %v1917_v5  ;;  %v1918_v46 = vshrl.u32 %v6901_v25, %v1917_v5  ;;  %vm1936_vm4 = vcmp.lt.s32.totalorder %v1915_v50, 3  ;;  %vm1935_vm5 = vcmp.lt.s32.totalorder %v1915_v50, 2 }
0x1069   :  { %v1921_v39 = vor.u32 %v1920_v12, %v1919_v44  ;;  %v1924_v7 = vor.u32 %v1923_v37, %v1922_v34  ;;  %v1927_v52 = vor.u32 %v1926_v11, %v1925_v1  ;;  %v1930_v4 = vor.u32 %v1929_v13, %v1928_v18 }
0x106a   :  { %v1933_v60 = vor.u32 %v1932_v17, %v1931_v8 }
0x106b   :  { %v1939_v56 = vsel %vm1937_vm3, %v1927_v52, 2102212464  ;;  %v1942_v3 = vsel %vm1934_vm2, %v1921_v39, %v1924_v7  ;;  %v1946_v48 = vsel %vm1934_vm2, %v1924_v7, %v1927_v52  ;;  %1620 = vperm.xlu1 %4853, %v1617_v28   ;;  %v1943_v47 = vsel %vm1937_vm3, %v1930_v4, 920167782 }
0x106c   :  { %v1947_v36 = vsel %vm1937_vm3, %v1933_v60, 1326507024  ;;  %v1944_v49 = vsel %vm1936_vm4, %v1927_v52, %v1943_v47  ;;  %v1938_v44 = vsel %vm1934_vm2, %v1918_v46, %v1921_v39  ;;  %v1940_v34 = vsel %vm1936_vm4, %v1924_v7, %v1939_v56 }
0x106d   :  { %v1948_v38 = vsel %vm1936_vm4, %v1930_v4, %v1947_v36  ;;  %v1945_v12 = vsel %vm1935_vm5, %v1942_v3, %v1944_v49  ;;  %v1941_v5 = vsel %vm1935_vm5, %v1938_v44, %v1940_v34 }
0x106e   :  { %v1949_v37 = vsel %vm1935_vm5, %v1946_v48, %v1948_v38  ;;  %v5795_v18 = vmul.u32.u64.low %v1950_v26, %v1945_v12  ;;  %v5796_v13 = vmul.u32.u64.high %v1950_v26, %v1945_v12, %v5795_v18  ;;  %v1957_v36 = vmul.u32 %v1950_v26, %v1941_v5 }
0x106f   :  { %v5792_v1 = vmul.u32.u64.low %v1950_v26, %v1949_v37  ;;  %v5793_v11 = vmul.u32.u64.high %v1950_v26, %v1949_v37, %v5792_v1  ;;  %1640 = vrot.lane.b32.xlu1 %v5756_v30, %s5020_s11 }
0x1070   :  { %v1960_v47 = vadd.s32 1, %v5796_v13 }
0x1071   :  { %vm1959_vm8 = vc.u32 %v5793_v11, %v5795_v18  ;;  %v1958_v30 = vadd.s32 %v5795_v18, %v5793_v11 }
0x1072   :  { %v1961_v50 = vsel %vm1959_vm8, %v1960_v47, %v5796_v13  ;;  %v6952_v47 = vand.u32 2147483647, %v5763_v23 }
0x1073   :  { %v1962_v28 = vadd.s32 %v1961_v50, %v1957_v36 }
0x1074   :  { %vm1903_vm11 = vcmp.le.f32.partialorder %v6952_v47, 0.7853982 }
0x1075   :  { %v1963_v8 = vadd.s32 536870912, %v1962_v28 }
0x1077   :  { %v1964_v48 = vshrl.u32 %v1963_v8, 30 }
0x1079   :  { %v1965_v38 = vshll.u32 %v1964_v48, 30  ;;  %v1988_v13 = vsub.s32 4, %v1964_v48 }
0x107b   :  { %v1966_v17 = vsub.s32 %v1962_v28, %v1965_v38  ;;  %v1989_v11 = vsel %vm1904_vm10, %v1988_v13, %v1964_v48 }
0x107c   :  { %v1991_v50 = vsel %vm1903_vm11, 0, %v1989_v11 }
0x107d   :  { %v1968_v24 = vsub.s32 0, %v1966_v17  ;;  %v1995_v28 = vadd.s32 3, %v1991_v50  ;;  %v2099_v8 = vand.u32 3, %v1991_v50 }
0x107f   :  { %v4696_v39 = vmin.u32 %v1968_v24, %v1966_v17  ;;  %v1996_v38 = vand.u32 3, %v1995_v28  ;;  %vm2104_vm1 = vcmp.eq.s32.totalorder %v2099_v8, 2  ;;  %vm2101_vm3 = vcmp.eq.s32.totalorder %v2099_v8, 0 }
0x1080   :  { %vm2100_vm5 = vcmp.lt.s32.totalorder %v2099_v8, 2  ;;  %v6954_v28 = vmov 1  }
0x1081   :  { %v1970_v7 = vclz %v4696_v39  ;;  %vm2001_vm2 = vcmp.eq.s32.totalorder %v1996_v38, 2  ;;  %vm1998_vm4 = vcmp.eq.s32.totalorder %v1996_v38, 0  ;;  %vm1997_vm8 = vcmp.lt.s32.totalorder %v1996_v38, 2 }
0x1083   :  { %v4697_v52 = vadd.s32 4294967294, %v1970_v7 }
0x1085   :  { %vm4698_vm9 = vcmp.lt.s32.totalorder %v4697_v52, 0 }
0x1086   :  { %v1973_v4 = vsel %vm4698_vm9, 0, %v4697_v52  ;;  %vm1994_vm9 = vweird.f32 %v5763_v23 }
0x1087   :  { %v1974_v60 = vsub.s32 32, %v1973_v4  ;;  %v1978_v56 = vsub.s32 4294967266, %v1973_v4  ;;  %v1975_v3 = vshll.u32 %v1966_v17, %v1973_v4 }
0x1089   :  { %v1976_v46 = vshrl.u32 %v1958_v30, %v1974_v60  ;;  %v1979_v49 = vadd.s32 127, %v1978_v56 }
0x108b   :  { %v1977_v26 = vor.u32 %v1976_v46, %v1975_v3  ;;  %v1980_v44 = vshll.u32 %v1979_v49, 23 }
0x108d   :  { %v1981_v34 = vor.u32 4788187, %v1980_v44  ;;  %v1984_v37 = vcvt.s32.f32 %v1977_v26 }
0x108f   :  { %v1982_v12 = vand.u32 2147483647, %v1981_v34 }
0x1091   :  { %v1985_v1 = vmul.f32 %v1984_v37, %v1982_v12  ;;  %v1325_v37 = vpop.permute.xlu0 %1324 }
0x1093   :  { %v1986_v5 = vxor.u32 2147483648, %v1985_v1 }
0x1095   :  { %v1987_v36 = vsel %vm1904_vm10, %v1986_v5, %v1985_v1  ;;  %v3530_v8 = vpop.permute.xlu0 %3529 }
0x1096   :  { %v1990_v18 = vsel %vm1903_vm11, %v5763_v23, %v1987_v36  ;;  %v1330_v23 = vrot.slane %v1325_v37, %v5085_v16 }
0x1097   :  { %4959 = vcosq.f32 %v1990_v18 }
0x1098   :  { %4961 = vsinq.f32 %v1990_v18  ;;  %v1331_v5 = vmul.f32 %v1330_v23, %v5522_v29 }
0x1099   :  { %v5832_v38 = vpop.permute.xlu0 %1598 }
0x10a1   :  { %v4960_v17 = vpop.eup %4959 }
0x10a2   :  { %v4962_v24 = vpop.eup %4961  ;;  %v2002_v39 = vxor.u32 2147483648, %v4960_v17 }
0x10a3   :  { %v1999_v7 = vxor.u32 2147483648, %v4962_v24 }
0x10a4   :  { %v2106_v52 = vsel %vm2104_vm1, %v2002_v39, %v4962_v24  ;;  %v2003_v4 = vsel %vm2001_vm2, %v2002_v39, %v4962_v24 }
0x10a5   :  { %v2103_v48 = vsel %vm2101_vm3, %v4960_v17, %v1999_v7  ;;  %v2000_v30 = vsel %vm1998_vm4, %v4960_v17, %v1999_v7 }
0x10a6   :  { %v2107_v60 = vsel %vm2100_vm5, %v2103_v48, %v2106_v52  ;;  %v2004_v56 = vsel %vm1997_vm8, %v2000_v30, %v2003_v4  ;;  %v5841_v48 = vmul.f32 0.05, %v5195_v21  ;;  %v6956_v30 = vmov 0  }
0x10a7   :  { %v5809_v3 = vsel %vm1994_vm9, nan, %v2107_v60  ;;  %v5811_v46 = vsel %vm1994_vm9, nan, %v2004_v56 }
0x10a8   :  { %6953 = vst [vmem:[#allocation14_spill] sm:$0xff] %v5811_v46  ;;  %6955 = vst [vmem:[#allocation15_spill] sm:$0xff] %v5841_v48  ;;  %v2439_v60 = vmul.f32 %v5841_v48, %v5841_v48 }
0x10cf   :  { %v5813_v49 = vpop.permute.xlu1 %1543 }
0x10d4   :  { %v5815_v26 = vpop.permute.xlu1 %1553 }
0x10d9   :  { %v5817_v44 = vpop.permute.xlu1 %1574 }
0x10de   :  { %v5819_v34 = vpop.permute.xlu1 %1586 }
0x10e2   :  { %v3545_v12 = vpop.permute.xlu1 %3544 }
0x10e3   :  { %v3547_v37 = vmul.f32 %v3545_v12, %v5717_v40 }
0x10e5   :  { %v3548_v23 = vmul.f32 -0.02, %v3547_v37 }
0x10e6   :  { %v5821_v1 = vpop.permute.xlu1 %1608 }
0x10ea   :  { %v1621_v13 = vpop.permute.xlu1 %1620 }
0x10eb   :  { %v1626_v47 = vrot.slane %v1621_v13, %v5085_v16  ;;  %v1728_v13 = vmul.f32 0.05, %v5734_v57 }
0x10ed   :  { %v1627_v36 = vmul.f32 %v1626_v47, %v1331_v5  ;;  %v6957_v47 = vmov 2  }
0x10ee   :  { %v1641_v18 = vpop.permute.xlu1 %1640 }
0x10ef   :  { %v1632_v11 = vrot.slane %v1627_v36, %v5085_v16  ;;  %v1643_v50 = vmul.f32 %v1641_v18, %v5772_v63 }
0x10f1   :  { %1633 = vrot.lane.b32.xlu0 %v1632_v11, %s5038_s25 }
0x10f5   :  { %1646 = vperm.xlu0 %4848, %v1643_v50  }
0x10f9   :  { %1666 = vrot.lane.b32.xlu0 %v5752_v32, %s5031_s24 }
0x10fa   :  { %4855 = vset.pattern.permute.xlu0 %v6954_v28 }
0x1163   :  { %v5834_v29 = vpop.permute.xlu0 %1633 }
0x1174   :  { %v1647_v17 = vpop.permute.xlu0 %1646 }
0x1175   :  { %v1652_v24 = vrot.slane %v1647_v17, %v5085_v16  ;;  %v1232_v17 = vmul.f32 %v5090_v22, %v5745_v53 }
0x1177   :  { %v1653_v39 = vmul.f32 %v1652_v24, %v1331_v5  ;;  %v1238_v24 = vmul.f32 %v5096_v27, %v5747_v59 }
0x1178   :  { %v1667_v52 = vpop.permute.xlu0 %1666 }
0x1179   :  { %v1658_v7 = vrot.slane %v1653_v39, %v5085_v16  ;;  %v1669_v4 = vmul.f32 %v1667_v52, %v5772_v63  ;;  %v3532_v63 = vmul.f32 %v3530_v8, %v5717_v40  ;;  %v1227_v8 = vmul.f32 %v5088_v20, %v5743_v54 }
0x117b   :  { %1659 = vrot.lane.b32.xlu1 %v1658_v7, %s5038_s25  ;;  %v3533_v56 = vmul.f32 0.02, %v3532_v63  ;;  %v1233_v7 = vadd.f32 %v1232_v17, %v1227_v8 }
0x117f   :  { %1672 = vperm.xlu1 %4853, %v1669_v4  }
0x1183   :  { %4854 = vset.pattern.permute.xlu1 %v6956_v30 }
0x1184   :  { %1690 = vperm.xlu1 %4854, %v5675_v35  }
0x1188   :  { %2445 = vrot.lane.b32.xlu1 %v2439_v60, %s5031_s24 }
0x118c   :  { %1889 = vrot.lane.b32.xlu1 %v5760_v58, %s5021_s12 }
0x1190   :  { %1703 = vperm.xlu1 %4854, %v5691_v45  }
0x1194   :  { %4856 = vset.pattern.permute.xlu1 %v6954_v28 }
0x1195   :  { %1708 = vperm.xlu1 %4856, %v5691_v45  }
0x1199   :  { %4858 = vset.pattern.permute.xlu1 %v6946_v61 }
0x119a   :  { %3536 = vperm.xlu1 %4858, %v3533_v56  }
0x119e   :  { %4859 = vset.pattern.permute.xlu1 %v6945_v31 }
0x119f   :  { %3551 = vperm.xlu1 %4859, %v3548_v23  }
0x11a3   :  { %4862 = vset.pattern.permute.xlu1 %v6954_v28 }
0x11a4   :  { %1721 = vperm.xlu1 %4862, %v5684_v33  }
0x11a8   :  { %1730 = vrot.lane.b32.xlu1 %v1728_v13, %s5044_s26 }
0x11a9   :  { %4863 = vset.pattern.permute.xlu1 %v6957_v47 }
0x11ed   :  { %v5862_v45 = vpop.permute.xlu1 %1659 }
0x11fe   :  { %v1673_v12 = vpop.permute.xlu1 %1672 }
0x11ff   :  { %v1678_v36 = vrot.slane %v1673_v12, %v5085_v16  ;;  %v3560_v12 = vmul.f32 0.0, %v3532_v63 }
0x1201   :  { %v1679_v11 = vmul.f32 %v1678_v36, %v1331_v5  ;;  %v1239_v5 = vadd.f32 %v1238_v24, %v1233_v7 }
0x1203   :  { %v1684_v18 = vrot.slane %v1679_v11, %v5085_v16  ;;  %v5866_v50 = vpop.permute.xlu1 %1690  ;;  %v1245_v4 = vmul.f32 %v5749_v55, %v1239_v5 }
0x1205   :  { %1685 = vrot.lane.b32.xlu0 %v1684_v18, %s5038_s25  ;;  %v1246_v37 = vadd.f32 %v1245_v4, %v5369_v19 }
0x1207   :  { %v2446_v39 = vpop.permute.xlu1 %2445  ;;  %v1247_v13 = vmul.f32 0.8333333, %v1246_v37 }
0x1209   :  { %2441 = vrot.lane.b32.xlu0 %v2439_v60, %s5020_s11  ;;  %v1734_v11 = vmul.f32 0.05, %v1247_v13 }
0x120b   :  { %v5876_v52 = vpop.permute.xlu1 %1889  ;;  %v1742_v55 = vrot.slane %v1734_v11, %v5112_v43 }
0x120d   :  { %1885 = vrot.lane.b32.xlu0 %v5760_v58, %s5024_s0 }
0x120f   :  { %v5881_v56 = vpop.permute.xlu1 %1703 }
0x1211   :  { %1695 = vperm.xlu0 %4855, %v5675_v35   ;;  %v1749_v35 = vrot.slane %v1742_v55, %v5112_v43 }
0x1214   :  { %v5885_v23 = vpop.permute.xlu1 %1708 }
0x1215   :  { %4857 = vset.pattern.permute.xlu0 %v6956_v30 }
0x1216   :  { %1716 = vperm.xlu0 %4857, %v5684_v33  }
0x1219   :  { %v5889_v36 = vpop.permute.xlu1 %3536 }
0x121a   :  { %4860 = vset.pattern.permute.xlu0 %v6943_v6 }
0x121b   :  { %3563 = vperm.xlu0 %4860, %v3560_v12  }
0x121e   :  { %v5893_v18 = vpop.permute.xlu1 %3551 }
0x121f   :  { %4861 = vset.pattern.permute.xlu0 %v6945_v31 }
0x1220   :  { %1564 = vperm.xlu0 %4861, %v5752_v32  }
0x1223   :  { %v5898_v8 = vpop.permute.xlu1 %1721 }
0x1224   :  { %1750 = vrot.lane.b32.xlu0 %v1749_v35, %s5046_s27  ;;  %v1549_v35 = vrot.slane %v5813_v49, %v5085_v16 }
0x1227   :  { %v1731_v33 = vpop.permute.xlu1 %1730 }
0x1228   :  { %v5902_v63 = vadd.f32 %v1731_v33, %v5679_v41  ;;  %v1580_v33 = vrot.slane %v5817_v44, %v5085_v16  ;;  %v1614_v44 = vrot.slane %v5821_v1, %v5085_v16 }
0x122a   :  { %6958 = vst [vmem:[#allocation16_spill] sm:$0xff] %v5902_v63  ;;  %1774 = vst.msk [vmem:[#allocation3 + $0x2] sm:$0x1] %vm628_vm6, %v5902_v63  ;;  %v1594_v49 = vmul.f32 %v5090_v22, %v1580_v33 }
0x1277   :  { %v5906_v17 = vpop.permute.xlu0 %1685 }
0x127b   :  { %v2442_v24 = vpop.permute.xlu0 %2441 }
0x127c   :  { %v2444_v7 = vadd.f32 %v2442_v24, %v2439_v60  ;;  %v1559_v60 = vrot.slane %v5815_v26, %v5085_v16 }
0x127e   :  { %v2448_v5 = vadd.f32 %v2446_v39, %v2444_v7  ;;  %v1592_v39 = vrot.slane %v5819_v34, %v5085_v16  ;;  %v1604_v34 = vrot.slane %v5832_v38, %v5085_v16  ;;  %v1581_v38 = vmul.f32 %v5096_v27, %v1580_v33 }
0x127f   :  { %v5910_v37 = vpop.permute.xlu0 %1885 }
0x1280   :  { %vm2449_vm10 = vcmp.gt.f32.partialorder %v2448_v5, 0.0  ;;  %v1663_v19 = vmul.f32 %v5096_v27, %v1604_v34 }
0x1281   :  { %v2450_v32 = vsel %vm2449_vm10, %v2448_v5, 1.0 }
0x1282   :  { %4963 = vrsqrt.f32 %v2450_v32  ;;  %v1593_v32 = vmul.f32 %v5088_v20, %v1592_v39 }
0x128c   :  { %v5908_v4 = vpop.eup %4963 }
0x128d   :  { %v5913_v13 = vmul.f32 %v5908_v4, %v2448_v5  ;;  %v1560_v5 = vmul.f32 %v5096_v27, %v1559_v60  ;;  %v1595_v60 = vadd.f32 %v1594_v49, %v1593_v32 }
0x128f   :  { %v2475_v41 = vand.u32 2139095040, %v5913_v13  ;;  %v6903_v11 = vand.u32 2147483647, %v5913_v13  ;;  %v1664_v42 = vmul.f32 %v1614_v44, %v1595_v60  ;;  %vm2474_vm9 = vcmp.lt.s32.totalorder %v5913_v13, 0 }
0x1290   :  { %v5916_v12 = vpop.permute.xlu0 %1695 }
0x1291   :  { %v2476_v55 = vshrl.u32 %v2475_v41, 23  ;;  %v2479_v7 = vand.u32 8388607, %v6903_v11  ;;  %v1550_v41 = vmul.f32 %v5090_v22, %v1549_v35 }
0x1293   :  { %v4703_v24 = vadd.s32 4294967169, %v2476_v55  ;;  %v2480_v11 = vor.u32 8388608, %v2479_v7  ;;  %v1561_v21 = vadd.f32 %v1560_v5, %v1550_v41  ;;  %v6960_v41 = vmov 683565275  }
0x1295   :  { %v2482_v25 = vadd.s32 1, %v4703_v24  ;;  %v5931_v26 = vpop.permute.xlu0 %1716  ;;  %v1605_v24 = vmul.f32 %v5088_v20, %v1604_v34  ;;  %v1615_v35 = vmul.f32 %v1614_v44, %v1561_v21  ;;  %v2520_v7 = vshll.u32 %v2480_v11, 8 }
0x1297   :  { %vm2483_vm11 = vcmp.gt.s32.totalorder %v2482_v25, 0 }
0x1298   :  { %v2484_v55 = vsel %vm2483_vm11, %v2482_v25, 0 }
0x1299   :  { %v2485_v63 = vshrl.u32 %v2484_v55, 5  ;;  %v2486_v39 = vand.u32 31, %v2484_v55 }
0x129a   :  { %v5941_v43 = vpop.permute.xlu0 %3563 }
0x129b   :  { %6959 = vst [vmem:[#allocation17_spill] sm:$0xff] %v5941_v43  ;;  %v2487_v47 = vsub.s32 32, %v2486_v39  ;;  %v2498_v1 = vshll.u32 %v6949_v62, %v2486_v39  ;;  %v2501_v25 = vshll.u32 %v6950_v15, %v2486_v39  ;;  %vm2507_vm1 = vcmp.lt.s32.totalorder %v2485_v63, 4 }
0x129c   :  { %v2489_v49 = vshll.u32 %v6960_v41, %v2486_v39  ;;  %v2492_v40 = vshll.u32 %v6947_v0, %v2486_v39  ;;  %v2495_v33 = vshll.u32 %v6948_v2, %v2486_v39  ;;  %vm2504_vm2 = vcmp.lt.s32.totalorder %v2485_v63, 1 }
0x129d   :  { %v2499_v5 = vshrl.u32 %v6950_v15, %v2487_v47  ;;  %v2502_v32 = vshrl.u32 %v6951_v14, %v2487_v47  ;;  %v2490_v55 = vshrl.u32 %v6947_v0, %v2487_v47  ;;  %v2493_v21 = vshrl.u32 %v6948_v2, %v2487_v47 }
0x129e   :  { %v2496_v60 = vshrl.u32 %v6949_v62, %v2487_v47  ;;  %v2488_v11 = vshrl.u32 %v6960_v41, %v2487_v47  ;;  %vm2505_vm3 = vcmp.lt.s32.totalorder %v2485_v63, 2  ;;  %vm2506_vm4 = vcmp.lt.s32.totalorder %v2485_v63, 3 }
0x129f   :  { %v2500_v48 = vor.u32 %v2499_v5, %v2498_v1  ;;  %v2503_v30 = vor.u32 %v2502_v32, %v2501_v25  ;;  %v1565_v51 = vpop.permute.xlu0 %1564  ;;  %v2491_v15 = vor.u32 %v2490_v55, %v2489_v49  ;;  %v2494_v46 = vor.u32 %v2493_v21, %v2492_v40 }
0x12a0   :  { %v1570_v14 = vrot.slane %v1565_v51, %v5085_v16  ;;  %v2497_v27 = vor.u32 %v2496_v60, %v2495_v33 }
0x12a1   :  { %v2513_v43 = vsel %vm2507_vm1, %v2500_v48, 920167782  ;;  %v2517_v0 = vsel %vm2507_vm1, %v2503_v30, 1326507024  ;;  %v2512_v25 = vsel %vm2504_vm2, %v2491_v15, %v2494_v46  ;;  %v2508_v47 = vsel %vm2504_vm2, %v2488_v11, %v2491_v15 }
0x12a2   :  { %v1571_v39 = vmul.f32 %v5088_v20, %v1570_v14  ;;  %v2509_v1 = vsel %vm2507_vm1, %v2497_v27, 2102212464  ;;  %v2514_v5 = vsel %vm2506_vm4, %v2497_v27, %v2513_v43  ;;  %v2516_v51 = vsel %vm2504_vm2, %v2494_v46, %v2497_v27 }
0x12a3   :  { %v1751_v32 = vpop.permute.xlu0 %1750  ;;  %v2515_v49 = vsel %vm2505_vm3, %v2512_v25, %v2514_v5  ;;  %v2518_v40 = vsel %vm2506_vm4, %v2500_v48, %v2517_v0  ;;  %v2510_v33 = vsel %vm2506_vm4, %v2494_v46, %v2509_v1  ;;  %v1637_v43 = vmul.f32 %v5090_v22, %v1604_v34 }
0x12a4   :  { %v1582_v55 = vsub.f32 %v1571_v39, %v1581_v38  ;;  %v5962_v21 = vadd.f32 %v1751_v32, %v5734_v57  ;;  %v2519_v30 = vsel %vm2505_vm3, %v2516_v51, %v2518_v40  ;;  %v1616_v27 = vadd.f32 %v1615_v35, %v1605_v24 }
0x12a5   :  { %v5965_v60 = vmul.u32.u64.low %v2520_v7, %v2519_v30  ;;  %v5966_v62 = vmul.u32.u64.high %v2520_v7, %v2519_v30, %v5965_v60  ;;  %v5968_v14 = vmul.u32.u64.low %v2520_v7, %v2515_v49  ;;  %v5969_v2 = vmul.u32.u64.high %v2520_v7, %v2515_v49, %v5968_v14 }
0x12a6   :  { %v1638_v15 = vmul.f32 %v1614_v44, %v1582_v55  ;;  %1775 = vst.msk [vmem:[#allocation3 + $0x2] sm:$0x1] %vm630_vm7, %v5962_v21  ;;  %v1665_v0 = vadd.f32 %v1664_v42, %v1663_v19  ;;  %v2511_v57 = vsel %vm2505_vm3, %v2508_v47, %v2510_v33  ;;  %v1636_v46 = vadd.f32 %v5834_v29, %v1616_v27 }
0x12a7   :  { %vm2529_vm5 = vc.u32 %v5966_v62, %v5968_v14  ;;  %v2530_v11 = vadd.s32 1, %v5969_v2  ;;  %v2527_v34 = vmul.u32 %v2520_v7, %v2511_v57  ;;  %v6015_v40 = vmul.f32 0.05, %v5248_v10 }
0x12a8   :  { %v1639_v48 = vadd.f32 %v1638_v15, %v1637_v43  ;;  %v1688_v38 = vadd.f32 %v5906_v17, %v1665_v0  ;;  %v1693_v44 = vmul.f32 %v5866_v50, %v1636_v46  ;;  %v1706_v1 = vmul.f32 %v5881_v56, %v1636_v46 }
0x12a9   :  { %v2531_v42 = vsel %vm2529_vm5, %v2530_v11, %v5969_v2  ;;  %v2528_v55 = vadd.s32 %v5968_v14, %v5966_v62  ;;  %v6024_v27 = vmul.f32 %v6015_v40, %v6015_v40  ;;  %v6029_v14 = vsub.f32 1.0, %v5809_v3 }
0x12aa   :  { %v1662_v39 = vadd.f32 %v5862_v45, %v1639_v48  ;;  %v2532_v17 = vadd.s32 %v2531_v42, %v2527_v34  ;;  %v1700_v24 = vmul.f32 %v1688_v38, %v5743_v54  ;;  %v1713_v35 = vmul.f32 %v1688_v38, %v5745_v53 }
0x12ab   :  { %v1719_v45 = vmul.f32 %v5931_v26, %v1636_v46  ;;  %v6000_v53 = vmul.f32 %v5910_v37, %v5694_v9  ;;  %v1892_v37 = vmul.f32 %v5876_v52, %v5694_v9  ;;  %v1883_v48 = vmul.f32 %v5760_v58, %v5694_v9 }
0x12ac   :  { %v1698_v19 = vmul.f32 %v5916_v12, %v1662_v39  ;;  %v1711_v63 = vmul.f32 %v5885_v23, %v1662_v39  ;;  %v1724_v29 = vmul.f32 %v5898_v8, %v1662_v39  ;;  %v2533_v50 = vadd.s32 536870912, %v2532_v17 }
0x12ad   :  { %v1726_v23 = vmul.f32 %v1688_v38, %v5747_v59  ;;  %v2153_v60 = vsub.f32 0.0, %v6000_v53  ;;  %v2187_v11 = vmul.f32 %v6029_v14, %v1883_v48 }
0x12ae   :  { %v1699_v7 = vadd.f32 %v1698_v19, %v1693_v44  ;;  %v1712_v25 = vadd.f32 %v1711_v63, %v1706_v1  ;;  %v1725_v2 = vadd.f32 %v1724_v29, %v1719_v45  ;;  %v2534_v12 = vshrl.u32 %v2533_v50, 30  ;;  %v6963_v50 = vld [vmem:[#allocation6_spill] sm:$0xff] }
0x12af   :  { %v6961_v1 = vand.u32 2147483647, %v5913_v13  ;;  %v3557_v19 = vrot.slane %v5893_v18, %v5085_v16  ;;  %v2110_v29 = vsub.f32 0.0, %v1892_v37 }
0x12b0   :  { %v5989_v5 = vadd.f32 %v1700_v24, %v1699_v7  ;;  %v5991_v56 = vadd.f32 %v1713_v35, %v1712_v25  ;;  %v2535_v54 = vshll.u32 %v2534_v12, 30  ;;  %v6002_v8 = vadd.f32 %v1726_v23, %v1725_v2  ;;  %v6962_v24 = vld [vmem:[#allocation17_spill] sm:$0xff] }
0x12b1   :  { %v2558_v34 = vsub.s32 4, %v2534_v12  ;;  %vm2473_vm10 = vcmp.le.f32.partialorder %v6961_v1, 0.7853982  ;;  %v3569_v35 = vrot.slane %v6962_v24, %v5085_v16  ;;  %v3558_v7 = vmul.f32 %v5090_v22, %v3557_v19 }
0x12b2   :  { %1777 = vrot.lane.b32.xlu1 %v5989_v5, %s5048_s28  ;;  %1782 = vrot.lane.b32.xlu0 %v5991_v56, %s5049_s29  ;;  %v2536_v26 = vsub.s32 %v2532_v17, %v2535_v54  ;;  %v3542_v17 = vrot.slane %v5889_v36, %v5085_v16 }
0x12b3   :  { %v2559_v42 = vsel %vm2474_vm9, %v2558_v34, %v2534_v12  ;;  %v3570_v2 = vmul.f32 %v6963_v50, %v3569_v35 }
0x12b4   :  { %v2538_v59 = vsub.s32 0, %v2536_v26  ;;  %v2561_v45 = vsel %vm2473_vm10, 0, %v2559_v42  ;;  %v3543_v18 = vmul.f32 %v5088_v20, %v3542_v17 }
0x12b5   :  { %v2565_v25 = vadd.s32 3, %v2561_v45  ;;  %v2669_v23 = vand.u32 3, %v2561_v45 }
0x12b6   :  { %2210 = vrot.lane.b32.xlu0 %v6000_v53, %s5020_s11  ;;  %1787 = vrot.lane.b32.xlu1 %v6002_v8, %s5050_s30  ;;  %v4704_v32 = vmin.u32 %v2538_v59, %v2536_v26  ;;  %v3559_v12 = vadd.f32 %v3558_v7, %v3543_v18 }
0x12b7   :  { %v2566_v36 = vand.u32 3, %v2565_v25  ;;  %vm2674_vm11 = vcmp.eq.s32.totalorder %v2669_v23, 2  ;;  %vm2671_vm2 = vcmp.eq.s32.totalorder %v2669_v23, 0  ;;  %vm2670_vm4 = vcmp.lt.s32.totalorder %v2669_v23, 2 }
0x12b8   :  { %v2540_v47 = vclz %v4704_v32  ;;  %v3571_v54 = vadd.f32 %v3570_v2, %v3559_v12  ;;  %v6966_v12 = vmov 0  }
0x12b9   :  { %vm2571_vm1 = vcmp.eq.s32.totalorder %v2566_v36, 2  ;;  %vm2568_vm3 = vcmp.eq.s32.totalorder %v2566_v36, 0  ;;  %vm2567_vm5 = vcmp.lt.s32.totalorder %v2566_v36, 2 }
0x12ba   :  { %2455 = vrot.lane.b32.xlu0 %v5908_v4, %s5024_s0  ;;  %1799 = vperm.xlu1 %4863, %v5991_v56   ;;  %v4705_v49 = vadd.s32 4294967294, %v2540_v47 }
0x12bc   :  { %vm4706_vm8 = vcmp.lt.s32.totalorder %v4705_v49, 0 }
0x12bd   :  { %v2543_v51 = vsel %vm4706_vm8, 0, %v4705_v49  ;;  %vm2564_vm8 = vweird.f32 %v5913_v13 }
0x12be   :  { %2134 = vperm.xlu0 %4861, %v1892_v37   ;;  %1805 = vperm.xlu1 %4863, %v6002_v8   ;;  %v2544_v33 = vsub.s32 32, %v2543_v51  ;;  %v2548_v30 = vsub.s32 4294967266, %v2543_v51  ;;  %v2545_v52 = vshll.u32 %v2536_v26, %v2543_v51 }
0x12c0   :  { %v2546_v43 = vshrl.u32 %v2528_v55, %v2544_v33  ;;  %v2549_v15 = vadd.s32 127, %v2548_v30 }
0x12c2   :  { %4867 = vset.pattern.permute.xlu0 %v6946_v61  ;;  %2236 = vrot.lane.b32.xlu1 %v1892_v37, %s5031_s24  ;;  %v2547_v0 = vor.u32 %v2546_v43, %v2545_v52  ;;  %v2550_v62 = vshll.u32 %v2549_v15, 23  ;;  %v6964_v52 = vld [vmem:[#allocation14_spill] sm:$0xff] }
0x12c3   :  { %2156 = vperm.xlu0 %4867, %v2153_v60   ;;  %4864 = vset.pattern.permute.xlu1 %v6945_v31 }
0x12c4   :  { %v2551_v57 = vor.u32 4788187, %v2550_v62  ;;  %v2554_v38 = vcvt.s32.f32 %v2547_v0 }
0x12c6   :  { %3011 = vrot.lane.b32.xlu1 %v6024_v27, %s5020_s11  ;;  %v2552_v46 = vand.u32 2147483647, %v2551_v57 }
0x12c7   :  { %4868 = vset.pattern.permute.xlu0 %v6943_v6 }
0x12c8   :  { %1894 = vperm.xlu0 %4868, %v5760_v58   ;;  %v2555_v39 = vmul.f32 %v2554_v38, %v2552_v46 }
0x12ca   :  { %3015 = vrot.lane.b32.xlu1 %v6024_v27, %s5031_s24  ;;  %v2556_v44 = vxor.u32 2147483648, %v2555_v39 }
0x12cc   :  { %2190 = vperm.xlu0 %4868, %v2187_v11   ;;  %v2557_v58 = vsel %vm2474_vm9, %v2556_v44, %v2555_v39 }
0x12cd   :  { %v2560_v63 = vsel %vm2473_vm10, %v5913_v13, %v2557_v58  ;;  %v6965_v13 = vld [vmem:[#allocation9_spill] sm:$0xff] }
0x12ce   :  { %2459 = vrot.lane.b32.xlu1 %v5908_v4, %s5021_s12  ;;  %4965 = vcosq.f32 %v2560_v63 }
0x12cf   :  { %4967 = vsinq.f32 %v2560_v63 }
0x12d0   :  { %4870 = vset.pattern.permute.xlu0 %v6954_v28 }
0x12d2   :  { %2113 = vperm.xlu1 %4864, %v2110_v29  }
0x12d6   :  { %4865 = vset.pattern.permute.xlu1 %v6946_v61 }
0x12d7   :  { %2123 = vperm.xlu1 %4865, %v6000_v53  }
0x12d8   :  { %v4966_v26 = vpop.eup %4965 }
0x12d9   :  { %v4968_v59 = vpop.eup %4967  ;;  %v2572_v32 = vxor.u32 2147483648, %v4966_v26 }
0x12da   :  { %v2569_v47 = vxor.u32 2147483648, %v4968_v59 }
0x12db   :  { %3573 = vrot.lane.b32.xlu1 %v3571_v54, %s5024_s0  ;;  %v2676_v37 = vsel %vm2674_vm11, %v2572_v32, %v4968_v59  ;;  %v2573_v49 = vsel %vm2571_vm1, %v2572_v32, %v4968_v59  ;;  %v6967_v54 = vld [vmem:[#allocation15_spill] sm:$0xff]  ;;  %v6968_v59 = vld [vmem:[#allocation13_spill] sm:$0xff] }
0x12dc   :  { %4866 = vset.pattern.permute.xlu1 %v6943_v6  ;;  %v2673_v51 = vsel %vm2671_vm2, %v4966_v26, %v2569_v47  ;;  %v2570_v53 = vsel %vm2568_vm3, %v4966_v26, %v2569_v47  ;;  %v6103_v32 = vmul.f32 0.05, %v6968_v59 }
0x12dd   :  { %v2677_v55 = vsel %vm2670_vm4, %v2673_v51, %v2676_v37  ;;  %v2574_v33 = vsel %vm2567_vm5, %v2570_v53, %v2573_v49 }
0x12de   :  { %v6059_v30 = vsel %vm2564_vm8, nan, %v2677_v55  ;;  %v6061_v60 = vsel %vm2564_vm8, nan, %v2574_v33  ;;  %6969 = vst [vmem:[#allocation17_spill] sm:$0xff] %v6103_v32  ;;  %v6111_v49 = vmul.f32 %v6103_v32, %v6103_v32 }
0x12df   :  { %2144 = vperm.xlu1 %4866, %v1883_v48  }
0x12e3   :  { %2168 = vperm.xlu1 %4866, %v5809_v3  }
0x12e7   :  { %2178 = vperm.xlu1 %4866, %v6964_v52   ;;  %v6970_v52 = vmov 2475754826  }
0x1324   :  { %v1783_v43 = vpop.permute.xlu0 %1782  ;;  %v1778_v15 = vpop.permute.xlu1 %1777 }
0x1325   :  { %1780 = vst.msk [vmem:[#allocation3 + $0x2] sm:$0x1] %vm636_vm12, %v1778_v15 }
0x1326   :  { %1785 = vst.msk [vmem:[#allocation3 + $0x2] sm:$0x1] %vm642_vm13, %v1783_v43 }
0x1328   :  { %v1788_v0 = vpop.permute.xlu1 %1787  ;;  %v2211_v62 = vpop.permute.xlu0 %2210 }
0x1329   :  { %1790 = vst.msk [vmem:[#allocation3 + $0x2] sm:$0x1] %vm648_vm14, %v1788_v0  ;;  %v6971_v0 = vmov 2131351028  }
0x132a   :  { %1791 = vst.msk [vmem:[#allocation3 + $0x2] sm:$0x1] %vm650_vm15, %v6965_v13 }
0x132c   :  { %v6070_v57 = vpop.permute.xlu0 %2455 }
0x1339   :  { %v6072_v48 = vpop.permute.xlu1 %1799 }
0x133d   :  { %v6074_v3 = vpop.permute.xlu0 %2134  ;;  %v6076_v46 = vpop.permute.xlu1 %1805 }
0x1341   :  { %v2237_v38 = vpop.permute.xlu1 %2236 }
0x1342   :  { %v6078_v11 = vpop.permute.xlu0 %2156  ;;  %v2239_v7 = vmul.f32 %v2237_v38, %v6029_v14  ;;  %v6972_v38 = vmov 2102212464  }
0x1345   :  { %v3012_v39 = vpop.permute.xlu1 %3011 }
0x1346   :  { %v3014_v44 = vadd.f32 %v3012_v39, %v6024_v27  ;;  %v2213_v27 = vmul.f32 %v2211_v62, %v6029_v14 }
0x1347   :  { %v1895_v34 = vpop.permute.xlu0 %1894 }
0x1348   :  { %v1900_v1 = vrot.slane %v1895_v34, %v5085_v16 }
0x1349   :  { %v3016_v58 = vpop.permute.xlu1 %3015 }
0x134a   :  { %v3018_v42 = vadd.f32 %v3016_v58, %v3014_v44  ;;  %v6083_v63 = vmul.f32 %v1900_v1, %v5694_v9  ;;  %v6973_v44 = vmov 920167782  }
0x134b   :  { %v2191_v19 = vpop.permute.xlu0 %2190 }
0x134c   :  { %vm3019_vm9 = vcmp.gt.f32.partialorder %v3018_v42, 0.0  ;;  %v2196_v29 = vrot.slane %v2191_v19, %v5085_v16 }
0x134d   :  { %v3020_v17 = vsel %vm3019_vm9, %v3018_v42, 1.0  ;;  %v2460_v2 = vpop.permute.xlu1 %2459 }
0x134e   :  { %4969 = vrsqrt.f32 %v3020_v17  ;;  %v2197_v24 = vmul.f32 %v2196_v29, %v6083_v63  ;;  %v6100_v26 = vmul.f32 %v2460_v2, %v6967_v54 }
0x1350   :  { %v2202_v35 = vrot.slane %v2197_v24, %v5085_v16 }
0x1352   :  { %2203 = vrot.lane.b32.xlu1 %v2202_v35, %s5038_s25 }
0x1356   :  { %2216 = vperm.xlu1 %4866, %v2213_v27  }
0x1358   :  { %v6090_v45 = vpop.eup %4969 }
0x1359   :  { %v6094_v9 = vmul.f32 %v6090_v45, %v3018_v42  ;;  %v6974_v42 = vmov 1326507024  }
0x135a   :  { %2242 = vperm.xlu1 %4866, %v2239_v7  }
0x135b   :  { %v3045_v25 = vand.u32 2139095040, %v6094_v9  ;;  %v3042_v14 = vand.u32 2147483647, %v6094_v9  ;;  %vm3044_vm8 = vcmp.lt.s32.totalorder %v6094_v9, 0 }
0x135d   :  { %v3046_v18 = vshrl.u32 %v3045_v25, 23  ;;  %v3049_v51 = vand.u32 8388607, %v3042_v14  ;;  %vm3043_vm9 = vcmp.le.f32.partialorder %v3042_v14, 0.7853982 }
0x135e   :  { %4869 = vset.pattern.permute.xlu1 %v6966_v12 }
0x135f   :  { %v4711_v23 = vadd.s32 4294967169, %v3046_v18  ;;  %2260 = vperm.xlu1 %4869, %v5989_v5   ;;  %v3050_v29 = vor.u32 8388608, %v3049_v51 }
0x1361   :  { %v3052_v36 = vadd.s32 1, %v4711_v23 }
0x1363   :  { %vm3053_vm10 = vcmp.gt.s32.totalorder %v3052_v36, 0  ;;  %2806 = vrot.lane.b32.xlu1 %v6100_v26, %s5031_s24 }
0x1364   :  { %v3054_v47 = vsel %vm3053_vm10, %v3052_v36, 0  ;;  %4873 = vset.pattern.permute.xlu1 %v6954_v28 }
0x1365   :  { %v3056_v37 = vand.u32 31, %v3054_v47  ;;  %v3055_v55 = vshrl.u32 %v3054_v47, 5 }
0x1367   :  { %v3057_v53 = vsub.s32 32, %v3056_v37  ;;  %3581 = vrot.lane.b32.xlu1 %v6111_v49, %s5020_s11  ;;  %v3059_v33 = vshll.u32 %v6960_v41, %v3056_v37  ;;  %v3062_v43 = vshll.u32 %v6970_v52, %v3056_v37  ;;  %v3065_v62 = vshll.u32 %v6971_v0, %v3056_v37 }
0x1368   :  { %v3068_v34 = vshll.u32 %v6972_v38, %v3056_v37  ;;  %v3071_v58 = vshll.u32 %v6973_v44, %v3056_v37  ;;  %vm3074_vm11 = vcmp.lt.s32.totalorder %v3055_v55, 1  ;;  %vm3077_vm1 = vcmp.lt.s32.totalorder %v3055_v55, 4 }
0x1369   :  { %v3060_v15 = vshrl.u32 %v6970_v52, %v3057_v53  ;;  %v3063_v13 = vshrl.u32 %v6971_v0, %v3057_v53  ;;  %v3066_v39 = vshrl.u32 %v6972_v38, %v3057_v53  ;;  %v3069_v1 = vshrl.u32 %v6973_v44, %v3057_v53 }
0x136a   :  { %v3072_v19 = vshrl.u32 %v6974_v42, %v3057_v53  ;;  %v3058_v23 = vshrl.u32 %v6960_v41, %v3057_v53  ;;  %vm3076_vm2 = vcmp.lt.s32.totalorder %v3055_v55, 3  ;;  %vm3075_vm3 = vcmp.lt.s32.totalorder %v3055_v55, 2 }
0x136b   :  { %v3061_v17 = vor.u32 %v3060_v15, %v3059_v33  ;;  %v3064_v24 = vor.u32 %v3063_v13, %v3062_v43  ;;  %v3067_v35 = vor.u32 %v3066_v39, %v3065_v62  ;;  %3585 = vrot.lane.b32.xlu1 %v6111_v49, %s5031_s24  ;;  %v3070_v27 = vor.u32 %v3069_v1, %v3068_v34 }
0x136c   :  { %v3073_v7 = vor.u32 %v3072_v19, %v3071_v58  ;;  %v3090_v33 = vshll.u32 %v3050_v29, 8 }
0x136d   :  { %v3079_v25 = vsel %vm3077_vm1, %v3067_v35, 2102212464  ;;  %v3082_v18 = vsel %vm3074_vm11, %v3061_v17, %v3064_v24  ;;  %v3086_v2 = vsel %vm3074_vm11, %v3064_v24, %v3067_v35  ;;  %v3083_v36 = vsel %vm3077_vm1, %v3070_v27, 920167782 }
0x136e   :  { %v3087_v47 = vsel %vm3077_vm1, %v3073_v7, 1326507024  ;;  %v3084_v37 = vsel %vm3076_vm2, %v3067_v35, %v3083_v36  ;;  %v3078_v43 = vsel %vm3074_vm11, %v3058_v23, %v3061_v17  ;;  %v3080_v15 = vsel %vm3076_vm2, %v3064_v24, %v3079_v25 }
0x136f   :  { %v3088_v51 = vsel %vm3076_vm2, %v3070_v27, %v3087_v47  ;;  %3029 = vrot.lane.b32.xlu1 %v6090_v45, %s5021_s12  ;;  %v3085_v13 = vsel %vm3075_vm3, %v3082_v18, %v3084_v37  ;;  %v3081_v53 = vsel %vm3075_vm3, %v3078_v43, %v3080_v15  ;;  %v6975_v25 = vmov 2  }
0x1370   :  { %v3089_v62 = vsel %vm3075_vm3, %v3086_v2, %v3088_v51  ;;  %v6135_v1 = vmul.u32.u64.low %v3090_v33, %v3085_v13  ;;  %v6136_v58 = vmul.u32.u64.high %v3090_v33, %v3085_v13, %v6135_v1  ;;  %v3097_v19 = vmul.u32 %v3090_v33, %v3081_v53 }
0x1371   :  { %v6132_v39 = vmul.u32.u64.low %v3090_v33, %v3089_v62  ;;  %v6133_v34 = vmul.u32.u64.high %v3090_v33, %v3089_v62, %v6132_v39 }
0x1372   :  { %v3100_v55 = vadd.s32 1, %v6136_v58 }
0x1373   :  { %2278 = vperm.xlu1 %4873, %v5991_v56   ;;  %vm3099_vm4 = vc.u32 %v6133_v34, %v6135_v1  ;;  %v3098_v37 = vadd.s32 %v6135_v1, %v6133_v34 }
0x1374   :  { %v3101_v29 = vsel %vm3099_vm4, %v3100_v55, %v6136_v58 }
0x1375   :  { %v3102_v17 = vadd.s32 %v3101_v29, %v3097_v19 }
0x1377   :  { %4874 = vset.pattern.permute.xlu1 %v6966_v12  ;;  %v3103_v24 = vadd.s32 536870912, %v3102_v17 }
0x1378   :  { %2286 = vperm.xlu1 %4874, %v6002_v8  }
0x1379   :  { %v3104_v35 = vshrl.u32 %v3103_v24, 30 }
0x137b   :  { %v3105_v27 = vshll.u32 %v3104_v35, 30  ;;  %v3128_v19 = vsub.s32 4, %v3104_v35 }
0x137c   :  { %4875 = vset.pattern.permute.xlu1 %v6954_v28 }
0x137d   :  { %2291 = vperm.xlu1 %4875, %v6002_v8   ;;  %v3106_v7 = vsub.s32 %v3102_v17, %v3105_v27  ;;  %v3129_v34 = vsel %vm3044_vm8, %v3128_v19, %v3104_v35 }
0x137e   :  { %v3131_v24 = vsel %vm3043_vm9, 0, %v3129_v34 }
0x137f   :  { %v3108_v18 = vsub.s32 0, %v3106_v7  ;;  %v3135_v27 = vadd.s32 3, %v3131_v24 }
0x1381   :  { %4876 = vset.pattern.permute.xlu1 %v6975_v25  ;;  %v4712_v2 = vmin.u32 %v3108_v18, %v3106_v7  ;;  %v3136_v18 = vand.u32 3, %v3135_v27 }
0x1383   :  { %v3110_v23 = vclz %v4712_v2  ;;  %vm3141_vm11 = vcmp.eq.s32.totalorder %v3136_v18, 2  ;;  %vm3138_vm2 = vcmp.eq.s32.totalorder %v3136_v18, 0  ;;  %vm3137_vm4 = vcmp.lt.s32.totalorder %v3136_v18, 2 }
0x1385   :  { %v4713_v36 = vadd.s32 4294967294, %v3110_v23 }
0x1387   :  { %vm4714_vm5 = vcmp.lt.s32.totalorder %v4713_v36, 0 }
0x1388   :  { %v3113_v47 = vsel %vm4714_vm5, 0, %v4713_v36  ;;  %vm3134_vm5 = vweird.f32 %v6094_v9 }
0x1389   :  { %v3114_v51 = vsub.s32 32, %v3113_v47  ;;  %v3118_v33 = vsub.s32 4294967266, %v3113_v47  ;;  %v3115_v43 = vshll.u32 %v3106_v7, %v3113_v47  ;;  %v3239_v7 = vand.u32 3, %v3131_v24 }
0x138b   :  { %v3116_v15 = vshrl.u32 %v3098_v37, %v3114_v51  ;;  %v3119_v13 = vadd.s32 127, %v3118_v33  ;;  %vm3244_vm10 = vcmp.eq.s32.totalorder %v3239_v7, 2  ;;  %vm3241_vm1 = vcmp.eq.s32.totalorder %v3239_v7, 0 }
0x138c   :  { %vm3240_vm3 = vcmp.lt.s32.totalorder %v3239_v7, 2 }
0x138d   :  { %v3117_v62 = vor.u32 %v3116_v15, %v3115_v43  ;;  %v3120_v39 = vshll.u32 %v3119_v13, 23 }
0x138f   :  { %v3121_v8 = vor.u32 4788187, %v3120_v39  ;;  %v3124_v53 = vcvt.s32.f32 %v3117_v62  ;;  %v6157_v62 = vpop.permute.xlu1 %2113 }
0x1391   :  { %v3122_v58 = vand.u32 2147483647, %v3121_v8 }
0x1393   :  { %v3125_v55 = vmul.f32 %v3124_v53, %v3122_v58  ;;  %v6159_v39 = vpop.permute.xlu1 %2123 }
0x1395   :  { %v3126_v29 = vxor.u32 2147483648, %v3125_v55 }
0x1397   :  { %v3127_v17 = vsel %vm3044_vm8, %v3126_v29, %v3125_v55  ;;  %v3574_v8 = vpop.permute.xlu1 %3573 }
0x1398   :  { %v3130_v1 = vsel %vm3043_vm9, %v6094_v9, %v3127_v17 }
0x1399   :  { %4971 = vcosq.f32 %v3130_v1 }
0x139a   :  { %4973 = vsinq.f32 %v3130_v1 }
0x139b   :  { %v6161_v58 = vpop.permute.xlu1 %2144 }
0x139f   :  { %v6163_v53 = vpop.permute.xlu1 %2168 }
0x13a3   :  { %v4972_v2 = vpop.eup %4971  ;;  %v6165_v55 = vpop.permute.xlu1 %2178 }
0x13a4   :  { %v4974_v23 = vpop.eup %4973  ;;  %v3142_v36 = vxor.u32 2147483648, %v4972_v2 }
0x13a5   :  { %v3139_v47 = vxor.u32 2147483648, %v4974_v23 }
0x13a6   :  { %v3246_v37 = vsel %vm3244_vm10, %v3142_v36, %v4974_v23  ;;  %v3143_v51 = vsel %vm3141_vm11, %v3142_v36, %v4974_v23 }
0x13a7   :  { %v3243_v14 = vsel %vm3241_vm1, %v4972_v2, %v3139_v47  ;;  %v3140_v35 = vsel %vm3138_vm2, %v4972_v2, %v3139_v47  ;;  %v6181_v2 = vmul.f32 %v6070_v57, %v6967_v54  ;;  %v4990_v57 = vld [vmem:[%s6876_s1 + $0x3] sm:$0x1] }
0x13a8   :  { %v3247_v33 = vsel %vm3240_vm3, %v3243_v14, %v3246_v37  ;;  %v3144_v43 = vsel %vm3137_vm4, %v3140_v35, %v3143_v51 }
0x13a9   :  { %v6153_v15 = vsel %vm3134_vm5, nan, %v3247_v33  ;;  %v6155_v13 = vsel %vm3134_vm5, nan, %v3144_v43  ;;  %v6977_v33 = vld [vmem:[#allocation7_spill] sm:$0xff] }
0x13aa   :  { %6976 = vst [vmem:[#allocation6_spill] sm:$0xff] %v6155_v13 }
0x13c4   :  { %v6167_v19 = vpop.permute.xlu1 %2203 }
0x13d5   :  { %v2217_v9 = vpop.permute.xlu1 %2216 }
0x13d6   :  { %v2222_v29 = vrot.slane %v2217_v9, %v5085_v16 }
0x13d8   :  { %v2223_v17 = vmul.f32 %v2222_v29, %v6083_v63 }
0x13d9   :  { %v2243_v34 = vpop.permute.xlu1 %2242 }
0x13da   :  { %v2228_v1 = vrot.slane %v2223_v17, %v5085_v16  ;;  %v2248_v24 = vrot.slane %v2243_v34, %v5085_v16 }
0x13dc   :  { %v2249_v27 = vmul.f32 %v2248_v24, %v6083_v63  ;;  %2229 = vrot.lane.b32.xlu0 %v2228_v1, %s5038_s25  ;;  %v3502_v63 = vld [vmem:[%s6876_s1 + $0x6] sm:$0x1] }
0x13dd   :  { %v3576_v14 = vsub.f32 %v3502_v63, %v3574_v8 }
0x13de   :  { %v2254_v7 = vrot.slane %v2249_v27, %v5085_v16  ;;  %v6176_v18 = vpop.permute.xlu1 %2260 }
0x13df   :  { %v3577_v43 = vmul.f32 %v3576_v14, %v6977_v33 }
0x13e0   :  { %2255 = vrot.lane.b32.xlu0 %v2254_v7, %s5038_s25 }
0x13e1   :  { %v4034_v9 = vmul.f32 0.05, %v3577_v43 }
0x13e2   :  { %v6183_v23 = vpop.permute.xlu1 %2806 }
0x13e4   :  { %2780 = vrot.lane.b32.xlu0 %v6181_v2, %s5020_s11 }
0x13e6   :  { %v3582_v36 = vpop.permute.xlu1 %3581 }
0x13e7   :  { %v3584_v47 = vadd.f32 %v3582_v36, %v6111_v49  ;;  %v6978_v49 = vld [vmem:[#allocation8_spill] sm:$0xff] }
0x13e8   :  { %2265 = vperm.xlu0 %4870, %v5989_v5   ;;  %v4042_v8 = vrot.slane %v4034_v9, %v6978_v49 }
0x13ea   :  { %v3586_v37 = vpop.permute.xlu1 %3585  ;;  %v4049_v1 = vrot.slane %v4042_v8, %v6978_v49 }
0x13eb   :  { %v3588_v51 = vadd.f32 %v3586_v37, %v3584_v47 }
0x13ec   :  { %4871 = vset.pattern.permute.xlu0 %v6966_v12 }
0x13ed   :  { %vm3589_vm8 = vcmp.gt.f32.partialorder %v3588_v51, 0.0  ;;  %1812 = vperm.xlu0 %4871, %v4990_v57  }
0x13ee   :  { %v3590_v35 = vsel %vm3589_vm8, %v3588_v51, 1.0 }
0x13ef   :  { %4975 = vrsqrt.f32 %v3590_v35 }
0x13f1   :  { %3025 = vrot.lane.b32.xlu0 %v6090_v45, %s5024_s0 }
0x13f5   :  { %2273 = vperm.xlu0 %4871, %v5991_v56   ;;  %v2298_v56 = vmul.f32 0.05, %v5962_v21 }
0x13f9   :  { %v6201_v29 = vpop.eup %4975  ;;  %4872 = vset.pattern.permute.xlu0 %v6975_v25 }
0x13fa   :  { %v6205_v17 = vmul.f32 %v6201_v29, %v3588_v51  ;;  %1794 = vperm.xlu0 %4872, %v5989_v5  }
0x13fc   :  { %v3615_v34 = vand.u32 2139095040, %v6205_v17  ;;  %v6925_v24 = vand.u32 2147483647, %v6205_v17  ;;  %vm3614_vm5 = vcmp.lt.s32.totalorder %v6205_v17, 0 }
0x13fe   :  { %v3616_v27 = vshrl.u32 %v3615_v34, 23  ;;  %4050 = vrot.lane.b32.xlu0 %v4049_v1, %s5026_s15  ;;  %v3619_v36 = vand.u32 8388607, %v6925_v24 }
0x1400   :  { %v4719_v7 = vadd.s32 4294967169, %v3616_v27  ;;  %v3620_v47 = vor.u32 8388608, %v3619_v36 }
0x1402   :  { %v3622_v63 = vadd.s32 1, %v4719_v7  ;;  %2300 = vrot.lane.b32.xlu0 %v2298_v56, %s5044_s26  ;;  %v3660_v43 = vshll.u32 %v3620_v47, 8 }
0x1404   :  { %vm3623_vm9 = vcmp.gt.s32.totalorder %v3622_v63, 0 }
0x1405   :  { %v3624_v5 = vsel %vm3623_vm9, %v3622_v63, 0 }
0x1406   :  { %v3626_v37 = vand.u32 31, %v3624_v5  ;;  %v3625_v51 = vshrl.u32 %v3624_v5, 5 }
0x1408   :  { %v3627_v14 = vsub.s32 32, %v3626_v37  ;;  %v3638_v57 = vshll.u32 %v6972_v38, %v3626_v37  ;;  %v3641_v35 = vshll.u32 %v6973_v44, %v3626_v37  ;;  %v3629_v34 = vshll.u32 %v6960_v41, %v3626_v37 }
0x1409   :  { %v3632_v27 = vshll.u32 %v6970_v52, %v3626_v37  ;;  %v3635_v7 = vshll.u32 %v6971_v0, %v3626_v37  ;;  %vm3647_vm10 = vcmp.lt.s32.totalorder %v3625_v51, 4  ;;  %vm3644_vm11 = vcmp.lt.s32.totalorder %v3625_v51, 1 }
0x140a   :  { %v3639_v9 = vshrl.u32 %v6973_v44, %v3627_v14  ;;  %v3642_v8 = vshrl.u32 %v6974_v42, %v3627_v14  ;;  %v3630_v1 = vshrl.u32 %v6970_v52, %v3627_v14  ;;  %v3633_v56 = vshrl.u32 %v6971_v0, %v3627_v14 }
0x140b   :  { %v3636_v36 = vshrl.u32 %v6972_v38, %v3627_v14  ;;  %v3628_v24 = vshrl.u32 %v6960_v41, %v3627_v14  ;;  %vm3645_vm1 = vcmp.lt.s32.totalorder %v3625_v51, 2  ;;  %vm3646_vm2 = vcmp.lt.s32.totalorder %v3625_v51, 3 }
0x140c   :  { %v3640_v63 = vor.u32 %v3639_v9, %v3638_v57  ;;  %v3643_v5 = vor.u32 %v3642_v8, %v3641_v35  ;;  %v3631_v47 = vor.u32 %v3630_v1, %v3629_v34  ;;  %v3634_v33 = vor.u32 %v3633_v56, %v3632_v27 }
0x140d   :  { %v3637_v10 = vor.u32 %v3636_v36, %v3635_v7 }
0x140e   :  { %v3653_v13 = vsel %vm3647_vm10, %v3640_v63, 920167782  ;;  %v3657_v25 = vsel %vm3647_vm10, %v3643_v5, 1326507024  ;;  %v3652_v44 = vsel %vm3644_vm11, %v3631_v47, %v3634_v33  ;;  %v3648_v37 = vsel %vm3644_vm11, %v3628_v24, %v3631_v47 }
0x140f   :  { %v3649_v42 = vsel %vm3647_vm10, %v3637_v10, 2102212464  ;;  %v3654_v52 = vsel %vm3646_vm2, %v3637_v10, %v3653_v13  ;;  %v3656_v32 = vsel %vm3644_vm11, %v3634_v33, %v3637_v10  ;;  %v3658_v57 = vsel %vm3646_vm2, %v3640_v63, %v3657_v25 }
0x1410   :  { %v3650_v0 = vsel %vm3646_vm2, %v3634_v33, %v3649_v42  ;;  %v3655_v38 = vsel %vm3645_vm1, %v3652_v44, %v3654_v52  ;;  %v3659_v35 = vsel %vm3645_vm1, %v3656_v32, %v3658_v57 }
0x1411   :  { %v6227_v9 = vmul.u32.u64.low %v3660_v43, %v3655_v38  ;;  %v6228_v8 = vmul.u32.u64.high %v3660_v43, %v3655_v38, %v6227_v9  ;;  %v6230_v14 = vmul.u32.u64.low %v3660_v43, %v3659_v35  ;;  %v6231_v34 = vmul.u32.u64.high %v3660_v43, %v3659_v35, %v6230_v14 }
0x1412   :  { %v3651_v1 = vsel %vm3645_vm1, %v3648_v37, %v3650_v0 }
0x1413   :  { %v3670_v27 = vadd.s32 1, %v6228_v8  ;;  %v3667_v56 = vmul.u32 %v3660_v43, %v3651_v1  ;;  %vm3669_vm3 = vc.u32 %v6231_v34, %v6227_v9  ;;  %v3668_v0 = vadd.s32 %v6227_v9, %v6231_v34 }
0x1415   :  { %v3671_v13 = vsel %vm3669_vm3, %v3670_v27, %v6228_v8 }
0x1416   :  { %v3672_v10 = vadd.s32 %v3671_v13, %v3667_v56  ;;  %v6979_v56 = vand.u32 2147483647, %v6205_v17 }
0x1418   :  { %v3673_v24 = vadd.s32 536870912, %v3672_v10  ;;  %vm3613_vm8 = vcmp.le.f32.partialorder %v6979_v56, 0.7853982 }
0x141a   :  { %v3674_v42 = vshrl.u32 %v3673_v24, 30 }
0x141c   :  { %v3675_v52 = vshll.u32 %v3674_v42, 30  ;;  %v3698_v1 = vsub.s32 4, %v3674_v42 }
0x141e   :  { %v3676_v44 = vsub.s32 %v3672_v10, %v3675_v52  ;;  %v3699_v9 = vsel %vm3614_vm5, %v3698_v1, %v3674_v42 }
0x141f   :  { %v3701_v10 = vsel %vm3613_vm8, 0, %v3699_v9  ;;  %v2162_v9 = vrot.slane %v6078_v11, %v5085_v16 }
0x1420   :  { %v3678_v32 = vsub.s32 0, %v3676_v44  ;;  %v3705_v24 = vadd.s32 3, %v3701_v10  ;;  %v3809_v52 = vand.u32 3, %v3701_v10 }
0x1422   :  { %v4720_v25 = vmin.u32 %v3678_v32, %v3676_v44  ;;  %vm3814_vm9 = vcmp.eq.s32.totalorder %v3809_v52, 2  ;;  %vm3811_vm11 = vcmp.eq.s32.totalorder %v3809_v52, 0  ;;  %vm3810_vm2 = vcmp.lt.s32.totalorder %v3809_v52, 2 }
0x1424   :  { %v3680_v38 = vclz %v4720_v25 }
0x1426   :  { %v4721_v33 = vadd.s32 4294967294, %v3680_v38 }
0x1428   :  { %vm4722_vm4 = vcmp.lt.s32.totalorder %v4721_v33, 0 }
0x1429   :  { %v3683_v51 = vsel %vm4722_vm4, 0, %v4721_v33  ;;  %vm3704_vm4 = vweird.f32 %v6205_v17 }
0x142a   :  { %v3684_v7 = vsub.s32 32, %v3683_v51  ;;  %v3688_v36 = vsub.s32 4294967266, %v3683_v51  ;;  %v3685_v43 = vshll.u32 %v3676_v44, %v3683_v51  ;;  %v3706_v44 = vand.u32 3, %v3705_v24 }
0x142c   :  { %v3686_v63 = vshrl.u32 %v3668_v0, %v3684_v7  ;;  %v3689_v5 = vadd.s32 127, %v3688_v36  ;;  %vm3711_vm10 = vcmp.eq.s32.totalorder %v3706_v44, 2  ;;  %vm3708_vm1 = vcmp.eq.s32.totalorder %v3706_v44, 0 }
0x142d   :  { %vm3707_vm3 = vcmp.lt.s32.totalorder %v3706_v44, 2  ;;  %v2163_v44 = vmul.f32 %v5088_v20, %v2162_v9  ;;  %v1802_v9 = vmul.f32 %v5090_v22, %v6072_v48 }
0x142e   :  { %v3687_v47 = vor.u32 %v3686_v63, %v3685_v43  ;;  %v3690_v37 = vshll.u32 %v3689_v5, 23 }
0x1430   :  { %v3691_v57 = vor.u32 4788187, %v3690_v37  ;;  %v3694_v8 = vcvt.s32.f32 %v3687_v47 }
0x1432   :  { %v3692_v35 = vand.u32 2147483647, %v3691_v57 }
0x1434   :  { %v3695_v14 = vmul.f32 %v3694_v8, %v3692_v35  ;;  %v2150_v35 = vrot.slane %v6161_v58, %v5085_v16  ;;  %v2140_v8 = vrot.slane %v6074_v3, %v5085_v16  ;;  %v2184_v3 = vrot.slane %v6165_v55, %v5085_v16 }
0x1436   :  { %v3696_v27 = vxor.u32 2147483648, %v3695_v14  ;;  %v2151_v56 = vmul.f32 %v6963_v50, %v2150_v35  ;;  %v2164_v10 = vmul.f32 %v5090_v22, %v2150_v35 }
0x1438   :  { %v3697_v13 = vsel %vm3614_vm5, %v3696_v27, %v3695_v14  ;;  %v2129_v14 = vrot.slane %v6159_v39, %v5085_v16  ;;  %v2119_v27 = vrot.slane %v6157_v62, %v5085_v16  ;;  %v2174_v62 = vrot.slane %v6163_v53, %v5085_v16 }
0x1439   :  { %v3700_v34 = vsel %vm3613_vm8, %v6205_v17, %v3697_v13  ;;  %v6254_v17 = vpop.permute.xlu1 %3029  ;;  %v2141_v13 = vmul.f32 %v5088_v20, %v2140_v8  ;;  %v2165_v11 = vadd.f32 %v2164_v10, %v2163_v44 }
0x143a   :  { %4977 = vcosq.f32 %v3700_v34  ;;  %v2130_v58 = vmul.f32 %v6963_v50, %v2129_v14  ;;  %v2120_v39 = vmul.f32 %v5090_v22, %v2119_v27  ;;  %v2175_v55 = vmul.f32 %v5088_v20, %v2174_v62 }
0x143b   :  { %4979 = vsinq.f32 %v3700_v34  ;;  %v2152_v34 = vsub.f32 %v2141_v13, %v2151_v56  ;;  %v2233_v53 = vmul.f32 %v6963_v50, %v2174_v62 }
0x143d   :  { %v2279_v52 = vpop.permute.xlu1 %2278 }
0x1444   :  { %v4978_v32 = vpop.eup %4977 }
0x1445   :  { %v4980_v25 = vpop.eup %4979  ;;  %v3712_v38 = vxor.u32 2147483648, %v4978_v32 }
0x1446   :  { %v3709_v33 = vxor.u32 2147483648, %v4980_v25 }
0x1447   :  { %v3816_v51 = vsel %vm3814_vm9, %v3712_v38, %v4980_v25  ;;  %v3713_v0 = vsel %vm3711_vm10, %v3712_v38, %v4980_v25  ;;  %v2208_v25 = vmul.f32 %v2184_v3, %v2152_v34 }
0x1448   :  { %v3813_v42 = vsel %vm3811_vm11, %v4978_v32, %v3709_v33  ;;  %v3710_v7 = vsel %vm3708_vm1, %v4978_v32, %v3709_v33  ;;  %v2131_v32 = vadd.f32 %v2130_v58, %v2120_v39  ;;  %v2207_v33 = vmul.f32 %v5090_v22, %v2174_v62 }
0x1449   :  { %v3817_v36 = vsel %vm3810_vm2, %v3813_v42, %v3816_v51  ;;  %v3714_v43 = vsel %vm3707_vm3, %v3710_v7, %v3713_v0  ;;  %v2234_v42 = vmul.f32 %v2184_v3, %v2165_v11  ;;  %v2287_v7 = vpop.permute.xlu1 %2286  ;;  %v1808_v62 = vmul.f32 %v6963_v50, %v6076_v46 }
0x144a   :  { %v6242_v63 = vsel %vm3704_vm4, nan, %v3817_v36  ;;  %v6244_v5 = vsel %vm3704_vm4, nan, %v3714_v43  ;;  %v2185_v38 = vmul.f32 %v2184_v3, %v2131_v32  ;;  %v2209_v0 = vadd.f32 %v2208_v25, %v2207_v33 }
0x144b   :  { %v2235_v14 = vadd.f32 %v2234_v42, %v2233_v53  ;;  %v6981_v53 = vld [vmem:[#allocation16_spill] sm:$0xff] }
0x144c   :  { %v2186_v36 = vadd.f32 %v2185_v38, %v2175_v55 }
0x144d   :  { %v2292_v58 = vpop.permute.xlu1 %2291 }
0x144e   :  { %v2230_v47 = vpop.permute.xlu0 %2229  ;;  %v2206_v8 = vadd.f32 %v6167_v19, %v2186_v36  ;;  %v6980_v36 = vld [vmem:[#allocation12_spill] sm:$0xff] }
0x144f   :  { %v2232_v43 = vadd.f32 %v2230_v47, %v2209_v0 }
0x1450   :  { %v2263_v56 = vmul.f32 %v6176_v18, %v2206_v8  ;;  %v2289_v44 = vmul.f32 %v2287_v7, %v2206_v8 }
0x1451   :  { %v2294_v34 = vmul.f32 %v2292_v58, %v2232_v43  ;;  %v2281_v11 = vmul.f32 %v2279_v52, %v2232_v43 }
0x1452   :  { %v2256_v37 = vpop.permute.xlu0 %2255 }
0x1453   :  { %v2258_v13 = vadd.f32 %v2256_v37, %v2235_v14  ;;  %v2295_v25 = vadd.f32 %v2294_v34, %v2289_v44  ;;  %v2679_v14 = vsub.f32 1.0, %v6059_v30 }
0x1455   :  { %v2296_v19 = vmul.f32 %v2258_v13, %v6076_v46  ;;  %v2283_v7 = vmul.f32 %v2258_v13, %v6072_v48 }
0x1456   :  { %v6246_v57 = vpop.permute.xlu0 %2780 }
0x1457   :  { %v6287_v0 = vadd.f32 %v2296_v19, %v2295_v25 }
0x1467   :  { %v2266_v1 = vpop.permute.xlu0 %2265 }
0x1468   :  { %v2268_v27 = vmul.f32 %v2266_v1, %v2232_v43 }
0x146a   :  { %v2269_v3 = vadd.f32 %v2268_v27, %v2263_v56  ;;  %v2809_v27 = vmul.f32 %v6183_v23, %v2679_v14  ;;  %v6312_v56 = vmul.f32 %v6254_v17, %v6015_v40  ;;  %v4991_v23 = vld [vmem:[%s6876_s1 + $0x4] sm:$0x1]  ;;  %v2453_v17 = vmul.f32 %v5908_v4, %v6967_v54 }
0x146c   :  { %v1813_v24 = vpop.permute.xlu0 %1812 }
0x1470   :  { %v6271_v51 = vpop.permute.xlu0 %3025 }
0x1471   :  { %v6336_v58 = vmul.f32 %v6271_v51, %v6015_v40 }
0x1474   :  { %v2274_v35 = vpop.permute.xlu0 %2273 }
0x1475   :  { %v2276_v1 = vmul.f32 %v2274_v35, %v2206_v8 }
0x1477   :  { %v2282_v33 = vadd.f32 %v2281_v11, %v2276_v1 }
0x1479   :  { %v1795_v39 = vpop.permute.xlu0 %1794  ;;  %v6296_v52 = vadd.f32 %v2283_v7, %v2282_v33 }
0x147a   :  { %v1797_v10 = vmul.f32 %v5088_v20, %v1795_v39  ;;  %v2270_v47 = vmul.f32 %v2258_v13, %v1795_v39  ;;  %v2757_v13 = vmul.f32 %v2679_v14, %v2453_v17 }
0x147c   :  { %v1803_v32 = vadd.f32 %v1802_v9, %v1797_v10  ;;  %v6283_v18 = vadd.f32 %v2270_v47, %v2269_v3  ;;  %v2783_v9 = vmul.f32 %v6246_v57, %v2679_v14  ;;  %v2723_v57 = vsub.f32 0.0, %v6181_v2  ;;  %v6982_v47 = vld [vmem:[#allocation10_spill] sm:$0xff] }
0x147d   :  { %v4051_v37 = vpop.permute.xlu0 %4050 }
0x147e   :  { %v1809_v38 = vadd.f32 %v1808_v62, %v1803_v32  ;;  %2347 = vrot.lane.b32.xlu0 %v6283_v18, %s5048_s28 }
0x1480   :  { %v1815_v55 = vmul.f32 %v1813_v24, %v1809_v38 }
0x1481   :  { %v2301_v42 = vpop.permute.xlu0 %2300 }
0x1482   :  { %v1816_v46 = vadd.f32 %v1815_v55, %v6980_v36  ;;  %v6292_v35 = vadd.f32 %v2301_v42, %v6981_v53  ;;  %2357 = vrot.lane.b32.xlu0 %v6287_v0, %s5050_s30 }
0x1484   :  { %2344 = vst.msk [vmem:[#allocation3 + $0x3] sm:$0x1] %vm628_vm6, %v6292_v35  ;;  %v1817_v43 = vmul.f32 0.8333333, %v1816_v46 }
0x1486   :  { %2369 = vperm.xlu0 %4872, %v6296_v52   ;;  %v2304_v24 = vmul.f32 0.05, %v1817_v43 }
0x1488   :  { %v2312_v8 = vrot.slane %v2304_v24, %v6978_v49 }
0x148a   :  { %4878 = vset.pattern.permute.xlu0 %v6943_v6  ;;  %v2319_v48 = vrot.slane %v2312_v8, %v6978_v49 }
0x148b   :  { %2464 = vperm.xlu0 %4878, %v5908_v4   ;;  %v2680_v4 = vsub.f32 0.0, %v6100_v26 }
0x148c   :  { %2320 = vrot.lane.b32.xlu1 %v2319_v48, %s5046_s27 }
0x148f   :  { %2812 = vperm.xlu0 %4878, %v2809_v27  }
0x1490   :  { %2352 = vrot.lane.b32.xlu1 %v6296_v52, %s5049_s29 }
0x1493   :  { %3376 = vrot.lane.b32.xlu0 %v6312_v56, %s5031_s24 }
0x1494   :  { %2364 = vperm.xlu1 %4876, %v6283_v18   ;;  %4881 = vset.pattern.permute.xlu0 %v6946_v61 }
0x1497   :  { %3595 = vrot.lane.b32.xlu0 %v6201_v29, %s5024_s0 }
0x1498   :  { %2375 = vperm.xlu1 %4876, %v6287_v0  }
0x149b   :  { %2693 = vperm.xlu0 %4881, %v6181_v2  }
0x149c   :  { %4877 = vset.pattern.permute.xlu1 %v6966_v12 }
0x149d   :  { %2382 = vperm.xlu1 %4877, %v4991_v23  }
0x149f   :  { %4882 = vset.pattern.permute.xlu0 %v6945_v31 }
0x14a0   :  { %2704 = vperm.xlu0 %4882, %v6100_v26  }
0x14a1   :  { %4879 = vset.pattern.permute.xlu1 %v6943_v6 }
0x14a2   :  { %2760 = vperm.xlu1 %4879, %v2757_v13  }
0x14a4   :  { %4885 = vset.pattern.permute.xlu0 %v6943_v6 }
0x14a5   :  { %2738 = vperm.xlu0 %4885, %v6059_v30   ;;  %v6347_v30 = vadd.f32 %v4051_v37, %v6968_v59 }
0x14a6   :  { %2786 = vperm.xlu1 %4879, %v2783_v9  }
0x14a7   :  { %v6351_v51 = vmul.f32 0.05, %v6347_v30 }
0x14a9   :  { %4887 = vset.pattern.permute.xlu0 %v6966_v12  ;;  %v6356_v26 = vmul.f32 %v6351_v51, %v6351_v51 }
0x14aa   :  { %3350 = vrot.lane.b32.xlu1 %v6336_v58, %s5020_s11 }
0x14ab   :  { %4880 = vset.pattern.permute.xlu1 %v6945_v31 }
0x14ae   :  { %2683 = vperm.xlu1 %4880, %v2680_v4  }
0x14b2   :  { %3599 = vrot.lane.b32.xlu1 %v6201_v29, %s5021_s12 }
0x14b3   :  { %4883 = vset.pattern.permute.xlu1 %v6943_v6 }
0x14b6   :  { %2714 = vperm.xlu1 %4883, %v2453_v17  }
0x14ba   :  { %4884 = vset.pattern.permute.xlu1 %v6946_v61 }
0x14bb   :  { %2726 = vperm.xlu1 %4884, %v2723_v57  }
0x14bf   :  { %4151 = vrot.lane.b32.xlu1 %v6356_v26, %s5020_s11 }
0x14c0   :  { %4886 = vset.pattern.permute.xlu1 %v6943_v6 }
0x14c3   :  { %4155 = vrot.lane.b32.xlu1 %v6356_v26, %s5031_s24 }
0x14c7   :  { %2748 = vperm.xlu1 %4886, %v6061_v60  }
0x14cb   :  { %4888 = vset.pattern.permute.xlu1 %v6954_v28 }
0x14f0   :  { %v2348_v2 = vpop.permute.xlu0 %2347 }
0x14f4   :  { %v2358_v10 = vpop.permute.xlu0 %2357 }
0x14fe   :  { %v2321_v39 = vpop.permute.xlu1 %2320 }
0x14ff   :  { %v6366_v34 = vadd.f32 %v2321_v39, %v5962_v21 }
0x1501   :  { %2345 = vst.msk [vmem:[#allocation3 + $0x3] sm:$0x1] %vm630_vm7, %v6366_v34 }
0x1502   :  { %2350 = vst.msk [vmem:[#allocation3 + $0x3] sm:$0x1] %vm636_vm12, %v2348_v2  ;;  %v2353_v3 = vpop.permute.xlu1 %2352 }
0x1503   :  { %2355 = vst.msk [vmem:[#allocation3 + $0x3] sm:$0x1] %vm642_vm13, %v2353_v3 }
0x1504   :  { %2360 = vst.msk [vmem:[#allocation3 + $0x3] sm:$0x1] %vm648_vm14, %v2358_v10 }
0x1505   :  { %2361 = vst.msk [vmem:[#allocation3 + $0x3] sm:$0x1] %vm650_vm15, %v6982_v47  ;;  %v6375_v60 = vpop.permute.xlu0 %2369 }
0x1506   :  { %v2372_v43 = vmul.f32 %v5090_v22, %v6375_v60 }
0x150a   :  { %v2465_v44 = vpop.permute.xlu0 %2464 }
0x150b   :  { %v2470_v1 = vrot.slane %v2465_v44, %v5085_v16  ;;  %v6419_v44 = vmul.f32 %v6090_v45, %v6015_v40 }
0x150d   :  { %v2471_v25 = vmul.f32 %v2470_v1, %v6967_v54  ;;  %v6983_v1 = vld [vmem:[#allocation17_spill] sm:$0xff] }
0x150e   :  { %v2813_v32 = vpop.permute.xlu0 %2812 }
0x150f   :  { %v2818_v11 = vrot.slane %v2813_v32, %v5085_v16 }
0x1511   :  { %v2819_v42 = vmul.f32 %v2818_v11, %v2471_v25 }
0x1512   :  { %v3377_v39 = vpop.permute.xlu0 %3376 }
0x1513   :  { %v6377_v62 = vpop.permute.xlu1 %2364  ;;  %v2824_v48 = vrot.slane %v2819_v42, %v5085_v16  ;;  %v2868_v42 = vmul.f32 0.05, %v6366_v34 }
0x1514   :  { %v2367_v7 = vmul.f32 %v5088_v20, %v6377_v62 }
0x1516   :  { %v2373_v14 = vadd.f32 %v2372_v43, %v2367_v7 }
0x1517   :  { %v6379_v21 = vpop.permute.xlu1 %2375 }
0x1518   :  { %v2378_v54 = vmul.f32 %v6963_v50, %v6379_v21 }
0x151a   :  { %v2379_v23 = vadd.f32 %v2378_v54, %v2373_v14 }
0x151c   :  { %v2383_v19 = vpop.permute.xlu1 %2382 }
0x151d   :  { %v2385_v13 = vmul.f32 %v2383_v19, %v2379_v23 }
0x151f   :  { %v2386_v4 = vadd.f32 %v2385_v13, %v6980_v36 }
0x1521   :  { %v2761_v37 = vpop.permute.xlu1 %2760  ;;  %v2387_v2 = vmul.f32 0.8333333, %v2386_v4  ;;  %v6984_v4 = vmov 2475754826  }
0x1522   :  { %v2766_v38 = vrot.slane %v2761_v37, %v5085_v16 }
0x1523   :  { %v2874_v47 = vmul.f32 0.05, %v2387_v2 }
0x1524   :  { %v2767_v33 = vmul.f32 %v2766_v38, %v2471_v25 }
0x1525   :  { %v2787_v55 = vpop.permute.xlu1 %2786  ;;  %v2882_v19 = vrot.slane %v2874_v47, %v6978_v49 }
0x1526   :  { %v2772_v46 = vrot.slane %v2767_v33, %v5085_v16  ;;  %v2792_v53 = vrot.slane %v2787_v55, %v5085_v16  ;;  %v3596_v33 = vpop.permute.xlu0 %3595 }
0x1528   :  { %v2793_v24 = vmul.f32 %v2792_v53, %v2471_v25  ;;  %2773 = vrot.lane.b32.xlu1 %v2772_v46, %s5038_s25 }
0x1529   :  { %v3351_v8 = vpop.permute.xlu1 %3350 }
0x152a   :  { %v2798_v27 = vrot.slane %v2793_v24, %v5085_v16 }
0x152c   :  { %2825 = vrot.lane.b32.xlu1 %v2824_v48, %s5038_s25  ;;  %2799 = vrot.lane.b32.xlu0 %v2798_v27, %s5038_s25 }
0x152d   :  { %v6398_v17 = vpop.permute.xlu1 %2683 }
0x1530   :  { %2835 = vperm.xlu1 %4888, %v6283_v18   ;;  %2830 = vperm.xlu0 %4887, %v6283_v18   ;;  %v3249_v18 = vsub.f32 1.0, %v6153_v15 }
0x1531   :  { %v3600_v9 = vpop.permute.xlu1 %3599 }
0x1532   :  { %v3379_v10 = vmul.f32 %v3377_v39, %v3249_v18  ;;  %v6423_v32 = vmul.f32 %v3600_v9, %v6983_v1  ;;  %v3327_v25 = vmul.f32 %v3249_v18, %v6419_v44  ;;  %v3353_v38 = vmul.f32 %v3351_v8, %v3249_v18 }
0x1533   :  { %v6985_v18 = vmov 2131351028  }
0x1534   :  { %4889 = vset.pattern.permute.xlu1 %v6966_v12  ;;  %4890 = vset.pattern.permute.xlu0 %v6954_v28 }
0x1535   :  { %2843 = vperm.xlu1 %4889, %v6296_v52   ;;  %2848 = vperm.xlu0 %4890, %v6296_v52   ;;  %v6407_v57 = vpop.permute.xlu1 %2714 }
0x1539   :  { %2856 = vperm.xlu1 %4889, %v6287_v0   ;;  %4892 = vset.pattern.permute.xlu0 %v6943_v6 }
0x153a   :  { %3034 = vperm.xlu0 %4892, %v6090_v45   ;;  %v6413_v3 = vpop.permute.xlu1 %2726  ;;  %v2889_v45 = vrot.slane %v2882_v19, %v6978_v49 }
0x153d   :  { %4891 = vset.pattern.permute.xlu1 %v6954_v28 }
0x153e   :  { %2861 = vperm.xlu1 %4891, %v6287_v0   ;;  %3382 = vperm.xlu0 %4892, %v3379_v10   ;;  %v4152_v52 = vpop.permute.xlu1 %4151 }
0x153f   :  { %v4154_v37 = vadd.f32 %v4152_v52, %v6356_v26  ;;  %v6434_v26 = vmul.f32 %v3596_v33, %v6983_v1  ;;  %v6986_v52 = vmov 2102212464  }
0x1542   :  { %4893 = vset.pattern.permute.xlu1 %v6943_v6  ;;  %3946 = vrot.lane.b32.xlu0 %v6423_v32, %s5031_s24  ;;  %v4156_v0 = vpop.permute.xlu1 %4155 }
0x1543   :  { %v4158_v11 = vadd.f32 %v4156_v0, %v4154_v37  ;;  %3330 = vperm.xlu1 %4893, %v3327_v25   ;;  %4896 = vset.pattern.permute.xlu0 %v6945_v31  ;;  %v6987_v25 = vmov 920167782  }
0x1545   :  { %vm4159_vm5 = vcmp.gt.f32.partialorder %v4158_v11, 0.0 }
0x1546   :  { %v4160_v55 = vsel %vm4159_vm5, %v4158_v11, 1.0  ;;  %2890 = vrot.lane.b32.xlu0 %v2889_v45, %s5046_s27  ;;  %v6988_v45 = vmov 1326507024  }
0x1547   :  { %4981 = vrsqrt.f32 %v4160_v55  ;;  %3356 = vperm.xlu1 %4893, %v3353_v38  }
0x154b   :  { %3920 = vrot.lane.b32.xlu1 %v6434_v26, %s5020_s11 }
0x154c   :  { %4894 = vset.pattern.permute.xlu1 %v6945_v31 }
0x154f   :  { %2870 = vrot.lane.b32.xlu1 %v2868_v42, %s5044_s26 }
0x1551   :  { %v6441_v7 = vpop.eup %4981 }
0x1552   :  { %v6444_v46 = vmul.f32 %v6441_v7, %v4158_v11 }
0x1554   :  { %v4185_v53 = vand.u32 2139095040, %v6444_v46  ;;  %v6935_v8 = vand.u32 2147483647, %v6444_v46  ;;  %vm4184_vm4 = vcmp.lt.s32.totalorder %v6444_v46, 0 }
0x1556   :  { %v4186_v43 = vshrl.u32 %v4185_v53, 23  ;;  %v4189_v27 = vand.u32 8388607, %v6935_v8 }
0x1558   :  { %v4727_v54 = vadd.s32 4294967169, %v4186_v43  ;;  %v4190_v33 = vor.u32 8388608, %v4189_v27 }
0x155a   :  { %v4192_v24 = vadd.s32 1, %v4727_v54 }
0x155c   :  { %vm4193_vm8 = vcmp.gt.s32.totalorder %v4192_v24, 0 }
0x155d   :  { %v4194_v48 = vsel %vm4193_vm8, %v4192_v24, 0 }
0x155e   :  { %v4196_v14 = vand.u32 31, %v4194_v48  ;;  %v4195_v13 = vshrl.u32 %v4194_v48, 5 }
0x1560   :  { %v4197_v23 = vsub.s32 32, %v4196_v14  ;;  %v4199_v9 = vshll.u32 %v6960_v41, %v4196_v14  ;;  %v4202_v2 = vshll.u32 %v6984_v4, %v4196_v14  ;;  %v4205_v47 = vshll.u32 %v6985_v18, %v4196_v14 }
0x1561   :  { %v4208_v37 = vshll.u32 %v6986_v52, %v4196_v14  ;;  %v4211_v11 = vshll.u32 %v6987_v25, %v4196_v14  ;;  %vm4214_vm9 = vcmp.lt.s32.totalorder %v4195_v13, 1  ;;  %vm4217_vm10 = vcmp.lt.s32.totalorder %v4195_v13, 4 }
0x1562   :  { %v4200_v39 = vshrl.u32 %v6984_v4, %v4197_v23  ;;  %v4203_v10 = vshrl.u32 %v6985_v18, %v4197_v23  ;;  %v4206_v19 = vshrl.u32 %v6986_v52, %v4197_v23  ;;  %v4209_v0 = vshrl.u32 %v6987_v25, %v4197_v23 }
0x1563   :  { %v4212_v38 = vshrl.u32 %v6988_v45, %v4197_v23  ;;  %v4198_v18 = vshrl.u32 %v6960_v41, %v4197_v23  ;;  %vm4216_vm11 = vcmp.lt.s32.totalorder %v4195_v13, 3  ;;  %vm4215_vm1 = vcmp.lt.s32.totalorder %v4195_v13, 2 }
0x1564   :  { %v4201_v55 = vor.u32 %v4200_v39, %v4199_v9  ;;  %v4204_v42 = vor.u32 %v4203_v10, %v4202_v2  ;;  %v4207_v53 = vor.u32 %v4206_v19, %v4205_v47  ;;  %v4210_v43 = vor.u32 %v4209_v0, %v4208_v37 }
0x1565   :  { %v4213_v54 = vor.u32 %v4212_v38, %v4211_v11  ;;  %v4230_v45 = vshll.u32 %v4190_v33, 8 }
0x1566   :  { %v4219_v24 = vsel %vm4217_vm10, %v4207_v53, 2102212464  ;;  %v4222_v48 = vsel %vm4214_vm9, %v4201_v55, %v4204_v42  ;;  %v4226_v4 = vsel %vm4214_vm9, %v4204_v42, %v4207_v53  ;;  %v4223_v52 = vsel %vm4217_vm10, %v4210_v43, 920167782 }
0x1567   :  { %v4227_v8 = vsel %vm4217_vm10, %v4213_v54, 1326507024  ;;  %v4224_v14 = vsel %vm4216_vm11, %v4207_v53, %v4223_v52  ;;  %v4218_v27 = vsel %vm4214_vm9, %v4198_v18, %v4201_v55  ;;  %v4220_v9 = vsel %vm4216_vm11, %v4204_v42, %v4219_v24 }
0x1568   :  { %v4228_v25 = vsel %vm4216_vm11, %v4210_v43, %v4227_v8  ;;  %v4225_v2 = vsel %vm4215_vm1, %v4222_v48, %v4224_v14  ;;  %v4221_v0 = vsel %vm4215_vm1, %v4218_v27, %v4220_v9 }
0x1569   :  { %v4229_v39 = vsel %vm4215_vm1, %v4226_v4, %v4228_v25  ;;  %v6464_v19 = vmul.u32.u64.low %v4230_v45, %v4225_v2  ;;  %v6465_v37 = vmul.u32.u64.high %v4230_v45, %v4225_v2, %v6464_v19  ;;  %v4237_v23 = vmul.u32 %v4230_v45, %v4221_v0 }
0x156a   :  { %v6461_v10 = vmul.u32.u64.low %v4230_v45, %v4229_v39  ;;  %v6462_v47 = vmul.u32.u64.high %v4230_v45, %v4229_v39, %v6461_v10 }
0x156b   :  { %v4240_v41 = vadd.s32 1, %v6465_v37 }
0x156c   :  { %vm4239_vm2 = vc.u32 %v6462_v47, %v6464_v19  ;;  %v4238_v48 = vadd.s32 %v6464_v19, %v6462_v47 }
0x156d   :  { %v4241_v13 = vsel %vm4239_vm2, %v4240_v41, %v6465_v37  ;;  %v2694_v41 = vpop.permute.xlu0 %2693 }
0x156e   :  { %v4242_v8 = vadd.s32 %v4241_v13, %v4237_v23  ;;  %v6989_v23 = vand.u32 2147483647, %v6444_v46 }
0x1570   :  { %v4243_v11 = vadd.s32 536870912, %v4242_v8  ;;  %vm4183_vm5 = vcmp.le.f32.partialorder %v6989_v23, 0.7853982 }
0x1572   :  { %v4244_v38 = vshrl.u32 %v4243_v11, 30  ;;  %v2705_v11 = vpop.permute.xlu0 %2704 }
0x1574   :  { %v4245_v33 = vshll.u32 %v4244_v38, 30  ;;  %v4268_v37 = vsub.s32 4, %v4244_v38 }
0x1576   :  { %v4246_v55 = vsub.s32 %v4242_v8, %v4245_v33  ;;  %v4269_v19 = vsel %vm4184_vm4, %v4268_v37, %v4244_v38  ;;  %v2732_v38 = vrot.slane %v6413_v3, %v5085_v16 }
0x1577   :  { %v4271_v8 = vsel %vm4183_vm5, 0, %v4269_v19 }
0x1578   :  { %v4248_v42 = vsub.s32 0, %v4246_v55  ;;  %v4275_v33 = vadd.s32 3, %v4271_v8 }
0x157a   :  { %v4728_v53 = vmin.u32 %v4248_v42, %v4246_v55  ;;  %v2710_v42 = vrot.slane %v2705_v11, %v5085_v16 }
0x157c   :  { %v4250_v43 = vclz %v4728_v53  ;;  %v2689_v53 = vrot.slane %v6398_v17, %v5085_v16 }
0x157e   :  { %v4729_v54 = vadd.s32 4294967294, %v4250_v43  ;;  %v2720_v43 = vrot.slane %v6407_v57, %v5085_v16  ;;  %v2733_v57 = vmul.f32 %v5088_v20, %v2732_v38 }
0x1580   :  { %vm4730_vm3 = vcmp.lt.s32.totalorder %v4729_v54, 0  ;;  %v2734_v17 = vmul.f32 %v5090_v22, %v2720_v43 }
0x1581   :  { %v4253_v24 = vsel %vm4730_vm3, 0, %v4729_v54  ;;  %v4379_v54 = vand.u32 3, %v4271_v8  ;;  %vm4274_vm3 = vweird.f32 %v6444_v46 }
0x1582   :  { %v4254_v4 = vsub.s32 32, %v4253_v24  ;;  %v4258_v18 = vsub.s32 4294967266, %v4253_v24  ;;  %v4255_v52 = vshll.u32 %v4246_v55, %v4253_v24  ;;  %v2699_v55 = vrot.slane %v2694_v41, %v5085_v16 }
0x1583   :  { %v4276_v24 = vand.u32 3, %v4275_v33  ;;  %vm4384_vm8 = vcmp.eq.s32.totalorder %v4379_v54, 2  ;;  %vm4381_vm10 = vcmp.eq.s32.totalorder %v4379_v54, 0  ;;  %vm4380_vm1 = vcmp.lt.s32.totalorder %v4379_v54, 2 }
0x1584   :  { %v4256_v14 = vshrl.u32 %v4238_v48, %v4254_v4  ;;  %v4259_v25 = vadd.s32 127, %v4258_v18  ;;  %v2700_v4 = vmul.f32 %v6963_v50, %v2699_v55  ;;  %v2711_v18 = vmul.f32 %v5088_v20, %v2710_v42 }
0x1585   :  { %vm4281_vm9 = vcmp.eq.s32.totalorder %v4276_v24, 2  ;;  %vm4278_vm11 = vcmp.eq.s32.totalorder %v4276_v24, 0  ;;  %vm4277_vm2 = vcmp.lt.s32.totalorder %v4276_v24, 2  ;;  %v2735_v55 = vadd.f32 %v2734_v17, %v2733_v57 }
0x1586   :  { %v4257_v45 = vor.u32 %v4256_v14, %v4255_v52  ;;  %v4260_v27 = vshll.u32 %v4259_v25, 23  ;;  %v2690_v14 = vmul.f32 %v5090_v22, %v2689_v53  ;;  %v2721_v25 = vmul.f32 %v6963_v50, %v2720_v43 }
0x1588   :  { %v4261_v9 = vor.u32 4788187, %v4260_v27  ;;  %v4264_v39 = vcvt.s32.f32 %v4257_v45  ;;  %v2749_v27 = vpop.permute.xlu1 %2748  ;;  %v2701_v11 = vadd.f32 %v2700_v4, %v2690_v14  ;;  %v2722_v33 = vsub.f32 %v2711_v18, %v2721_v25 }
0x158a   :  { %v4262_v2 = vand.u32 2147483647, %v4261_v9 }
0x158c   :  { %v4265_v10 = vmul.f32 %v4264_v39, %v4262_v2  ;;  %v2739_v39 = vpop.permute.xlu0 %2738 }
0x158d   :  { %v2744_v8 = vrot.slane %v2739_v39, %v5085_v16 }
0x158e   :  { %v4266_v0 = vxor.u32 2147483648, %v4265_v10 }
0x158f   :  { %v2745_v38 = vmul.f32 %v5088_v20, %v2744_v8  ;;  %v2803_v54 = vmul.f32 %v6963_v50, %v2744_v8 }
0x1590   :  { %v4267_v47 = vsel %vm4184_vm4, %v4266_v0, %v4265_v10  ;;  %v2754_v0 = vrot.slane %v2749_v27, %v5085_v16  ;;  %vm4642_vm4 = vcmask 23552  }
0x1591   :  { %v4270_v13 = vsel %vm4183_vm5, %v6444_v46, %v4267_v47  ;;  %v2777_v46 = vmul.f32 %v5090_v22, %v2744_v8  ;;  %vm4648_vm5 = vcmask 97280  }
0x1592   :  { %4983 = vcosq.f32 %v4270_v13  ;;  %v2755_v42 = vmul.f32 %v2754_v0, %v2701_v11  ;;  %v2778_v53 = vmul.f32 %v2754_v0, %v2722_v33  ;;  %v2804_v43 = vmul.f32 %v2754_v0, %v2735_v55 }
0x1593   :  { %4985 = vsinq.f32 %v4270_v13 }
0x1594   :  { %v2805_v27 = vadd.f32 %v2804_v43, %v2803_v54 }
0x159a   :  { %v2774_v47 = vpop.permute.xlu1 %2773 }
0x159c   :  { %v4984_v48 = vpop.eup %4983 }
0x159d   :  { %v4986_v52 = vpop.eup %4985  ;;  %v4282_v45 = vxor.u32 2147483648, %v4984_v48 }
0x159e   :  { %v4279_v9 = vxor.u32 2147483648, %v4986_v52  ;;  %v2800_v24 = vpop.permute.xlu0 %2799 }
0x159f   :  { %v4386_v3 = vsel %vm4384_vm8, %v4282_v45, %v4986_v52  ;;  %v4283_v2 = vsel %vm4281_vm9, %v4282_v45, %v4986_v52  ;;  %v2756_v52 = vadd.f32 %v2755_v42, %v2745_v38  ;;  %v2779_v45 = vadd.f32 %v2778_v53, %v2777_v46 }
0x15a0   :  { %v4383_v10 = vsel %vm4381_vm10, %v4984_v48, %v4279_v9  ;;  %v4280_v37 = vsel %vm4278_vm11, %v4984_v48, %v4279_v9  ;;  %v2826_v48 = vpop.permute.xlu1 %2825  ;;  %vm4650_vm8 = vcmask 121856  }
0x15a1   :  { %v4387_v41 = vsel %vm4380_vm1, %v4383_v10, %v4386_v3  ;;  %v4284_v23 = vsel %vm4277_vm2, %v4280_v37, %v4283_v2  ;;  %v2776_v9 = vadd.f32 %v2774_v47, %v2756_v52  ;;  %v2802_v3 = vadd.f32 %v2800_v24, %v2779_v45 }
0x15a2   :  { %v6491_v19 = vsel %vm4274_vm3, nan, %v4387_v41  ;;  %v6493_v13 = vsel %vm4274_vm3, nan, %v4284_v23  ;;  %v2828_v2 = vadd.f32 %v2826_v48, %v2805_v27  ;;  %v6990_v52 = vmov 2  }
0x15a4   :  { %v2840_v17 = vmul.f32 %v2828_v2, %v6377_v62  ;;  %v2853_v23 = vmul.f32 %v2828_v2, %v6375_v60  ;;  %v2866_v53 = vmul.f32 %v2828_v2, %v6379_v21  ;;  %v3250_v60 = vsub.f32 0.0, %v6312_v56 }
0x15af   :  { %v2831_v4 = vpop.permute.xlu0 %2830  ;;  %v2836_v18 = vpop.permute.xlu1 %2835 }
0x15b0   :  { %v2833_v14 = vmul.f32 %v2831_v4, %v2776_v9  ;;  %v2838_v25 = vmul.f32 %v2836_v18, %v2802_v3 }
0x15b2   :  { %v2839_v57 = vadd.f32 %v2838_v25, %v2833_v14  ;;  %v3819_v14 = vsub.f32 1.0, %v6242_v63 }
0x15b4   :  { %v6500_v39 = vadd.f32 %v2840_v17, %v2839_v57  ;;  %v2849_v10 = vpop.permute.xlu0 %2848  ;;  %v2844_v37 = vpop.permute.xlu1 %2843 }
0x15b5   :  { %v2851_v0 = vmul.f32 %v2849_v10, %v2802_v3  ;;  %v2846_v41 = vmul.f32 %v2844_v37, %v2776_v9 }
0x15b6   :  { %2917 = vrot.lane.b32.xlu1 %v6500_v39, %s5048_s28 }
0x15b7   :  { %v2852_v47 = vadd.f32 %v2851_v0, %v2846_v41  ;;  %v3820_v41 = vsub.f32 0.0, %v6423_v32 }
0x15b8   :  { %v2857_v8 = vpop.permute.xlu1 %2856 }
0x15b9   :  { %v2854_v11 = vadd.f32 %v2853_v23, %v2852_v47  ;;  %v3035_v33 = vpop.permute.xlu0 %3034  ;;  %v2859_v62 = vmul.f32 %v2857_v8, %v2776_v9  ;;  %v6992_v8 = vld [vmem:[#allocation11_spill] sm:$0xff] }
0x15bb   :  { %2922 = vrot.lane.b32.xlu0 %v2854_v11, %s5049_s29 }
0x15bd   :  { %v2862_v55 = vpop.permute.xlu1 %2861  ;;  %v6508_v38 = vpop.permute.xlu0 %3382 }
0x15be   :  { %v2864_v42 = vmul.f32 %v2862_v55, %v2802_v3  ;;  %v3040_v3 = vrot.slane %v3035_v33, %v5085_v16  ;;  %v3388_v17 = vrot.slane %v6508_v38, %v5085_v16 }
0x15bf   :  { %3274 = vperm.xlu0 %4896, %v6312_v56  }
0x15c0   :  { %v2865_v43 = vadd.f32 %v2864_v42, %v2859_v62 }
0x15c1   :  { %v3947_v48 = vpop.permute.xlu0 %3946 }
0x15c2   :  { %v2867_v54 = vadd.f32 %v2866_v53, %v2865_v43  ;;  %v3331_v46 = vpop.permute.xlu1 %3330 }
0x15c3   :  { %4165 = vrot.lane.b32.xlu0 %v6441_v7, %s5024_s0 }
0x15c4   :  { %2927 = vrot.lane.b32.xlu1 %v2867_v54, %s5050_s30  ;;  %4901 = vset.pattern.permute.xlu0 %v6954_v28 }
0x15c5   :  { %v2891_v45 = vpop.permute.xlu0 %2890 }
0x15c6   :  { %v3357_v24 = vpop.permute.xlu1 %3356  ;;  %v6524_v56 = vadd.f32 %v2891_v45, %v6366_v34  ;;  %v3041_v34 = vmul.f32 %v3040_v3, %v6015_v40  ;;  %v3949_v40 = vmul.f32 %v3947_v48, %v3819_v14 }
0x15c7   :  { %3405 = vperm.xlu0 %4901, %v6500_v39   ;;  %v3362_v2 = vrot.slane %v3357_v24, %v5085_v16 }
0x15c8   :  { %3253 = vperm.xlu1 %4894, %v3250_v60   ;;  %v3389_v10 = vmul.f32 %v3388_v17, %v3041_v34 }
0x15c9   :  { %v3363_v4 = vmul.f32 %v3362_v2, %v3041_v34  ;;  %v3863_v2 = vsub.f32 0.0, %v6434_v26 }
0x15ca   :  { %v3921_v21 = vpop.permute.xlu1 %3920  ;;  %v3394_v0 = vrot.slane %v3389_v10, %v5085_v16 }
0x15cb   :  { %4902 = vset.pattern.permute.xlu0 %v6990_v52  ;;  %v3368_v18 = vrot.slane %v3363_v4, %v5085_v16 }
0x15cc   :  { %2934 = vperm.xlu0 %4902, %v6500_v39   ;;  %4895 = vset.pattern.permute.xlu1 %v6946_v61 }
0x15cd   :  { %3263 = vperm.xlu1 %4895, %v6336_v58  }
0x15ce   :  { %v2871_v27 = vpop.permute.xlu1 %2870 }
0x15cf   :  { %v6521_v9 = vadd.f32 %v2871_v27, %v6292_v35  ;;  %v3293_v35 = vsub.f32 0.0, %v6336_v58  ;;  %v3923_v58 = vmul.f32 %v3921_v21, %v3819_v14 }
0x15d0   :  { %2939 = vperm.xlu0 %4902, %v2854_v11  }
0x15d1   :  { %2914 = vst.msk [vmem:[#allocation3 + $0x4] sm:$0x1] %vm628_vm6, %v6521_v9  ;;  %4897 = vset.pattern.permute.xlu1 %v6943_v6 }
0x15d2   :  { %2915 = vst.msk [vmem:[#allocation3 + $0x4] sm:$0x1] %vm630_vm7, %v6524_v56  ;;  %3284 = vperm.xlu1 %4897, %v6419_v44   ;;  %v6991_v44 = vld [vmem:[#allocation6_spill] sm:$0xff] }
0x15d4   :  { %4904 = vset.pattern.permute.xlu0 %v6943_v6 }
0x15d5   :  { %3308 = vperm.xlu0 %4904, %v6153_v15   ;;  %v3336_v15 = vrot.slane %v3331_v46, %v5085_v16 }
0x15d6   :  { %4898 = vset.pattern.permute.xlu1 %v6946_v61 }
0x15d7   :  { %3296 = vperm.xlu1 %4898, %v3293_v35   ;;  %v3337_v25 = vmul.f32 %v3336_v15, %v3041_v34 }
0x15d9   :  { %3604 = vperm.xlu0 %4904, %v6201_v29   ;;  %v3342_v57 = vrot.slane %v3337_v25, %v5085_v16 }
0x15db   :  { %4899 = vset.pattern.permute.xlu1 %v6943_v6 }
0x15dc   :  { %3318 = vperm.xlu1 %4899, %v6991_v44  }
0x15dd   :  { %3369 = vrot.lane.b32.xlu0 %v3368_v18, %s5038_s25 }
0x15e0   :  { %4169 = vrot.lane.b32.xlu1 %v6441_v7, %s5021_s12 }
0x15e1   :  { %3926 = vperm.xlu0 %4904, %v3923_v58   ;;  %4900 = vset.pattern.permute.xlu1 %v6966_v12 }
0x15e4   :  { %3400 = vperm.xlu1 %4900, %v6500_v39   ;;  %v3593_v39 = vmul.f32 %v6201_v29, %v6983_v1 }
0x15e5   :  { %3952 = vperm.xlu0 %4904, %v3949_v40  }
0x15e6   :  { %v3897_v37 = vmul.f32 %v3819_v14, %v3593_v39 }
0x15e8   :  { %3413 = vperm.xlu1 %4900, %v2854_v11  }
0x15e9   :  { %4114 = vrot.lane.b32.xlu0 %v6347_v30, %s5021_s12 }
0x15ea   :  { %4910 = vset.pattern.permute.xlu0 %v6946_v61 }
0x15ec   :  { %4903 = vset.pattern.permute.xlu1 %v6954_v28 }
0x15ed   :  { %3418 = vperm.xlu1 %4903, %v2854_v11  }
0x15f1   :  { %4905 = vset.pattern.permute.xlu1 %v6966_v12 }
0x15f2   :  { %3426 = vperm.xlu1 %4905, %v2867_v54  }
0x15f6   :  { %4906 = vset.pattern.permute.xlu1 %v6954_v28 }
0x15f7   :  { %3431 = vperm.xlu1 %4906, %v2867_v54  }
0x15fb   :  { %4907 = vset.pattern.permute.xlu1 %v6990_v52 }
0x15fc   :  { %2945 = vperm.xlu1 %4907, %v2867_v54  }
0x1600   :  { %3343 = vrot.lane.b32.xlu1 %v3342_v57, %s5038_s25 }
0x1601   :  { %4908 = vset.pattern.permute.xlu1 %v6943_v6 }
0x1604   :  { %3900 = vperm.xlu1 %4908, %v3897_v37  }
0x1608   :  { %3395 = vrot.lane.b32.xlu1 %v3394_v0, %s5038_s25 }
0x1609   :  { %4909 = vset.pattern.permute.xlu1 %v6945_v31 }
0x160c   :  { %4099 = vrot.lane.b32.xlu1 %v6347_v30, %s5020_s11 }
0x1610   :  { %3823 = vperm.xlu1 %4909, %v3820_v41  }
0x1628   :  { %v2918_v23 = vpop.permute.xlu1 %2917 }
0x1629   :  { %2920 = vst.msk [vmem:[#allocation3 + $0x4] sm:$0x1] %vm636_vm12, %v2918_v23 }
0x162d   :  { %v2923_v29 = vpop.permute.xlu0 %2922 }
0x162e   :  { %2925 = vst.msk [vmem:[#allocation3 + $0x4] sm:$0x1] %vm642_vm13, %v2923_v29 }
0x1636   :  { %v2928_v47 = vpop.permute.xlu1 %2927 }
0x1637   :  { %2930 = vst.msk [vmem:[#allocation3 + $0x4] sm:$0x1] %vm648_vm14, %v2928_v47 }
0x1638   :  { %2931 = vst.msk [vmem:[#allocation3 + $0x4] sm:$0x1] %vm650_vm15, %v6992_v8 }
0x163e   :  { %v3275_v11 = vpop.permute.xlu0 %3274 }
0x163f   :  { %v3280_v18 = vrot.slane %v3275_v11, %v5085_v16 }
0x1642   :  { %v4166_v33 = vpop.permute.xlu0 %4165 }
0x1643   :  { %v6576_v55 = vmul.f32 %v4166_v33, %v6351_v51 }
0x1645   :  { %4490 = vrot.lane.b32.xlu1 %v6576_v55, %s5020_s11 }
0x1646   :  { %v6580_v62 = vpop.permute.xlu0 %3405 }
0x1647   :  { %v3254_v42 = vpop.permute.xlu1 %3253 }
0x1648   :  { %v3259_v44 = vrot.slane %v3254_v42, %v5085_v16 }
0x1649   :  { %3844 = vperm.xlu1 %4909, %v6423_v32  }
0x164a   :  { %v3260_v25 = vmul.f32 %v5090_v22, %v3259_v44 }
0x164b   :  { %v6583_v53 = vpop.permute.xlu0 %2934 }
0x164c   :  { %v3264_v43 = vpop.permute.xlu1 %3263  ;;  %v2937_v54 = vmul.f32 %v5088_v20, %v6583_v53 }
0x164d   :  { %4911 = vset.pattern.permute.xlu1 %v6943_v6  ;;  %v3269_v34 = vrot.slane %v3264_v43, %v5085_v16 }
0x164e   :  { %3854 = vperm.xlu1 %4911, %v3593_v39  }
0x164f   :  { %v6586_v38 = vpop.permute.xlu0 %2939  ;;  %v3270_v14 = vmul.f32 %v6963_v50, %v3269_v34 }
0x1650   :  { %v2942_v46 = vmul.f32 %v5090_v22, %v6586_v38 }
0x1651   :  { %v3285_v60 = vpop.permute.xlu1 %3284  ;;  %v3271_v57 = vadd.f32 %v3270_v14, %v3260_v25 }
0x1652   :  { %v2943_v24 = vadd.f32 %v2942_v46, %v2937_v54  ;;  %3878 = vperm.xlu1 %4911, %v6242_v63   ;;  %v3290_v4 = vrot.slane %v3285_v60, %v5085_v16 }
0x1654   :  { %v3309_v15 = vpop.permute.xlu0 %3308  ;;  %v3304_v41 = vmul.f32 %v5090_v22, %v3290_v4 }
0x1655   :  { %v3314_v10 = vrot.slane %v3309_v15, %v5085_v16 }
0x1656   :  { %v3297_v48 = vpop.permute.xlu1 %3296  ;;  %4913 = vset.pattern.permute.xlu1 %v6966_v12 }
0x1657   :  { %v3302_v58 = vrot.slane %v3297_v48, %v5085_v16  ;;  %v3347_v33 = vmul.f32 %v5090_v22, %v3314_v10  ;;  %v3315_v42 = vmul.f32 %v5088_v20, %v3314_v10 }
0x1658   :  { %v3605_v8 = vpop.permute.xlu0 %3604 }
0x1659   :  { %v3303_v37 = vmul.f32 %v5088_v20, %v3302_v58 }
0x165b   :  { %v3319_v32 = vpop.permute.xlu1 %3318  ;;  %v3305_v11 = vadd.f32 %v3304_v41, %v3303_v37 }
0x165c   :  { %v3324_v17 = vrot.slane %v3319_v32, %v5085_v16 }
0x165e   :  { %v3325_v47 = vmul.f32 %v3324_v17, %v3271_v57  ;;  %v3374_v32 = vmul.f32 %v3324_v17, %v3305_v11 }
0x165f   :  { %v4170_v21 = vpop.permute.xlu1 %4169 }
0x1660   :  { %v6595_v45 = vmul.f32 %v4170_v21, %v6351_v51  ;;  %v3326_v60 = vadd.f32 %v3325_v47, %v3315_v42  ;;  %v3370_v21 = vpop.permute.xlu0 %3369  ;;  %v4992_v47 = vld [vmem:[%s6876_s1 + $0x5] sm:$0x1] }
0x1662   :  { %4516 = vrot.lane.b32.xlu0 %v6595_v45, %s5031_s24 }
0x1663   :  { %v3401_v27 = vpop.permute.xlu1 %3400 }
0x1666   :  { %3833 = vperm.xlu0 %4910, %v6434_v26   ;;  %v3291_v26 = vmul.f32 %v6963_v50, %v3290_v4  ;;  %v3373_v4 = vmul.f32 %v6963_v50, %v3314_v10 }
0x1667   :  { %v3414_v3 = vpop.permute.xlu1 %3413 }
0x1668   :  { %v3375_v14 = vadd.f32 %v3374_v32, %v3373_v4  ;;  %v4993_v4 = vld [vmem:[%s6876_s1 + $0x6] sm:$0x1] }
0x166a   :  { %3866 = vperm.xlu0 %4910, %v3863_v2  }
0x166c   :  { %v3419_v35 = vpop.permute.xlu1 %3418 }
0x166e   :  { %4912 = vset.pattern.permute.xlu0 %v6943_v6 }
0x166f   :  { %3888 = vperm.xlu0 %4912, %v6244_v5   ;;  %v3281_v5 = vmul.f32 %v5088_v20, %v3280_v18 }
0x1671   :  { %v3427_v63 = vpop.permute.xlu1 %3426  ;;  %v3292_v39 = vsub.f32 %v3281_v5, %v3291_v26 }
0x1673   :  { %4916 = vset.pattern.permute.xlu0 %v6990_v52  ;;  %v3348_v23 = vmul.f32 %v3324_v17, %v3292_v39 }
0x1675   :  { %v3349_v46 = vadd.f32 %v3348_v23, %v3347_v33  ;;  %v4389_v33 = vsub.f32 1.0, %v6491_v19 }
0x1676   :  { %v3432_v40 = vpop.permute.xlu1 %3431 }
0x1677   :  { %v3372_v34 = vadd.f32 %v3370_v21, %v3349_v46  ;;  %v6660_v46 = vmul.f32 %v6441_v7, %v6351_v51 }
0x1679   :  { %v3408_v58 = vmul.f32 %v6580_v62, %v3372_v34  ;;  %v3421_v15 = vmul.f32 %v3419_v35, %v3372_v34  ;;  %v3434_v37 = vmul.f32 %v3432_v40, %v3372_v34  ;;  %v3610_v62 = vrot.slane %v3605_v8, %v5085_v16 }
0x167b   :  { %v2946_v0 = vpop.permute.xlu1 %2945 }
0x167c   :  { %v2948_v29 = vmul.f32 %v6963_v50, %v2946_v0 }
0x167e   :  { %v6620_v43 = vadd.f32 %v2948_v29, %v2943_v24 }
0x167f   :  { %v3344_v54 = vpop.permute.xlu1 %3343 }
0x1680   :  { %v3346_v48 = vadd.f32 %v3344_v54, %v3326_v60  ;;  %v4467_v60 = vmul.f32 %v4389_v33, %v6660_v46 }
0x1682   :  { %v3403_v18 = vmul.f32 %v3401_v27, %v3346_v48  ;;  %v3416_v44 = vmul.f32 %v3414_v3, %v3346_v48  ;;  %v3429_v24 = vmul.f32 %v3427_v63, %v3346_v48  ;;  %v3927_v3 = vpop.permute.xlu0 %3926 }
0x1683   :  { %v3901_v2 = vpop.permute.xlu1 %3900 }
0x1684   :  { %v3409_v25 = vadd.f32 %v3408_v58, %v3403_v18  ;;  %v3422_v57 = vadd.f32 %v3421_v15, %v3416_v44  ;;  %v3435_v10 = vadd.f32 %v3434_v37, %v3429_v24  ;;  %v3906_v8 = vrot.slane %v3901_v2, %v5085_v16 }
0x1686   :  { %v3953_v40 = vpop.permute.xlu0 %3952 }
0x1687   :  { %v3396_v26 = vpop.permute.xlu1 %3395  ;;  %v3958_v42 = vrot.slane %v3953_v40, %v5085_v16 }
0x1688   :  { %v3398_v5 = vadd.f32 %v3396_v26, %v3375_v14 }
0x168a   :  { %v3410_v39 = vmul.f32 %v3398_v5, %v6583_v53  ;;  %v3423_v17 = vmul.f32 %v3398_v5, %v6586_v38  ;;  %v3436_v27 = vmul.f32 %v3398_v5, %v2946_v0  ;;  %v3932_v53 = vrot.slane %v3927_v3, %v5085_v16  ;;  %v4115_v29 = vpop.permute.xlu0 %4114 }
0x168b   :  { %v3611_v38 = vmul.f32 %v3610_v62, %v6983_v1  ;;  %v4117_v1 = vmul.f32 %v4115_v29, %v6347_v30  ;;  %v4100_v2 = vpop.permute.xlu1 %4099 }
0x168c   :  { %v6626_v41 = vadd.f32 %v3410_v39, %v3409_v25  ;;  %v6628_v23 = vadd.f32 %v3423_v17, %v3422_v57  ;;  %v6633_v35 = vadd.f32 %v3436_v27, %v3435_v10  ;;  %v4102_v34 = vmul.f32 %v4100_v2, %v6347_v30 }
0x168d   :  { %v3933_v63 = vmul.f32 %v3932_v53, %v3611_v38  ;;  %v4118_v11 = vmul.f32 -0.02, %v4117_v1  ;;  %v3907_v54 = vmul.f32 %v3906_v8, %v3611_v38  ;;  %v3959_v48 = vmul.f32 %v3958_v42, %v3611_v38 }
0x168e   :  { %3509 = vperm.xlu0 %4916, %v6628_v23   ;;  %3970 = vperm.xlu1 %4913, %v6626_v41   ;;  %v4103_v18 = vmul.f32 0.02, %v4102_v34  ;;  %v4130_v14 = vmul.f32 0.0, %v4102_v34 }
0x168f   :  { %v3938_v0 = vrot.slane %v3933_v63, %v5085_v16  ;;  %v3912_v32 = vrot.slane %v3907_v54, %v5085_v16  ;;  %v3964_v21 = vrot.slane %v3959_v48, %v5085_v16  ;;  %v3824_v44 = vpop.permute.xlu1 %3823 }
0x1690   :  { %v3829_v40 = vrot.slane %v3824_v44, %v5085_v16 }
0x1692   :  { %3515 = vperm.xlu0 %4916, %v6633_v35   ;;  %4914 = vset.pattern.permute.xlu1 %v6954_v28 }
0x1693   :  { %3975 = vperm.xlu1 %4914, %v6626_v41  }
0x1696   :  { %4919 = vset.pattern.permute.xlu0 %v6966_v12 }
0x1697   :  { %3983 = vperm.xlu0 %4919, %v6628_v23   ;;  %3988 = vperm.xlu1 %4914, %v6628_v23  }
0x169b   :  { %3939 = vrot.lane.b32.xlu0 %v3938_v0, %s5038_s25  ;;  %4915 = vset.pattern.permute.xlu1 %v6990_v52 }
0x169c   :  { %3504 = vperm.xlu1 %4915, %v6626_v41  }
0x169f   :  { %2952 = vperm.xlu0 %4919, %v4992_v47   ;;  %v3830_v47 = vmul.f32 %v5090_v22, %v3829_v40 }
0x16a0   :  { %4917 = vset.pattern.permute.xlu1 %v6966_v12 }
0x16a1   :  { %3996 = vperm.xlu1 %4917, %v6633_v35  }
0x16a3   :  { %4922 = vset.pattern.permute.xlu0 %v6945_v31 }
0x16a4   :  { %4121 = vperm.xlu0 %4922, %v4118_v11  }
0x16a5   :  { %4918 = vset.pattern.permute.xlu1 %v6954_v28 }
0x16a6   :  { %4001 = vperm.xlu1 %4918, %v6633_v35  }
0x16a8   :  { %4924 = vset.pattern.permute.xlu0 %v6943_v6 }
0x16a9   :  { %4470 = vperm.xlu0 %4924, %v4467_v60  }
0x16aa   :  { %3913 = vrot.lane.b32.xlu1 %v3912_v32, %s5038_s25 }
0x16ab   :  { %4920 = vset.pattern.permute.xlu1 %v6966_v12 }
0x16ad   :  { %4925 = vset.pattern.permute.xlu0 %v6990_v52 }
0x16ae   :  { %3965 = vrot.lane.b32.xlu1 %v3964_v21, %s5038_s25 }
0x16b2   :  { %3522 = vperm.xlu1 %4920, %v4993_v4  }
0x16b6   :  { %4921 = vset.pattern.permute.xlu1 %v6946_v61 }
0x16b7   :  { %4106 = vperm.xlu1 %4921, %v4103_v18   ;;  %v4491_v26 = vpop.permute.xlu1 %4490 }
0x16b8   :  { %v4493_v58 = vmul.f32 %v4491_v26, %v4389_v33 }
0x16bb   :  { %4923 = vset.pattern.permute.xlu1 %v6943_v6 }
0x16bc   :  { %4174 = vperm.xlu1 %4923, %v6441_v7  }
0x16c0   :  { %4133 = vperm.xlu1 %4923, %v4130_v14  }
0x16c4   :  { %4496 = vperm.xlu1 %4923, %v4493_v58  }
0x16c8   :  { %v3845_v24 = vpop.permute.xlu1 %3844 }
0x16cd   :  { %v3855_v25 = vpop.permute.xlu1 %3854 }
0x16ce   :  { %v3860_v62 = vrot.slane %v3855_v25, %v5085_v16 }
0x16d0   :  { %v3861_v29 = vmul.f32 %v6963_v50, %v3860_v62  ;;  %v3874_v48 = vmul.f32 %v5090_v22, %v3860_v62 }
0x16d1   :  { %v3879_v39 = vpop.permute.xlu1 %3878 }
0x16d2   :  { %v3884_v32 = vrot.slane %v3879_v39, %v5085_v16 }
0x16d4   :  { %v4517_v15 = vpop.permute.xlu0 %4516  ;;  %v3917_v44 = vmul.f32 %v5090_v22, %v3884_v32  ;;  %v3885_v14 = vmul.f32 %v5088_v20, %v3884_v32 }
0x16d5   :  { %v4519_v5 = vmul.f32 %v4517_v15, %v4389_v33 }
0x16d7   :  { %4522 = vperm.xlu1 %4923, %v4519_v5  }
0x16db   :  { %4926 = vset.pattern.permute.xlu1 %v6990_v52  ;;  %v3850_v52 = vrot.slane %v3845_v24, %v5085_v16 }
0x16dd   :  { %v3851_v8 = vmul.f32 %v5088_v20, %v3850_v52 }
0x16df   :  { %v3862_v60 = vsub.f32 %v3851_v8, %v3861_v29 }
0x16e5   :  { %v3834_v57 = vpop.permute.xlu0 %3833 }
0x16e6   :  { %v3839_v53 = vrot.slane %v3834_v57, %v5085_v16 }
0x16e8   :  { %v3840_v1 = vmul.f32 %v6963_v50, %v3839_v53 }
0x16e9   :  { %v3867_v17 = vpop.permute.xlu0 %3866 }
0x16ea   :  { %v3872_v0 = vrot.slane %v3867_v17, %v5085_v16  ;;  %v3841_v21 = vadd.f32 %v3840_v1, %v3830_v47  ;;  %v3943_v17 = vmul.f32 %v6963_v50, %v3884_v32 }
0x16ec   :  { %v3873_v11 = vmul.f32 %v5088_v20, %v3872_v0 }
0x16ee   :  { %v3889_v27 = vpop.permute.xlu0 %3888  ;;  %v3875_v2 = vadd.f32 %v3874_v48, %v3873_v11 }
0x16ef   :  { %v3894_v33 = vrot.slane %v3889_v27, %v5085_v16 }
0x16f1   :  { %v3918_v34 = vmul.f32 %v3894_v33, %v3862_v60  ;;  %v3895_v4 = vmul.f32 %v3894_v33, %v3841_v21  ;;  %v3944_v5 = vmul.f32 %v3894_v33, %v3875_v2 }
0x16f3   :  { %v3919_v58 = vadd.f32 %v3918_v34, %v3917_v44  ;;  %v3896_v15 = vadd.f32 %v3895_v4, %v3885_v14  ;;  %v3945_v62 = vadd.f32 %v3944_v5, %v3943_v17 }
0x170d   :  { %v3971_v37 = vpop.permute.xlu1 %3970  ;;  %v3510_v10 = vpop.permute.xlu0 %3509 }
0x1711   :  { %v3516_v38 = vpop.permute.xlu0 %3515 }
0x1712   :  { %v3976_v3 = vpop.permute.xlu1 %3975 }
0x1716   :  { %v3989_v7 = vpop.permute.xlu1 %3988  ;;  %v3984_v54 = vpop.permute.xlu0 %3983 }
0x171a   :  { %v3940_v26 = vpop.permute.xlu0 %3939 }
0x171b   :  { %v3505_v63 = vpop.permute.xlu1 %3504  ;;  %v3942_v25 = vadd.f32 %v3940_v26, %v3919_v58 }
0x171d   :  { %v3978_v40 = vmul.f32 %v3976_v3, %v3942_v25  ;;  %v3991_v52 = vmul.f32 %v3989_v7, %v3942_v25  ;;  %v3512_v3 = vmul.f32 %v5090_v22, %v3510_v10 }
0x171e   :  { %v2953_v32 = vpop.permute.xlu0 %2952 }
0x1720   :  { %v3997_v42 = vpop.permute.xlu1 %3996 }
0x1725   :  { %v4002_v18 = vpop.permute.xlu1 %4001 }
0x1726   :  { %v4004_v60 = vmul.f32 %v4002_v18, %v3942_v25  ;;  %v2955_v18 = vmul.f32 %v2953_v32, %v6620_v43  ;;  %v4433_v43 = vsub.f32 0.0, %v6576_v55 }
0x1729   :  { %v3914_v24 = vpop.permute.xlu1 %3913 }
0x172a   :  { %v3916_v57 = vadd.f32 %v3914_v24, %v3896_v15 }
0x172c   :  { %v3973_v27 = vmul.f32 %v3971_v37, %v3916_v57  ;;  %v3986_v39 = vmul.f32 %v3984_v54, %v3916_v57  ;;  %v3999_v29 = vmul.f32 %v3997_v42, %v3916_v57  ;;  %v3507_v37 = vmul.f32 %v5088_v20, %v3505_v63 }
0x172d   :  { %v3966_v53 = vpop.permute.xlu1 %3965  ;;  %v4390_v42 = vsub.f32 0.0, %v6595_v45 }
0x172e   :  { %v3968_v0 = vadd.f32 %v3966_v53, %v3945_v62  ;;  %v3979_v1 = vadd.f32 %v3978_v40, %v3973_v27  ;;  %v3992_v47 = vadd.f32 %v3991_v52, %v3986_v39  ;;  %v4005_v54 = vadd.f32 %v4004_v60, %v3999_v29 }
0x172f   :  { %v3513_v34 = vadd.f32 %v3512_v3, %v3507_v37 }
0x1730   :  { %v3980_v8 = vmul.f32 %v3968_v0, %v3505_v63  ;;  %v3993_v11 = vmul.f32 %v3968_v0, %v3510_v10  ;;  %v4006_v21 = vmul.f32 %v3968_v0, %v3516_v38  ;;  %v3518_v63 = vmul.f32 %v6963_v50, %v3516_v38 }
0x1731   :  { %v3523_v2 = vpop.permute.xlu1 %3522  ;;  %v2956_v10 = vadd.f32 %v2955_v18, %v6980_v36 }
0x1732   :  { %v6695_v48 = vadd.f32 %v3980_v8, %v3979_v1  ;;  %v6697_v33 = vadd.f32 %v3993_v11, %v3992_v47  ;;  %v6703_v7 = vadd.f32 %v4006_v21, %v4005_v54  ;;  %v3519_v44 = vadd.f32 %v3518_v63, %v3513_v34 }
0x1733   :  { %v2957_v58 = vmul.f32 0.8333333, %v2956_v10 }
0x1734   :  { %4079 = vperm.xlu1 %4926, %v6697_v33   ;;  %4074 = vperm.xlu0 %4925, %v6695_v48   ;;  %v3525_v14 = vmul.f32 %v3523_v2, %v3519_v44 }
0x1735   :  { %v3444_v5 = vmul.f32 0.05, %v2957_v58 }
0x1736   :  { %v4107_v4 = vpop.permute.xlu1 %4106  ;;  %v3526_v38 = vadd.f32 %v3525_v14, %v6980_v36 }
0x1738   :  { %4085 = vperm.xlu1 %4926, %v6703_v7   ;;  %4927 = vset.pattern.permute.xlu0 %v6945_v31  ;;  %v3527_v24 = vmul.f32 0.8333333, %v3526_v38 }
0x1739   :  { %4393 = vperm.xlu0 %4927, %v4390_v42  }
0x173b   :  { %v4175_v26 = vpop.permute.xlu1 %4174 }
0x173c   :  { %4928 = vset.pattern.permute.xlu1 %v6946_v61 }
0x173d   :  { %4403 = vperm.xlu1 %4928, %v6576_v55   ;;  %4930 = vset.pattern.permute.xlu0 %v6943_v6 }
0x173e   :  { %4424 = vperm.xlu0 %4930, %v6660_v46  }
0x173f   :  { %v4134_v15 = vpop.permute.xlu1 %4133 }
0x1740   :  { %v4139_v40 = vrot.slane %v4134_v15, %v5085_v16 }
0x1741   :  { %4929 = vset.pattern.permute.xlu1 %v6945_v31  ;;  %v6726_v31 = vld [vmem:[%s6876_s1 + $0x7] sm:$0x1]  ;;  %s5052_s1 = smov [#allocation3]  }
0x1742   :  { %4414 = vperm.xlu1 %4929, %v6595_v45   ;;  %4448 = vperm.xlu0 %4930, %v6491_v19   ;;  %v3452_v45 = vrot.slane %v3444_v5, %v6978_v49  ;;  %v4014_v19 = vmul.f32 0.05, %v3527_v24 }
0x1743   :  { %v4497_v46 = vpop.permute.xlu1 %4496 }
0x1744   :  { %v4022_v55 = vrot.slane %v4014_v19, %v6978_v49  ;;  %v4502_v25 = vrot.slane %v4497_v46, %v5085_v16  ;;  %v3459_v57 = vrot.slane %v3452_v45, %v6978_v49 }
0x1746   :  { %4931 = vset.pattern.permute.xlu1 %v6946_v61  ;;  %4934 = vset.pattern.permute.xlu0 %v6966_v12  ;;  %v4180_v61 = vrot.slane %v4175_v26, %v5085_v16  ;;  %v4029_v39 = vrot.slane %v4022_v55, %v6978_v49 }
0x1747   :  { %4436 = vperm.xlu1 %4931, %v4433_v43   ;;  %4540 = vperm.xlu0 %4934, %v6695_v48  }
0x1748   :  { %v4181_v17 = vmul.f32 %v4180_v61, %v6351_v51  ;;  %v3438_v51 = vmul.f32 0.05, %v6524_v56 }
0x174a   :  { %v4503_v27 = vmul.f32 %v4502_v25, %v4181_v17 }
0x174b   :  { %4932 = vset.pattern.permute.xlu1 %v6966_v12  ;;  %4937 = vset.pattern.permute.xlu0 %v6954_v28 }
0x174c   :  { %4092 = vperm.xlu1 %4932, %v6726_v31   ;;  %4558 = vperm.xlu0 %4937, %v6697_v33   ;;  %v4508_v62 = vrot.slane %v4503_v27, %v5085_v16 }
0x1750   :  { %4933 = vset.pattern.permute.xlu1 %v6943_v6  ;;  %3460 = vrot.lane.b32.xlu0 %v3459_v57, %s5046_s27  ;;  %v4122_v6 = vpop.permute.xlu0 %4121 }
0x1751   :  { %4458 = vperm.xlu1 %4933, %v6493_v13   ;;  %v4112_v13 = vrot.slane %v4107_v4, %v5085_v16  ;;  %v4127_v53 = vrot.slane %v4122_v6, %v5085_v16 }
0x1753   :  { %v4113_v52 = vmul.f32 %v5088_v20, %v4112_v13  ;;  %v4128_v29 = vmul.f32 %v5090_v22, %v4127_v53 }
0x1754   :  { %4030 = vrot.lane.b32.xlu0 %v4029_v39, %s5046_s27  ;;  %v4471_v0 = vpop.permute.xlu0 %4470 }
0x1755   :  { %4935 = vset.pattern.permute.xlu1 %v6954_v28  ;;  %v4476_v47 = vrot.slane %v4471_v0, %v5085_v16  ;;  %v4129_v8 = vadd.f32 %v4128_v29, %v4113_v52 }
0x1756   :  { %4545 = vperm.xlu1 %4935, %v6695_v48   ;;  %v4523_v1 = vpop.permute.xlu1 %4522 }
0x1757   :  { %v4477_v11 = vmul.f32 %v4476_v47, %v4181_v17  ;;  %v4528_v21 = vrot.slane %v4523_v1, %v5085_v16 }
0x1758   :  { %4509 = vrot.lane.b32.xlu0 %v4508_v62, %s5038_s25 }
0x1759   :  { %v4529_v2 = vmul.f32 %v4528_v21, %v4181_v17  ;;  %v4482_v37 = vrot.slane %v4477_v11, %v5085_v16 }
0x175a   :  { %4936 = vset.pattern.permute.xlu1 %v6966_v12  ;;  %v4140_v12 = vmul.f32 %v6963_v50, %v4139_v40 }
0x175b   :  { %4553 = vperm.xlu1 %4936, %v6697_v33   ;;  %v4534_v54 = vrot.slane %v4529_v2, %v5085_v16 }
0x175c   :  { %3440 = vrot.lane.b32.xlu0 %v3438_v51, %s5044_s26  ;;  %v4141_v60 = vadd.f32 %v4140_v12, %v4129_v8 }
0x175f   :  { %4566 = vperm.xlu1 %4936, %v6703_v7  }
0x1763   :  { %4938 = vset.pattern.permute.xlu1 %v6954_v28 }
0x1764   :  { %4571 = vperm.xlu1 %4938, %v6703_v7  }
0x1768   :  { %4143 = vrot.lane.b32.xlu1 %v4141_v60, %s5024_s0  ;;  %s4660_s0 = sshll.u32 %s5052_s1, 4  ;;  %s4661_s0 = int_to_ptr.vmem [resolvable:$true] %s4660_s0 }
0x1769   :  { %p4999_p1 = scmp.lt.s32.totalorder %s4661_s0, %s4661_s0 }
0x176c   :  { %4483 = vrot.lane.b32.xlu1 %v4482_v37, %s5038_s25 }
0x1770   :  { %4535 = vrot.lane.b32.xlu1 %v4534_v54, %s5038_s25 }
0x17b3   :  { %v6767_v28 = vpop.permute.xlu0 %4074  ;;  %v6769_v3 = vpop.permute.xlu1 %4079 }
0x17b4   :  { %v4077_v44 = vmul.f32 %v5088_v20, %v6767_v28  ;;  %v4082_v10 = vmul.f32 %v5090_v22, %v6769_v3 }
0x17b6   :  { %v4083_v38 = vadd.f32 %v4082_v10, %v4077_v44 }
0x17b7   :  { %v6771_v42 = vpop.permute.xlu1 %4085 }
0x17b8   :  { %v4394_v32 = vpop.permute.xlu0 %4393  ;;  %v4088_v14 = vmul.f32 %v6963_v50, %v6771_v42 }
0x17b9   :  { %v4399_v29 = vrot.slane %v4394_v32, %v5085_v16 }
0x17ba   :  { %v4089_v43 = vadd.f32 %v4088_v14, %v4083_v38  ;;  %v6993_v14 = vld [vmem:[#allocation7_spill] sm:$0xff] }
0x17bb   :  { %v4400_v8 = vmul.f32 %v5090_v22, %v4399_v29 }
0x17bc   :  { %v4404_v34 = vpop.permute.xlu1 %4403 }
0x17bd   :  { %v4425_v4 = vpop.permute.xlu0 %4424  ;;  %v4409_v40 = vrot.slane %v4404_v34, %v5085_v16 }
0x17be   :  { %v4430_v0 = vrot.slane %v4425_v4, %v5085_v16 }
0x17c0   :  { %v4444_v32 = vmul.f32 %v5090_v22, %v4430_v0 }
0x17c1   :  { %v4449_v63 = vpop.permute.xlu0 %4448  ;;  %v4415_v18 = vpop.permute.xlu1 %4414 }
0x17c2   :  { %v4420_v13 = vrot.slane %v4415_v18, %v5085_v16  ;;  %v4454_v11 = vrot.slane %v4449_v63, %v5085_v16 }
0x17c4   :  { %v4421_v1 = vmul.f32 %v5088_v20, %v4420_v13  ;;  %v4455_v18 = vmul.f32 %v5088_v20, %v4454_v11 }
0x17c6   :  { %v6779_v26 = vpop.permute.xlu0 %4540  ;;  %v4437_v58 = vpop.permute.xlu1 %4436 }
0x17cb   :  { %v6781_v15 = vpop.permute.xlu0 %4558  ;;  %v4093_v5 = vpop.permute.xlu1 %4092 }
0x17cc   :  { %v4095_v24 = vmul.f32 %v4093_v5, %v4089_v43 }
0x17ce   :  { %v4096_v45 = vadd.f32 %v4095_v24, %v6980_v36 }
0x17cf   :  { %v3461_v19 = vpop.permute.xlu0 %3460 }
0x17d0   :  { %v4097_v46 = vmul.f32 0.8333333, %v4096_v45  ;;  %v3463_v61 = vadd.f32 %v3461_v19, %v6524_v56  ;;  %v4459_v55 = vpop.permute.xlu1 %4458  ;;  %v4513_v45 = vmul.f32 %v6963_v50, %v4454_v11 }
0x17d1   :  { %v4464_v47 = vrot.slane %v4459_v55, %v5085_v16 }
0x17d2   :  { %v4584_v25 = vmul.f32 0.05, %v4097_v46  ;;  %v4008_v57 = vmul.f32 0.05, %v3463_v61 }
0x17d3   :  { %v4031_v17 = vpop.permute.xlu0 %4030 }
0x17d4   :  { %v4592_v27 = vrot.slane %v4584_v25, %v6978_v49  ;;  %v6786_v39 = vadd.f32 %v4031_v17, %v3463_v61  ;;  %4010 = vrot.lane.b32.xlu1 %v4008_v57, %s5044_s26 }
0x17d5   :  { %v4546_v62 = vpop.permute.xlu1 %4545 }
0x17d6   :  { %v4578_v51 = vmul.f32 0.05, %v6786_v39  ;;  %v4599_v6 = vrot.slane %v4592_v27, %v6978_v49 }
0x17d7   :  { %v4510_v36 = vpop.permute.xlu0 %4509 }
0x17d8   :  { %4580 = vrot.lane.b32.xlu0 %v4578_v51, %s5044_s26  ;;  %4600 = vrot.lane.b32.xlu1 %v4599_v6, %s5046_s27 }
0x17da   :  { %v4554_v56 = vpop.permute.xlu1 %4553 }
0x17db   :  { %v3441_v53 = vpop.permute.xlu0 %3440 }
0x17dc   :  { %v6796_v52 = vadd.f32 %v3441_v53, %v6521_v9  ;;  %3487 = vrot.lane.b32.xlu0 %v6626_v41, %s5048_s28  ;;  %4057 = vrot.lane.b32.xlu1 %v6695_v48, %s5048_s28  ;;  %v4410_v9 = vmul.f32 %v6963_v50, %v4409_v40  ;;  %v4431_v41 = vmul.f32 %v6963_v50, %v4430_v0 }
0x17dd   :  { %v4442_v48 = vrot.slane %v4437_v58, %v5085_v16 }
0x17de   :  { %3484 = vst.msk [vmem:[#allocation3 + $0x5] sm:$0x1] %vm628_vm6, %v6796_v52  ;;  %v4567_v12 = vpop.permute.xlu1 %4566  ;;  %v4432_v60 = vsub.f32 %v4421_v1, %v4431_v41  ;;  %v4411_v2 = vadd.f32 %v4410_v9, %v4400_v8 }
0x17df   :  { %3485 = vst.msk [vmem:[#allocation3 + $0x5] sm:$0x1] %vm630_vm7, %v3463_v61  ;;  %v4443_v37 = vmul.f32 %v5088_v20, %v4442_v48 }
0x17e0   :  { %4062 = vrot.lane.b32.xlu0 %v6697_v33, %s5049_s29  ;;  %3492 = vrot.lane.b32.xlu1 %v6628_v23, %s5049_s29  ;;  %v4488_v54 = vmul.f32 %v4464_v47, %v4432_v60  ;;  %v4465_v33 = vmul.f32 %v4464_v47, %v4411_v2  ;;  %v4487_v23 = vmul.f32 %v5090_v22, %v4454_v11 }
0x17e1   :  { %v4445_v44 = vadd.f32 %v4444_v32, %v4443_v37 }
0x17e2   :  { %v4489_v10 = vadd.f32 %v4488_v54, %v4487_v23  ;;  %v4466_v63 = vadd.f32 %v4465_v33, %v4455_v18 }
0x17e3   :  { %v4572_v21 = vpop.permute.xlu1 %4571  ;;  %v4514_v38 = vmul.f32 %v4464_v47, %v4445_v44 }
0x17e4   :  { %v4512_v24 = vadd.f32 %v4510_v36, %v4489_v10 }
0x17e5   :  { %v4515_v46 = vadd.f32 %v4514_v38, %v4513_v45 }
0x17e6   :  { %v4548_v61 = vmul.f32 %v4546_v62, %v4512_v24  ;;  %v4574_v51 = vmul.f32 %v4572_v21, %v4512_v24  ;;  %v4561_v6 = vmul.f32 %v6781_v15, %v4512_v24 }
0x17e7   :  { %v4144_v34 = vpop.permute.xlu1 %4143 }
0x17e8   :  { %v4146_v4 = vsub.f32 %v6726_v31, %v4144_v34 }
0x17ea   :  { %v4147_v16 = vmul.f32 %v4146_v4, %v6993_v14 }
0x17eb   :  { %v4484_v58 = vpop.permute.xlu1 %4483 }
0x17ec   :  { %v4604_v43 = vmul.f32 0.05, %v4147_v16  ;;  %v4486_v5 = vadd.f32 %v4484_v58, %v4466_v63 }
0x17ee   :  { %v4612_v19 = vrot.slane %v4604_v43, %v6978_v49  ;;  %v4543_v22 = vmul.f32 %v6779_v26, %v4486_v5  ;;  %v4569_v25 = vmul.f32 %v4567_v12, %v4486_v5  ;;  %v4556_v17 = vmul.f32 %v4554_v56, %v4486_v5 }
0x17ef   :  { %v4536_v31 = vpop.permute.xlu1 %4535 }
0x17f0   :  { %v4619_v20 = vrot.slane %v4612_v19, %v6978_v49  ;;  %v4538_v55 = vadd.f32 %v4536_v31, %v4515_v46  ;;  %v4549_v57 = vadd.f32 %v4548_v61, %v4543_v22  ;;  %v4575_v13 = vadd.f32 %v4574_v51, %v4569_v25 }
0x17f1   :  { %v4562_v49 = vadd.f32 %v4561_v6, %v4556_v17 }
0x17f2   :  { %4620 = vrot.lane.b32.xlu1 %v4619_v20, %s5026_s15  ;;  %v4550_v27 = vmul.f32 %v4538_v55, %v6767_v28  ;;  %v4576_v50 = vmul.f32 %v4538_v55, %v6771_v42  ;;  %v4563_v26 = vmul.f32 %v4538_v55, %v6769_v3  ;;  %s4994_s15 = scalar_lea.vmem %s4661_s0, 128 }
0x17f3   :  { %p4995_p0 = scmp.ne.s32.totalorder %s4661_s0, %s4994_s15  ;;  %p5000_p2 = scmp.lt.s32.totalorder %s4994_s15, %s4994_s15 }
0x17f4   :  { %v4551_v36 = vadd.f32 %v4550_v27, %v4549_v57  ;;  %v4577_v62 = vadd.f32 %v4576_v50, %v4575_v13  ;;  %v4564_v53 = vadd.f32 %v4563_v26, %v4562_v49 }
0x17f5   :  { %p5001_p3 = por %p5000_p2, %p4999_p1 }
0x17f6   :  { %3497 = vrot.lane.b32.xlu1 %v6633_v35, %s5050_s30  ;;  %4627 = vrot.lane.b32.xlu0 %v4551_v36, %s5048_s28 }
0x17f7   :  { %p5002_p4 = pnand %p5001_p3, %p4995_p0 }
0x17fa   :  { %4637 = vrot.lane.b32.xlu1 %v4577_v62, %s5050_s30  ;;  %4632 = vrot.lane.b32.xlu0 %v4564_v53, %s5049_s29 }
0x17fe   :  { %4067 = vrot.lane.b32.xlu0 %v6703_v7, %s5050_s30 }
0x1846   :  { %v4011_v28 = vpop.permute.xlu1 %4010 }
0x1847   :  { %v4013_v42 = vadd.f32 %v4011_v28, %v6796_v52 }
0x1849   :  { %4054 = vst.msk [vmem:[#allocation3 + $0x6] sm:$0x1] %vm628_vm6, %v4013_v42 }
0x184a   :  { %4055 = vst.msk [vmem:[#allocation3 + $0x6] sm:$0x1] %vm630_vm7, %v6786_v39  ;;  %v4581_v35 = vpop.permute.xlu0 %4580  ;;  %v4601_v3 = vpop.permute.xlu1 %4600 }
0x184b   :  { %v4583_v15 = vadd.f32 %v4581_v35, %v4013_v42  ;;  %v4603_v56 = vadd.f32 %v4601_v3, %v6786_v39 }
0x184d   :  { %4624 = vst.msk [vmem:[#allocation3 + $0x7] sm:$0x1] %vm628_vm6, %v4583_v15  ;;  %vm4644_vm6 = vcmask 48128   ;;  %v4643_v1 = vsel %vm4642_vm4, %v4583_v15, %v4603_v56 }
0x184e   :  { %4625 = vst.msk [vmem:[#allocation3 + $0x7] sm:$0x1] %vm630_vm7, %v4603_v56  ;;  %v3488_v40 = vpop.permute.xlu0 %3487  ;;  %v4058_v0 = vpop.permute.xlu1 %4057  ;;  %vm4646_vm7 = vcmask 72704  }
0x184f   :  { %3490 = vst.msk [vmem:[#allocation3 + $0x5] sm:$0x1] %vm636_vm12, %v3488_v40  ;;  %4060 = vst.msk [vmem:[#allocation3 + $0x6] sm:$0x1] %vm636_vm12, %v4058_v0 }
0x1852   :  { %v4063_v7 = vpop.permute.xlu0 %4062  ;;  %v3493_v52 = vpop.permute.xlu1 %3492 }
0x1853   :  { %4065 = vst.msk [vmem:[#allocation3 + $0x6] sm:$0x1] %vm642_vm13, %v4063_v7  ;;  %3495 = vst.msk [vmem:[#allocation3 + $0x5] sm:$0x1] %vm642_vm13, %v3493_v52 }
0x1864   :  { %v4621_v29 = vpop.permute.xlu1 %4620 }
0x1865   :  { %v4623_v47 = vadd.f32 %v4621_v29, %v6347_v30 }
0x1868   :  { %v3498_v12 = vpop.permute.xlu1 %3497  ;;  %v4628_v39 = vpop.permute.xlu0 %4627 }
0x1869   :  { %3500 = vst.msk [vmem:[#allocation3 + $0x5] sm:$0x1] %vm648_vm14, %v3498_v12  ;;  %v4645_v41 = vsel %vm4644_vm6, %v4643_v1, %v4628_v39 }
0x186a   :  { %4630 = vst.msk [vmem:[#allocation3 + $0x7] sm:$0x1] %vm636_vm12, %v4628_v39 }
0x186b   :  { %3501 = vst.msk [vmem:[#allocation3 + $0x5] sm:$0x1] %vm650_vm15, %v6968_v59 }
0x186c   :  { %v4638_v9 = vpop.permute.xlu1 %4637  ;;  %v4633_v48 = vpop.permute.xlu0 %4632 }
0x186d   :  { %4635 = vst.msk [vmem:[#allocation3 + $0x7] sm:$0x1] %vm642_vm13, %v4633_v48  ;;  %v4647_v8 = vsel %vm4646_vm7, %v4645_v41, %v4633_v48 }
0x186e   :  { %4640 = vst.msk [vmem:[#allocation3 + $0x7] sm:$0x1] %vm648_vm14, %v4638_v9  ;;  %v4649_v11 = vsel %vm4648_vm5, %v4647_v8, %v4638_v9 }
0x186f   :  { %4641 = vst.msk [vmem:[#allocation3 + $0x7] sm:$0x1] %vm650_vm15, %v4623_v47  ;;  %v4651_v59 = vsel %vm4650_vm8, %v4649_v11, %v4623_v47 }
0x1870   :  { %4653 = vst.msk [vmem:[#allocation2] sm:$0x1] %vm34_vm0, %v4651_v59  ;;  %v4068_v60 = vpop.permute.xlu0 %4067 }
0x1871   :  { %4070 = vst.msk [vmem:[#allocation3 + $0x6] sm:$0x1] %vm648_vm14, %v4068_v60 }
0x1872   :  { %4071 = vst.msk [vmem:[#allocation3 + $0x6] sm:$0x1] %vm650_vm15, %v6347_v30 }
0x1873   :  { %5005 = shalt.err (!%p5002_p4)
}
0x1874   :  { %s5006_s24 = scalar_lea.hbm %s6877_s2, 128 }
0x1875   :  { %p5007_p5 = scmp.ne.s32.totalorder %s6877_s2, %s5006_s24  ;;  %p5010_p6 = scmp.lt.u32.totalorder %s5006_s24, %s6877_s2 }
0x1877   :  { %p5012_p7 = pnand %p5010_p6, %p5007_p5 }
0x1879   :  { %5015 = shalt.err (!%p5012_p7)
}
0x187a   :  { %4663 = dma.vmem_to_hbm [thread:$0]  %s4661_s0, 128, %s6877_s2, [#allocation4]  }
0x187b   :  { %5016 = dma.done.wait [#allocation4], 128  }
0x187c   :  { %5017 = vsyncadd [#allocation4], 4294967168 }
0x187d   :  { %4667 = vsyncpa [#allocation4], 1 }

</bundles_post_ra>
